<compile_context>
chip_gen: v6e
topology: v6e:2x2x1
jax: 0.10.0
libtpu: 0.0.40
codegen_flags: <defaults>
</compile_context>

<pallas_src>
import jax
import jax.numpy as jnp
from jax import lax
from jax.experimental import pallas as pl
from jax.experimental.pallas import tpu as pltpu

# ---------------------------------------------------------------------------
# Sizes
B = 8        # graphs in the batch
G = 4        # graphs per grid step  (grid = B // G = 2 parallel steps)
N = 128      # nodes per graph
F_IN = 32    # features_num
H = 32       # hidden
C = 2        # num_class
E = 256      # directed edges per graph

# Packed-parameter buffer: [104, 128] f32, lane-dense (4 x 32-lane matrices per 32-row band).
W_ROWS = 104
W_LANES = 128


# ---------------------------------------------------------------------------
# Kernel: G graphs per grid step, all dense matmuls with M = G*N rows.
def gnn_kernel(x_ref, a_ref, w_ref, out_ref):
    f32 = jnp.float32

    def mm(a, b):
        return jnp.dot(a, b, preferred_element_type=f32)

    # ---- static slices of the lane-dense packed parameter buffer ----
    w1   = w_ref[0:32,   0:32]     # first_lin W            [F_IN, H]
    wr1  = w_ref[0:32,  32:64]     # conv1.lin_rel W        [H, H]
    wl1  = w_ref[0:32,  64:96]     # conv1.lin_root W       [H, H]
    wr1d = w_ref[0:32,  96:128]    # conv1_di.lin_rel W     [H, H]
    wl1d = w_ref[32:64,  0:32]     # conv1_di.lin_root W    [H, H]
    wca  = w_ref[32:64, 32:64]     # con_lin1 W[:H]         [H, H]
    wcb  = w_ref[32:64, 64:96]     # con_lin1 W[H:]         [H, H]
    wr2  = w_ref[32:64, 96:128]    # conv2.lin_rel W        [H, H]
    wl2  = w_ref[64:96,  0:32]     # conv2.lin_root W       [H, H]
    wr2d = w_ref[64:96, 32:64]     # conv2_di.lin_rel W     [H, H]
    wl2d = w_ref[64:96, 64:96]     # conv2_di.lin_root W    [H, H]
    woa_t = w_ref[96:98,  0:32]    # out W[:H]^T            [C, H]
    wob_t = w_ref[96:98, 32:64]    # out W[H:]^T            [C, H]
    bo_c  = w_ref[96:98, 64:65]    # out bias (column)      [C, 1]
    b1    = w_ref[98:99,  0:32]
    br1   = w_ref[98:99, 32:64]
    br1d  = w_ref[98:99, 64:96]
    bcon  = w_ref[98:99, 96:128]
    br2   = w_ref[99:100, 0:32]
    br2d  = w_ref[99:100, 32:64]

    # ---- first_lin + relu (dropout is identity in eval mode) ----
    x = x_ref[...]                                     # [G*N, F_IN]
    h = jnp.maximum(mm(x, w1) + b1, 0.0)               # [G*N, H]

    # ---- adjacency: cast bf16->f32 (exact integer counts) and transpose ONCE per graph;
    #      the transposed copies are reused by both GraphConv layers (XLU is idle here). ----
    a_f = [a_ref[g].astype(f32) for g in range(G)]     # [N, N] each
    a_t = [af.T for af in a_f]                         # A^T per graph

    def aggregate(hm):                                 # hm: [G*N, H]
        fw = [mm(a_f[g], hm[g * N:(g + 1) * N, :]) for g in range(G)]
        rv = [mm(a_t[g], hm[g * N:(g + 1) * N, :]) for g in range(G)]
        return jnp.concatenate(fw, axis=0), jnp.concatenate(rv, axis=0)

    # ---- layer 1 (both directions, no lane concatenation anywhere) ----
    agf, agr = aggregate(h)                            # [G*N, H] each
    x1 = jnp.maximum(mm(agf, wr1) + mm(h, wl1) + br1, 0.0)
    x2 = jnp.maximum(mm(agr, wr1d) + mm(h, wl1d) + br1d, 0.0)

    # con_lin1 on split weights: concat([x1,x2]) @ Wcon == x1 @ Wcon[:H] + x2 @ Wcon[H:]
    h2 = mm(x1, wca) + mm(x2, wcb) + bcon              # [G*N, H]

    # ---- layer 2 ----
    agf2, agr2 = aggregate(h2)
    y1 = jnp.maximum(mm(agf2, wr2) + mm(h2, wl2) + br2, 0.0)
    y2 = jnp.maximum(mm(agr2, wr2d) + mm(h2, wl2d) + br2d, 0.0)

    # ---- output head, computed transposed ([C, G*N]) so the store is lane-dense ----
    # lt[c, m] = sum_k y1[m,k]*Wout[:H][k,c] + sum_k y2[m,k]*Wout[H:][k,c] + bout[c]
    lt = (lax.dot_general(woa_t, y1, (((1,), (1,)), ((), ())),
                          preferred_element_type=f32)
          + lax.dot_general(wob_t, y2, (((1,), (1,)), ((), ())),
                            preferred_element_type=f32)
          + bo_c)                                      # [C, G*N]

    # log_softmax over the class axis (axis 0, size 2)
    m = jnp.max(lt, axis=0, keepdims=True)
    s = lt - m
    lse = jnp.log(jnp.sum(jnp.exp(s), axis=0, keepdims=True))
    out_ref[...] = s - lse


def graph_gnn_di(x_b, adj_bf16, w_packed):
    """x_b: [B,N,F_IN] f32, adj_bf16: [B,N,N] bf16 (A[dst,src]), w_packed: [104,128] f32."""
    b_total = x_b.shape[0]
    assert b_total % G == 0
    x_flat = x_b.reshape(b_total * N, F_IN)

    out_flat = pl.pallas_call(
        gnn_kernel,
        out_shape=jax.ShapeDtypeStruct((C, b_total * N), jnp.float32),
        grid=(b_total // G,),
        in_specs=[
            pl.BlockSpec((G * N, F_IN), lambda b: (b, 0)),
            pl.BlockSpec((G, N, N), lambda b: (b, 0, 0)),
            pl.BlockSpec((W_ROWS, W_LANES), lambda b: (0, 0)),   # constant -> DMA'd once
        ],
        out_specs=pl.BlockSpec((C, G * N), lambda b: (0, b)),
        compiler_params=pltpu.CompilerParams(
            dimension_semantics=("parallel",)),
    )(x_flat, adj_bf16, w_packed)

    return out_flat.T.reshape(b_total, N, C)


# ---------------------------------------------------------------------------
# Host-side parameter prep: split / pre-transpose and pack lane-dense into [104,128].
def pack_parameters(params):
    (w1, b1,
     wr1, br1, wl1, wr1d, br1d, wl1d,
     wcon, bcon,
     wr2, br2, wl2, wr2d, br2d, wl2d,
     wout, bout) = params

    buf = jnp.zeros((W_ROWS, W_LANES), jnp.float32)

    def put(b, r, c, arr):
        rr, cc = arr.shape
        return b.at[r:r + rr, c:c + cc].set(arr)

    buf = put(buf, 0, 0, w1)
    buf = put(buf, 0, 32, wr1)
    buf = put(buf, 0, 64, wl1)
    buf = put(buf, 0, 96, wr1d)
    buf = put(buf, 32, 0, wl1d)
    buf = put(buf, 32, 32, wcon[:H])
    buf = put(buf, 32, 64, wcon[H:])
    buf = put(buf, 32, 96, wr2)
    buf = put(buf, 64, 0, wl2)
    buf = put(buf, 64, 32, wr2d)
    buf = put(buf, 64, 64, wl2d)
    buf = put(buf, 96, 0, wout[:H].T)            # [C, H]
    buf = put(buf, 96, 32, wout[H:].T)           # [C, H]
    buf = put(buf, 96, 64, bout.reshape(C, 1))   # [C, 1]
    buf = put(buf, 98, 0, b1)
    buf = put(buf, 98, 32, br1)
    buf = put(buf, 98, 64, br1d)
    buf = put(buf, 98, 96, bcon)
    buf = put(buf, 99, 0, br2)
    buf = put(buf, 99, 32, br2d)
    return buf


def linear_params(key, fan_in, fan_out, bias=True):
    """PyTorch-Linear-style uniform init, weight returned as [in, out]."""
    k = 1.0 / jnp.sqrt(jnp.float32(fan_in))
    kw, kb = jax.random.split(key)
    w = jax.random.uniform(kw, (fan_in, fan_out), jnp.float32, -k, k)
    if not bias:
        return (w,)
    b = jax.random.uniform(kb, (1, fan_out), jnp.float32, -k, k)
    return (w, b)


def reference_forward(x, adj, adj_re, params):
    """Pure-JAX reference for one graph, mirroring the PyTorch forward (eval mode)."""
    (w1, b1,
     wr1, br1, wl1, wr1d, br1d, wl1d,
     wcon, bcon,
     wr2, br2, wl2, wr2d, br2d, wl2d,
     wout, bout) = params

    def gconv(h, a, wrel, brel, wroot):
        return (a @ h) @ wrel + brel + h @ wroot

    h = jax.nn.relu(x @ w1 + b1)
    x1 = jax.nn.relu(gconv(h, adj, wr1, br1, wl1))
    x2 = jax.nn.relu(gconv(h, adj_re, wr1d, br1d, wl1d))
    h2 = jnp.concatenate([x1, x2], axis=1) @ wcon + bcon
    y1 = jax.nn.relu(gconv(h2, adj, wr2, br2, wl2))
    y2 = jax.nn.relu(gconv(h2, adj_re, wr2d, br2d, wl2d))
    logits = jnp.concatenate([y1, y2], axis=1) @ wout + bout
    return jax.nn.log_softmax(logits, axis=-1)


if __name__ == "__main__":
    root = jax.random.PRNGKey(0)
    keys = jax.random.split(root, 16)

    # Batch of B graphs: node features + random directed edge lists -> dense A[dst, src].
    x_b = jax.random.normal(keys[0], (B, N, F_IN), jnp.float32)
    src = jax.random.randint(keys[1], (B, E), 0, N)
    dst = jax.random.randint(keys[2], (B, E), 0, N)
    bidx = jnp.broadcast_to(jnp.arange(B)[:, None], (B, E))
    adj_b = jnp.zeros((B, N, N), jnp.float32).at[bidx, dst, src].add(1.0)
    # data.edge_index_re is None -> edge_index_re = edge_index[[1,0],:]  =>  A_re = A^T
    adj_re_b = jnp.swapaxes(adj_b, 1, 2)        # reference only; kernel transposes in VMEM
    adj_bf16 = adj_b.astype(jnp.bfloat16)       # integer edge counts are exact in bf16

    # One shared set of model parameters (deterministic init), applied to all graphs.
    (w1, b1) = linear_params(keys[3], F_IN, H)                      # first_lin
    (wr1, br1) = linear_params(keys[4], H, H)                       # conv1.lin_rel
    (wl1,) = linear_params(keys[5], H, H, bias=False)               # conv1.lin_root
    (wr1d, br1d) = linear_params(keys[6], H, H)                     # conv1_di.lin_rel
    (wl1d,) = linear_params(keys[7], H, H, bias=False)              # conv1_di.lin_root
    (wcon, bcon) = linear_params(keys[8], 2 * H, H)                 # con_lin1
    (wr2, br2) = linear_params(keys[9], H, H)                       # conv2.lin_rel
    (wl2,) = linear_params(keys[10], H, H, bias=False)              # conv2.lin_root
    (wr2d, br2d) = linear_params(keys[11], H, H)                    # conv2_di.lin_rel
    (wl2d,) = linear_params(keys[12], H, H, bias=False)             # conv2_di.lin_root
    (wout, bout) = linear_params(keys[13], 2 * H, C)                # out
    # fuse_weight exists in __init__ but is unused in forward; omitted on purpose.

    params = (w1, b1,
              wr1, br1, wl1, wr1d, br1d, wl1d,
              wcon, bcon,
              wr2, br2, wl2, wr2d, br2d, wl2d,
              wout, bout)

    w_packed = pack_parameters(params)

    out = graph_gnn_di(x_b, adj_bf16, w_packed)
    out = jax.block_until_ready(out)

    ref = jax.vmap(lambda xx, aa, ar: reference_forward(xx, aa, ar, params))(
        x_b, adj_b, adj_re_b)
    assert out.shape == (B, N, C)
    assert jnp.allclose(out, ref, atol=2e-4, rtol=2e-4), "mismatch vs JAX reference"

    print("KERNEL_OK")
</pallas_src>

<mosaic_0001>
module attributes {stable_mosaic.version = 11 : i64} {
  func.func @gnn_kernel(%arg0: i32, %arg1: memref<512x32xf32, #tpu.memory_space<vmem>>, %arg2: memref<4x128x128xbf16, #tpu.memory_space<vmem>>, %arg3: memref<104x128xf32, #tpu.memory_space<vmem>>, %arg4: memref<2x512xf32, #tpu.memory_space<vmem>>) attributes {dimension_semantics = [#tpu.dimension_semantics<parallel>], iteration_bounds = array<i64: 2>, scalar_prefetch = 0 : i64, scratch_operands = 0 : i64, tpu.core_type = #tpu.core_type<tc>, window_params = [{transform_indices = @transform_0, window_bounds = array<i64: 512, 32>}, {transform_indices = @transform_1, window_bounds = array<i64: 4, 128, 128>}, {pipeline_mode = #tpu.pipeline_mode<synchronous>, transform_indices = @transform_2, window_bounds = array<i64: 104, 128>}, {transform_indices = @transform_3, window_bounds = array<i64: 2, 512>}]} {
    %c0 = arith.constant 0 : index
    %c0_0 = arith.constant 0 : index
    %0 = vector.load %arg3[%c0, %c0_0] : memref<104x128xf32, #tpu.memory_space<vmem>>, vector<32x32xf32>
    %c0_1 = arith.constant 0 : index
    %c32 = arith.constant 32 : index
    %1 = vector.load %arg3[%c0_1, %c32] : memref<104x128xf32, #tpu.memory_space<vmem>>, vector<32x32xf32>
    %c0_2 = arith.constant 0 : index
    %c64 = arith.constant 64 : index
    %2 = vector.load %arg3[%c0_2, %c64] : memref<104x128xf32, #tpu.memory_space<vmem>>, vector<32x32xf32>
    %c0_3 = arith.constant 0 : index
    %c96 = arith.constant 96 : index
    %3 = vector.load %arg3[%c0_3, %c96] : memref<104x128xf32, #tpu.memory_space<vmem>>, vector<32x32xf32>
    %c32_4 = arith.constant 32 : index
    %c0_5 = arith.constant 0 : index
    %4 = vector.load %arg3[%c32_4, %c0_5] : memref<104x128xf32, #tpu.memory_space<vmem>>, vector<32x32xf32>
    %c32_6 = arith.constant 32 : index
    %c32_7 = arith.constant 32 : index
    %5 = vector.load %arg3[%c32_6, %c32_7] : memref<104x128xf32, #tpu.memory_space<vmem>>, vector<32x32xf32>
    %c32_8 = arith.constant 32 : index
    %c64_9 = arith.constant 64 : index
    %6 = vector.load %arg3[%c32_8, %c64_9] : memref<104x128xf32, #tpu.memory_space<vmem>>, vector<32x32xf32>
    %c32_10 = arith.constant 32 : index
    %c96_11 = arith.constant 96 : index
    %7 = vector.load %arg3[%c32_10, %c96_11] : memref<104x128xf32, #tpu.memory_space<vmem>>, vector<32x32xf32>
    %c64_12 = arith.constant 64 : index
    %c0_13 = arith.constant 0 : index
    %8 = vector.load %arg3[%c64_12, %c0_13] : memref<104x128xf32, #tpu.memory_space<vmem>>, vector<32x32xf32>
    %c64_14 = arith.constant 64 : index
    %c32_15 = arith.constant 32 : index
    %9 = vector.load %arg3[%c64_14, %c32_15] : memref<104x128xf32, #tpu.memory_space<vmem>>, vector<32x32xf32>
    %c64_16 = arith.constant 64 : index
    %c64_17 = arith.constant 64 : index
    %10 = vector.load %arg3[%c64_16, %c64_17] : memref<104x128xf32, #tpu.memory_space<vmem>>, vector<32x32xf32>
    %c96_18 = arith.constant 96 : index
    %c0_19 = arith.constant 0 : index
    %11 = vector.load %arg3[%c96_18, %c0_19] : memref<104x128xf32, #tpu.memory_space<vmem>>, vector<2x32xf32>
    %c96_20 = arith.constant 96 : index
    %c32_21 = arith.constant 32 : index
    %12 = vector.load %arg3[%c96_20, %c32_21] : memref<104x128xf32, #tpu.memory_space<vmem>>, vector<2x32xf32>
    %c96_22 = arith.constant 96 : index
    %c64_23 = arith.constant 64 : index
    %13 = vector.load %arg3[%c96_22, %c64_23] : memref<104x128xf32, #tpu.memory_space<vmem>>, vector<2x1xf32>
    %c98 = arith.constant 98 : index
    %c0_24 = arith.constant 0 : index
    %14 = vector.load %arg3[%c98, %c0_24] : memref<104x128xf32, #tpu.memory_space<vmem>>, vector<1x32xf32>
    %c98_25 = arith.constant 98 : index
    %c32_26 = arith.constant 32 : index
    %15 = vector.load %arg3[%c98_25, %c32_26] : memref<104x128xf32, #tpu.memory_space<vmem>>, vector<1x32xf32>
    %c98_27 = arith.constant 98 : index
    %c64_28 = arith.constant 64 : index
    %16 = vector.load %arg3[%c98_27, %c64_28] : memref<104x128xf32, #tpu.memory_space<vmem>>, vector<1x32xf32>
    %c98_29 = arith.constant 98 : index
    %c96_30 = arith.constant 96 : index
    %17 = vector.load %arg3[%c98_29, %c96_30] : memref<104x128xf32, #tpu.memory_space<vmem>>, vector<1x32xf32>
    %c99 = arith.constant 99 : index
    %c0_31 = arith.constant 0 : index
    %18 = vector.load %arg3[%c99, %c0_31] : memref<104x128xf32, #tpu.memory_space<vmem>>, vector<1x32xf32>
    %c99_32 = arith.constant 99 : index
    %c32_33 = arith.constant 32 : index
    %19 = vector.load %arg3[%c99_32, %c32_33] : memref<104x128xf32, #tpu.memory_space<vmem>>, vector<1x32xf32>
    %c0_34 = arith.constant 0 : index
    %c0_35 = arith.constant 0 : index
    %20 = vector.load %arg1[%c0_34, %c0_35] : memref<512x32xf32, #tpu.memory_space<vmem>>, vector<512x32xf32>
    %cst = arith.constant dense<0.000000e+00> : vector<512x32xf32>
    %21 = tpu.matmul %20, %0, %cst {dimension_numbers = #tpu.dot_dimension_numbers<[1], [0], [0], [1], [0, 0, 1, 1], [], []>} : vector<512x32xf32>, vector<32x32xf32>, vector<512x32xf32> -> vector<512x32xf32>
    %22 = vector.broadcast %14 : vector<1x32xf32> to vector<512x32xf32>
    %23 = arith.addf %21, %22 : vector<512x32xf32>
    %cst_36 = arith.constant 0.000000e+00 : f32
    %24 = vector.broadcast %cst_36 : f32 to vector<512x32xf32>
    %25 = arith.maximumf %23, %24 : vector<512x32xf32>
    %c0_37 = arith.constant 0 : index
    %c0_38 = arith.constant 0 : index
    %c0_39 = arith.constant 0 : index
    %26 = vector.load %arg2[%c0_37, %c0_38, %c0_39] : memref<4x128x128xbf16, #tpu.memory_space<vmem>>, vector<1x128x128xbf16>
    %27 = vector.shape_cast %26 : vector<1x128x128xbf16> to vector<128x128xbf16>
    %28 = arith.extf %27 : vector<128x128xbf16> to vector<128x128xf32>
    %c1 = arith.constant 1 : index
    %c0_40 = arith.constant 0 : index
    %c0_41 = arith.constant 0 : index
    %29 = vector.load %arg2[%c1, %c0_40, %c0_41] : memref<4x128x128xbf16, #tpu.memory_space<vmem>>, vector<1x128x128xbf16>
    %30 = vector.shape_cast %29 : vector<1x128x128xbf16> to vector<128x128xbf16>
    %31 = arith.extf %30 : vector<128x128xbf16> to vector<128x128xf32>
    %c2 = arith.constant 2 : index
    %c0_42 = arith.constant 0 : index
    %c0_43 = arith.constant 0 : index
    %32 = vector.load %arg2[%c2, %c0_42, %c0_43] : memref<4x128x128xbf16, #tpu.memory_space<vmem>>, vector<1x128x128xbf16>
    %33 = vector.shape_cast %32 : vector<1x128x128xbf16> to vector<128x128xbf16>
    %34 = arith.extf %33 : vector<128x128xbf16> to vector<128x128xf32>
    %c3 = arith.constant 3 : index
    %c0_44 = arith.constant 0 : index
    %c0_45 = arith.constant 0 : index
    %35 = vector.load %arg2[%c3, %c0_44, %c0_45] : memref<4x128x128xbf16, #tpu.memory_space<vmem>>, vector<1x128x128xbf16>
    %36 = vector.shape_cast %35 : vector<1x128x128xbf16> to vector<128x128xbf16>
    %37 = arith.extf %36 : vector<128x128xbf16> to vector<128x128xf32>
    %38 = tpu.transpose %28, [1, 0] : vector<128x128xf32> -> vector<128x128xf32>
    %39 = tpu.transpose %31, [1, 0] : vector<128x128xf32> -> vector<128x128xf32>
    %40 = tpu.transpose %34, [1, 0] : vector<128x128xf32> -> vector<128x128xf32>
    %41 = tpu.transpose %37, [1, 0] : vector<128x128xf32> -> vector<128x128xf32>
    %42 = vector.extract_strided_slice %25 {offsets = [0, 0], sizes = [128, 32], strides = [1, 1]} : vector<512x32xf32> to vector<128x32xf32>
    %cst_46 = arith.constant dense<0.000000e+00> : vector<128x32xf32>
    %43 = tpu.matmul %28, %42, %cst_46 {dimension_numbers = #tpu.dot_dimension_numbers<[1], [0], [0], [1], [0, 0, 1, 1], [], []>} : vector<128x128xf32>, vector<128x32xf32>, vector<128x32xf32> -> vector<128x32xf32>
    %44 = vector.extract_strided_slice %25 {offsets = [128, 0], sizes = [128, 32], strides = [1, 1]} : vector<512x32xf32> to vector<128x32xf32>
    %cst_47 = arith.constant dense<0.000000e+00> : vector<128x32xf32>
    %45 = tpu.matmul %31, %44, %cst_47 {dimension_numbers = #tpu.dot_dimension_numbers<[1], [0], [0], [1], [0, 0, 1, 1], [], []>} : vector<128x128xf32>, vector<128x32xf32>, vector<128x32xf32> -> vector<128x32xf32>
    %46 = vector.extract_strided_slice %25 {offsets = [256, 0], sizes = [128, 32], strides = [1, 1]} : vector<512x32xf32> to vector<128x32xf32>
    %cst_48 = arith.constant dense<0.000000e+00> : vector<128x32xf32>
    %47 = tpu.matmul %34, %46, %cst_48 {dimension_numbers = #tpu.dot_dimension_numbers<[1], [0], [0], [1], [0, 0, 1, 1], [], []>} : vector<128x128xf32>, vector<128x32xf32>, vector<128x32xf32> -> vector<128x32xf32>
    %48 = vector.extract_strided_slice %25 {offsets = [384, 0], sizes = [128, 32], strides = [1, 1]} : vector<512x32xf32> to vector<128x32xf32>
    %cst_49 = arith.constant dense<0.000000e+00> : vector<128x32xf32>
    %49 = tpu.matmul %37, %48, %cst_49 {dimension_numbers = #tpu.dot_dimension_numbers<[1], [0], [0], [1], [0, 0, 1, 1], [], []>} : vector<128x128xf32>, vector<128x32xf32>, vector<128x32xf32> -> vector<128x32xf32>
    %50 = vector.extract_strided_slice %25 {offsets = [0, 0], sizes = [128, 32], strides = [1, 1]} : vector<512x32xf32> to vector<128x32xf32>
    %cst_50 = arith.constant dense<0.000000e+00> : vector<128x32xf32>
    %51 = tpu.matmul %38, %50, %cst_50 {dimension_numbers = #tpu.dot_dimension_numbers<[1], [0], [0], [1], [0, 0, 1, 1], [], []>} : vector<128x128xf32>, vector<128x32xf32>, vector<128x32xf32> -> vector<128x32xf32>
    %52 = vector.extract_strided_slice %25 {offsets = [128, 0], sizes = [128, 32], strides = [1, 1]} : vector<512x32xf32> to vector<128x32xf32>
    %cst_51 = arith.constant dense<0.000000e+00> : vector<128x32xf32>
    %53 = tpu.matmul %39, %52, %cst_51 {dimension_numbers = #tpu.dot_dimension_numbers<[1], [0], [0], [1], [0, 0, 1, 1], [], []>} : vector<128x128xf32>, vector<128x32xf32>, vector<128x32xf32> -> vector<128x32xf32>
    %54 = vector.extract_strided_slice %25 {offsets = [256, 0], sizes = [128, 32], strides = [1, 1]} : vector<512x32xf32> to vector<128x32xf32>
    %cst_52 = arith.constant dense<0.000000e+00> : vector<128x32xf32>
    %55 = tpu.matmul %40, %54, %cst_52 {dimension_numbers = #tpu.dot_dimension_numbers<[1], [0], [0], [1], [0, 0, 1, 1], [], []>} : vector<128x128xf32>, vector<128x32xf32>, vector<128x32xf32> -> vector<128x32xf32>
    %56 = vector.extract_strided_slice %25 {offsets = [384, 0], sizes = [128, 32], strides = [1, 1]} : vector<512x32xf32> to vector<128x32xf32>
    %cst_53 = arith.constant dense<0.000000e+00> : vector<128x32xf32>
    %57 = tpu.matmul %41, %56, %cst_53 {dimension_numbers = #tpu.dot_dimension_numbers<[1], [0], [0], [1], [0, 0, 1, 1], [], []>} : vector<128x128xf32>, vector<128x32xf32>, vector<128x32xf32> -> vector<128x32xf32>
    %58 = tpu.concatenate %43, %45, %47, %49 in 0 : vector<128x32xf32>, vector<128x32xf32>, vector<128x32xf32>, vector<128x32xf32> -> vector<512x32xf32>
    %59 = tpu.concatenate %51, %53, %55, %57 in 0 : vector<128x32xf32>, vector<128x32xf32>, vector<128x32xf32>, vector<128x32xf32> -> vector<512x32xf32>
    %cst_54 = arith.constant dense<0.000000e+00> : vector<512x32xf32>
    %60 = tpu.matmul %58, %1, %cst_54 {dimension_numbers = #tpu.dot_dimension_numbers<[1], [0], [0], [1], [0, 0, 1, 1], [], []>} : vector<512x32xf32>, vector<32x32xf32>, vector<512x32xf32> -> vector<512x32xf32>
    %cst_55 = arith.constant dense<0.000000e+00> : vector<512x32xf32>
    %61 = tpu.matmul %25, %2, %cst_55 {dimension_numbers = #tpu.dot_dimension_numbers<[1], [0], [0], [1], [0, 0, 1, 1], [], []>} : vector<512x32xf32>, vector<32x32xf32>, vector<512x32xf32> -> vector<512x32xf32>
    %62 = arith.addf %60, %61 : vector<512x32xf32>
    %63 = vector.broadcast %15 : vector<1x32xf32> to vector<512x32xf32>
    %64 = arith.addf %62, %63 : vector<512x32xf32>
    %cst_56 = arith.constant 0.000000e+00 : f32
    %65 = vector.broadcast %cst_56 : f32 to vector<512x32xf32>
    %66 = arith.maximumf %64, %65 : vector<512x32xf32>
    %cst_57 = arith.constant dense<0.000000e+00> : vector<512x32xf32>
    %67 = tpu.matmul %59, %3, %cst_57 {dimension_numbers = #tpu.dot_dimension_numbers<[1], [0], [0], [1], [0, 0, 1, 1], [], []>} : vector<512x32xf32>, vector<32x32xf32>, vector<512x32xf32> -> vector<512x32xf32>
    %cst_58 = arith.constant dense<0.000000e+00> : vector<512x32xf32>
    %68 = tpu.matmul %25, %4, %cst_58 {dimension_numbers = #tpu.dot_dimension_numbers<[1], [0], [0], [1], [0, 0, 1, 1], [], []>} : vector<512x32xf32>, vector<32x32xf32>, vector<512x32xf32> -> vector<512x32xf32>
    %69 = arith.addf %67, %68 : vector<512x32xf32>
    %70 = vector.broadcast %16 : vector<1x32xf32> to vector<512x32xf32>
    %71 = arith.addf %69, %70 : vector<512x32xf32>
    %cst_59 = arith.constant 0.000000e+00 : f32
    %72 = vector.broadcast %cst_59 : f32 to vector<512x32xf32>
    %73 = arith.maximumf %71, %72 : vector<512x32xf32>
    %cst_60 = arith.constant dense<0.000000e+00> : vector<512x32xf32>
    %74 = tpu.matmul %66, %5, %cst_60 {dimension_numbers = #tpu.dot_dimension_numbers<[1], [0], [0], [1], [0, 0, 1, 1], [], []>} : vector<512x32xf32>, vector<32x32xf32>, vector<512x32xf32> -> vector<512x32xf32>
    %cst_61 = arith.constant dense<0.000000e+00> : vector<512x32xf32>
    %75 = tpu.matmul %73, %6, %cst_61 {dimension_numbers = #tpu.dot_dimension_numbers<[1], [0], [0], [1], [0, 0, 1, 1], [], []>} : vector<512x32xf32>, vector<32x32xf32>, vector<512x32xf32> -> vector<512x32xf32>
    %76 = arith.addf %74, %75 : vector<512x32xf32>
    %77 = vector.broadcast %17 : vector<1x32xf32> to vector<512x32xf32>
    %78 = arith.addf %76, %77 : vector<512x32xf32>
    %79 = vector.extract_strided_slice %78 {offsets = [0, 0], sizes = [128, 32], strides = [1, 1]} : vector<512x32xf32> to vector<128x32xf32>
    %cst_62 = arith.constant dense<0.000000e+00> : vector<128x32xf32>
    %80 = tpu.matmul %28, %79, %cst_62 {dimension_numbers = #tpu.dot_dimension_numbers<[1], [0], [0], [1], [0, 0, 1, 1], [], []>} : vector<128x128xf32>, vector<128x32xf32>, vector<128x32xf32> -> vector<128x32xf32>
    %81 = vector.extract_strided_slice %78 {offsets = [128, 0], sizes = [128, 32], strides = [1, 1]} : vector<512x32xf32> to vector<128x32xf32>
    %cst_63 = arith.constant dense<0.000000e+00> : vector<128x32xf32>
    %82 = tpu.matmul %31, %81, %cst_63 {dimension_numbers = #tpu.dot_dimension_numbers<[1], [0], [0], [1], [0, 0, 1, 1], [], []>} : vector<128x128xf32>, vector<128x32xf32>, vector<128x32xf32> -> vector<128x32xf32>
    %83 = vector.extract_strided_slice %78 {offsets = [256, 0], sizes = [128, 32], strides = [1, 1]} : vector<512x32xf32> to vector<128x32xf32>
    %cst_64 = arith.constant dense<0.000000e+00> : vector<128x32xf32>
    %84 = tpu.matmul %34, %83, %cst_64 {dimension_numbers = #tpu.dot_dimension_numbers<[1], [0], [0], [1], [0, 0, 1, 1], [], []>} : vector<128x128xf32>, vector<128x32xf32>, vector<128x32xf32> -> vector<128x32xf32>
    %85 = vector.extract_strided_slice %78 {offsets = [384, 0], sizes = [128, 32], strides = [1, 1]} : vector<512x32xf32> to vector<128x32xf32>
    %cst_65 = arith.constant dense<0.000000e+00> : vector<128x32xf32>
    %86 = tpu.matmul %37, %85, %cst_65 {dimension_numbers = #tpu.dot_dimension_numbers<[1], [0], [0], [1], [0, 0, 1, 1], [], []>} : vector<128x128xf32>, vector<128x32xf32>, vector<128x32xf32> -> vector<128x32xf32>
    %87 = vector.extract_strided_slice %78 {offsets = [0, 0], sizes = [128, 32], strides = [1, 1]} : vector<512x32xf32> to vector<128x32xf32>
    %cst_66 = arith.constant dense<0.000000e+00> : vector<128x32xf32>
    %88 = tpu.matmul %38, %87, %cst_66 {dimension_numbers = #tpu.dot_dimension_numbers<[1], [0], [0], [1], [0, 0, 1, 1], [], []>} : vector<128x128xf32>, vector<128x32xf32>, vector<128x32xf32> -> vector<128x32xf32>
    %89 = vector.extract_strided_slice %78 {offsets = [128, 0], sizes = [128, 32], strides = [1, 1]} : vector<512x32xf32> to vector<128x32xf32>
    %cst_67 = arith.constant dense<0.000000e+00> : vector<128x32xf32>
    %90 = tpu.matmul %39, %89, %cst_67 {dimension_numbers = #tpu.dot_dimension_numbers<[1], [0], [0], [1], [0, 0, 1, 1], [], []>} : vector<128x128xf32>, vector<128x32xf32>, vector<128x32xf32> -> vector<128x32xf32>
    %91 = vector.extract_strided_slice %78 {offsets = [256, 0], sizes = [128, 32], strides = [1, 1]} : vector<512x32xf32> to vector<128x32xf32>
    %cst_68 = arith.constant dense<0.000000e+00> : vector<128x32xf32>
    %92 = tpu.matmul %40, %91, %cst_68 {dimension_numbers = #tpu.dot_dimension_numbers<[1], [0], [0], [1], [0, 0, 1, 1], [], []>} : vector<128x128xf32>, vector<128x32xf32>, vector<128x32xf32> -> vector<128x32xf32>
    %93 = vector.extract_strided_slice %78 {offsets = [384, 0], sizes = [128, 32], strides = [1, 1]} : vector<512x32xf32> to vector<128x32xf32>
    %cst_69 = arith.constant dense<0.000000e+00> : vector<128x32xf32>
    %94 = tpu.matmul %41, %93, %cst_69 {dimension_numbers = #tpu.dot_dimension_numbers<[1], [0], [0], [1], [0, 0, 1, 1], [], []>} : vector<128x128xf32>, vector<128x32xf32>, vector<128x32xf32> -> vector<128x32xf32>
    %95 = tpu.concatenate %80, %82, %84, %86 in 0 : vector<128x32xf32>, vector<128x32xf32>, vector<128x32xf32>, vector<128x32xf32> -> vector<512x32xf32>
    %96 = tpu.concatenate %88, %90, %92, %94 in 0 : vector<128x32xf32>, vector<128x32xf32>, vector<128x32xf32>, vector<128x32xf32> -> vector<512x32xf32>
    %cst_70 = arith.constant dense<0.000000e+00> : vector<512x32xf32>
    %97 = tpu.matmul %95, %7, %cst_70 {dimension_numbers = #tpu.dot_dimension_numbers<[1], [0], [0], [1], [0, 0, 1, 1], [], []>} : vector<512x32xf32>, vector<32x32xf32>, vector<512x32xf32> -> vector<512x32xf32>
    %cst_71 = arith.constant dense<0.000000e+00> : vector<512x32xf32>
    %98 = tpu.matmul %78, %8, %cst_71 {dimension_numbers = #tpu.dot_dimension_numbers<[1], [0], [0], [1], [0, 0, 1, 1], [], []>} : vector<512x32xf32>, vector<32x32xf32>, vector<512x32xf32> -> vector<512x32xf32>
    %99 = arith.addf %97, %98 : vector<512x32xf32>
    %100 = vector.broadcast %18 : vector<1x32xf32> to vector<512x32xf32>
    %101 = arith.addf %99, %100 : vector<512x32xf32>
    %cst_72 = arith.constant 0.000000e+00 : f32
    %102 = vector.broadcast %cst_72 : f32 to vector<512x32xf32>
    %103 = arith.maximumf %101, %102 : vector<512x32xf32>
    %cst_73 = arith.constant dense<0.000000e+00> : vector<512x32xf32>
    %104 = tpu.matmul %96, %9, %cst_73 {dimension_numbers = #tpu.dot_dimension_numbers<[1], [0], [0], [1], [0, 0, 1, 1], [], []>} : vector<512x32xf32>, vector<32x32xf32>, vector<512x32xf32> -> vector<512x32xf32>
    %cst_74 = arith.constant dense<0.000000e+00> : vector<512x32xf32>
    %105 = tpu.matmul %78, %10, %cst_74 {dimension_numbers = #tpu.dot_dimension_numbers<[1], [0], [0], [1], [0, 0, 1, 1], [], []>} : vector<512x32xf32>, vector<32x32xf32>, vector<512x32xf32> -> vector<512x32xf32>
    %106 = arith.addf %104, %105 : vector<512x32xf32>
    %107 = vector.broadcast %19 : vector<1x32xf32> to vector<512x32xf32>
    %108 = arith.addf %106, %107 : vector<512x32xf32>
    %cst_75 = arith.constant 0.000000e+00 : f32
    %109 = vector.broadcast %cst_75 : f32 to vector<512x32xf32>
    %110 = arith.maximumf %108, %109 : vector<512x32xf32>
    %cst_76 = arith.constant dense<0.000000e+00> : vector<2x512xf32>
    %111 = tpu.matmul %11, %103, %cst_76 {dimension_numbers = #tpu.dot_dimension_numbers<[1], [1], [0], [0], [0, 0, 1, 0], [], []>} : vector<2x32xf32>, vector<512x32xf32>, vector<2x512xf32> -> vector<2x512xf32>
    %cst_77 = arith.constant dense<0.000000e+00> : vector<2x512xf32>
    %112 = tpu.matmul %12, %110, %cst_77 {dimension_numbers = #tpu.dot_dimension_numbers<[1], [1], [0], [0], [0, 0, 1, 0], [], []>} : vector<2x32xf32>, vector<512x32xf32>, vector<2x512xf32> -> vector<2x512xf32>
    %113 = arith.addf %111, %112 : vector<2x512xf32>
    %114 = vector.broadcast %13 : vector<2x1xf32> to vector<2x512xf32>
    %115 = arith.addf %113, %114 : vector<2x512xf32>
    %cst_78 = arith.constant dense<0xFF800000> : vector<512xf32>
    %116 = vector.multi_reduction <maximumf>, %115, %cst_78 [0] : vector<2x512xf32> to vector<512xf32>
    %117 = vector.shape_cast %116 : vector<512xf32> to vector<1x512xf32>
    %118 = vector.broadcast %117 : vector<1x512xf32> to vector<2x512xf32>
    %119 = arith.subf %115, %118 : vector<2x512xf32>
    %120 = math.exp %119 : vector<2x512xf32>
    %cst_79 = arith.constant dense<0.000000e+00> : vector<512xf32>
    %121 = vector.multi_reduction <add>, %120, %cst_79 [0] : vector<2x512xf32> to vector<512xf32>
    %122 = vector.shape_cast %121 : vector<512xf32> to vector<1x512xf32>
    %123 = math.log %122 : vector<1x512xf32>
    %124 = vector.broadcast %123 : vector<1x512xf32> to vector<2x512xf32>
    %125 = arith.subf %119, %124 : vector<2x512xf32>
    %c0_80 = arith.constant 0 : index
    %c0_81 = arith.constant 0 : index
    %126 = vector.load %arg4[%c0_80, %c0_81] : memref<2x512xf32, #tpu.memory_space<vmem>>, vector<2x512xf32>
    tpu.vector_store %arg4[%c0_80, %c0_81], %125 {strides = array<i32>} : memref<2x512xf32, #tpu.memory_space<vmem>>, vector<2x512xf32>,
    return
  }
  func.func @transform_0(%arg0: i32) -> (i32, i32) {
    %c0_i32 = arith.constant 0 : i32
    %c0_i32_0 = arith.constant 0 : i32
    return %arg0, %c0_i32 : i32, i32
  }
  func.func @transform_1(%arg0: i32) -> (i32, i32, i32) {
    %c0_i32 = arith.constant 0 : i32
    %c0_i32_0 = arith.constant 0 : i32
    %c0_i32_1 = arith.constant 0 : i32
    return %arg0, %c0_i32, %c0_i32_0 : i32, i32, i32
  }
  func.func @transform_2(%arg0: i32) -> (i32, i32) {
    %c0_i32 = arith.constant 0 : i32
    %c0_i32_0 = arith.constant 0 : i32
    %c0_i32_1 = arith.constant 0 : i32
    return %c0_i32, %c0_i32_0 : i32, i32
  }
  func.func @transform_3(%arg0: i32) -> (i32, i32) {
    %c0_i32 = arith.constant 0 : i32
    %c0_i32_0 = arith.constant 0 : i32
    return %c0_i32, %arg0 : i32, i32
  }
}

</mosaic_0001>

<bundles_post_ra>
// kernel: tpu_custom_call.1
= control target key start
LH: loop header
LB: loop body
LE: loop exit
PB: predicated region body
PF: predicated region fallthrough
CT: control target
= control target key end

     0   :  { %8 = vsyncpa [#allocation3], 0  ;;  %s20598_s0 = inlined_call_operand.vmem [shape: f32[1024,32], index: 0, kind: input, shape index: {}]   ;;  %s20599_s1 = inlined_call_operand.vmem [shape: bf16[8,128,128], index: 1, kind: input, shape index: {}]   ;;  %s20600_s2 = inlined_call_operand.vmem [shape: f32[104,128], index: 2, kind: input, shape index: {}]   ;;  %s20601_s3 = inlined_call_operand.hbm [shape: f32[2,1024], index: 3, kind: output, shape index: {}]  }
   0x1   :  { %10 = vsyncpa [#allocation3 + $0x1], 0  ;;  %s15372_s12 = smov 0   ;;  %s15374_s13 = smov 0  }
   0x2   :  { %s15376_s14 = smov 0   ;;  %s15378_s15 = smov 0  }
   0x3 LB: > { %s15393_s16 = sadd.s32 4294967295, %s15344_s15   ;;  %s10462_s17 = sadd.s32 4294967294, %s15344_s15   ;;  %s15344_s15 = sphi %s15378_s15, %s21860_s15   ;;  %s15340_s14 = sphi %s15376_s14, %s21859_s14   ;;  %s15336_s13 = sphi %s15374_s13, %s21858_s13   ;;  %s15332_s12 = sphi %s15372_s12, %s21857_s12  }
   0x4   : > { %s15397_s18 = sadd.s32 1, %s15344_s15   ;;  %s96_s19 = sadd.s32 1, %s15340_s14 }
   0x5   : > { %s93_s20 = ssub.s32 %s15344_s15, %s15397_s18  ;;  %p106_p0 = scmp.ne.s32.totalorder %s15340_s14, %s15336_s13 }
   0x6   : > { %p94_p1 = scmp.eq.s32.totalorder %s93_s20, 0  ;;  %p107_p2 = scmp.eq.s32.totalorder %s15393_s16, 1 }
   0x7   : > { %p112_p3 = scmp.ne.s32.totalorder %s15336_s13, %s15332_s12  ;;  %p113_p4 = scmp.eq.s32.totalorder %s10462_s17, 1 }
   0x8   : > { %s15408_s21 = scalar_select %p94_p1, %s15340_s14, %s96_s19  }
   0x9   : > { %p15410_p5 = por %p107_p2, %p106_p0  ;;  %p15414_p6 = por %p113_p4, %p112_p3 }
   0xa   : > { %p10465_p7 = scmp.ge.s32.totalorder %s15344_s15, 1  ;;  %p153_p8 = scmp.lt.s32.totalorder %s15344_s15, 3 }
   0xc   : > { %p154_p9 = pnand %p10465_p7, %p153_p8 }
   0xe   : > { %157 = sbr.rel (%p154_p9) target bundleno = 2175 (0x87f), region = 32 }
  0x13   : > { %v15423_v0 = vld [vmem:[%s20600_s2 + $0x18] sm:$0xff]  ;;  %v15428_v1 = vld [vmem:[%s20600_s2 + $0x10] sm:$0xff]  ;;  %s10467_s28 = sshll.u32 %s15393_s16, 6  ;;  %v15436_v2 = vld [vmem:[%s20600_s2 + $0x8] sm:$0xff]  ;;  %vm280_vm0 = vcmask 261120   ;;  %s10469_s10 = sshll.u32 %s15393_s16, 2 }
  0x14   : > { %12920 = vmatprep.subr.mxu0 %v15423_v0  ;;  %p184_p10 = scmp.lt.s32.totalorder %s10467_s28, 127  ;;  %v15443_v3 = vld [vmem:[%s20600_s2] sm:$0xff]  ;;  %p190_p11 = scmp.lt.s32.totalorder %s10469_s10, 7  ;;  %vm10272_vm1 = vcmask 1041408  }
  0x15   : > { %12921 = vmatpush3.msra.mxu0 %v15423_v0  ;;  %s15346_s24 = smov 96   ;;  %s15347_s25 = smov 64  }
  0x16   : > { %12922 = vmatprep.subr.mxu0 %v15428_v1  ;;  %s21862_s28 = smov (!%p184_p10, %s10467_s28), 127  ;;  %s21864_s10 = smov (!%p190_p11, %s10469_s10), 7 }
  0x17   : > { %12923 = vmatpush3.msra.mxu0 %v15428_v1  ;;  %s10468_s6 = sshll.u32 %s21862_s28, 3  ;;  %s11363_s11 = sshll.u32 %s21864_s10, 6 }
  0x18   : > { %12924 = vmatprep.subr.mxu0 %v15436_v2  ;;  %s15450_s9 = scalar_lea.vmem %s20598_s0, %s10468_s6  ;;  %s15479_s20 = scalar_lea.vmem %s20599_s1, %s11363_s11 }
  0x19   : > { %12925 = vmatpush3.msra.mxu0 %v15436_v2  ;;  %v212_v4 = vld [vmem:[%s15450_s9] sm:$0xff]  ;;  %v213_v5 = vld [vmem:[%s15450_s9 + $0x8] sm:$0xff]  ;;  %v214_v6 = vld [vmem:[%s15450_s9 + $0x10] sm:$0xff]  ;;  %s15348_s30 = smov 32   ;;  %s180_s29 = sand.u32 1, %s15336_s13  }
  0x1a   : > { %12926 = vmatprep.subr.mxu0 %v15443_v3  ;;  %12928 = vmatprep.mubr.msk.f32.mxu0 %vm280_vm0, %v212_v4  ;;  %v215_v7 = vld [vmem:[%s15450_s9 + $0x18] sm:$0xff]  ;;  %v216_v8 = vld [vmem:[%s15450_s9 + $0x20] sm:$0xff]  ;;  %v217_v9 = vld [vmem:[%s15450_s9 + $0x28] sm:$0xff]  ;;  %s10466_s4 = sshll.u32 %s180_s29, 3  ;;  %s10377_s10 = scalar_lea.sflag [#allocation3], %s180_s29 }
  0x1b   : > { %12927 = vmatpush3.msra.mxu0 %v15443_v3  ;;  %v218_v10 = vld [vmem:[%s15450_s9 + $0x30] sm:$0xff]  ;;  %v219_v11 = vld [vmem:[%s15450_s9 + $0x38] sm:$0xff]  ;;  %v220_v12 = vld [vmem:[%s15450_s9 + $0x40] sm:$0xff]  ;;  %s182_s5 = scalar_lea.vmem [#allocation2], %s10466_s4 }
  0x1c   : > { %12929 = vmatmul.mubr.msk.f32.vlgmr.msra.gmra.mxu0 %vm280_vm0, %v213_v5  ;;  %v221_v13 = vld [vmem:[%s15450_s9 + $0x48] sm:$0xff]  ;;  %v222_v14 = vld [vmem:[%s15450_s9 + $0x50] sm:$0xff]  ;;  %v223_v15 = vld [vmem:[%s15450_s9 + $0x58] sm:$0xff]  ;;  %s10391_s6 = sshll.u32 %s182_s5, 4  ;;  %s10392_s6 = int_to_ptr.vmem [resolvable:$true] %s10391_s6 }
  0x1d   : > { %12931 = vmatprep.mubr.msk.f32.mxu0 %vm280_vm0, %v214_v6  ;;  %v224_v16 = vld [vmem:[%s15450_s9 + $0x60] sm:$0xff]  ;;  %v225_v19 = vld [vmem:[%s15450_s9 + $0x68] sm:$0xff]  ;;  %v226_v29 = vld [vmem:[%s15450_s9 + $0x70] sm:$0xff]  ;;  %s15284_s11 = scalar_lea.vmem %s10392_s6, 128 }
  0x1e   : > { %v11366_v17 = vld [vmem:[%s15479_s20] sm:$0xff]   ;;  %v11493_v25 = vld [vmem:[%s15479_s20 + $0x8] sm:$0xff]   ;;  %v227_v40 = vld [vmem:[%s15450_s9 + $0x78] sm:$0xff]  ;;  %p15285_p12 = scmp.ne.s32.totalorder %s10392_s6, %s15284_s11 }
  0x1f   : > { %v11500_v18 = vld [vmem:[%s15479_s20 + $0x40] sm:$0xff]   ;;  %v15488_v20 = vunpack.c.l.bf16 %v11366_v17  ;;  %v15492_v22 = vunpack.c.h.bf16 %v11366_v17  ;;  %v11501_v26 = vld [vmem:[%s15479_s20 + $0x48] sm:$0xff]   ;;  %v15518_v37 = vunpack.c.l.bf16 %v11493_v25  ;;  %v15536_v46 = vunpack.c.h.bf16 %v11493_v25  ;;  %v11494_v49 = vld [vmem:[%s15479_s20 + $0x10] sm:$0xff]  }
  0x20   : > { %12932 = vmatmul.mubr.msk.f32.gmra.mxu0 %vm280_vm0, %v215_v7  ;;  %v15490_v21 = vunpack.c.l.bf16 %v11500_v18  ;;  %v15494_v23 = vunpack.c.h.bf16 %v11500_v18  ;;  %v11508_v24 = vld [vmem:[%s15479_s20 + $0x80] sm:$0xff]   ;;  %v11509_v34 = vld [vmem:[%s15479_s20 + $0x88] sm:$0xff]   ;;  %v15520_v38 = vunpack.c.l.bf16 %v11501_v26  ;;  %v15538_v47 = vunpack.c.h.bf16 %v11501_v26  ;;  %v11502_v50 = vld [vmem:[%s15479_s20 + $0x50] sm:$0xff]   ;;  %p15286_p13 = pnand %p15285_p12, %p15410_p5 }
  0x21   : > { %12934 = vmatprep.mubr.msk.f32.mxu0 %vm280_vm0, %v216_v8  ;;  %21007 = vst [vmem:[#allocation5_spill] sm:$0xff] %v15488_v20  ;;  %21009 = vst [vmem:[#allocation7_spill] sm:$0xff] %v15492_v22  ;;  %v15500_v27 = vunpack.c.l.bf16 %v11508_v24  ;;  %v11516_v28 = vld [vmem:[%s15479_s20 + $0xc0] sm:$0xff]   ;;  %13056 = vmatprep.mubr.f32.mxu1 %v15488_v20  ;;  %v15509_v32 = vunpack.c.h.bf16 %v11508_v24  ;;  %v11517_v35 = vld [vmem:[%s15479_s20 + $0xc8] sm:$0xff]   ;;  %v15529_v43 = vunpack.c.l.bf16 %v11509_v34  ;;  %v15547_v53 = vunpack.c.h.bf16 %v11509_v34 }
  0x22   : > { %21008 = vst [vmem:[#allocation6_spill] sm:$0xff] %v15490_v21  ;;  %21010 = vst [vmem:[#allocation8_spill] sm:$0xff] %v15494_v23  ;;  %v15036_v30 = vpack.i.bf16 %v15490_v21, %v15488_v20  ;;  %v15506_v31 = vunpack.c.l.bf16 %v11516_v28  ;;  %v15511_v33 = vunpack.c.h.bf16 %v11516_v28  ;;  %v15038_v36 = vpack.i.bf16 %v15494_v23, %v15492_v22  ;;  %v228_v41 = vld [vmem:[%s15450_s9 + $0x80] sm:$0xff]  ;;  %v229_v48 = vld [vmem:[%s15450_s9 + $0x88] sm:$0xff]  ;;  %p15287_p0 = pneg %p15286_p13 }
  0x23   : > { %21011 = vst [vmem:[#allocation9_spill] sm:$0xff] %v15500_v27  ;;  %21013 = vst [vmem:[#allocation11_spill] sm:$0xff] %v15509_v32  ;;  %v15531_v44 = vunpack.c.l.bf16 %v11517_v35  ;;  %v15040_v45 = vpack.i.bf16 %v15520_v38, %v15518_v37  ;;  %v230_v51 = vld [vmem:[%s15450_s9 + $0x90] sm:$0xff]  ;;  %v15549_v54 = vunpack.c.h.bf16 %v11517_v35  ;;  %v15042_v57 = vpack.i.bf16 %v15538_v47, %v15536_v46  ;;  %v231_v60 = vld [vmem:[%s15450_s9 + $0x98] sm:$0xff] }
  0x24   : > { %12935 = vmatmul.mubr.msk.f32.gmra.mxu0 %vm280_vm0, %v217_v9  ;;  %21012 = vst [vmem:[#allocation10_spill] sm:$0xff] %v15506_v31  ;;  %21014 = vst [vmem:[#allocation12_spill] sm:$0xff] %v15511_v33  ;;  %15037 = vxpose.xlu0.b32.start [1/16] %v15036_v30, 128  ;;  %v15148_v39 = vpack.i.bf16 %v15506_v31, %v15500_v27  ;;  %v15150_v42 = vpack.i.bf16 %v15511_v33, %v15509_v32  ;;  %v11510_v55 = vld [vmem:[%s15479_s20 + $0x90] sm:$0xff]   ;;  %v15556_v58 = vunpack.c.l.bf16 %v11494_v49  ;;  %v232_v61 = vld [vmem:[%s15450_s9 + $0xa0] sm:$0xff] }
  0x25   : > { %12937 = vmatprep.mubr.msk.f32.mxu0 %vm280_vm0, %v218_v10  ;;  %21015 = vst [vmem:[#allocation13_spill] sm:$0xff] %v15518_v37  ;;  %21016 = vst [vmem:[#allocation14_spill] sm:$0xff] %v15520_v38  ;;  %v15152_v52 = vpack.i.bf16 %v15531_v44, %v15529_v43  ;;  %v11518_v56 = vld [vmem:[%s15479_s20 + $0xd0] sm:$0xff]   ;;  %v15558_v59 = vunpack.c.l.bf16 %v11502_v50  ;;  %v15154_v62 = vpack.i.bf16 %v15549_v54, %v15547_v53  ;;  %v15565_v63 = vunpack.c.l.bf16 %v11510_v55  ;;  %v233_v8 = vld [vmem:[%s15450_s9 + $0xa8] sm:$0xff] }
  0x26   : > { %15149 = vxpose.xlu1.b32.start [1/16] %v15148_v39, 128  ;;  %21017 = vst [vmem:[#allocation15_spill] sm:$0xff] %v15529_v43  ;;  %21018 = vst [vmem:[#allocation16_spill] sm:$0xff] %v15531_v44  ;;  %v15567_v4 = vunpack.c.l.bf16 %v11518_v56  ;;  %v15572_v6 = vunpack.c.h.bf16 %v11494_v49  ;;  %v15574_v7 = vunpack.c.h.bf16 %v11502_v50  ;;  %v11495_v9 = vld [vmem:[%s15479_s20 + $0x18] sm:$0xff]   ;;  %v236_v25 = vld [vmem:[%s15450_s9 + $0xc0] sm:$0xff] }
  0x27   : > { %21019 = vst [vmem:[#allocation17_spill] sm:$0xff] %v15536_v46  ;;  %21020 = vst [vmem:[#allocation18_spill] sm:$0xff] %v15538_v47  ;;  %v15044_v5 = vpack.i.bf16 %v15558_v59, %v15556_v58  ;;  %v11503_v10 = vld [vmem:[%s15479_s20 + $0x58] sm:$0xff]   ;;  %v15592_v18 = vunpack.c.l.bf16 %v11495_v9  ;;  %v15608_v34 = vunpack.c.h.bf16 %v11495_v9  ;;  %v11496_v39 = vld [vmem:[%s15479_s20 + $0x20] sm:$0xff]  }
  0x28   : > { %12938 = vmatmul.mubr.msk.f32.gmra.mxu0 %vm280_vm0, %v219_v11  ;;  %15039 = vxpose.xlu0.b32.cont [2/16] %v15038_v36, 128  ;;  %21021 = vst [vmem:[#allocation19_spill] sm:$0xff] %v15547_v53  ;;  %21022 = vst [vmem:[#allocation20_spill] sm:$0xff] %v15549_v54  ;;  %v234_v11 = vld [vmem:[%s15450_s9 + $0xb0] sm:$0xff]  ;;  %v15046_v17 = vpack.i.bf16 %v15574_v7, %v15572_v6  ;;  %v235_v24 = vld [vmem:[%s15450_s9 + $0xb8] sm:$0xff]  ;;  %v15610_v35 = vunpack.c.h.bf16 %v11503_v10 }
  0x29   : > { %12940 = vmatprep.mubr.msk.f32.mxu0 %vm280_vm0, %v220_v12  ;;  %21023 = vst [vmem:[#allocation21_spill] sm:$0xff] %v15556_v58  ;;  %21024 = vst [vmem:[#allocation22_spill] sm:$0xff] %v15558_v59  ;;  %v15156_v12 = vpack.i.bf16 %v15567_v4, %v15565_v63  ;;  %v237_v36 = vld [vmem:[%s15450_s9 + $0xc8] sm:$0xff]  ;;  %v11512_v49 = vld [vmem:[%s15479_s20 + $0xa0] sm:$0xff]  }
  0x2a   : > { %15151 = vxpose.xlu1.b32.cont [2/16] %v15150_v42, 128  ;;  %21025 = vst [vmem:[#allocation23_spill] sm:$0xff] %v15565_v63  ;;  %21026 = vst [vmem:[#allocation24_spill] sm:$0xff] %v15567_v4  ;;  %v11520_v50 = vld [vmem:[%s15479_s20 + $0xe0] sm:$0xff]   ;;  %v11522_v20 = vld [vmem:[%s15479_s20 + $0xf0] sm:$0xff]  }
  0x2b   : > { %21027 = vst [vmem:[#allocation25_spill] sm:$0xff] %v15572_v6  ;;  %21028 = vst [vmem:[#allocation26_spill] sm:$0xff] %v15574_v7  ;;  %v11523_v4 = vld [vmem:[%s15479_s20 + $0xf8] sm:$0xff]  }
  0x2c   : > { %12941 = vmatmul.mubr.msk.f32.gmra.mxu0 %vm280_vm0, %v221_v13  ;;  %15041 = vxpose.xlu0.b32.cont [3/16] %v15040_v45, 128  ;;  %v15583_v13 = vunpack.c.h.bf16 %v11510_v55  ;;  %21031 = vst [vmem:[#allocation29_spill] sm:$0xff] %v15592_v18  ;;  %21035 = vst [vmem:[#allocation33_spill] sm:$0xff] %v15608_v34 }
  0x2d   : > { %12943 = vmatprep.mubr.msk.f32.mxu0 %vm280_vm0, %v222_v14  ;;  %v15585_v14 = vunpack.c.h.bf16 %v11518_v56  ;;  %21036 = vst [vmem:[#allocation34_spill] sm:$0xff] %v15610_v35  ;;  %v239_v56 = vld [vmem:[%s15450_s9 + $0xd8] sm:$0xff] }
  0x2e   : > { %15153 = vxpose.xlu1.b32.cont [3/16] %v15152_v52, 128  ;;  %21029 = vst [vmem:[#allocation27_spill] sm:$0xff] %v15583_v13  ;;  %v15628_v52 = vunpack.c.l.bf16 %v11496_v39 }
  0x2f   : > { %21030 = vst [vmem:[#allocation28_spill] sm:$0xff] %v15585_v14  ;;  %v15158_v26 = vpack.i.bf16 %v15585_v14, %v15583_v13  ;;  %v15729_v14 = vunpack.c.h.bf16 %v11522_v20 }
  0x30   : > { %12944 = vmatmul.mubr.msk.f32.gmra.mxu0 %vm280_vm0, %v223_v15  ;;  %15043 = vxpose.xlu0.b32.cont [4/16] %v15042_v57, 128  ;;  %v11511_v15 = vld [vmem:[%s15479_s20 + $0x98] sm:$0xff]   ;;  %21039 = vst [vmem:[#allocation37_spill] sm:$0xff] %v15628_v52  ;;  %v240_v57 = vld [vmem:[%s15450_s9 + $0xe0] sm:$0xff] }
  0x31   : > { %12946 = vmatprep.mubr.msk.f32.mxu0 %vm280_vm0, %v224_v16  ;;  %v11519_v16 = vld [vmem:[%s15479_s20 + $0xd8] sm:$0xff]   ;;  %v15601_v28 = vunpack.c.l.bf16 %v11511_v15  ;;  %v15619_v45 = vunpack.c.h.bf16 %v11511_v15  ;;  %v242_v15 = vld [vmem:[%s15450_s9 + $0xf0] sm:$0xff]  ;;  %21062 = vst [vmem:[#allocation60_spill] sm:$0xff] %v15729_v14 }
  0x32   : > { %15155 = vxpose.xlu1.b32.cont [4/16] %v15154_v62, 128  ;;  %v15639_v62 = vunpack.c.l.bf16 %v11520_v50 }
  0x33   : > { %21033 = vst [vmem:[#allocation31_spill] sm:$0xff] %v15601_v28  ;;  %21037 = vst [vmem:[#allocation35_spill] sm:$0xff] %v15619_v45 }
  0x34   : > { %12947 = vmatmul.mubr.msk.f32.gmra.mxu0 %vm280_vm0, %v225_v19  ;;  %15045 = vxpose.xlu0.b32.cont [5/16] %v15044_v5, 128  ;;  %v15594_v19 = vunpack.c.l.bf16 %v11503_v10  ;;  %21042 = vst [vmem:[#allocation40_spill] sm:$0xff] %v15639_v62  ;;  %v241_v10 = vld [vmem:[%s15450_s9 + $0xe8] sm:$0xff] }
  0x35   : > { %12949 = vmatprep.mubr.msk.f32.mxu0 %vm280_vm0, %v226_v29  ;;  %v15603_v29 = vunpack.c.l.bf16 %v11519_v16 }
  0x36   : > { %21032 = vst [vmem:[#allocation30_spill] sm:$0xff] %v15594_v19  ;;  %15157 = vxpose.xlu1.b32.cont [5/16] %v15156_v12, 128  ;;  %v15048_v30 = vpack.i.bf16 %v15594_v19, %v15592_v18  ;;  %v11505_v12 = vld [vmem:[%s15479_s20 + $0x68] sm:$0xff]  }
  0x37   : > { %21034 = vst [vmem:[#allocation32_spill] sm:$0xff] %v15603_v29  ;;  %v15160_v42 = vpack.i.bf16 %v15603_v29, %v15601_v28  ;;  %v250_v29 = vld [vmem:[%s15450_s9 + $0x130] sm:$0xff] }
  0x38   : > { %12950 = vmatmul.mubr.msk.f32.gmra.mxu0 %vm280_vm0, %v227_v40  ;;  %15047 = vxpose.xlu0.b32.cont [6/16] %v15046_v17, 128  ;;  %v11504_v40 = vld [vmem:[%s15479_s20 + $0x60] sm:$0xff]   ;;  %v15655_v17 = vunpack.c.h.bf16 %v11512_v49 }
  0x39   : > { %12952 = vmatprep.mubr.msk.f32.mxu0 %vm280_vm0, %v228_v41  ;;  %v238_v41 = vld [vmem:[%s15450_s9 + $0xd0] sm:$0xff]  ;;  %v15630_v55 = vunpack.c.l.bf16 %v11504_v40  ;;  %v15646_v9 = vunpack.c.h.bf16 %v11504_v40  ;;  %v243_v40 = vld [vmem:[%s15450_s9 + $0xf8] sm:$0xff] }
  0x3a   : > { %15159 = vxpose.xlu1.b32.cont [6/16] %v15158_v26, 128  ;;  %21045 = vst [vmem:[#allocation43_spill] sm:$0xff] %v15655_v17  ;;  %v11521_v26 = vld [vmem:[%s15479_s20 + $0xe8] sm:$0xff]  }
  0x3b   : > { %21040 = vst [vmem:[#allocation38_spill] sm:$0xff] %v15630_v55  ;;  %v15052_v5 = vpack.i.bf16 %v15630_v55, %v15628_v52  ;;  %21044 = vst [vmem:[#allocation42_spill] sm:$0xff] %v15646_v9 }
  0x3c   : > { %12953 = vmatmul.mubr.msk.f32.gmra.mxu0 %vm280_vm0, %v229_v48  ;;  %v15621_v48 = vunpack.c.h.bf16 %v11519_v16  ;;  %15049 = vxpose.xlu0.b32.cont [7/16] %v15048_v30, 128 }
  0x3d   : > { %12955 = vmatprep.mubr.msk.f32.mxu0 %vm280_vm0, %v230_v51  ;;  %v15050_v51 = vpack.i.bf16 %v15610_v35, %v15608_v34 }
  0x3e   : > { %21038 = vst [vmem:[#allocation36_spill] sm:$0xff] %v15621_v48  ;;  %15161 = vxpose.xlu1.b32.cont [7/16] %v15160_v42, 128 }
  0x40   : > { %12956 = vmatmul.mubr.msk.f32.gmra.mxu0 %vm280_vm0, %v231_v60  ;;  %v15162_v60 = vpack.i.bf16 %v15621_v48, %v15619_v45  ;;  %15051 = vxpose.xlu0.b32.cont [8/16] %v15050_v51, 128  ;;  %v11507_v48 = vld [vmem:[%s15479_s20 + $0x78] sm:$0xff]  }
  0x41   : > { %12958 = vmatprep.mubr.msk.f32.mxu0 %vm280_vm0, %v232_v61  ;;  %v15637_v61 = vunpack.c.l.bf16 %v11512_v49 }
  0x42   : > { %15163 = vxpose.xlu1.b32.cont [8/16] %v15162_v60, 128  ;;  %v245_v60 = vld [vmem:[%s15450_s9 + $0x108] sm:$0xff] }
  0x43   : > { %21041 = vst [vmem:[#allocation39_spill] sm:$0xff] %v15637_v61  ;;  %v15164_v16 = vpack.i.bf16 %v15639_v62, %v15637_v61 }
  0x44   : > { %12959 = vmatmul.mubr.msk.f32.gmra.mxu0 %vm280_vm0, %v233_v8  ;;  %v15644_v8 = vunpack.c.h.bf16 %v11496_v39  ;;  %15053 = vxpose.xlu0.b32.cont [9/16] %v15052_v5, 128  ;;  %v15666_v39 = vunpack.c.l.bf16 %v11505_v12  ;;  %v11498_v5 = vld [vmem:[%s15479_s20 + $0x30] sm:$0xff]  }
  0x45   : > { %12961 = vmatprep.mubr.msk.f32.mxu0 %vm280_vm0, %v234_v11  ;;  %v11497_v11 = vld [vmem:[%s15479_s20 + $0x28] sm:$0xff]  }
  0x46   : > { %21043 = vst [vmem:[#allocation41_spill] sm:$0xff] %v15644_v8  ;;  %v15054_v30 = vpack.i.bf16 %v15646_v9, %v15644_v8  ;;  %21048 = vst [vmem:[#allocation46_spill] sm:$0xff] %v15666_v39  ;;  %15165 = vxpose.xlu1.b32.cont [9/16] %v15164_v16, 128 }
  0x48   : > { %12962 = vmatmul.mubr.msk.f32.gmra.mxu0 %vm280_vm0, %v235_v24  ;;  %v15657_v24 = vunpack.c.h.bf16 %v11520_v50  ;;  %v15675_v50 = vunpack.c.l.bf16 %v11521_v26  ;;  %15055 = vxpose.xlu0.b32.cont [10/16] %v15054_v30, 128 }
  0x49   : > { %12964 = vmatprep.mubr.msk.f32.mxu0 %vm280_vm0, %v236_v25  ;;  %v11513_v25 = vld [vmem:[%s15479_s20 + $0xa8] sm:$0xff]  }
  0x4a   : > { %21046 = vst [vmem:[#allocation44_spill] sm:$0xff] %v15657_v24  ;;  %v15166_v42 = vpack.i.bf16 %v15657_v24, %v15655_v17  ;;  %v15673_v49 = vunpack.c.l.bf16 %v11513_v25  ;;  %21050 = vst [vmem:[#allocation48_spill] sm:$0xff] %v15675_v50  ;;  %v15691_v30 = vunpack.c.h.bf16 %v11513_v25  ;;  %v247_v25 = vld [vmem:[%s15450_s9 + $0x118] sm:$0xff] }
  0x4c   : > { %12965 = vmatmul.mubr.msk.f32.gmra.mxu0 %vm280_vm0, %v237_v36  ;;  %v15664_v36 = vunpack.c.l.bf16 %v11497_v11  ;;  %21049 = vst [vmem:[#allocation47_spill] sm:$0xff] %v15673_v49  ;;  %15167 = vxpose.xlu1.b32.cont [10/16] %v15166_v42, 128  ;;  %v15168_v16 = vpack.i.bf16 %v15675_v50, %v15673_v49  ;;  %21053 = vst [vmem:[#allocation51_spill] sm:$0xff] %v15691_v30  ;;  %v15711_v50 = vunpack.c.l.bf16 %v11522_v20 }
  0x4d   : > { %12967 = vmatprep.mubr.msk.f32.mxu0 %vm280_vm0, %v238_v41  ;;  %v244_v41 = vld [vmem:[%s15450_s9 + $0x100] sm:$0xff] }
  0x4e   : > { %21047 = vst [vmem:[#allocation45_spill] sm:$0xff] %v15664_v36  ;;  %v15056_v51 = vpack.i.bf16 %v15666_v39, %v15664_v36  ;;  %21058 = vst [vmem:[#allocation56_spill] sm:$0xff] %v15711_v50 }
  0x50   : > { %12968 = vmatmul.mubr.msk.f32.gmra.mxu0 %vm280_vm0, %v239_v56  ;;  %v15680_v56 = vunpack.c.h.bf16 %v11497_v11  ;;  %v11514_v11 = vld [vmem:[%s15479_s20 + $0xb0] sm:$0xff]   ;;  %15057 = vxpose.xlu0.b32.cont [11/16] %v15056_v51, 128 }
  0x51   : > { %12970 = vmatprep.mubr.msk.f32.mxu0 %vm280_vm0, %v240_v57  ;;  %v15682_v57 = vunpack.c.h.bf16 %v11505_v12  ;;  %15169 = vxpose.xlu1.b32.cont [11/16] %v15168_v16, 128  ;;  %v15709_v51 = vunpack.c.l.bf16 %v11514_v11  ;;  %v249_v16 = vld [vmem:[%s15450_s9 + $0x128] sm:$0xff] }
  0x52   : > { %21051 = vst [vmem:[#allocation49_spill] sm:$0xff] %v15680_v56 }
  0x53   : > { %21052 = vst [vmem:[#allocation50_spill] sm:$0xff] %v15682_v57  ;;  %v15058_v12 = vpack.i.bf16 %v15682_v57, %v15680_v56  ;;  %21057 = vst [vmem:[#allocation55_spill] sm:$0xff] %v15709_v51 }
  0x54   : > { %12971 = vmatmul.mubr.msk.f32.gmra.mxu0 %vm280_vm0, %v241_v10  ;;  %v11506_v10 = vld [vmem:[%s15479_s20 + $0x70] sm:$0xff]  }
  0x55   : > { %12973 = vmatprep.mubr.msk.f32.mxu0 %vm280_vm0, %v242_v15  ;;  %v246_v15 = vld [vmem:[%s15450_s9 + $0x110] sm:$0xff]  ;;  %v15702_v42 = vunpack.c.l.bf16 %v11506_v10  ;;  %15059 = vxpose.xlu0.b32.cont [12/16] %v15058_v12, 128  ;;  %v15718_v62 = vunpack.c.h.bf16 %v11506_v10  ;;  %v15727_v12 = vunpack.c.h.bf16 %v11514_v11  ;;  %v251_v11 = vld [vmem:[%s15450_s9 + $0x138] sm:$0xff] }
  0x57   : > { %21056 = vst [vmem:[#allocation54_spill] sm:$0xff] %v15702_v42  ;;  %21060 = vst [vmem:[#allocation58_spill] sm:$0xff] %v15718_v62  ;;  %v15174_v20 = vpack.i.bf16 %v15729_v14, %v15727_v12  ;;  %v254_v14 = vld [vmem:[%s15450_s9 + $0x150] sm:$0xff] }
  0x58   : > { %12974 = vmatmul.mubr.msk.f32.gmra.mxu0 %vm280_vm0, %v243_v40  ;;  %v15693_v40 = vunpack.c.h.bf16 %v11521_v26  ;;  %v248_v26 = vld [vmem:[%s15450_s9 + $0x120] sm:$0xff]  ;;  %21061 = vst [vmem:[#allocation59_spill] sm:$0xff] %v15727_v12 }
  0x59   : > { %12976 = vmatprep.mubr.msk.f32.mxu0 %vm280_vm0, %v244_v41  ;;  %v15700_v41 = vunpack.c.l.bf16 %v11498_v5 }
  0x5a   : > { %21054 = vst [vmem:[#allocation52_spill] sm:$0xff] %v15693_v40 }
  0x5b   : > { %21055 = vst [vmem:[#allocation53_spill] sm:$0xff] %v15700_v41  ;;  %v15060_v24 = vpack.i.bf16 %v15702_v42, %v15700_v41 }
  0x5c   : > { %12977 = vmatmul.mubr.msk.f32.gmra.mxu0 %vm280_vm0, %v245_v60  ;;  %v15170_v60 = vpack.i.bf16 %v15693_v40, %v15691_v30  ;;  %v11499_v40 = vld [vmem:[%s15479_s20 + $0x38] sm:$0xff]  }
  0x5d   : > { %12979 = vmatprep.mubr.msk.f32.mxu0 %vm280_vm0, %v246_v15  ;;  %v15716_v15 = vunpack.c.h.bf16 %v11498_v5  ;;  %v11515_v5 = vld [vmem:[%s15479_s20 + $0xb8] sm:$0xff]   ;;  %15061 = vxpose.xlu0.b32.cont [13/16] %v15060_v24, 128  ;;  %v15747_v24 = vunpack.c.l.bf16 %v11523_v4  ;;  %v15752_v44 = vunpack.c.h.bf16 %v11499_v40 }
  0x5e   : > { %15171 = vxpose.xlu1.b32.cont [12/16] %v15170_v60, 128  ;;  %v15738_v60 = vunpack.c.l.bf16 %v11507_v48  ;;  %v15745_v54 = vunpack.c.l.bf16 %v11515_v5  ;;  %v15761_v33 = vunpack.c.h.bf16 %v11515_v5 }
  0x5f   : > { %21059 = vst [vmem:[#allocation57_spill] sm:$0xff] %v15716_v15  ;;  %v15062_v10 = vpack.i.bf16 %v15718_v62, %v15716_v15  ;;  %21066 = vst [vmem:[#allocation64_spill] sm:$0xff] %v15747_v24 }
  0x60   : > { %12980 = vmatmul.mubr.msk.f32.gmra.mxu0 %vm280_vm0, %v247_v25  ;;  %v15172_v25 = vpack.i.bf16 %v15711_v50, %v15709_v51  ;;  %21064 = vst [vmem:[#allocation62_spill] sm:$0xff] %v15738_v60  ;;  %v252_v50 = vld [vmem:[%s15450_s9 + $0x140] sm:$0xff]  ;;  %21065 = vst [vmem:[#allocation63_spill] sm:$0xff] %v15745_v54 }
  0x61   : > { %12982 = vmatprep.mubr.msk.f32.mxu0 %vm280_vm0, %v248_v26  ;;  %v15736_v26 = vunpack.c.l.bf16 %v11499_v40  ;;  %15063 = vxpose.xlu0.b32.cont [14/16] %v15062_v10, 128  ;;  %21067 = vst [vmem:[#allocation65_spill] sm:$0xff] %v15752_v44  ;;  %21069 = vst [vmem:[#allocation67_spill] sm:$0xff] %v15761_v33  ;;  %v15763_v10 = vunpack.c.h.bf16 %v11523_v4  ;;  %v256_v40 = vld [vmem:[%s15450_s9 + $0x160] sm:$0xff]  ;;  %v257_v4 = vld [vmem:[%s15450_s9 + $0x168] sm:$0xff] }
  0x62   : > { %15173 = vxpose.xlu1.b32.cont [13/16] %v15172_v25, 128  ;;  %v253_v25 = vld [vmem:[%s15450_s9 + $0x148] sm:$0xff] }
  0x63   : > { %21063 = vst [vmem:[#allocation61_spill] sm:$0xff] %v15736_v26  ;;  %21070 = vst [vmem:[#allocation68_spill] sm:$0xff] %v15763_v10  ;;  %v15178_v5 = vpack.i.bf16 %v15763_v10, %v15761_v33 }
  0x64   : > { %12983 = vmatmul.mubr.msk.f32.gmra.mxu0 %vm280_vm0, %v249_v16  ;;  %v15064_v16 = vpack.i.bf16 %v15738_v60, %v15736_v26 }
  0x65   : > { %12985 = vmatprep.mubr.msk.f32.mxu0 %vm280_vm0, %v250_v29  ;;  %v15754_v29 = vunpack.c.h.bf16 %v11507_v48 }
  0x66   : > { %15175 = vxpose.xlu1.b32.cont [14/16] %v15174_v20, 128  ;;  %15065 = vxpose.xlu0.b32.cont [15/16] %v15064_v16, 128  ;;  %v258_v20 = vld [vmem:[%s15450_s9 + $0x170] sm:$0xff]  ;;  %v260_v16 = vld [vmem:[%s15450_s9 + $0x180] sm:$0xff] }
  0x67   : > { %21068 = vst [vmem:[#allocation66_spill] sm:$0xff] %v15754_v29  ;;  %v15066_v48 = vpack.i.bf16 %v15754_v29, %v15752_v44 }
  0x68   : > { %12986 = vmatmul.mubr.msk.f32.gmra.mxu0 %vm280_vm0, %v251_v11  ;;  %v15176_v11 = vpack.i.bf16 %v15747_v24, %v15745_v54 }
  0x69   : > { %12988 = vmatprep.mubr.msk.f32.mxu0 %vm280_vm0, %v252_v50  ;;  %v255_v50 = vld [vmem:[%s15450_s9 + $0x158] sm:$0xff] }
  0x6a   : > { %15177 = vxpose.xlu1.b32.cont [15/16] %v15176_v11, 128  ;;  %15067 = vxpose.xlu0.b32.end [16/16] %v15066_v48, 128  ;;  %v262_v11 = vld [vmem:[%s15450_s9 + $0x190] sm:$0xff]  ;;  %v263_v48 = vld [vmem:[%s15450_s9 + $0x198] sm:$0xff] }
  0x6c   : > { %12989 = vmatmul.mubr.msk.f32.gmra.mxu0 %vm280_vm0, %v253_v25  ;;  %v261_v25 = vld [vmem:[%s15450_s9 + $0x188] sm:$0xff] }
  0x6d   : > { %12991 = vmatprep.mubr.msk.f32.mxu0 %vm280_vm0, %v254_v14  ;;  %v259_v14 = vld [vmem:[%s15450_s9 + $0x178] sm:$0xff] }
  0x6e   : > { %15179 = vxpose.xlu1.b32.end [16/16] %v15178_v5, 128  ;;  %v266_v5 = vld [vmem:[%s15450_s9 + $0x1b0] sm:$0xff] }
  0x70   : > { %12992 = vmatmul.mubr.msk.f32.gmra.mxu0 %vm280_vm0, %v255_v50  ;;  %v264_v50 = vld [vmem:[%s15450_s9 + $0x1a0] sm:$0xff] }
  0x71   : > { %12994 = vmatprep.mubr.msk.f32.mxu0 %vm280_vm0, %v256_v40  ;;  %v265_v40 = vld [vmem:[%s15450_s9 + $0x1a8] sm:$0xff] }
  0x74   : > { %12995 = vmatmul.mubr.msk.f32.gmra.mxu0 %vm280_vm0, %v257_v4  ;;  %v267_v4 = vld [vmem:[%s15450_s9 + $0x1b8] sm:$0xff] }
  0x75   : > { %12997 = vmatprep.mubr.msk.f32.mxu0 %vm280_vm0, %v258_v20  ;;  %v268_v20 = vld [vmem:[%s15450_s9 + $0x1c0] sm:$0xff] }
  0x78   : > { %12998 = vmatmul.mubr.msk.f32.gmra.mxu0 %vm280_vm0, %v259_v14  ;;  %v269_v14 = vld [vmem:[%s15450_s9 + $0x1c8] sm:$0xff] }
  0x79   : > { %13000 = vmatprep.mubr.msk.f32.mxu0 %vm280_vm0, %v260_v16  ;;  %v270_v16 = vld [vmem:[%s15450_s9 + $0x1d0] sm:$0xff] }
  0x7c   : > { %13001 = vmatmul.mubr.msk.f32.gmra.mxu0 %vm280_vm0, %v261_v25  ;;  %v271_v25 = vld [vmem:[%s15450_s9 + $0x1d8] sm:$0xff] }
  0x7d   : > { %13003 = vmatprep.mubr.msk.f32.mxu0 %vm280_vm0, %v262_v11  ;;  %v272_v11 = vld [vmem:[%s15450_s9 + $0x1e0] sm:$0xff] }
  0x80   : > { %13004 = vmatmul.mubr.msk.f32.gmra.mxu0 %vm280_vm0, %v263_v48  ;;  %v273_v48 = vld [vmem:[%s15450_s9 + $0x1e8] sm:$0xff] }
  0x81   : > { %13006 = vmatprep.mubr.msk.f32.mxu0 %vm280_vm0, %v264_v50  ;;  %v274_v50 = vld [vmem:[%s15450_s9 + $0x1f0] sm:$0xff] }
  0x84   : > { %13007 = vmatmul.mubr.msk.f32.gmra.mxu0 %vm280_vm0, %v265_v40  ;;  %v275_v40 = vld [vmem:[%s15450_s9 + $0x1f8] sm:$0xff] }
  0x85   : > { %13009 = vmatprep.mubr.msk.f32.mxu0 %vm280_vm0, %v266_v5 }
  0x88   : > { %13010 = vmatmul.mubr.msk.f32.gmra.mxu0 %vm280_vm0, %v267_v4 }
  0x89   : > { %13012 = vmatprep.mubr.msk.f32.mxu0 %vm280_vm0, %v268_v20 }
  0x8c   : > { %13013 = vmatmul.mubr.msk.f32.gmra.mxu0 %vm280_vm0, %v269_v14  ;;  %2940 = vrot.lane.b32.xlu1 %v15423_v0, %s15346_s24 }
  0x8d   : > { %13015 = vmatprep.mubr.msk.f32.mxu0 %vm280_vm0, %v270_v16 }
  0x90   : > { %13016 = vmatmul.mubr.msk.f32.gmra.mxu0 %vm280_vm0, %v271_v25  ;;  %2349 = vrot.lane.b32.xlu1 %v15428_v1, %s15347_s25 }
  0x91   : > { %13018 = vmatprep.mubr.msk.f32.mxu0 %vm280_vm0, %v272_v11 }
  0x93   : > { %2351 = vrot.lane.b32.xlu0 %v15423_v0, %s15347_s25 }
  0x94   : > { %13019 = vmatmul.mubr.msk.f32.gmra.mxu0 %vm280_vm0, %v273_v48  ;;  %2938 = vrot.lane.b32.xlu1 %v15428_v1, %s15346_s24 }
  0x95   : > { %13021 = vmatprep.mubr.msk.f32.mxu0 %vm280_vm0, %v274_v50 }
  0x97   : > { %2936 = vrot.lane.b32.xlu0 %v15436_v2, %s15346_s24 }
  0x98   : > { %13022 = vmatmul.mubr.msk.f32.gmra.mxu0 %vm280_vm0, %v275_v40  ;;  %2347 = vrot.lane.b32.xlu1 %v15436_v2, %s15347_s25 }
  0x9b   : > { %2934 = vrot.lane.b32.xlu0 %v15443_v3, %s15346_s24 }
  0x9c   : > { %2345 = vrot.lane.b32.xlu1 %v15443_v3, %s15347_s25 }
  0xaa   : > { %v15829_v5 = vpop.trf.xlu0 }
  0xab   : > { %21071 = vst [vmem:[#allocation69_spill] sm:$0xff] %v15829_v5  ;;  %v20635_v14 = vunpack.i.l.bf16 %v15829_v5 }
  0xad   : > { %13280 = vmatprep.mubr.f32.mxu0 %v20635_v14 }
  0xae   : > { %v15831_v4 = vpop.trf.xlu0  ;;  %v15833_v1 = vpop.trf.xlu1 }
  0xaf   : > { %21072 = vst [vmem:[#allocation70_spill] sm:$0xff] %v15831_v4  ;;  %21073 = vst [vmem:[#allocation71_spill] sm:$0xff] %v15833_v1 }
  0xb2   : > { %v15835_v20 = vpop.trf.xlu0  ;;  %v15837_v0 = vpop.trf.xlu1 }
  0xb3   : > { %21074 = vst [vmem:[#allocation72_spill] sm:$0xff] %v15835_v20  ;;  %21075 = vst [vmem:[#allocation73_spill] sm:$0xff] %v15837_v0 }
  0xb6   : > { %v15840_v16 = vpop.trf.xlu0  ;;  %v15844_v2 = vpop.trf.xlu1 }
  0xb7   : > { %21076 = vst [vmem:[#allocation74_spill] sm:$0xff] %v15840_v16  ;;  %21077 = vst [vmem:[#allocation75_spill] sm:$0xff] %v15844_v2 }
  0xba   : > { %v15846_v3 = vpop.trf.xlu0  ;;  %v15848_v25 = vpop.trf.xlu1 }
  0xbb   : > { %21078 = vst [vmem:[#allocation76_spill] sm:$0xff] %v15846_v3  ;;  %21079 = vst [vmem:[#allocation77_spill] sm:$0xff] %v15848_v25 }
  0xbe   : > { %v15850_v11 = vpop.trf.xlu0  ;;  %v15854_v50 = vpop.trf.xlu1 }
  0xbf   : > { %21080 = vst [vmem:[#allocation78_spill] sm:$0xff] %v15850_v11  ;;  %21082 = vst [vmem:[#allocation80_spill] sm:$0xff] %v15854_v50 }
  0xc2   : > { %v15852_v48 = vpop.trf.xlu0  ;;  %v15858_v10 = vpop.trf.xlu1 }
  0xc3   : > { %21081 = vst [vmem:[#allocation79_spill] sm:$0xff] %v15852_v48  ;;  %21084 = vst [vmem:[#allocation82_spill] sm:$0xff] %v15858_v10 }
  0xc6   : > { %v15856_v40 = vpop.trf.xlu0  ;;  %v15862_v5 = vpop.trf.xlu1 }
  0xc7   : > { %21083 = vst [vmem:[#allocation81_spill] sm:$0xff] %v15856_v40  ;;  %21086 = vst [vmem:[#allocation84_spill] sm:$0xff] %v15862_v5 }
  0xca   : > { %v15860_v24 = vpop.trf.xlu0  ;;  %v15866_v31 = vpop.trf.xlu1 }
  0xcb   : > { %21085 = vst [vmem:[#allocation83_spill] sm:$0xff] %v15860_v24  ;;  %21088 = vst [vmem:[#allocation86_spill] sm:$0xff] %v15866_v31 }
  0xce   : > { %v15864_v14 = vpop.trf.xlu0  ;;  %v15874_v51 = vpop.trf.xlu1 }
  0xcf   : > { %21087 = vst [vmem:[#allocation85_spill] sm:$0xff] %v15864_v14  ;;  %21091 = vst [vmem:[#allocation89_spill] sm:$0xff] %v15874_v51 }
  0xd2   : > { %v15868_v33 = vpop.trf.xlu0  ;;  %v15882_v61 = vpop.trf.xlu1 }
  0xd3   : > { %21089 = vst [vmem:[#allocation87_spill] sm:$0xff] %v15868_v33  ;;  %21093 = vst [vmem:[#allocation91_spill] sm:$0xff] %v15882_v61 }
  0xd6   : > { %v15872_v12 = vpop.trf.xlu0  ;;  %v15892_v13 = vpop.trf.xlu1 }
  0xd7   : > { %21090 = vst [vmem:[#allocation88_spill] sm:$0xff] %v15872_v12  ;;  %21095 = vst [vmem:[#allocation93_spill] sm:$0xff] %v15892_v13  ;;  %v15907_v13 = vld [vmem:[%s20600_s2 + $0x62] ss:$0 sm:$0xff] }
  0xda   : > { %v15880_v17 = vpop.trf.xlu0  ;;  %v15900_v43 = vpop.trf.xlu1 }
  0xdb   : > { %21092 = vst [vmem:[#allocation90_spill] sm:$0xff] %v15880_v17  ;;  %21098 = vst [vmem:[#allocation96_spill] sm:$0xff] %v15900_v43 }
  0xdc   : > { %v15870_v54 = vpop.f32.mrf.mxu0 }
  0xde   : > { %v15876_v30 = vpop.f32.mrf.mxu0  ;;  %v15888_v31 = vpop.trf.xlu0 }
  0xdf   : > { %21094 = vst [vmem:[#allocation92_spill] sm:$0xff] %v15888_v31  ;;  %v15902_v32 = vpop.trf.xlu1 }
  0xe0   : > { %v15878_v49 = vpop.f32.mrf.mxu0  ;;  %21099 = vst [vmem:[#allocation97_spill] sm:$0xff] %v15902_v32 }
  0xe2   : > { %v15884_v45 = vpop.f32.mrf.mxu0  ;;  %v15894_v51 = vpop.trf.xlu0 }
  0xe3   : > { %21096 = vst [vmem:[#allocation94_spill] sm:$0xff] %v15894_v51  ;;  %v15909_v60 = vpop.trf.xlu1 }
  0xe4   : > { %v15886_v28 = vpop.f32.mrf.mxu0  ;;  %21100 = vst [vmem:[#allocation98_spill] sm:$0xff] %v15909_v60 }
  0xe6   : > { %v15890_v5 = vpop.f32.mrf.mxu0  ;;  %v15898_v53 = vpop.trf.xlu0 }
  0xe7   : > { %21097 = vst [vmem:[#allocation95_spill] sm:$0xff] %v15898_v53 }
  0xe8   : > { %v12939_v63 = vpop.f32.mrf.mxu0 }
  0xea   : > { %v15896_v10 = vpop.f32.mrf.mxu0 }
  0xec   : > { %v12942_v50 = vpop.f32.mrf.mxu0 }
  0xee   : > { %v579_v61 = vpop.f32.mrf.mxu0 }
  0xf0   : > { %v12945_v25 = vpop.f32.mrf.mxu0 }
  0xf2   : > { %v589_v2 = vpop.f32.mrf.mxu0 }
  0xf4   : > { %v12948_v27 = vpop.f32.mrf.mxu0 }
  0xf5   : > { %v605_v43 = vadd.f32 %v12948_v27, %v15907_v13  ;;  %v15927_v27 = vpop.trf.xlu1 }
  0xf6   : > { %v599_v0 = vpop.f32.mrf.mxu0  ;;  %21103 = vst [vmem:[#allocation101_spill] sm:$0xff] %v15927_v27 }
  0xf7   : > { %v600_v9 = vadd.f32 %v15907_v13, %v599_v0 }
  0xf8   : > { %v12951_v29 = vpop.f32.mrf.mxu0 }
  0xf9   : > { %v615_v62 = vadd.f32 %v12951_v29, %v15907_v13  ;;  %v590_v29 = vadd.f32 %v15907_v13, %v589_v2  ;;  %v15939_v0 = vmax.f32 %v600_v9, 0.0  ;;  %v15956_v2 = vpop.trf.xlu1 }
  0xfa   : > { %v609_v42 = vpop.f32.mrf.mxu0  ;;  %21107 = vst [vmem:[#allocation105_spill] sm:$0xff] %v15956_v2 }
  0xfb   : > { %v15913_v57 = vmax.f32 %v615_v62, 0.0  ;;  %v610_v39 = vadd.f32 %v15907_v13, %v609_v42  ;;  %v595_v62 = vadd.f32 %v12945_v25, %v15907_v13  ;;  %v15930_v42 = vmax.f32 %v605_v43, 0.0  ;;  %21105 = vst [vmem:[#allocation103_spill] sm:$0xff] %v15939_v0 }
  0xfc   : > { %v15916_v32 = vpop.f32.mrf.mxu0  ;;  %v585_v25 = vadd.f32 %v12942_v50, %v15907_v13  ;;  %v15959_v27 = vmax.f32 %v590_v29, 0.0  ;;  %v570_v29 = vadd.f32 %v15907_v13, %v15896_v10  ;;  %v560_v10 = vadd.f32 %v15907_v13, %v15890_v5 }
  0xfd   : > { %21101 = vst [vmem:[#allocation99_spill] sm:$0xff] %v15913_v57  ;;  %v15919_v55 = vmax.f32 %v610_v39, 0.0  ;;  %13024 = vmatprep.subr.mxu1 %v15913_v57  ;;  %13248 = vmatprep.subr.mxu0 %v15913_v57  ;;  %21104 = vst [vmem:[#allocation102_spill] sm:$0xff] %v15930_v42 }
  0xfe   : > { %v15923_v60 = vpop.f32.mrf.mxu0  ;;  %13025 = vmatpush3.msra.mxu1 %v15913_v57  ;;  %13249 = vmatpush3.msra.mxu0 %v15913_v57  ;;  %v15948_v57 = vmax.f32 %v595_v62, 0.0  ;;  %21108 = vst [vmem:[#allocation106_spill] sm:$0xff] %v15959_v27  ;;  %v575_v62 = vadd.f32 %v12939_v63, %v15907_v13 }
  0xff   : > { %21102 = vst [vmem:[#allocation100_spill] sm:$0xff] %v15919_v55  ;;  %13026 = vmatprep.subr.mxu1 %v15919_v55  ;;  %13250 = vmatprep.subr.mxu0 %v15919_v55 }
 0x100   : > { %v15934_v39 = vpop.f32.mrf.mxu0  ;;  %13027 = vmatpush3.msra.mxu1 %v15919_v55  ;;  %13251 = vmatpush3.msra.mxu0 %v15919_v55  ;;  %21106 = vst [vmem:[#allocation104_spill] sm:$0xff] %v15948_v57  ;;  %v580_v55 = vadd.f32 %v15907_v13, %v579_v61 }
 0x101   : > { %13028 = vmatprep.subr.mxu1 %v15930_v42  ;;  %13252 = vmatprep.subr.mxu0 %v15930_v42 }
 0x102   : > { %v15943_v43 = vpop.f32.mrf.mxu0  ;;  %13029 = vmatpush3.msra.mxu1 %v15930_v42  ;;  %13253 = vmatpush3.msra.mxu0 %v15930_v42  ;;  %v15968_v42 = vmax.f32 %v585_v25, 0.0  ;;  %v565_v25 = vadd.f32 %v15886_v28, %v15907_v13 }
 0x103   : > { %13030 = vmatprep.subr.mxu1 %v15939_v0  ;;  %13254 = vmatprep.subr.mxu0 %v15939_v0 }
 0x104   : > { %v15952_v9 = vpop.f32.mrf.mxu0  ;;  %13031 = vmatpush3.msra.mxu1 %v15939_v0  ;;  %13255 = vmatpush3.msra.mxu0 %v15939_v0  ;;  %21109 = vst [vmem:[#allocation107_spill] sm:$0xff] %v15968_v42  ;;  %v15978_v0 = vmax.f32 %v580_v55, 0.0 }
 0x105   : > { %13032 = vmatprep.subr.mxu1 %v15948_v57  ;;  %13256 = vmatprep.subr.mxu0 %v15948_v57 }
 0x106   : > { %v15963_v50 = vpop.f32.mrf.mxu0  ;;  %13033 = vmatpush3.msra.mxu1 %v15948_v57  ;;  %13257 = vmatpush3.msra.mxu0 %v15948_v57  ;;  %21110 = vst [vmem:[#allocation108_spill] sm:$0xff] %v15978_v0  ;;  %v15988_v57 = vmax.f32 %v575_v62, 0.0  ;;  %v555_v62 = vadd.f32 %v15878_v49, %v15907_v13 }
 0x107   : > { %13034 = vmatprep.subr.mxu1 %v15959_v27  ;;  %13258 = vmatprep.subr.mxu0 %v15959_v27 }
 0x108   : > { %v15972_v61 = vpop.f32.mrf.mxu0  ;;  %13035 = vmatpush3.msra.mxu1 %v15959_v27  ;;  %13259 = vmatpush3.msra.mxu0 %v15959_v27  ;;  %21111 = vst [vmem:[#allocation109_spill] sm:$0xff] %v15988_v57  ;;  %v15998_v27 = vmax.f32 %v570_v29, 0.0  ;;  %v550_v29 = vadd.f32 %v15907_v13, %v15884_v45 }
 0x109   : > { %13036 = vmatprep.subr.mxu1 %v15968_v42  ;;  %13260 = vmatprep.subr.mxu0 %v15968_v42 }
 0x10a   : > { %v15982_v63 = vpop.f32.mrf.mxu0  ;;  %13037 = vmatpush3.msra.mxu1 %v15968_v42  ;;  %13261 = vmatpush3.msra.mxu0 %v15968_v42  ;;  %21112 = vst [vmem:[#allocation110_spill] sm:$0xff] %v15998_v27  ;;  %v16008_v42 = vmax.f32 %v565_v25, 0.0  ;;  %v545_v25 = vadd.f32 %v15870_v54, %v15907_v13 }
 0x10b   : > { %13038 = vmatprep.subr.mxu1 %v15978_v0  ;;  %13262 = vmatprep.subr.mxu0 %v15978_v0 }
 0x10c   : > { %v15992_v55 = vpop.f32.mrf.mxu0  ;;  %13039 = vmatpush3.msra.mxu1 %v15978_v0  ;;  %13263 = vmatpush3.msra.mxu0 %v15978_v0  ;;  %21113 = vst [vmem:[#allocation111_spill] sm:$0xff] %v16008_v42  ;;  %v16016_v0 = vmax.f32 %v560_v10, 0.0  ;;  %v540_v10 = vadd.f32 %v15907_v13, %v15876_v30 }
 0x10d   : > { %13040 = vmatprep.subr.mxu1 %v15988_v57  ;;  %13264 = vmatprep.subr.mxu0 %v15988_v57 }
 0x10e   : > { %v16002_v28 = vpop.f32.mrf.mxu0  ;;  %13041 = vmatpush3.msra.mxu1 %v15988_v57  ;;  %13265 = vmatpush3.msra.mxu0 %v15988_v57  ;;  %21114 = vst [vmem:[#allocation112_spill] sm:$0xff] %v16016_v0  ;;  %v16024_v57 = vmax.f32 %v555_v62, 0.0  ;;  %v16038_v62 = vmax.f32 %v545_v25, 0.0  ;;  %v16044_v30 = vmax.f32 %v540_v10, 0.0 }
 0x10f   : > { %13042 = vmatprep.subr.mxu1 %v15998_v27  ;;  %13266 = vmatprep.subr.mxu0 %v15998_v27 }
 0x110   : > { %v12969_v5 = vpop.f32.mrf.mxu0  ;;  %13043 = vmatpush3.msra.mxu1 %v15998_v27  ;;  %13267 = vmatpush3.msra.mxu0 %v15998_v27  ;;  %21115 = vst [vmem:[#allocation113_spill] sm:$0xff] %v16024_v57  ;;  %v16032_v27 = vmax.f32 %v550_v29, 0.0  ;;  %21117 = vst [vmem:[#allocation115_spill] sm:$0xff] %v16038_v62 }
 0x111   : > { %13044 = vmatprep.subr.mxu1 %v16008_v42  ;;  %13268 = vmatprep.subr.mxu0 %v16008_v42 }
 0x112   : > { %v669_v49 = vpop.f32.mrf.mxu0  ;;  %13045 = vmatpush3.msra.mxu1 %v16008_v42  ;;  %13269 = vmatpush3.msra.mxu0 %v16008_v42  ;;  %21116 = vst [vmem:[#allocation114_spill] sm:$0xff] %v16032_v27 }
 0x113   : > { %13046 = vmatprep.subr.mxu1 %v16016_v0  ;;  %13270 = vmatprep.subr.mxu0 %v16016_v0 }
 0x114   : > { %v12972_v45 = vpop.f32.mrf.mxu0  ;;  %13047 = vmatpush3.msra.mxu1 %v16016_v0  ;;  %13271 = vmatpush3.msra.mxu0 %v16016_v0 }
 0x115   : > { %13048 = vmatprep.subr.mxu1 %v16024_v57  ;;  %13272 = vmatprep.subr.mxu0 %v16024_v57  ;;  %v685_v25 = vadd.f32 %v12972_v45, %v15907_v13 }
 0x116   : > { %v679_v54 = vpop.f32.mrf.mxu0  ;;  %13049 = vmatpush3.msra.mxu1 %v16024_v57  ;;  %13273 = vmatpush3.msra.mxu0 %v16024_v57 }
 0x117   : > { %13050 = vmatprep.subr.mxu1 %v16032_v27  ;;  %13274 = vmatprep.subr.mxu0 %v16032_v27  ;;  %v680_v45 = vadd.f32 %v15907_v13, %v679_v54  ;;  %v21120_v54 = vunpack.i.l.bf16 %v15831_v4 }
 0x118   : > { %v12975_v42 = vpop.f32.mrf.mxu0  ;;  %13051 = vmatpush3.msra.mxu1 %v16032_v27  ;;  %13275 = vmatpush3.msra.mxu0 %v16032_v27 }
 0x119   : > { %v695_v29 = vadd.f32 %v12975_v42, %v15907_v13  ;;  %13052 = vmatprep.subr.mxu1 %v16038_v62  ;;  %13276 = vmatprep.subr.mxu0 %v16038_v62  ;;  %v675_v42 = vadd.f32 %v12969_v5, %v15907_v13  ;;  %v670_v5 = vadd.f32 %v15907_v13, %v669_v49  ;;  %v21124_v49 = vunpack.i.l.bf16 %v15840_v16 }
 0x11a   : > { %v689_v0 = vpop.f32.mrf.mxu0  ;;  %13053 = vmatpush3.msra.mxu1 %v16038_v62  ;;  %13277 = vmatpush3.msra.mxu0 %v16038_v62  ;;  %v16073_v62 = vmax.f32 %v685_v25, 0.0  ;;  %v16086_v25 = vmax.f32 %v680_v45, 0.0 }
 0x11b   : > { %v16052_v57 = vmax.f32 %v695_v29, 0.0  ;;  %v690_v2 = vadd.f32 %v15907_v13, %v689_v0  ;;  %13054 = vmatprep.subr.mxu1 %v16044_v30  ;;  %13278 = vmatprep.subr.mxu0 %v16044_v30 }
 0x11c   : > { %v16058_v10 = vpop.f32.mrf.mxu0  ;;  %13055 = vmatpush3.msra.mxu1 %v16044_v30  ;;  %13279 = vmatpush3.msra.mxu0 %v16044_v30  ;;  %21119 = vst [vmem:[#allocation117_spill] sm:$0xff] %v16073_v62  ;;  %21122 = vst [vmem:[#allocation118_spill] sm:$0xff] %v16086_v25 }
 0x11d   : > { %v16064_v29 = vmax.f32 %v690_v2, 0.0  ;;  %13057 = vmatmul.mubr.f32.vlgmr.msra.gmra.mxu1 %v15492_v22  ;;  %13080 = vmatprep.subr.mxu1 %v16052_v57  ;;  %v21121_v22 = vunpack.i.l.bf16 %v15835_v20  ;;  %v665_v2 = vadd.f32 %v15992_v55, %v15907_v13  ;;  %v660_v55 = vadd.f32 %v15907_v13, %v16002_v28 }
 0x11e   : > { %v16068_v0 = vpop.f32.mrf.mxu0  ;;  %13081 = vmatpush3.msra.mxu1 %v16052_v57  ;;  %13059 = vmatprep.mubr.f32.mxu1 %v15518_v37  ;;  %v21128_v28 = vunpack.i.l.bf16 %v15850_v11 }
 0x11f   : > { %21118 = vst [vmem:[#allocation116_spill] sm:$0xff] %v16064_v29  ;;  %13082 = vmatprep.subr.mxu1 %v16064_v29  ;;  %13281 = vmatmul.mubr.f32.vlgmr.msra.gmra.mxu0 %v21120_v54  ;;  %v16120_v45 = vmax.f32 %v665_v2, 0.0  ;;  %v16134_v2 = vmax.f32 %v660_v55, 0.0 }
 0x120   : > { %v16079_v27 = vpop.f32.mrf.mxu0  ;;  %13083 = vmatpush3.msra.mxu1 %v16064_v29  ;;  %13283 = vmatprep.mubr.f32.mxu0 %v21121_v22  ;;  %v16096_v22 = vmax.f32 %v675_v42, 0.0  ;;  %v16110_v42 = vmax.f32 %v670_v5, 0.0 }
 0x121   : > { %13060 = vmatmul.mubr.f32.gmra.mxu1 %v15536_v46  ;;  %13084 = vmatprep.subr.mxu1 %v16073_v62  ;;  %v21125_v46 = vunpack.i.l.bf16 %v15846_v3  ;;  %21127 = vst [vmem:[#allocation121_spill] sm:$0xff] %v16120_v45 }
 0x122   : > { %v16090_v54 = vpop.f32.mrf.mxu0  ;;  %13085 = vmatpush3.msra.mxu1 %v16073_v62  ;;  %13062 = vmatprep.mubr.f32.mxu1 %v15556_v58  ;;  %21123 = vst [vmem:[#allocation119_spill] sm:$0xff] %v16096_v22  ;;  %21126 = vst [vmem:[#allocation120_spill] sm:$0xff] %v16110_v42 }
 0x123   : > { %13086 = vmatprep.subr.mxu1 %v16086_v25  ;;  %13284 = vmatmul.mubr.f32.gmra.mxu0 %v21124_v49 }
 0x124   : > { %v16102_v37 = vpop.f32.mrf.mxu0  ;;  %13087 = vmatpush3.msra.mxu1 %v16086_v25  ;;  %13286 = vmatprep.mubr.f32.mxu0 %v21125_v46  ;;  %v655_v46 = vadd.f32 %v15972_v61, %v15907_v13  ;;  %v650_v61 = vadd.f32 %v15907_v13, %v15982_v63  ;;  %v21130_v63 = vunpack.i.l.bf16 %v15856_v40 }
 0x125   : > { %13063 = vmatmul.mubr.f32.gmra.mxu1 %v15572_v6  ;;  %13088 = vmatprep.subr.mxu1 %v16096_v22  ;;  %v21129_v6 = vunpack.i.l.bf16 %v15852_v48 }
 0x126   : > { %v16114_v49 = vpop.f32.mrf.mxu0  ;;  %13089 = vmatpush3.msra.mxu1 %v16096_v22  ;;  %13065 = vmatprep.mubr.f32.mxu1 %v15592_v18  ;;  %v16144_v5 = vmax.f32 %v655_v46, 0.0  ;;  %v16158_v46 = vmax.f32 %v650_v61, 0.0  ;;  %v625_v61 = vadd.f32 %v15916_v32, %v15907_v13  ;;  %v620_v32 = vadd.f32 %v15907_v13, %v15923_v60 }
 0x127   : > { %13090 = vmatprep.subr.mxu1 %v16110_v42  ;;  %13287 = vmatmul.mubr.f32.gmra.mxu0 %v21128_v28 }
 0x128   : > { %v16126_v58 = vpop.f32.mrf.mxu0  ;;  %13091 = vmatpush3.msra.mxu1 %v16110_v42  ;;  %13289 = vmatprep.mubr.f32.mxu0 %v21129_v6  ;;  %v645_v6 = vadd.f32 %v15952_v9, %v15907_v13  ;;  %v640_v9 = vadd.f32 %v15907_v13, %v15963_v50  ;;  %v21132_v50 = vunpack.i.l.bf16 %v15864_v14 }
 0x129   : > { %13066 = vmatmul.mubr.f32.gmra.mxu1 %v15608_v34  ;;  %13092 = vmatprep.subr.mxu1 %v16120_v45  ;;  %v21131_v34 = vunpack.i.l.bf16 %v15860_v24 }
 0x12a   : > { %v16138_v28 = vpop.f32.mrf.mxu0  ;;  %13093 = vmatpush3.msra.mxu1 %v16120_v45  ;;  %13068 = vmatprep.mubr.f32.mxu1 %v15628_v52  ;;  %v16168_v55 = vmax.f32 %v645_v6, 0.0  ;;  %v16182_v6 = vmax.f32 %v640_v9, 0.0  ;;  %v16208_v9 = vmax.f32 %v625_v61, 0.0 }
 0x12b   : > { %13094 = vmatprep.subr.mxu1 %v16134_v2  ;;  %13290 = vmatmul.mubr.f32.gmra.mxu0 %v21130_v63 }
 0x12c   : > { %v16150_v18 = vpop.f32.mrf.mxu0  ;;  %13095 = vmatpush3.msra.mxu1 %v16134_v2  ;;  %13292 = vmatprep.mubr.f32.mxu0 %v21131_v34  ;;  %v635_v34 = vadd.f32 %v15934_v39, %v15907_v13  ;;  %v630_v39 = vadd.f32 %v15907_v13, %v15943_v43  ;;  %v21134_v43 = vunpack.i.l.bf16 %v15872_v12 }
 0x12d   : > { %13069 = vmatmul.mubr.f32.gmra.mxu1 %v15644_v8  ;;  %13096 = vmatprep.subr.mxu1 %v16144_v5  ;;  %v21133_v8 = vunpack.i.l.bf16 %v15868_v33 }
 0x12e   : > { %v16162_v63 = vpop.f32.mrf.mxu0  ;;  %13097 = vmatpush3.msra.mxu1 %v16144_v5  ;;  %13071 = vmatprep.mubr.f32.mxu1 %v15664_v36 }
 0x12f   : > { %13098 = vmatprep.subr.mxu1 %v16158_v46  ;;  %13293 = vmatmul.mubr.f32.gmra.mxu0 %v21132_v50 }
 0x130   : > { %v16174_v52 = vpop.f32.mrf.mxu0  ;;  %13099 = vmatpush3.msra.mxu1 %v16158_v46  ;;  %13295 = vmatprep.mubr.f32.mxu0 %v21133_v8  ;;  %v16190_v8 = vmax.f32 %v635_v34, 0.0  ;;  %v16202_v34 = vmax.f32 %v630_v39, 0.0 }
 0x131   : > { %13072 = vmatmul.mubr.f32.gmra.mxu1 %v15680_v56  ;;  %13100 = vmatprep.subr.mxu1 %v16168_v55  ;;  %v21135_v56 = vunpack.i.l.bf16 %v15880_v17  ;;  %v16218_v17 = vmax.f32 %v620_v32, 0.0  ;;  %v21138_v32 = vunpack.i.l.bf16 %v15898_v53 }
 0x132   : > { %v749_v50 = vpop.f32.mrf.mxu0  ;;  %13101 = vmatpush3.msra.mxu1 %v16168_v55  ;;  %13074 = vmatprep.mubr.f32.mxu1 %v15700_v41  ;;  %v20747_v41 = vunpack.i.l.bf16 %v15894_v51 }
 0x133   : > { %13102 = vmatprep.subr.mxu1 %v16182_v6  ;;  %13296 = vmatmul.mubr.f32.gmra.mxu0 %v21134_v43 }
 0x134   : > { %v12996_v36 = vpop.f32.mrf.mxu0  ;;  %13103 = vmatpush3.msra.mxu1 %v16182_v6  ;;  %13298 = vmatprep.mubr.f32.mxu0 %v21135_v56  ;;  %v21136_v56 = vunpack.i.l.bf16 %v15888_v31 }
 0x135   : > { %13075 = vmatmul.mubr.f32.gmra.mxu1 %v15716_v15  ;;  %13104 = vmatprep.subr.mxu1 %v16190_v8  ;;  %v20749_v15 = vunpack.i.l.bf16 %v15833_v1 }
 0x136   : > { %v759_v43 = vpop.f32.mrf.mxu0  ;;  %13105 = vmatpush3.msra.mxu1 %v16190_v8  ;;  %13077 = vmatprep.mubr.f32.mxu1 %v15736_v26 }
 0x137   : > { %13106 = vmatprep.subr.mxu1 %v16202_v34  ;;  %13299 = vmatmul.mubr.f32.gmra.mxu0 %v21136_v56 }
 0x138   : > { %v12999_v39 = vpop.f32.mrf.mxu0  ;;  %13107 = vmatpush3.msra.mxu1 %v16202_v34  ;;  %13301 = vmatprep.mubr.f32.mxu0 %v20747_v41 }
 0x139   : > { %v775_v61 = vadd.f32 %v12999_v39, %v15907_v13  ;;  %13078 = vmatmul.mubr.f32.gmra.mxu1 %v15752_v44  ;;  %13108 = vmatprep.subr.mxu1 %v16208_v9  ;;  %v765_v39 = vadd.f32 %v12996_v36, %v15907_v13 }
 0x13a   : > { %v769_v26 = vpop.f32.mrf.mxu0  ;;  %13109 = vmatpush3.msra.mxu1 %v16208_v9  ;;  %13112 = vmatprep.mubr.f32.mxu1 %v15490_v21 }
 0x13b   : > { %v16225_v56 = vmax.f32 %v775_v61, 0.0  ;;  %v770_v60 = vadd.f32 %v15907_v13, %v769_v26  ;;  %13110 = vmatprep.subr.mxu1 %v16218_v17  ;;  %13302 = vmatmul.mubr.f32.gmra.mxu0 %v21138_v32  ;;  %v760_v26 = vadd.f32 %v15907_v13, %v759_v43  ;;  %v16248_v36 = vmax.f32 %v765_v39, 0.0 }
 0x13c   : > { %v16232_v41 = vpop.f32.mrf.mxu0  ;;  %13111 = vmatpush3.msra.mxu1 %v16218_v17  ;;  %13392 = vmatprep.mubr.f32.mxu0 %v20749_v15  ;;  %v755_v43 = vadd.f32 %v16174_v52, %v15907_v13  ;;  %v750_v15 = vadd.f32 %v15907_v13, %v749_v50 }
 0x13d   : > { %21137 = vst [vmem:[#allocation122_spill] sm:$0xff] %v16225_v56  ;;  %v16237_v44 = vmax.f32 %v770_v60, 0.0  ;;  %13113 = vmatmul.mubr.f32.vlgmr.msra.gmra.mxu1 %v15494_v23  ;;  %13136 = vmatprep.subr.mxu1 %v16225_v56  ;;  %21140 = vst [vmem:[#allocation124_spill] sm:$0xff] %v16248_v36  ;;  %v16258_v32 = vmax.f32 %v760_v26, 0.0  ;;  %v725_v23 = vadd.f32 %v16102_v37, %v15907_v13 }
 0x13e   : > { %13360 = vmatprep.subr.mxu0 %v16225_v56  ;;  %v16243_v61 = vpop.f32.mrf.mxu0  ;;  %13137 = vmatpush3.msra.mxu1 %v16225_v56  ;;  %v16271_v26 = vmax.f32 %v755_v43, 0.0  ;;  %v740_v43 = vadd.f32 %v15907_v13, %v16162_v63  ;;  %v735_v63 = vadd.f32 %v16126_v58, %v15907_v13 }
 0x13f   : > { %21139 = vst [vmem:[#allocation123_spill] sm:$0xff] %v16237_v44  ;;  %13361 = vmatpush3.msra.mxu0 %v16225_v56  ;;  %13138 = vmatprep.subr.mxu1 %v16237_v44  ;;  %21141 = vst [vmem:[#allocation125_spill] sm:$0xff] %v16258_v32  ;;  %v21149_v56 = vld [vmem:[#allocation42_spill] sm:$0xff] }
 0x140   : > { %13362 = vmatprep.subr.mxu0 %v16237_v44  ;;  %v16251_v60 = vpop.f32.mrf.mxu0  ;;  %13115 = vmatprep.mubr.f32.mxu1 %v15520_v38  ;;  %21142 = vst [vmem:[#allocation126_spill] sm:$0xff] %v16271_v26  ;;  %v16281_v38 = vmax.f32 %v750_v15, 0.0 }
 0x141   : > { %13139 = vmatpush3.msra.mxu1 %v16237_v44  ;;  %13363 = vmatpush3.msra.mxu0 %v16237_v44 }
 0x142   : > { %13116 = vmatmul.mubr.f32.gmra.mxu1 %v15538_v47  ;;  %13140 = vmatprep.subr.mxu1 %v16248_v36  ;;  %v16262_v39 = vpop.f32.mrf.mxu0  ;;  %v745_v47 = vadd.f32 %v16150_v18, %v15907_v13  ;;  %21143 = vst [vmem:[#allocation127_spill] sm:$0xff] %v16281_v38 }
 0x143   : > { %13364 = vmatprep.subr.mxu0 %v16248_v36  ;;  %13141 = vmatpush3.msra.mxu1 %v16248_v36 }
 0x144   : > { %13365 = vmatpush3.msra.mxu0 %v16248_v36  ;;  %13142 = vmatprep.subr.mxu1 %v16258_v32  ;;  %v16269_v52 = vpop.f32.mrf.mxu0  ;;  %v21153_v36 = vld [vmem:[#allocation50_spill] sm:$0xff] }
 0x145   : > { %13366 = vmatprep.subr.mxu0 %v16258_v32  ;;  %13118 = vmatprep.mubr.f32.mxu1 %v15558_v59  ;;  %v16293_v59 = vmax.f32 %v745_v47, 0.0 }
 0x146   : > { %13143 = vmatpush3.msra.mxu1 %v16258_v32  ;;  %13367 = vmatpush3.msra.mxu0 %v16258_v32  ;;  %v16279_v50 = vpop.f32.mrf.mxu0  ;;  %v710_v32 = vadd.f32 %v15907_v13, %v16090_v54 }
 0x147   : > { %13119 = vmatmul.mubr.f32.gmra.mxu1 %v15574_v7  ;;  %13144 = vmatprep.subr.mxu1 %v16271_v26  ;;  %21144 = vst [vmem:[#allocation128_spill] sm:$0xff] %v16293_v59  ;;  %v16303_v7 = vmax.f32 %v740_v43, 0.0  ;;  %v16317_v43 = vmax.f32 %v735_v63, 0.0  ;;  %v720_v63 = vadd.f32 %v15907_v13, %v16114_v49  ;;  %v715_v49 = vadd.f32 %v16079_v27, %v15907_v13 }
 0x148   : > { %13368 = vmatprep.subr.mxu0 %v16271_v26  ;;  %13145 = vmatpush3.msra.mxu1 %v16271_v26  ;;  %v16289_v18 = vpop.f32.mrf.mxu0  ;;  %v16365_v54 = vmax.f32 %v710_v32, 0.0 }
 0x149   : > { %13369 = vmatpush3.msra.mxu0 %v16271_v26  ;;  %13146 = vmatprep.subr.mxu1 %v16281_v38  ;;  %21145 = vst [vmem:[#allocation129_spill] sm:$0xff] %v16303_v7  ;;  %21146 = vst [vmem:[#allocation130_spill] sm:$0xff] %v16317_v43  ;;  %v16347_v44 = vmax.f32 %v720_v63, 0.0  ;;  %v16357_v27 = vmax.f32 %v715_v49, 0.0  ;;  %v21155_v63 = vld [vmem:[#allocation54_spill] sm:$0xff]  ;;  %v700_v49 = vadd.f32 %v15907_v13, %v16068_v0 }
 0x14a   : > { %13370 = vmatprep.subr.mxu0 %v16281_v38  ;;  %13121 = vmatprep.mubr.f32.mxu1 %v15594_v19  ;;  %v16297_v15 = vpop.f32.mrf.mxu0  ;;  %v730_v19 = vadd.f32 %v15907_v13, %v16138_v28  ;;  %21156 = vst [vmem:[#allocation135_spill] sm:$0xff] %v16365_v54  ;;  %v21157_v26 = vld [vmem:[#allocation58_spill] sm:$0xff] }
 0x14b   : > { %13147 = vmatpush3.msra.mxu1 %v16281_v38  ;;  %13371 = vmatpush3.msra.mxu0 %v16281_v38  ;;  %21152 = vst [vmem:[#allocation133_spill] sm:$0xff] %v16347_v44  ;;  %21154 = vst [vmem:[#allocation134_spill] sm:$0xff] %v16357_v27  ;;  %v16382_v0 = vmax.f32 %v700_v49, 0.0  ;;  %v21161_v38 = vld [vmem:[#allocation66_spill] sm:$0xff] }
 0x14c   : > { %13122 = vmatmul.mubr.f32.gmra.mxu1 %v15610_v35  ;;  %13148 = vmatprep.subr.mxu1 %v16293_v59  ;;  %v16307_v47 = vpop.f32.mrf.mxu0  ;;  %v21147_v35 = vld [vmem:[#allocation38_spill] sm:$0xff]  ;;  %v16327_v21 = vmax.f32 %v730_v19, 0.0 }
 0x14d   : > { %13372 = vmatprep.subr.mxu0 %v16293_v59  ;;  %13149 = vmatpush3.msra.mxu1 %v16293_v59  ;;  %v21151_v19 = vld [vmem:[#allocation46_spill] sm:$0xff]  ;;  %21160 = vst [vmem:[#allocation137_spill] sm:$0xff] %v16382_v0 }
 0x14e   : > { %13373 = vmatpush3.msra.mxu0 %v16293_v59  ;;  %13150 = vmatprep.subr.mxu1 %v16303_v7  ;;  %v16315_v58 = vpop.f32.mrf.mxu0  ;;  %21148 = vst [vmem:[#allocation131_spill] sm:$0xff] %v16327_v21 }
 0x14f   : > { %13374 = vmatprep.subr.mxu0 %v16303_v7  ;;  %13124 = vmatprep.mubr.f32.mxu1 %v21147_v35  ;;  %v16339_v35 = vmax.f32 %v725_v23, 0.0 }
 0x150   : > { %13151 = vmatpush3.msra.mxu1 %v16303_v7  ;;  %13375 = vmatpush3.msra.mxu0 %v16303_v7  ;;  %v16325_v28 = vpop.f32.mrf.mxu0  ;;  %v21166_v7 = vld [vmem:[#allocation75_spill] sm:$0xff] }
 0x151   : > { %13125 = vmatmul.mubr.f32.gmra.mxu1 %v21149_v56  ;;  %13152 = vmatprep.subr.mxu1 %v16317_v43  ;;  %21150 = vst [vmem:[#allocation132_spill] sm:$0xff] %v16339_v35 }
 0x152   : > { %13376 = vmatprep.subr.mxu0 %v16317_v43  ;;  %13153 = vmatpush3.msra.mxu1 %v16317_v43  ;;  %v16335_v37 = vpop.f32.mrf.mxu0 }
 0x153   : > { %13377 = vmatpush3.msra.mxu0 %v16317_v43  ;;  %13154 = vmatprep.subr.mxu1 %v16327_v21  ;;  %v20781_v43 = vunpack.i.l.bf16 %v21166_v7 }
 0x154   : > { %13378 = vmatprep.subr.mxu0 %v16327_v21  ;;  %13127 = vmatprep.mubr.f32.mxu1 %v21151_v19  ;;  %v13020_v56 = vpop.f32.mrf.mxu0  ;;  %v705_v19 = vadd.f32 %v16058_v10, %v15907_v13 }
 0x155   : > { %13155 = vmatpush3.msra.mxu1 %v16327_v21  ;;  %13379 = vmatpush3.msra.mxu0 %v16327_v21  ;;  %v21168_v21 = vld [vmem:[#allocation15_spill] sm:$0xff] }
 0x156   : > { %13128 = vmatmul.mubr.f32.gmra.mxu1 %v21153_v36  ;;  %13156 = vmatprep.subr.mxu1 %v16339_v35  ;;  %v839_v23 = vpop.f32.mrf.mxu0  ;;  %v16376_v32 = vmax.f32 %v705_v19, 0.0  ;;  %v21162_v19 = vld [vmem:[#allocation73_spill] sm:$0xff] }
 0x157   : > { %13380 = vmatprep.subr.mxu0 %v16339_v35  ;;  %13157 = vmatpush3.msra.mxu1 %v16339_v35 }
 0x158   : > { %13381 = vmatpush3.msra.mxu0 %v16339_v35  ;;  %13158 = vmatprep.subr.mxu1 %v16347_v44  ;;  %v13023_v36 = vpop.f32.mrf.mxu0  ;;  %21158 = vst [vmem:[#allocation136_spill] sm:$0xff] %v16376_v32 }
 0x159   : > { %13382 = vmatprep.subr.mxu0 %v16347_v44  ;;  %13130 = vmatprep.mubr.f32.mxu1 %v21155_v63  ;;  %v855_v10 = vadd.f32 %v13023_v36, %v15907_v13 }
 0x15a   : > { %13159 = vmatpush3.msra.mxu1 %v16347_v44  ;;  %13383 = vmatpush3.msra.mxu0 %v16347_v44  ;;  %v849_v63 = vpop.f32.mrf.mxu0  ;;  %v21174_v44 = vld [vmem:[#allocation27_spill] sm:$0xff] }
 0x15b   : > { %13131 = vmatmul.mubr.f32.gmra.mxu1 %v21157_v26  ;;  %13160 = vmatprep.subr.mxu1 %v16357_v27  ;;  %v21159_v26 = vld [vmem:[#allocation62_spill] sm:$0xff]  ;;  %v850_v59 = vadd.f32 %v15907_v13, %v849_v63  ;;  %v16387_v36 = vmax.f32 %v855_v10, 0.0  ;;  %v845_v63 = vadd.f32 %v13020_v56, %v15907_v13  ;;  %v21165_v10 = vld [vmem:[#allocation11_spill] sm:$0xff]  ;;  %v21167_v56 = vld [vmem:[#allocation77_spill] sm:$0xff] }
 0x15c   : > { %13384 = vmatprep.subr.mxu0 %v16357_v27  ;;  %13161 = vmatpush3.msra.mxu1 %v16357_v27 }
 0x15d   : > { %13385 = vmatpush3.msra.mxu0 %v16357_v27  ;;  %13162 = vmatprep.subr.mxu1 %v16365_v54  ;;  %v16396_v49 = vmax.f32 %v850_v59, 0.0  ;;  %v840_v59 = vadd.f32 %v15907_v13, %v839_v23  ;;  %v835_v23 = vadd.f32 %v16325_v28, %v15907_v13  ;;  %v830_v28 = vadd.f32 %v15907_v13, %v16335_v37 }
 0x15e   : > { %13386 = vmatprep.subr.mxu0 %v16365_v54  ;;  %13133 = vmatprep.mubr.f32.mxu1 %v21159_v26  ;;  %v20778_v26 = vunpack.i.l.bf16 %v21162_v19  ;;  %v825_v37 = vadd.f32 %v16307_v47, %v15907_v13  ;;  %v820_v47 = vadd.f32 %v15907_v13, %v16315_v58  ;;  %v815_v58 = vadd.f32 %v16289_v18, %v15907_v13 }
 0x15f   : > { %13163 = vmatpush3.msra.mxu1 %v16365_v54  ;;  %13387 = vmatpush3.msra.mxu0 %v16365_v54  ;;  %21163 = vst [vmem:[#allocation138_spill] sm:$0xff] %v16396_v49  ;;  %v16424_v35 = vmax.f32 %v840_v59, 0.0  ;;  %v21171_v59 = vld [vmem:[#allocation82_spill] sm:$0xff]  ;;  %v16448_v27 = vmax.f32 %v830_v28, 0.0  ;;  %v21178_v54 = vld [vmem:[#allocation35_spill] sm:$0xff]  ;;  %v810_v18 = vadd.f32 %v15907_v13, %v16297_v15  ;;  %v805_v15 = vadd.f32 %v16269_v52, %v15907_v13 }
 0x160   : > { %13134 = vmatmul.mubr.f32.gmra.mxu1 %v21161_v38  ;;  %13164 = vmatprep.subr.mxu1 %v16376_v32  ;;  %v21164_v38 = vld [vmem:[#allocation9_spill] sm:$0xff]  ;;  %v21176_v28 = vld [vmem:[#allocation86_spill] sm:$0xff]  ;;  %v800_v52 = vadd.f32 %v15907_v13, %v16279_v50  ;;  %v795_v50 = vadd.f32 %v16251_v60, %v15907_v13  ;;  %v790_v60 = vadd.f32 %v15907_v13, %v16262_v39 }
 0x161   : > { %13388 = vmatprep.subr.mxu0 %v16376_v32  ;;  %13165 = vmatpush3.msra.mxu1 %v16376_v32  ;;  %v785_v39 = vadd.f32 %v16232_v41, %v15907_v13  ;;  %v780_v41 = vadd.f32 %v15907_v13, %v16243_v61  ;;  %v20815_v61 = vunpack.i.h.bf16 %v15833_v1  ;;  %v21200_v1 = vld [vmem:[#allocation16_spill] sm:$0xff] }
 0x162   : > { %13389 = vmatpush3.msra.mxu0 %v16376_v32  ;;  %13166 = vmatprep.subr.mxu1 %v16382_v0  ;;  %v16472_v32 = vmax.f32 %v820_v47, 0.0  ;;  %v21181_v47 = vld [vmem:[#allocation91_spill] sm:$0xff] }
 0x163   : > { %13390 = vmatprep.subr.mxu0 %v16382_v0  ;;  %13167 = vmatpush3.msra.mxu1 %v16382_v0  ;;  %v16568_v13 = vmax.f32 %v780_v41, 0.0  ;;  %v21198_v41 = vld [vmem:[#allocation10_spill] sm:$0xff] }
 0x164   : > { %13168 = vmatprep.mubr.f32.mxu1 %v21164_v38  ;;  %13391 = vmatpush3.msra.mxu0 %v16382_v0  ;;  %v16413_v38 = vmax.f32 %v845_v63, 0.0  ;;  %v21170_v63 = vld [vmem:[#allocation80_spill] sm:$0xff]  ;;  %21179 = vst [vmem:[#allocation140_spill] sm:$0xff] %v16472_v32  ;;  %v21183_v0 = vld [vmem:[#allocation43_spill] sm:$0xff] }
 0x165   : > { %13169 = vmatmul.mubr.f32.vlgmr.msra.gmra.mxu1 %v21165_v10  ;;  %13192 = vmatprep.subr.mxu1 %v16387_v36  ;;  %v20782_v10 = vunpack.i.l.bf16 %v21167_v56 }
 0x166   : > { %13393 = vmatmul.mubr.f32.vlgmr.msra.gmra.mxu0 %v20778_v26  ;;  %13416 = vmatprep.subr.mxu0 %v16387_v36  ;;  %v21169_v26 = vld [vmem:[#allocation19_spill] sm:$0xff] }
 0x167   : > { %13193 = vmatpush3.msra.mxu1 %v16387_v36  ;;  %13417 = vmatpush3.msra.mxu0 %v16387_v36 }
 0x168   : > { %13194 = vmatprep.subr.mxu1 %v16396_v49  ;;  %13418 = vmatprep.subr.mxu0 %v16396_v49 }
 0x169   : > { %13171 = vmatprep.mubr.f32.mxu1 %v21168_v21  ;;  %13195 = vmatpush3.msra.mxu1 %v16396_v49  ;;  %v20787_v21 = vunpack.i.l.bf16 %v21170_v63 }
 0x16a   : > { %13395 = vmatprep.mubr.f32.mxu0 %v20781_v43  ;;  %13419 = vmatpush3.msra.mxu0 %v16396_v49  ;;  %v20788_v43 = vunpack.i.l.bf16 %v21171_v59 }
 0x16b   : > { %13172 = vmatmul.mubr.f32.gmra.mxu1 %v21169_v26  ;;  %13196 = vmatprep.subr.mxu1 %v16413_v38  ;;  %v16437_v26 = vmax.f32 %v835_v23, 0.0  ;;  %v21175_v23 = vld [vmem:[#allocation84_spill] sm:$0xff] }
 0x16c   : > { %13396 = vmatmul.mubr.f32.gmra.mxu0 %v20782_v10  ;;  %13420 = vmatprep.subr.mxu0 %v16413_v38  ;;  %v21173_v10 = vld [vmem:[#allocation23_spill] sm:$0xff] }
 0x16d   : > { %13197 = vmatpush3.msra.mxu1 %v16413_v38  ;;  %13421 = vmatpush3.msra.mxu0 %v16413_v38  ;;  %21172 = vst [vmem:[#allocation139_spill] sm:$0xff] %v16437_v26 }
 0x16e   : > { %13198 = vmatprep.subr.mxu1 %v16424_v35  ;;  %13422 = vmatprep.subr.mxu0 %v16424_v35 }
 0x16f   : > { %13174 = vmatprep.mubr.f32.mxu1 %v21173_v10  ;;  %13199 = vmatpush3.msra.mxu1 %v16424_v35  ;;  %v20793_v10 = vunpack.i.l.bf16 %v21175_v23 }
 0x170   : > { %13398 = vmatprep.mubr.f32.mxu0 %v20787_v21  ;;  %13423 = vmatpush3.msra.mxu0 %v16424_v35  ;;  %v20794_v21 = vunpack.i.l.bf16 %v21176_v28  ;;  %v16496_v28 = vmax.f32 %v810_v18, 0.0  ;;  %v21185_v18 = vld [vmem:[#allocation96_spill] sm:$0xff] }
 0x171   : > { %13175 = vmatmul.mubr.f32.gmra.mxu1 %v21174_v44  ;;  %13200 = vmatprep.subr.mxu1 %v16437_v26  ;;  %v16461_v44 = vmax.f32 %v825_v37, 0.0  ;;  %v21180_v37 = vld [vmem:[#allocation89_spill] sm:$0xff] }
 0x172   : > { %13399 = vmatmul.mubr.f32.gmra.mxu0 %v20788_v43  ;;  %13424 = vmatprep.subr.mxu0 %v16437_v26  ;;  %v21177_v43 = vld [vmem:[#allocation31_spill] sm:$0xff] }
 0x173   : > { %13201 = vmatpush3.msra.mxu1 %v16437_v26  ;;  %13425 = vmatpush3.msra.mxu0 %v16437_v26 }
 0x174   : > { %13202 = vmatprep.subr.mxu1 %v16448_v27  ;;  %13426 = vmatprep.subr.mxu0 %v16448_v27 }
 0x175   : > { %13177 = vmatprep.mubr.f32.mxu1 %v21177_v43  ;;  %13203 = vmatpush3.msra.mxu1 %v16448_v27  ;;  %v20798_v43 = vunpack.i.l.bf16 %v21180_v37  ;;  %v16520_v37 = vmax.f32 %v800_v52, 0.0  ;;  %v21190_v52 = vld [vmem:[#allocation98_spill] sm:$0xff] }
 0x176   : > { %13401 = vmatprep.mubr.f32.mxu0 %v20793_v10  ;;  %13427 = vmatpush3.msra.mxu0 %v16448_v27  ;;  %v20799_v10 = vunpack.i.l.bf16 %v21181_v47  ;;  %v21188_v47 = vld [vmem:[#allocation51_spill] sm:$0xff] }
 0x177   : > { %13178 = vmatmul.mubr.f32.gmra.mxu1 %v21178_v54  ;;  %13204 = vmatprep.subr.mxu1 %v16461_v44  ;;  %v16485_v54 = vmax.f32 %v815_v58, 0.0  ;;  %v21184_v58 = vld [vmem:[#allocation93_spill] sm:$0xff] }
 0x178   : > { %13402 = vmatmul.mubr.f32.gmra.mxu0 %v20794_v21  ;;  %13428 = vmatprep.subr.mxu0 %v16461_v44  ;;  %v21182_v21 = vld [vmem:[#allocation39_spill] sm:$0xff] }
 0x179   : > { %13205 = vmatpush3.msra.mxu1 %v16461_v44  ;;  %13429 = vmatpush3.msra.mxu0 %v16461_v44 }
 0x17a   : > { %13206 = vmatprep.subr.mxu1 %v16472_v32  ;;  %13430 = vmatprep.subr.mxu0 %v16472_v32 }
 0x17b   : > { %13180 = vmatprep.mubr.f32.mxu1 %v21182_v21  ;;  %13207 = vmatpush3.msra.mxu1 %v16472_v32  ;;  %v20802_v21 = vunpack.i.l.bf16 %v21184_v58  ;;  %v21193_v58 = vld [vmem:[#allocation59_spill] sm:$0xff] }
 0x17c   : > { %13404 = vmatprep.mubr.f32.mxu0 %v20798_v43  ;;  %13431 = vmatpush3.msra.mxu0 %v16472_v32  ;;  %v20803_v43 = vunpack.i.l.bf16 %v21185_v18  ;;  %v16540_v18 = vpop.permute.xlu1 %2940 }
 0x17d   : > { %13181 = vmatmul.mubr.f32.gmra.mxu1 %v21183_v0  ;;  %13208 = vmatprep.subr.mxu1 %v16485_v54  ;;  %v16509_v0 = vmax.f32 %v805_v15, 0.0  ;;  %v21189_v15 = vld [vmem:[#allocation97_spill] sm:$0xff]  ;;  %21192 = vst [vmem:[#allocation142_spill] sm:$0xff] %v16540_v18  ;;  %v21197_v18 = vld [vmem:[#allocation67_spill] sm:$0xff] }
 0x17e   : > { %13405 = vmatmul.mubr.f32.gmra.mxu0 %v20799_v10  ;;  %13432 = vmatprep.subr.mxu0 %v16485_v54  ;;  %v21187_v10 = vld [vmem:[#allocation47_spill] sm:$0xff] }
 0x17f   : > { %13209 = vmatpush3.msra.mxu1 %v16485_v54  ;;  %13433 = vmatpush3.msra.mxu0 %v16485_v54  ;;  %21186 = vst [vmem:[#allocation141_spill] sm:$0xff] %v16509_v0 }
 0x180   : > { %13210 = vmatprep.subr.mxu1 %v16496_v28  ;;  %13434 = vmatprep.subr.mxu0 %v16496_v28 }
 0x181   : > { %13183 = vmatprep.mubr.f32.mxu1 %v21187_v10  ;;  %13211 = vmatpush3.msra.mxu1 %v16496_v28  ;;  %v20806_v10 = vunpack.i.l.bf16 %v21189_v15  ;;  %v16559_v15 = vmax.f32 %v785_v39, 0.0  ;;  %v20816_v39 = vunpack.i.h.bf16 %v21162_v19  ;;  %v20821_v19 = vunpack.i.h.bf16 %v21170_v63  ;;  %v21209_v63 = vld [vmem:[#allocation44_spill] sm:$0xff] }
 0x182   : > { %13407 = vmatprep.mubr.f32.mxu0 %v20802_v21  ;;  %13435 = vmatpush3.msra.mxu0 %v16496_v28  ;;  %v20808_v21 = vunpack.i.l.bf16 %v21190_v52  ;;  %v2350_v52 = vpop.permute.xlu1 %2349 }
 0x183   : > { %13184 = vmatmul.mubr.f32.gmra.mxu1 %v21188_v47  ;;  %13212 = vmatprep.subr.mxu1 %v16509_v0  ;;  %v16533_v47 = vmax.f32 %v795_v50, 0.0  ;;  %v16546_v50 = vmax.f32 %v790_v60, 0.0  ;;  %v21195_v60 = vld [vmem:[#allocation105_spill] sm:$0xff] }
 0x184   : > { %13408 = vmatmul.mubr.f32.gmra.mxu0 %v20803_v43  ;;  %13436 = vmatprep.subr.mxu0 %v16509_v0  ;;  %v21191_v43 = vld [vmem:[#allocation55_spill] sm:$0xff] }
 0x185   : > { %13213 = vmatpush3.msra.mxu1 %v16509_v0  ;;  %13437 = vmatpush3.msra.mxu0 %v16509_v0 }
 0x186   : > { %13214 = vmatprep.subr.mxu1 %v16520_v37  ;;  %13438 = vmatprep.subr.mxu0 %v16520_v37 }
 0x187   : > { %13186 = vmatprep.mubr.f32.mxu1 %v21191_v43  ;;  %13215 = vmatpush3.msra.mxu1 %v16520_v37  ;;  %v21194_v43 = vld [vmem:[#allocation101_spill] sm:$0xff] }
 0x188   : > { %13410 = vmatprep.mubr.f32.mxu0 %v20806_v10  ;;  %13439 = vmatpush3.msra.mxu0 %v16520_v37  ;;  %v20812_v10 = vunpack.i.l.bf16 %v21194_v43 }
 0x189   : > { %13187 = vmatmul.mubr.f32.gmra.mxu1 %v21193_v58  ;;  %13216 = vmatprep.subr.mxu1 %v16533_v47  ;;  %v20811_v58 = vunpack.i.l.bf16 %v21195_v60 }
 0x18a   : > { %13411 = vmatmul.mubr.f32.gmra.mxu0 %v20808_v21  ;;  %13440 = vmatprep.subr.mxu0 %v16533_v47  ;;  %v21196_v21 = vld [vmem:[#allocation63_spill] sm:$0xff] }
 0x18b   : > { %13217 = vmatpush3.msra.mxu1 %v16533_v47  ;;  %13441 = vmatpush3.msra.mxu0 %v16533_v47 }
 0x18c   : > { %13218 = vmatprep.subr.mxu1 %v16546_v50  ;;  %13442 = vmatprep.subr.mxu0 %v16546_v50 }
 0x18d   : > { %13189 = vmatprep.mubr.f32.mxu1 %v21196_v21  ;;  %13219 = vmatpush3.msra.mxu1 %v16546_v50  ;;  %v20820_v21 = vunpack.i.h.bf16 %v21167_v56  ;;  %v21211_v56 = vld [vmem:[#allocation112_spill] sm:$0xff] }
 0x18e   : > { %13413 = vmatprep.mubr.f32.mxu0 %v20812_v10  ;;  %13443 = vmatpush3.msra.mxu0 %v16546_v50  ;;  %v20819_v10 = vunpack.i.h.bf16 %v21166_v7  ;;  %v20822_v7 = vunpack.i.h.bf16 %v21171_v59  ;;  %v21208_v59 = vld [vmem:[#allocation40_spill] sm:$0xff] }
 0x18f   : > { %13190 = vmatmul.mubr.f32.gmra.mxu1 %v21197_v18  ;;  %13220 = vmatprep.subr.mxu1 %v16559_v15  ;;  %v21199_v18 = vld [vmem:[#allocation12_spill] sm:$0xff] }
 0x190   : > { %13414 = vmatmul.mubr.f32.gmra.mxu0 %v20811_v58  ;;  %13444 = vmatprep.subr.mxu0 %v16559_v15  ;;  %v16584_v58 = vpop.permute.xlu1 %2938 }
 0x191   : > { %13221 = vmatpush3.msra.mxu1 %v16559_v15  ;;  %13445 = vmatpush3.msra.mxu0 %v16559_v15 }
 0x192   : > { %13222 = vmatprep.subr.mxu1 %v16568_v13  ;;  %13446 = vmatprep.subr.mxu0 %v16568_v13 }
 0x193   : > { %13223 = vmatpush3.msra.mxu1 %v16568_v13  ;;  %13224 = vmatprep.mubr.f32.mxu1 %v21198_v41  ;;  %v2352_v41 = vpop.permute.xlu0 %2351 }
 0x194   : > { %13447 = vmatpush3.msra.mxu0 %v16568_v13  ;;  %13448 = vmatprep.mubr.f32.mxu0 %v20815_v61  ;;  %v21201_v61 = vld [vmem:[#allocation20_spill] sm:$0xff] }
 0x195   : > { %13225 = vmatmul.mubr.f32.vlgmr.msra.gmra.mxu1 %v21199_v18  ;;  %13304 = vmatprep.subr.mxu1 %v16052_v57  ;;  %v21223_v18 = vld [vmem:[#allocation107_spill] sm:$0xff] }
 0x196   : > { %13449 = vmatmul.mubr.f32.vlgmr.msra.gmra.mxu0 %v20816_v39  ;;  %13305 = vmatpush3.msra.mxu1 %v16052_v57  ;;  %v2348_v39 = vpop.permute.xlu1 %2347 }
 0x197   : > { %13306 = vmatprep.subr.mxu1 %v16064_v29  ;;  %13227 = vmatprep.mubr.f32.mxu1 %v21200_v1 }
 0x198   : > { %13307 = vmatpush3.msra.mxu1 %v16064_v29  ;;  %13451 = vmatprep.mubr.f32.mxu0 %v20819_v10  ;;  %v21202_v10 = vld [vmem:[#allocation24_spill] sm:$0xff] }
 0x199   : > { %13228 = vmatmul.mubr.f32.gmra.mxu1 %v21201_v61  ;;  %13308 = vmatprep.subr.mxu1 %v16073_v62  ;;  %v21220_v61 = vld [vmem:[#allocation64_spill] sm:$0xff] }
 0x19a   : > { %13452 = vmatmul.mubr.f32.gmra.mxu0 %v20820_v21  ;;  %13472 = vmatprep.subr.mxu0 %v2352_v41  ;;  %v21203_v21 = vld [vmem:[#allocation28_spill] sm:$0xff] }
 0x19b   : > { %13309 = vmatpush3.msra.mxu1 %v16073_v62  ;;  %13473 = vmatpush3.msra.mxu0 %v2352_v41  ;;  %v2346_v41 = vpop.permute.xlu1 %2345 }
 0x19c   : > { %13310 = vmatprep.subr.mxu1 %v16086_v25  ;;  %13474 = vmatprep.subr.mxu0 %v2350_v52 }
 0x19d   : > { %13230 = vmatprep.mubr.f32.mxu1 %v21202_v10  ;;  %13311 = vmatpush3.msra.mxu1 %v16086_v25  ;;  %v21219_v10 = vld [vmem:[#allocation108_spill] sm:$0xff] }
 0x19e   : > { %13454 = vmatprep.mubr.f32.mxu0 %v20821_v19  ;;  %13475 = vmatpush3.msra.mxu0 %v2350_v52  ;;  %v21204_v19 = vld [vmem:[#allocation32_spill] sm:$0xff] }
 0x19f   : > { %13231 = vmatmul.mubr.f32.gmra.mxu1 %v21203_v21  ;;  %13312 = vmatprep.subr.mxu1 %v16096_v22  ;;  %v21205_v52 = vld [vmem:[#allocation36_spill] sm:$0xff] }
 0x1a0   : > { %13455 = vmatmul.mubr.f32.gmra.mxu0 %v20822_v7  ;;  %13476 = vmatprep.subr.mxu0 %v2348_v39  ;;  %v21206_v7 = vld [vmem:[#allocation115_spill] sm:$0xff]  ;;  %v21216_v21 = vld [vmem:[#allocation56_spill] sm:$0xff] }
 0x1a1   : > { %13313 = vmatpush3.msra.mxu1 %v16096_v22  ;;  %13477 = vmatpush3.msra.mxu0 %v2348_v39  ;;  %v21207_v39 = vld [vmem:[#allocation114_spill] sm:$0xff] }
 0x1a2   : > { %13480 = vmatprep.mubr.msk.f32.mxu0 %vm280_vm0, %v16044_v30  ;;  %13314 = vmatprep.subr.mxu1 %v16110_v42 }
 0x1a3   : > { %13478 = vmatprep.subr.mxu0 %v2346_v41  ;;  %13233 = vmatprep.mubr.f32.mxu1 %v21204_v19  ;;  %v21215_v19 = vld [vmem:[#allocation110_spill] sm:$0xff] }
 0x1a4   : > { %13315 = vmatpush3.msra.mxu1 %v16110_v42  ;;  %13479 = vmatpush3.msra.mxu0 %v2346_v41  ;;  %v21210_v41 = vld [vmem:[#allocation113_spill] sm:$0xff] }
 0x1a5   : > { %13234 = vmatmul.mubr.f32.gmra.mxu1 %v21205_v52  ;;  %13316 = vmatprep.subr.mxu1 %v16120_v45  ;;  %v21212_v52 = vld [vmem:[#allocation48_spill] sm:$0xff] }
 0x1a6   : > { %13481 = vmatmul.mubr.msk.f32.vlgmr.msra.gmra.mxu0 %vm280_vm0, %v21206_v7  ;;  %13317 = vmatpush3.msra.mxu1 %v16120_v45 }
 0x1a7   : > { %13483 = vmatprep.mubr.msk.f32.mxu0 %vm280_vm0, %v21207_v39  ;;  %13318 = vmatprep.subr.mxu1 %v16134_v2 }
 0x1a8   : > { %13236 = vmatprep.mubr.f32.mxu1 %v21208_v59  ;;  %13319 = vmatpush3.msra.mxu1 %v16134_v2  ;;  %v21213_v59 = vld [vmem:[#allocation52_spill] sm:$0xff] }
 0x1a9   : > { %13237 = vmatmul.mubr.f32.gmra.mxu1 %v21209_v63  ;;  %13320 = vmatprep.subr.mxu1 %v16144_v5  ;;  %v21214_v63 = vld [vmem:[#allocation111_spill] sm:$0xff] }
 0x1aa   : > { %13484 = vmatmul.mubr.msk.f32.gmra.mxu0 %vm280_vm0, %v21210_v41  ;;  %13321 = vmatpush3.msra.mxu1 %v16144_v5 }
 0x1ab   : > { %13486 = vmatprep.mubr.msk.f32.mxu0 %vm280_vm0, %v21211_v56  ;;  %13322 = vmatprep.subr.mxu1 %v16158_v46 }
 0x1ac   : > { %13239 = vmatprep.mubr.f32.mxu1 %v21212_v52  ;;  %13323 = vmatpush3.msra.mxu1 %v16158_v46  ;;  %v21217_v52 = vld [vmem:[#allocation60_spill] sm:$0xff] }
 0x1ad   : > { %13240 = vmatmul.mubr.f32.gmra.mxu1 %v21213_v59  ;;  %13324 = vmatprep.subr.mxu1 %v16168_v55  ;;  %v21218_v59 = vld [vmem:[#allocation109_spill] sm:$0xff] }
 0x1ae   : > { %13487 = vmatmul.mubr.msk.f32.gmra.mxu0 %vm280_vm0, %v21214_v63  ;;  %13325 = vmatpush3.msra.mxu1 %v16168_v55 }
 0x1af   : > { %13489 = vmatprep.mubr.msk.f32.mxu0 %vm280_vm0, %v21215_v19  ;;  %13326 = vmatprep.subr.mxu1 %v16182_v6 }
 0x1b0   : > { %13242 = vmatprep.mubr.f32.mxu1 %v21216_v21  ;;  %13327 = vmatpush3.msra.mxu1 %v16182_v6  ;;  %v21221_v21 = vld [vmem:[#allocation68_spill] sm:$0xff] }
 0x1b1   : > { %13243 = vmatmul.mubr.f32.gmra.mxu1 %v21217_v52  ;;  %13328 = vmatprep.subr.mxu1 %v16190_v8  ;;  %v21222_v52 = vld [vmem:[#allocation69_spill] sm:$0xff] }
 0x1b2   : > { %13490 = vmatmul.mubr.msk.f32.gmra.mxu0 %vm280_vm0, %v21218_v59  ;;  %13329 = vmatpush3.msra.mxu1 %v16190_v8  ;;  %v20826_v1 = vunpack.i.h.bf16 %v21222_v52  ;;  %v21225_v52 = vld [vmem:[#allocation104_spill] sm:$0xff] }
 0x1b3   : > { %13492 = vmatprep.mubr.msk.f32.mxu0 %vm280_vm0, %v21219_v10  ;;  %13330 = vmatprep.subr.mxu1 %v16202_v34  ;;  %v21224_v10 = vld [vmem:[#allocation106_spill] sm:$0xff] }
 0x1b4   : > { %13245 = vmatprep.mubr.f32.mxu1 %v21220_v61  ;;  %13331 = vmatpush3.msra.mxu1 %v16202_v34  ;;  %v20828_v61 = vunpack.i.h.bf16 %v15831_v4  ;;  %v16710_v4 = vld [vmem:[%s20600_s2 + $0x38] sm:$0xff] }
 0x1b5   : > { %13246 = vmatmul.mubr.f32.gmra.mxu1 %v21221_v21  ;;  %13332 = vmatprep.subr.mxu1 %v16208_v9  ;;  %v15277_v21 = vld [vmem:[%s20600_s2 + $0x18] sm:$0xff] }
 0x1b6   : > { %13493 = vmatmul.mubr.msk.f32.gmra.mxu0 %vm280_vm0, %v21223_v18  ;;  %13333 = vmatpush3.msra.mxu1 %v16208_v9  ;;  %v20831_v18 = vunpack.i.h.bf16 %v15835_v20  ;;  %v20835_v20 = vunpack.i.h.bf16 %v15846_v3  ;;  %v21229_v3 = vld [vmem:[#allocation99_spill] sm:$0xff] }
 0x1b7   : > { %13336 = vmatprep.mubr.f32.mxu1 %v20826_v1  ;;  %13495 = vmatprep.mubr.msk.f32.mxu0 %vm280_vm0, %v21224_v10  ;;  %v15278_v1 = vld [vmem:[%s20600_s2 + $0x10] sm:$0xff] }
 0x1b8   : > { %13334 = vmatprep.subr.mxu1 %v16218_v17  ;;  %4046 = vrot.lane.b32.xlu1 %v15277_v21, %s15348_s30  ;;  %v21226_v21 = vld [vmem:[#allocation103_spill] sm:$0xff] }
 0x1b9   : > { %13335 = vmatpush3.msra.mxu1 %v16218_v17  ;;  %4044 = vrot.lane.b32.xlu0 %v15278_v1, %s15348_s30  ;;  %v20834_v1 = vunpack.i.h.bf16 %v15840_v16  ;;  %v21234_v16 = vld [vmem:[#allocation142_spill] sm:$0xff] }
 0x1ba   : > { %13337 = vmatmul.mubr.f32.vlgmr.msra.gmra.mxu1 %v20828_v61  ;;  %14960 = vmatprep.subr.mxu1 %v16387_v36  ;;  %v15279_v61 = vld [vmem:[%s20600_s2 + $0x8] sm:$0xff] }
 0x1bb   : > { %13496 = vmatmul.mubr.msk.f32.gmra.mxu0 %vm280_vm0, %v21225_v52  ;;  %13339 = vmatprep.mubr.f32.mxu1 %v20831_v18  ;;  %v15280_v18 = vld [vmem:[%s20600_s2] sm:$0xff] }
 0x1bc   : > { %14976 = vmatpush3.msra.mxu1 %v16387_v36  ;;  %13498 = vmatprep.mubr.msk.f32.mxu0 %vm280_vm0, %v21226_v21  ;;  %v21228_v21 = vld [vmem:[#allocation100_spill] sm:$0xff] }
 0x1bd   : > { %14961 = vmatprep.subr.mxu1 %v16396_v49  ;;  %4042 = vrot.lane.b32.xlu1 %v15279_v61, %s15348_s30  ;;  %v21227_v61 = vld [vmem:[#allocation102_spill] sm:$0xff] }
 0x1be   : > { %14977 = vmatpush3.msra.mxu1 %v16396_v49  ;;  %4040 = vrot.lane.b32.xlu0 %v15280_v18, %s15348_s30  ;;  %v20838_v18 = vunpack.i.h.bf16 %v15850_v11  ;;  %v20845_v11 = vunpack.i.h.bf16 %v15860_v24 }
 0x1bf   : > { %13340 = vmatmul.mubr.f32.gmra.mxu1 %v20834_v1  ;;  %14962 = vmatprep.subr.mxu1 %v16413_v38  ;;  %v20841_v1 = vunpack.i.h.bf16 %v15852_v48 }
 0x1c0   : > { %13499 = vmatmul.mubr.msk.f32.gmra.mxu0 %vm280_vm0, %v21227_v61  ;;  %13342 = vmatprep.mubr.f32.mxu1 %v20835_v20  ;;  %v16731_v20 = vld [vmem:[%s20600_s2 + $0x30] sm:$0xff] }
 0x1c1   : > { %14978 = vmatpush3.msra.mxu1 %v16413_v38  ;;  %13501 = vmatprep.mubr.msk.f32.mxu0 %vm280_vm0, %v21228_v21 }
 0x1c2   : > { %14963 = vmatprep.subr.mxu1 %v16424_v35  ;;  %13680 = vmatprep.subr.mxu0 %v16710_v4 }
 0x1c3   : > { %14979 = vmatpush3.msra.mxu1 %v16424_v35  ;;  %13681 = vmatpush3.msra.mxu0 %v16710_v4 }
 0x1c4   : > { %13343 = vmatmul.mubr.f32.gmra.mxu1 %v20838_v18  ;;  %14964 = vmatprep.subr.mxu1 %v16437_v26  ;;  %v20842_v18 = vunpack.i.h.bf16 %v15856_v40  ;;  %v20851_v40 = vunpack.i.h.bf16 %v15868_v33  ;;  %v21233_v33 = vld [vmem:[#allocation91_spill] sm:$0xff] }
 0x1c5   : > { %13502 = vmatmul.mubr.msk.f32.gmra.mxu0 %vm280_vm0, %v21229_v3  ;;  %13345 = vmatprep.mubr.f32.mxu1 %v20841_v1  ;;  %v16752_v1 = vld [vmem:[%s20600_s2 + $0x28] sm:$0xff]  ;;  %v20881_v48 = vunpack.i.h.bf16 %v21233_v33 }
 0x1c6   : > { %14980 = vmatpush3.msra.mxu1 %v16437_v26  ;;  %13504 = vmatprep.mubr.msk.f32.mxu0 %vm280_vm0, %v16218_v17 }
 0x1c7   : > { %14965 = vmatprep.subr.mxu1 %v16448_v27  ;;  %13682 = vmatprep.subr.mxu0 %v16731_v20 }
 0x1c8   : > { %14981 = vmatpush3.msra.mxu1 %v16448_v27  ;;  %13683 = vmatpush3.msra.mxu0 %v16731_v20 }
 0x1c9   : > { %13346 = vmatmul.mubr.f32.gmra.mxu1 %v20842_v18  ;;  %14966 = vmatprep.subr.mxu1 %v16461_v44  ;;  %v20846_v18 = vunpack.i.h.bf16 %v15864_v14  ;;  %v21230_v14 = vld [vmem:[#allocation90_spill] sm:$0xff] }
 0x1ca   : > { %13505 = vmatmul.mubr.msk.f32.gmra.mxu0 %vm280_vm0, %v16208_v9  ;;  %13348 = vmatprep.mubr.f32.mxu1 %v20845_v11  ;;  %v16773_v11 = vld [vmem:[%s20600_s2 + $0x20] sm:$0xff]  ;;  %v20853_v24 = vunpack.i.h.bf16 %v21230_v14  ;;  %v21232_v14 = vld [vmem:[#allocation89_spill] sm:$0xff] }
 0x1cb   : > { %14982 = vmatpush3.msra.mxu1 %v16461_v44  ;;  %13507 = vmatprep.mubr.msk.f32.mxu0 %vm280_vm0, %v16202_v34 }
 0x1cc   : > { %14967 = vmatprep.subr.mxu1 %v16472_v32  ;;  %13684 = vmatprep.subr.mxu0 %v16752_v1 }
 0x1cd   : > { %14983 = vmatpush3.msra.mxu1 %v16472_v32  ;;  %13685 = vmatpush3.msra.mxu0 %v16752_v1 }
 0x1ce   : > { %13349 = vmatmul.mubr.f32.gmra.mxu1 %v20846_v18  ;;  %14968 = vmatprep.subr.mxu1 %v16485_v54  ;;  %v20852_v18 = vunpack.i.h.bf16 %v15872_v12 }
 0x1cf   : > { %13508 = vmatmul.mubr.msk.f32.gmra.mxu0 %vm280_vm0, %v16190_v8  ;;  %13351 = vmatprep.mubr.f32.mxu1 %v20851_v40  ;;  %v20855_v40 = vunpack.i.h.bf16 %v15888_v31  ;;  %v15281_v31 = vld [vmem:[%s20600_s2 + $0x62] ss:$0 sm:$0xff] }
 0x1d0   : > { %14984 = vmatpush3.msra.mxu1 %v16485_v54  ;;  %13510 = vmatprep.mubr.msk.f32.mxu0 %vm280_vm0, %v16182_v6 }
 0x1d1   : > { %14969 = vmatprep.subr.mxu1 %v16496_v28  ;;  %13686 = vmatprep.subr.mxu0 %v16773_v11 }
 0x1d2   : > { %14985 = vmatpush3.msra.mxu1 %v16496_v28  ;;  %13687 = vmatpush3.msra.mxu0 %v16773_v11 }
 0x1d3   : > { %13352 = vmatmul.mubr.f32.gmra.mxu1 %v20852_v18  ;;  %14970 = vmatprep.subr.mxu1 %v16509_v0  ;;  %v20854_v18 = vunpack.i.h.bf16 %v15894_v51 }
 0x1d4   : > { %13511 = vmatmul.mubr.msk.f32.gmra.mxu0 %vm280_vm0, %v16168_v55  ;;  %13354 = vmatprep.mubr.f32.mxu1 %v20853_v24  ;;  %v20858_v24 = vunpack.i.h.bf16 %v15898_v53 }
 0x1d5   : > { %14986 = vmatpush3.msra.mxu1 %v16509_v0  ;;  %13513 = vmatprep.mubr.msk.f32.mxu0 %vm280_vm0, %v16158_v46 }
 0x1d6   : > { %14971 = vmatprep.subr.mxu1 %v16520_v37  ;;  %4770 = vrot.lane.b32.xlu1 %v16710_v4, %s15347_s25 }
 0x1d7   : > { %14987 = vmatpush3.msra.mxu1 %v16520_v37  ;;  %5359 = vrot.lane.b32.xlu0 %v16710_v4, %s15346_s24 }
 0x1d8   : > { %13355 = vmatmul.mubr.f32.gmra.mxu1 %v20855_v40  ;;  %14972 = vmatprep.subr.mxu1 %v16533_v47 }
 0x1d9   : > { %13514 = vmatmul.mubr.msk.f32.gmra.mxu0 %vm280_vm0, %v16144_v5  ;;  %13357 = vmatprep.mubr.f32.mxu1 %v20854_v18  ;;  %v20865_v18 = vunpack.i.h.bf16 %v21175_v23  ;;  %v20877_v23 = vunpack.i.h.bf16 %v21232_v14 }
 0x1da   : > { %14988 = vmatpush3.msra.mxu1 %v16533_v47  ;;  %13516 = vmatprep.mubr.msk.f32.mxu0 %vm280_vm0, %v16134_v2 }
 0x1db   : > { %14973 = vmatprep.subr.mxu1 %v16546_v50  ;;  %4768 = vrot.lane.b32.xlu1 %v16731_v20, %s15347_s25 }
 0x1dc   : > { %14989 = vmatpush3.msra.mxu1 %v16546_v50  ;;  %5357 = vrot.lane.b32.xlu0 %v16731_v20, %s15346_s24 }
 0x1dd   : > { %13358 = vmatmul.mubr.f32.gmra.mxu1 %v20858_v24  ;;  %14974 = vmatprep.subr.mxu1 %v16559_v15  ;;  %v16827_v40 = vpop.f32.mrf.mxu1  ;;  %v21231_v24 = vld [vmem:[#allocation86_spill] sm:$0xff] }
 0x1de   : > { %13517 = vmatmul.mubr.msk.f32.gmra.mxu0 %vm280_vm0, %v16120_v45  ;;  %14990 = vmatpush3.msra.mxu1 %v16559_v15  ;;  %v20876_v53 = vunpack.i.h.bf16 %v21231_v24 }
 0x1df   : > { %13457 = vmatprep.mubr.f32.mxu1 %v20865_v18  ;;  %13519 = vmatprep.mubr.msk.f32.mxu0 %vm280_vm0, %v16110_v42  ;;  %v16836_v51 = vpop.f32.mrf.mxu1  ;;  %v21235_v42 = vld [vmem:[#allocation93_spill] sm:$0xff] }
 0x1e0   : > { %14975 = vmatprep.subr.mxu1 %v16568_v13  ;;  %3524 = vrot.lane.b32.xlu1 %v15281_v31, %s15346_s24  ;;  %v20883_v24 = vunpack.i.h.bf16 %v21235_v42  ;;  %v21240_v42 = vld [vmem:[#allocation137_spill] sm:$0xff] }
 0x1e1   : > { %14991 = vmatpush3.msra.mxu1 %v16568_v13  ;;  %v16846_v18 = vpop.f32.mrf.mxu1  ;;  %4629 = vrot.lane.b32.xlu0 %v15281_v31, %s15347_s25 }
 0x1e2   : > { %13458 = vmatmul.mubr.f32.vlgmr.msra.gmra.mxu1 %v20876_v53  ;;  %13520 = vmatmul.mubr.msk.f32.gmra.mxu0 %vm280_vm0, %v16096_v22 }
 0x1e3   : > { %13460 = vmatprep.mubr.f32.mxu1 %v20877_v23  ;;  %13522 = vmatprep.mubr.msk.f32.mxu0 %vm280_vm0, %v16086_v25  ;;  %v1257_v12 = vpop.f32.mrf.mxu1  ;;  %v16871_v23 = vpop.f32.mrf.mxu0  ;;  %v21237_v25 = vld [vmem:[#allocation96_spill] sm:$0xff] }
 0x1e4   : > { %13576 = vmatprep.subr.mxu1 %v21234_v16  ;;  %4766 = vrot.lane.b32.xlu1 %v16752_v1, %s15347_s25  ;;  %21236 = vst [vmem:[#allocation115_spill] sm:$0xff] %v16871_v23  ;;  %v20888_v22 = vunpack.i.h.bf16 %v21237_v25 }
 0x1e5   : > { %13577 = vmatpush3.msra.mxu1 %v21234_v16  ;;  %v16863_v53 = vpop.f32.mrf.mxu1  ;;  %5355 = vrot.lane.b32.xlu0 %v16752_v1, %s15346_s24  ;;  %v2937_v16 = vpop.permute.xlu0 %2936 }
 0x1e6   : > { %13461 = vmatmul.mubr.f32.gmra.mxu1 %v20881_v48  ;;  %13523 = vmatmul.mubr.msk.f32.gmra.mxu0 %vm280_vm0, %v16073_v62  ;;  %v21238_v48 = vld [vmem:[#allocation97_spill] sm:$0xff]  ;;  %v21241_v62 = vld [vmem:[#allocation98_spill] sm:$0xff] }
 0x1e7   : > { %13463 = vmatprep.mubr.f32.mxu1 %v20883_v24  ;;  %13525 = vmatprep.mubr.msk.f32.mxu0 %vm280_vm0, %v16064_v29  ;;  %v1267_v14 = vpop.f32.mrf.mxu1  ;;  %v20890_v33 = vunpack.i.h.bf16 %v21238_v48  ;;  %v16889_v24 = vpop.f32.mrf.mxu0  ;;  %v20892_v45 = vunpack.i.h.bf16 %v21241_v62 }
 0x1e8   : > { %13578 = vmatprep.subr.mxu1 %v16584_v58  ;;  %4764 = vrot.lane.b32.xlu1 %v16773_v11, %s15347_s25  ;;  %21239 = vst [vmem:[#allocation114_spill] sm:$0xff] %v16889_v24  ;;  %v21244_v24 = vunpack.i.h.bf16 %v21194_v43  ;;  %v21248_v43 = vld [vmem:[#allocation133_spill] sm:$0xff] }
 0x1e9   : > { %13579 = vmatpush3.msra.mxu1 %v16584_v58  ;;  %v13067_v23 = vpop.f32.mrf.mxu1  ;;  %5353 = vrot.lane.b32.xlu0 %v16773_v11, %s15346_s24  ;;  %v20894_v58 = vunpack.i.h.bf16 %v21195_v60  ;;  %v16905_v48 = vpop.f32.mrf.mxu0  ;;  %v21251_v60 = vld [vmem:[#allocation131_spill] sm:$0xff] }
 0x1ea   : > { %13464 = vmatmul.mubr.f32.gmra.mxu1 %v20888_v22  ;;  %13526 = vmatmul.mubr.msk.f32.gmra.mxu0 %vm280_vm0, %v16052_v57  ;;  %v2935_v22 = vpop.permute.xlu0 %2934  ;;  %21243 = vst [vmem:[#allocation113_spill] sm:$0xff] %v16905_v48  ;;  %v21252_v48 = vld [vmem:[#allocation130_spill] sm:$0xff] }
 0x1eb   : > { %13466 = vmatprep.mubr.f32.mxu1 %v20890_v33  ;;  %13528 = vmatprep.mubr.msk.f32.mxu0 %vm280_vm0, %v21240_v42  ;;  %v1277_v29 = vpop.f32.mrf.mxu1  ;;  %v21242_v33 = vld [vmem:[#allocation136_spill] sm:$0xff] }
 0x1ec   : > { %13580 = vmatprep.subr.mxu1 %v2937_v16  ;;  %5942 = vrot.lane.b32.xlu1 %v15281_v31, %s15348_s30  ;;  %v21245_v31 = vld [vmem:[#allocation135_spill] sm:$0xff] }
 0x1ed   : > { %13581 = vmatpush3.msra.mxu1 %v2937_v16  ;;  %v13070_v25 = vpop.f32.mrf.mxu1  ;;  %7752 = vrot.lane.b32.xlu0 %v16710_v4, %s15348_s30 }
 0x1ee   : > { %13467 = vmatmul.mubr.f32.gmra.mxu1 %v20892_v45  ;;  %13529 = vmatmul.mubr.msk.f32.gmra.mxu0 %vm280_vm0, %v21242_v33  ;;  %v21246_v45 = vld [vmem:[#allocation134_spill] sm:$0xff] }
 0x1ef   : > { %13469 = vmatprep.mubr.f32.mxu1 %v21244_v24  ;;  %13531 = vmatprep.mubr.msk.f32.mxu0 %vm280_vm0, %v21245_v31  ;;  %v1287_v16 = vpop.f32.mrf.mxu1  ;;  %v16919_v24 = vpop.f32.mrf.mxu0 }
 0x1f0   : > { %13582 = vmatprep.subr.mxu1 %v2935_v22  ;;  %7750 = vrot.lane.b32.xlu1 %v16731_v20, %s15348_s30  ;;  %21247 = vst [vmem:[#allocation112_spill] sm:$0xff] %v16919_v24  ;;  %v21254_v24 = vld [vmem:[#allocation129_spill] sm:$0xff] }
 0x1f1   : > { %13583 = vmatpush3.msra.mxu1 %v2935_v22  ;;  %v13073_v4 = vpop.f32.mrf.mxu1  ;;  %7748 = vrot.lane.b32.xlu0 %v16752_v1, %s15348_s30  ;;  %v21249_v1 = vld [vmem:[#allocation132_spill] sm:$0xff] }
 0x1f2   : > { %13470 = vmatmul.mubr.f32.gmra.mxu1 %v20894_v58  ;;  %13532 = vmatmul.mubr.msk.f32.gmra.mxu0 %vm280_vm0, %v21246_v45  ;;  %v16931_v58 = vpop.f32.mrf.mxu0 }
 0x1f3   : > { %13534 = vmatprep.mubr.msk.f32.mxu0 %vm280_vm0, %v21248_v43  ;;  %13584 = vmatprep.mubr.msk.f32.mxu1 %vm280_vm0, %v16836_v51  ;;  %v1297_v20 = vpop.f32.mrf.mxu1  ;;  %21250 = vst [vmem:[#allocation111_spill] sm:$0xff] %v16931_v58 }
 0x1f4   : > { %7746 = vrot.lane.b32.xlu1 %v16773_v11, %s15348_s30  ;;  %v16940_v11 = vpop.f32.mrf.mxu0  ;;  %s11364_s30 = sshll.u32 %s15393_s16, 7 }
 0x1f5   : > { %v13076_v22 = vpop.f32.mrf.mxu1  ;;  %21253 = vst [vmem:[#allocation110_spill] sm:$0xff] %v16940_v11  ;;  %v21258_v11 = vld [vmem:[#allocation126_spill] sm:$0xff]  ;;  %s10389_s9 = scalar_lea.hbm %s20601_s3, %s11364_s30 }
 0x1f6   : > { %13535 = vmatmul.mubr.msk.f32.gmra.mxu0 %vm280_vm0, %v21249_v1  ;;  %13585 = vmatmul.mubr.msk.f32.vlgmr.msra.gmra.mxu1 %vm280_vm0, %v16827_v40 }
 0x1f7   : > { %13537 = vmatprep.mubr.msk.f32.mxu0 %vm280_vm0, %v21251_v60  ;;  %13587 = vmatprep.mubr.msk.f32.mxu1 %vm280_vm0, %v1257_v12  ;;  %v1307_v62 = vpop.f32.mrf.mxu1  ;;  %v21255_v60 = vld [vmem:[#allocation128_spill] sm:$0xff]  ;;  %v16949_v12 = vpop.f32.mrf.mxu0 }
 0x1f8   : > { %21256 = vst [vmem:[#allocation109_spill] sm:$0xff] %v16949_v12  ;;  %v21261_v12 = vld [vmem:[#allocation124_spill] sm:$0xff] }
 0x1f9   : > { %v13079_v51 = vpop.f32.mrf.mxu1 }
 0x1fa   : > { %13538 = vmatmul.mubr.msk.f32.gmra.mxu0 %vm280_vm0, %v21252_v48  ;;  %13588 = vmatmul.mubr.msk.f32.gmra.mxu1 %vm280_vm0, %v16846_v18  ;;  %v21257_v48 = vld [vmem:[#allocation127_spill] sm:$0xff] }
 0x1fb   : > { %13540 = vmatprep.mubr.msk.f32.mxu0 %vm280_vm0, %v21254_v24  ;;  %13590 = vmatprep.mubr.msk.f32.mxu1 %vm280_vm0, %v1267_v14  ;;  %v1317_v40 = vpop.f32.mrf.mxu1  ;;  %v16957_v24 = vpop.f32.mrf.mxu0 }
 0x1fc   : > { %21259 = vst [vmem:[#allocation106_spill] sm:$0xff] %v16957_v24 }
 0x1fd   : > { %v13114_v58 = vpop.f32.mrf.mxu1 }
 0x1fe   : > { %13541 = vmatmul.mubr.msk.f32.gmra.mxu0 %vm280_vm0, %v21255_v60  ;;  %13591 = vmatmul.mubr.msk.f32.gmra.mxu1 %vm280_vm0, %v16863_v53  ;;  %v21260_v60 = vld [vmem:[#allocation125_spill] sm:$0xff] }
 0x1ff   : > { %13543 = vmatprep.mubr.msk.f32.mxu0 %vm280_vm0, %v21257_v48  ;;  %13593 = vmatprep.mubr.msk.f32.mxu1 %vm280_vm0, %v1277_v29  ;;  %v1392_v18 = vpop.f32.mrf.mxu1  ;;  %v16965_v29 = vpop.f32.mrf.mxu0  ;;  %v21263_v48 = vld [vmem:[#allocation123_spill] sm:$0xff] }
 0x200   : > { %21262 = vst [vmem:[#allocation104_spill] sm:$0xff] %v16965_v29 }
 0x202   : > { %13544 = vmatmul.mubr.msk.f32.gmra.mxu0 %vm280_vm0, %v21258_v11  ;;  %13594 = vmatmul.mubr.msk.f32.gmra.mxu1 %vm280_vm0, %v13067_v23  ;;  %v13117_v14 = vpop.f32.mrf.mxu1  ;;  %v21264_v11 = vld [vmem:[#allocation122_spill] sm:$0xff] }
 0x203   : > { %13546 = vmatprep.mubr.msk.f32.mxu0 %vm280_vm0, %v21260_v60  ;;  %13596 = vmatprep.mubr.msk.f32.mxu1 %vm280_vm0, %v1287_v16  ;;  %v16973_v16 = vpop.f32.mrf.mxu0 }
 0x204   : > { %v1402_v53 = vpop.f32.mrf.mxu1 }
 0x205   : > { %v16981_v29 = vpop.f32.mrf.mxu0 }
 0x206   : > { %13547 = vmatmul.mubr.msk.f32.gmra.mxu0 %vm280_vm0, %v21261_v12  ;;  %13597 = vmatmul.mubr.msk.f32.gmra.mxu1 %vm280_vm0, %v13070_v25  ;;  %21265 = vst [vmem:[#allocation102_spill] sm:$0xff] %v16981_v29 }
 0x207   : > { %13549 = vmatprep.mubr.msk.f32.mxu0 %vm280_vm0, %v21263_v48  ;;  %13599 = vmatprep.mubr.msk.f32.mxu1 %vm280_vm0, %v1297_v20  ;;  %v13120_v23 = vpop.f32.mrf.mxu1 }
 0x209   : > { %v1412_v24 = vpop.f32.mrf.mxu1 }
 0x20a   : > { %13550 = vmatmul.mubr.msk.f32.gmra.mxu0 %vm280_vm0, %v21264_v11  ;;  %13600 = vmatmul.mubr.msk.f32.gmra.mxu1 %vm280_vm0, %v13073_v4 }
 0x20b   : > { %13552 = vmatprep.mubr.msk.f32.mxu0 %vm280_vm0, %v16568_v13  ;;  %13602 = vmatprep.mubr.msk.f32.mxu1 %vm280_vm0, %v1307_v62  ;;  %v16989_v62 = vpop.f32.mrf.mxu0 }
 0x20c   : > { %v13123_v25 = vpop.f32.mrf.mxu1 }
 0x20d   : > { %v16997_v29 = vpop.f32.mrf.mxu0 }
 0x20e   : > { %13553 = vmatmul.mubr.msk.f32.gmra.mxu0 %vm280_vm0, %v16559_v15  ;;  %13603 = vmatmul.mubr.msk.f32.gmra.mxu1 %vm280_vm0, %v13076_v22  ;;  %v1422_v20 = vpop.f32.mrf.mxu1 }
 0x20f   : > { %13555 = vmatprep.mubr.msk.f32.mxu0 %vm280_vm0, %v16546_v50  ;;  %13605 = vmatprep.mubr.msk.f32.mxu1 %vm280_vm0, %v1317_v40 }
 0x211   : > { %v13126_v4 = vpop.f32.mrf.mxu1 }
 0x212   : > { %13556 = vmatmul.mubr.msk.f32.gmra.mxu0 %vm280_vm0, %v16533_v47  ;;  %13606 = vmatmul.mubr.msk.f32.gmra.mxu1 %vm280_vm0, %v13079_v51 }
 0x213   : > { %13558 = vmatprep.mubr.msk.f32.mxu0 %vm280_vm0, %v16520_v37  ;;  %13608 = vmatprep.mubr.msk.f32.mxu1 %vm280_vm0, %v1392_v18  ;;  %v1432_v22 = vpop.f32.mrf.mxu1  ;;  %v17005_v18 = vpop.f32.mrf.mxu0 }
 0x216   : > { %13559 = vmatmul.mubr.msk.f32.gmra.mxu0 %vm280_vm0, %v16509_v0  ;;  %13609 = vmatmul.mubr.msk.f32.gmra.mxu1 %vm280_vm0, %v13114_v58  ;;  %v13129_v40 = vpop.f32.mrf.mxu1 }
 0x217   : > { %13561 = vmatprep.mubr.msk.f32.mxu0 %vm280_vm0, %v16496_v28  ;;  %13611 = vmatprep.mubr.msk.f32.mxu1 %vm280_vm0, %v1402_v53  ;;  %v17013_v53 = vpop.f32.mrf.mxu0 }
 0x218   : > { %v1442_v51 = vpop.f32.mrf.mxu1 }
 0x21a   : > { %13562 = vmatmul.mubr.msk.f32.gmra.mxu0 %vm280_vm0, %v16485_v54  ;;  %13612 = vmatmul.mubr.msk.f32.gmra.mxu1 %vm280_vm0, %v13117_v14 }
 0x21b   : > { %13564 = vmatprep.mubr.msk.f32.mxu0 %vm280_vm0, %v16472_v32  ;;  %13614 = vmatprep.mubr.msk.f32.mxu1 %vm280_vm0, %v1412_v24  ;;  %v13132_v58 = vpop.f32.mrf.mxu1  ;;  %v17021_v32 = vpop.f32.mrf.mxu0 }
 0x21d   : > { %v1452_v0 = vpop.f32.mrf.mxu1 }
 0x21e   : > { %13565 = vmatmul.mubr.msk.f32.gmra.mxu0 %vm280_vm0, %v16461_v44  ;;  %13615 = vmatmul.mubr.msk.f32.gmra.mxu1 %vm280_vm0, %v13120_v23 }
 0x21f   : > { %13567 = vmatprep.mubr.msk.f32.mxu0 %vm280_vm0, %v16448_v27  ;;  %13617 = vmatprep.mubr.msk.f32.mxu1 %vm280_vm0, %v1422_v20 }
 0x220   : > { %v13135_v14 = vpop.f32.mrf.mxu1 }
 0x222   : > { %13568 = vmatmul.mubr.msk.f32.gmra.mxu0 %vm280_vm0, %v16437_v26  ;;  %13618 = vmatmul.mubr.msk.f32.gmra.mxu1 %vm280_vm0, %v13123_v25  ;;  %v1462_v24 = vpop.f32.mrf.mxu1 }
 0x223   : > { %13570 = vmatprep.mubr.msk.f32.mxu0 %vm280_vm0, %v16424_v35  ;;  %13620 = vmatprep.mubr.msk.f32.mxu1 %vm280_vm0, %v1432_v22 }
 0x225   : > { %v13170_v23 = vpop.f32.mrf.mxu1 }
 0x226   : > { %13571 = vmatmul.mubr.msk.f32.gmra.mxu0 %vm280_vm0, %v16413_v38  ;;  %13621 = vmatmul.mubr.msk.f32.gmra.mxu1 %vm280_vm0, %v13126_v4  ;;  %v17029_v20 = vpop.f32.mrf.mxu0 }
 0x227   : > { %21266 = vst [vmem:[#allocation100_spill] sm:$0xff] %v17029_v20  ;;  %13573 = vmatprep.mubr.msk.f32.mxu0 %vm280_vm0, %v16396_v49  ;;  %13623 = vmatprep.mubr.msk.f32.mxu1 %vm280_vm0, %v1442_v51  ;;  %v1537_v25 = vpop.f32.mrf.mxu1 }
 0x228   : > { %v17034_v26 = vpop.f32.mrf.mxu0 }
 0x229   : > { %21267 = vst [vmem:[#allocation99_spill] sm:$0xff] %v17034_v26 }
 0x22a   : > { %13574 = vmatmul.mubr.msk.f32.gmra.mxu0 %vm280_vm0, %v16387_v36  ;;  %13624 = vmatmul.mubr.msk.f32.gmra.mxu1 %vm280_vm0, %v13129_v40  ;;  %v4047_v22 = vpop.permute.xlu1 %4046 }
 0x22b   : > { %13688 = vmatprep.mubr.msk.f32.mxu0 %vm280_vm0, %v16044_v30  ;;  %13626 = vmatprep.mubr.msk.f32.mxu1 %vm280_vm0, %v1452_v0  ;;  %v13173_v4 = vpop.f32.mrf.mxu1  ;;  %v4045_v51 = vpop.permute.xlu0 %4044 }
 0x22c   : > { %v17042_v20 = vpop.f32.mrf.mxu0  ;;  %13784 = vmatprep.subr.mxu1 %v4047_v22 }
 0x22d   : > { %v1547_v49 = vpop.f32.mrf.mxu1  ;;  %13785 = vmatpush3.msra.mxu1 %v4047_v22  ;;  %v21270_v22 = vld [vmem:[#allocation103_spill] sm:$0xff] }
 0x22e   : > { %13689 = vmatmul.mubr.msk.f32.vlgmr.msra.gmra.mxu0 %vm280_vm0, %v21206_v7  ;;  %13627 = vmatmul.mubr.msk.f32.gmra.mxu1 %vm280_vm0, %v13132_v58  ;;  %v17047_v26 = vpop.f32.mrf.mxu0 }
 0x22f   : > { %13691 = vmatprep.mubr.msk.f32.mxu0 %vm280_vm0, %v21207_v39  ;;  %13629 = vmatprep.mubr.msk.f32.mxu1 %vm280_vm0, %v1462_v24  ;;  %v4043_v0 = vpop.permute.xlu1 %4042 }
 0x230   : > { %13786 = vmatprep.subr.mxu1 %v4045_v51  ;;  %v4041_v58 = vpop.permute.xlu0 %4040 }
 0x231   : > { %v13176_v30 = vpop.f32.mrf.mxu1  ;;  %13787 = vmatpush3.msra.mxu1 %v4045_v51 }
 0x232   : > { %13692 = vmatmul.mubr.msk.f32.gmra.mxu0 %vm280_vm0, %v21210_v41  ;;  %13630 = vmatmul.mubr.msk.f32.gmra.mxu1 %vm280_vm0, %v13135_v14  ;;  %v17055_v40 = vpop.f32.mrf.mxu0 }
 0x233   : > { %13694 = vmatprep.mubr.msk.f32.mxu0 %vm280_vm0, %v21211_v56  ;;  %13632 = vmatprep.mubr.msk.f32.mxu1 %vm280_vm0, %v1537_v25  ;;  %v1557_v7 = vpop.f32.mrf.mxu1 }
 0x234   : > { %v17060_v39 = vpop.f32.mrf.mxu0  ;;  %13788 = vmatprep.subr.mxu1 %v4043_v0 }
 0x235   : > { %13789 = vmatpush3.msra.mxu1 %v4043_v0 }
 0x236   : > { %13695 = vmatmul.mubr.msk.f32.gmra.mxu0 %vm280_vm0, %v21214_v63  ;;  %13633 = vmatmul.mubr.msk.f32.gmra.mxu1 %vm280_vm0, %v13170_v23  ;;  %v21268_v63 = vld [vmem:[#allocation108_spill] sm:$0xff] }
 0x237   : > { %13697 = vmatprep.mubr.msk.f32.mxu0 %vm280_vm0, %v21215_v19  ;;  %13635 = vmatprep.mubr.msk.f32.mxu1 %vm280_vm0, %v1547_v49  ;;  %v13179_v41 = vpop.f32.mrf.mxu1  ;;  %v21269_v49 = vld [vmem:[#allocation107_spill] sm:$0xff] }
 0x238   : > { %v17068_v56 = vpop.f32.mrf.mxu0  ;;  %13790 = vmatprep.subr.mxu1 %v4041_v58 }
 0x239   : > { %v1567_v14 = vpop.f32.mrf.mxu1  ;;  %13791 = vmatpush3.msra.mxu1 %v4041_v58 }
 0x23a   : > { %13698 = vmatmul.mubr.msk.f32.gmra.mxu0 %vm280_vm0, %v21218_v59  ;;  %13636 = vmatmul.mubr.msk.f32.gmra.mxu1 %vm280_vm0, %v13173_v4  ;;  %v17073_v24 = vpop.f32.mrf.mxu0 }
 0x23b   : > { %13700 = vmatprep.mubr.msk.f32.mxu0 %vm280_vm0, %v21268_v63  ;;  %13638 = vmatprep.mubr.msk.f32.mxu1 %vm280_vm0, %v1557_v7 }
 0x23d   : > { %v13182_v19 = vpop.f32.mrf.mxu1 }
 0x23e   : > { %13701 = vmatmul.mubr.msk.f32.gmra.mxu0 %vm280_vm0, %v21269_v49  ;;  %13639 = vmatmul.mubr.msk.f32.gmra.mxu1 %vm280_vm0, %v13176_v30  ;;  %v17081_v23 = vpop.f32.mrf.mxu0 }
 0x23f   : > { %13703 = vmatprep.mubr.msk.f32.mxu0 %vm280_vm0, %v21224_v10  ;;  %13641 = vmatprep.mubr.msk.f32.mxu1 %vm280_vm0, %v1567_v14  ;;  %v1577_v59 = vpop.f32.mrf.mxu1 }
 0x240   : > { %v17086_v25 = vpop.f32.mrf.mxu0 }
 0x242   : > { %13704 = vmatmul.mubr.msk.f32.gmra.mxu0 %vm280_vm0, %v21225_v52  ;;  %13642 = vmatmul.mubr.msk.f32.gmra.mxu1 %vm280_vm0, %v13179_v41 }
 0x243   : > { %13706 = vmatprep.mubr.msk.f32.mxu0 %vm280_vm0, %v21270_v22  ;;  %13644 = vmatprep.mubr.msk.f32.mxu1 %vm280_vm0, %v1577_v59  ;;  %v13185_v4 = vpop.f32.mrf.mxu1  ;;  %v21272_v59 = vld [vmem:[#allocation120_spill] sm:$0xff] }
 0x244   : > { %v17094_v51 = vpop.f32.mrf.mxu0 }
 0x245   : > { %v1587_v30 = vpop.f32.mrf.mxu1 }
 0x246   : > { %13707 = vmatmul.mubr.msk.f32.gmra.mxu0 %vm280_vm0, %v21227_v61  ;;  %13645 = vmatmul.mubr.msk.f32.gmra.mxu1 %vm280_vm0, %v13182_v19  ;;  %v17099_v10 = vpop.f32.mrf.mxu0 }
 0x247   : > { %13709 = vmatprep.mubr.msk.f32.mxu0 %vm280_vm0, %v21228_v21  ;;  %13647 = vmatprep.mubr.msk.f32.mxu1 %vm280_vm0, %v1587_v30  ;;  %v21273_v30 = vld [vmem:[#allocation119_spill] sm:$0xff] }
 0x248   : > { %v4771_v52 = vpop.permute.xlu1 %4770 }
 0x249   : > { %v13188_v0 = vpop.f32.mrf.mxu1  ;;  %13888 = vmatprep.subr.mxu0 %v4771_v52 }
 0x24a   : > { %13710 = vmatmul.mubr.msk.f32.gmra.mxu0 %vm280_vm0, %v21229_v3  ;;  %v17106_v7 = vpop.f32.mrf.mxu0  ;;  %13648 = vmatmul.mubr.msk.f32.gmra.mxu1 %vm280_vm0, %v13185_v4 }
 0x24b   : > { %13712 = vmatprep.mubr.msk.f32.mxu0 %vm280_vm0, %v16218_v17  ;;  %v1597_v61 = vpop.f32.mrf.mxu1  ;;  %13889 = vmatpush3.msra.mxu0 %v4771_v52  ;;  %v21274_v52 = vld [vmem:[#allocation118_spill] sm:$0xff] }
 0x24c   : > { %v17111_v58 = vpop.f32.mrf.mxu0  ;;  %13650 = vmatprep.mubr.msk.f32.mxu1 %vm280_vm0, %v1597_v61  ;;  %v21275_v61 = vld [vmem:[#allocation117_spill] sm:$0xff] }
 0x24d   : > { %v4769_v21 = vpop.permute.xlu1 %4768 }
 0x24e   : > { %13713 = vmatmul.mubr.msk.f32.gmra.mxu0 %vm280_vm0, %v16208_v9  ;;  %13651 = vmatmul.mubr.msk.f32.gmra.mxu1 %vm280_vm0, %v13188_v0 }
 0x24f   : > { %13715 = vmatprep.mubr.msk.f32.mxu0 %vm280_vm0, %v16202_v34  ;;  %v13191_v3 = vpop.f32.mrf.mxu1  ;;  %13890 = vmatprep.subr.mxu0 %v4769_v21 }
 0x250   : > { %v17119_v41 = vpop.f32.mrf.mxu0  ;;  %13891 = vmatpush3.msra.mxu0 %v4769_v21 }
 0x251   : > { %v1607_v17 = vpop.f32.mrf.mxu1 }
 0x252   : > { %13716 = vmatmul.mubr.msk.f32.gmra.mxu0 %vm280_vm0, %v16190_v8  ;;  %v17123_v14 = vpop.f32.mrf.mxu0  ;;  %13653 = vmatprep.mubr.msk.f32.mxu1 %vm280_vm0, %v1607_v17 }
 0x253   : > { %13718 = vmatprep.mubr.msk.f32.mxu0 %vm280_vm0, %v16182_v6  ;;  %13654 = vmatmul.mubr.msk.f32.gmra.mxu1 %vm280_vm0, %v13191_v3  ;;  %v21276_v3 = vld [vmem:[#allocation116_spill] sm:$0xff] }
 0x255   : > { %v13226_v9 = vpop.f32.mrf.mxu1 }
 0x256   : > { %13719 = vmatmul.mubr.msk.f32.gmra.mxu0 %vm280_vm0, %v16168_v55  ;;  %v17131_v34 = vpop.f32.mrf.mxu0 }
 0x257   : > { %13721 = vmatprep.mubr.msk.f32.mxu0 %vm280_vm0, %v16158_v46  ;;  %v1682_v63 = vpop.f32.mrf.mxu1  ;;  %v21271_v46 = vld [vmem:[#allocation121_spill] sm:$0xff] }
 0x258   : > { %v17135_v8 = vpop.f32.mrf.mxu0  ;;  %13656 = vmatprep.mubr.msk.f32.mxu1 %vm280_vm0, %v1682_v63 }
 0x259   : > { %v13229_v19 = vpop.f32.mrf.mxu1  ;;  %13657 = vmatmul.mubr.msk.f32.gmra.mxu1 %vm280_vm0, %v13226_v9 }
 0x25a   : > { %13722 = vmatmul.mubr.msk.f32.gmra.mxu0 %vm280_vm0, %v16144_v5  ;;  %v17141_v6 = vpop.f32.mrf.mxu0 }
 0x25b   : > { %13724 = vmatprep.mubr.msk.f32.mxu0 %vm280_vm0, %v16134_v2  ;;  %v1692_v55 = vpop.f32.mrf.mxu1 }
 0x25c   : > { %v17145_v49 = vpop.f32.mrf.mxu0  ;;  %13659 = vmatprep.mubr.msk.f32.mxu1 %vm280_vm0, %v1692_v55 }
 0x25d   : > { %13660 = vmatmul.mubr.msk.f32.gmra.mxu1 %vm280_vm0, %v13229_v19 }
 0x25e   : > { %13725 = vmatmul.mubr.msk.f32.gmra.mxu0 %vm280_vm0, %v21271_v46 }
 0x25f   : > { %13727 = vmatprep.mubr.msk.f32.mxu0 %vm280_vm0, %v21272_v59  ;;  %v13232_v22 = vpop.f32.mrf.mxu1 }
 0x260   : > { %v17153_v5 = vpop.f32.mrf.mxu0 }
 0x261   : > { %v1702_v4 = vpop.f32.mrf.mxu1 }
 0x262   : > { %13728 = vmatmul.mubr.msk.f32.gmra.mxu0 %vm280_vm0, %v21273_v30  ;;  %v17157_v2 = vpop.f32.mrf.mxu0  ;;  %13662 = vmatprep.mubr.msk.f32.mxu1 %vm280_vm0, %v1702_v4 }
 0x263   : > { %13730 = vmatprep.mubr.msk.f32.mxu0 %vm280_vm0, %v21274_v52  ;;  %13663 = vmatmul.mubr.msk.f32.gmra.mxu1 %vm280_vm0, %v13232_v22  ;;  %v5360_v52 = vpop.permute.xlu0 %5359 }
 0x264   : > { %13992 = vmatprep.subr.mxu1 %v5360_v52 }
 0x265   : > { %v13235_v0 = vpop.f32.mrf.mxu1 }
 0x266   : > { %13731 = vmatmul.mubr.msk.f32.gmra.mxu0 %vm280_vm0, %v21275_v61  ;;  %v17165_v21 = vpop.f32.mrf.mxu0 }
 0x267   : > { %13733 = vmatprep.mubr.msk.f32.mxu0 %vm280_vm0, %v21276_v3  ;;  %v1712_v17 = vpop.f32.mrf.mxu1  ;;  %v21278_v3 = vld [vmem:[#allocation131_spill] sm:$0xff] }
 0x268   : > { %v17169_v9 = vpop.f32.mrf.mxu0  ;;  %13665 = vmatprep.mubr.msk.f32.mxu1 %vm280_vm0, %v1712_v17 }
 0x269   : > { %v13238_v63 = vpop.f32.mrf.mxu1  ;;  %13666 = vmatmul.mubr.msk.f32.gmra.mxu1 %vm280_vm0, %v13235_v0 }
 0x26a   : > { %13734 = vmatmul.mubr.msk.f32.gmra.mxu0 %vm280_vm0, %v16052_v57  ;;  %v17175_v19 = vpop.f32.mrf.mxu0 }
 0x26b   : > { %13736 = vmatprep.mubr.msk.f32.mxu0 %vm280_vm0, %v21240_v42  ;;  %v1722_v55 = vpop.f32.mrf.mxu1 }
 0x26c   : > { %v17179_v46 = vpop.f32.mrf.mxu0  ;;  %13668 = vmatprep.mubr.msk.f32.mxu1 %vm280_vm0, %v1722_v55 }
 0x26d   : > { %v13241_v59 = vpop.f32.mrf.mxu1  ;;  %13669 = vmatmul.mubr.msk.f32.gmra.mxu1 %vm280_vm0, %v13238_v63  ;;  %v21279_v63 = vld [vmem:[#allocation130_spill] sm:$0xff] }
 0x26e   : > { %13737 = vmatmul.mubr.msk.f32.gmra.mxu0 %vm280_vm0, %v21242_v33  ;;  %v17185_v22 = vpop.f32.mrf.mxu0 }
 0x26f   : > { %13739 = vmatprep.mubr.msk.f32.mxu0 %vm280_vm0, %v21245_v31  ;;  %v1732_v57 = vpop.f32.mrf.mxu1 }
 0x270   : > { %v17189_v4 = vpop.f32.mrf.mxu0  ;;  %13671 = vmatprep.mubr.msk.f32.mxu1 %vm280_vm0, %v1732_v57  ;;  %v21282_v57 = vld [vmem:[#allocation129_spill] sm:$0xff] }
 0x271   : > { %v13244_v42 = vpop.f32.mrf.mxu1  ;;  %13672 = vmatmul.mubr.msk.f32.gmra.mxu1 %vm280_vm0, %v13241_v59  ;;  %v21280_v59 = vld [vmem:[#allocation114_spill] sm:$0xff] }
 0x272   : > { %13740 = vmatmul.mubr.msk.f32.gmra.mxu0 %vm280_vm0, %v21246_v45  ;;  %v17195_v30 = vpop.f32.mrf.mxu0  ;;  %v5358_v45 = vpop.permute.xlu0 %5357 }
 0x273   : > { %13742 = vmatprep.mubr.msk.f32.mxu0 %vm280_vm0, %v21248_v43  ;;  %v1742_v33 = vpop.f32.mrf.mxu1 }
 0x274   : > { %v17199_v31 = vpop.f32.mrf.mxu0  ;;  %13674 = vmatprep.mubr.msk.f32.mxu1 %vm280_vm0, %v1742_v33 }
 0x275   : > { %v13247_v0 = vpop.f32.mrf.mxu1  ;;  %13675 = vmatmul.mubr.msk.f32.gmra.mxu1 %vm280_vm0, %v13244_v42 }
 0x276   : > { %13743 = vmatmul.mubr.msk.f32.gmra.mxu0 %vm280_vm0, %v21249_v1  ;;  %v17205_v61 = vpop.f32.mrf.mxu0  ;;  %v17219_v1 = vpop.permute.xlu0 %4629 }
 0x277   : > { %21277 = vst [vmem:[#allocation142_spill] sm:$0xff] %v17205_v61  ;;  %13745 = vmatprep.mubr.msk.f32.mxu0 %vm280_vm0, %v21278_v3  ;;  %v1752_v17 = vpop.f32.mrf.mxu1  ;;  %21281 = vst [vmem:[#allocation137_spill] sm:$0xff] %v17219_v1  ;;  %v21290_v61 = vld [vmem:[#allocation113_spill] sm:$0xff] }
 0x278   : > { %v17209_v43 = vpop.f32.mrf.mxu0  ;;  %13677 = vmatprep.mubr.msk.f32.mxu1 %vm280_vm0, %v1752_v17  ;;  %v21286_v17 = vld [vmem:[#allocation128_spill] sm:$0xff] }
 0x279   : > { %13678 = vmatmul.mubr.msk.f32.gmra.mxu1 %vm280_vm0, %v13247_v0  ;;  %v21285_v0 = vld [vmem:[#allocation115_spill] sm:$0xff] }
 0x27a   : > { %13746 = vmatmul.mubr.msk.f32.gmra.mxu0 %vm280_vm0, %v21279_v63  ;;  %v17215_v55 = vpop.f32.mrf.mxu1  ;;  %13792 = vmatprep.mubr.msk.f32.mxu1 %vm280_vm0, %v21280_v59  ;;  %v21287_v63 = vld [vmem:[#allocation112_spill] sm:$0xff]  ;;  %v21288_v59 = vld [vmem:[#allocation127_spill] sm:$0xff] }
 0x27b   : > { %13748 = vmatprep.mubr.msk.f32.mxu0 %vm280_vm0, %v21282_v57  ;;  %v17223_v42 = vpop.f32.mrf.mxu0  ;;  %v5356_v57 = vpop.permute.xlu0 %5355 }
 0x27c   : > { %21283 = vst [vmem:[#allocation136_spill] sm:$0xff] %v17223_v42  ;;  %v17225_v33 = vpop.f32.mrf.mxu1 }
 0x27d   : > { %v17227_v3 = vpop.f32.mrf.mxu0  ;;  %13793 = vmatmul.mubr.msk.f32.vlgmr.msra.gmra.mxu1 %vm280_vm0, %v21285_v0  ;;  %v21291_v0 = vld [vmem:[#allocation126_spill] sm:$0xff] }
 0x27e   : > { %21284 = vst [vmem:[#allocation135_spill] sm:$0xff] %v17227_v3  ;;  %13749 = vmatmul.mubr.msk.f32.gmra.mxu0 %vm280_vm0, %v21286_v17  ;;  %13795 = vmatprep.mubr.msk.f32.mxu1 %vm280_vm0, %v21287_v63  ;;  %v21293_v63 = vld [vmem:[#allocation110_spill] sm:$0xff] }
 0x27f   : > { %13751 = vmatprep.mubr.msk.f32.mxu0 %vm280_vm0, %v21288_v59  ;;  %v17237_v1 = vpop.f32.mrf.mxu1  ;;  %13993 = vmatpush3.msra.mxu1 %v5360_v52 }
 0x280   : > { %v17239_v42 = vpop.f32.mrf.mxu0  ;;  %13994 = vmatprep.subr.mxu1 %v5358_v45 }
 0x281   : > { %21289 = vst [vmem:[#allocation134_spill] sm:$0xff] %v17239_v42  ;;  %v1982_v3 = vpop.f32.mrf.mxu1  ;;  %13796 = vmatmul.mubr.msk.f32.gmra.mxu1 %vm280_vm0, %v21290_v61  ;;  %v21294_v42 = vld [vmem:[#allocation111_spill] sm:$0xff]  ;;  %v5354_v61 = vpop.permute.xlu0 %5353 }
 0x282   : > { %13752 = vmatmul.mubr.msk.f32.gmra.mxu0 %vm280_vm0, %v21291_v0  ;;  %v17245_v17 = vpop.f32.mrf.mxu0  ;;  %13798 = vmatprep.mubr.msk.f32.mxu1 %vm280_vm0, %v21293_v63  ;;  %v21296_v63 = vld [vmem:[#allocation109_spill] sm:$0xff] }
 0x283   : > { %21292 = vst [vmem:[#allocation133_spill] sm:$0xff] %v17245_v17  ;;  %13754 = vmatprep.mubr.msk.f32.mxu0 %vm280_vm0, %v21260_v60  ;;  %13995 = vmatpush3.msra.mxu1 %v5358_v45  ;;  %v21295_v17 = vld [vmem:[#allocation106_spill] sm:$0xff] }
 0x284   : > { %v17251_v52 = vpop.f32.mrf.mxu1  ;;  %13996 = vmatprep.subr.mxu1 %v5356_v57 }
 0x285   : > { %v17253_v59 = vpop.f32.mrf.mxu0  ;;  %13799 = vmatmul.mubr.msk.f32.gmra.mxu1 %vm280_vm0, %v21294_v42 }
 0x286   : > { %13755 = vmatmul.mubr.msk.f32.gmra.mxu0 %vm280_vm0, %v21261_v12  ;;  %v1992_v0 = vpop.f32.mrf.mxu1  ;;  %13801 = vmatprep.mubr.msk.f32.mxu1 %vm280_vm0, %v21295_v17 }
 0x287   : > { %13757 = vmatprep.mubr.msk.f32.mxu0 %vm280_vm0, %v21263_v48  ;;  %v17263_v60 = vpop.f32.mrf.mxu0  ;;  %13997 = vmatpush3.msra.mxu1 %v5356_v57  ;;  %v21297_v57 = vld [vmem:[#allocation104_spill] sm:$0xff] }
 0x288   : > { %13998 = vmatprep.subr.mxu1 %v5354_v61 }
 0x289   : > { %v13347_v45 = vpop.f32.mrf.mxu1  ;;  %13802 = vmatmul.mubr.msk.f32.gmra.mxu1 %vm280_vm0, %v21296_v63  ;;  %v21299_v63 = vld [vmem:[#allocation141_spill] sm:$0xff] }
 0x28a   : > { %13758 = vmatmul.mubr.msk.f32.gmra.mxu0 %vm280_vm0, %v21264_v11  ;;  %v17269_v42 = vpop.f32.mrf.mxu0  ;;  %13804 = vmatprep.mubr.msk.f32.mxu1 %vm280_vm0, %v16973_v16 }
 0x28b   : > { %13760 = vmatprep.mubr.msk.f32.mxu0 %vm280_vm0, %v16568_v13  ;;  %v2002_v48 = vpop.f32.mrf.mxu1  ;;  %13999 = vmatpush3.msra.mxu1 %v5354_v61  ;;  %v21298_v61 = vld [vmem:[#allocation102_spill] sm:$0xff] }
 0x28c   : > { %v17275_v12 = vpop.f32.mrf.mxu0 }
 0x28d   : > { %13805 = vmatmul.mubr.msk.f32.gmra.mxu1 %vm280_vm0, %v21297_v57 }
 0x28e   : > { %13761 = vmatmul.mubr.msk.f32.gmra.mxu0 %vm280_vm0, %v16559_v15  ;;  %v13350_v17 = vpop.f32.mrf.mxu1  ;;  %13807 = vmatprep.mubr.msk.f32.mxu1 %vm280_vm0, %v16989_v62 }
 0x28f   : > { %13763 = vmatprep.mubr.msk.f32.mxu0 %vm280_vm0, %v16546_v50  ;;  %v17285_v11 = vpop.f32.mrf.mxu0 }
 0x290   : > { %v2012_v13 = vpop.f32.mrf.mxu1 }
 0x291   : > { %v17287_v16 = vpop.f32.mrf.mxu0  ;;  %13808 = vmatmul.mubr.msk.f32.gmra.mxu1 %vm280_vm0, %v21298_v61 }
 0x292   : > { %13764 = vmatmul.mubr.msk.f32.gmra.mxu0 %vm280_vm0, %v16533_v47  ;;  %13810 = vmatprep.mubr.msk.f32.mxu1 %vm280_vm0, %v17005_v18  ;;  %v21300_v18 = vld [vmem:[#allocation140_spill] sm:$0xff] }
 0x293   : > { %13766 = vmatprep.mubr.msk.f32.mxu0 %vm280_vm0, %v16520_v37  ;;  %v13353_v15 = vpop.f32.mrf.mxu1 }
 0x294   : > { %v17297_v62 = vpop.f32.mrf.mxu0 }
 0x295   : > { %v2022_v50 = vpop.f32.mrf.mxu1  ;;  %13811 = vmatmul.mubr.msk.f32.gmra.mxu1 %vm280_vm0, %v16997_v29 }
 0x296   : > { %13767 = vmatmul.mubr.msk.f32.gmra.mxu0 %vm280_vm0, %v21299_v63  ;;  %v17303_v57 = vpop.f32.mrf.mxu0  ;;  %13813 = vmatprep.mubr.msk.f32.mxu1 %vm280_vm0, %v17021_v32 }
 0x297   : > { %13769 = vmatprep.mubr.msk.f32.mxu0 %vm280_vm0, %v16496_v28 }
 0x298   : > { %v13356_v47 = vpop.f32.mrf.mxu1 }
 0x299   : > { %v17309_v37 = vpop.f32.mrf.mxu0  ;;  %13814 = vmatmul.mubr.msk.f32.gmra.mxu1 %vm280_vm0, %v17013_v53 }
 0x29a   : > { %13770 = vmatmul.mubr.msk.f32.gmra.mxu0 %vm280_vm0, %v16485_v54  ;;  %v2032_v29 = vpop.f32.mrf.mxu1  ;;  %13816 = vmatprep.mubr.msk.f32.mxu1 %vm280_vm0, %v17225_v33 }
 0x29b   : > { %13772 = vmatprep.mubr.msk.f32.mxu0 %vm280_vm0, %v21300_v18  ;;  %v17319_v32 = vpop.f32.mrf.mxu0 }
 0x29d   : > { %v13359_v61 = vpop.f32.mrf.mxu1  ;;  %13817 = vmatmul.mubr.msk.f32.gmra.mxu1 %vm280_vm0, %v17215_v55  ;;  %v21302_v55 = vld [vmem:[#allocation139_spill] sm:$0xff] }
 0x29e   : > { %v17323_v28 = vpop.f32.mrf.mxu0  ;;  %13773 = vmatmul.mubr.msk.f32.gmra.mxu0 %vm280_vm0, %v16461_v44  ;;  %13819 = vmatprep.mubr.msk.f32.mxu1 %vm280_vm0, %v1982_v3 }
 0x29f   : > { %13775 = vmatprep.mubr.msk.f32.mxu0 %vm280_vm0, %v16448_v27  ;;  %v2042_v54 = vpop.f32.mrf.mxu1 }
 0x2a0   : > { %v17330_v53 = vpop.f32.mrf.mxu0 }
 0x2a1   : > { %13820 = vmatmul.mubr.msk.f32.gmra.mxu1 %vm280_vm0, %v17237_v1 }
 0x2a2   : > { %v17334_v33 = vpop.f32.mrf.mxu1  ;;  %v17336_v63 = vpop.f32.mrf.mxu0  ;;  %13776 = vmatmul.mubr.msk.f32.gmra.mxu0 %vm280_vm0, %v21302_v55  ;;  %13822 = vmatprep.mubr.msk.f32.mxu1 %vm280_vm0, %v1992_v0  ;;  %v21305_v0 = vld [vmem:[#allocation138_spill] sm:$0xff] }
 0x2a3   : > { %21301 = vst [vmem:[#allocation132_spill] sm:$0xff] %v17336_v63  ;;  %13778 = vmatprep.mubr.msk.f32.mxu0 %vm280_vm0, %v16424_v35 }
 0x2a4   : > { %v17343_v44 = vpop.f32.mrf.mxu1  ;;  %v17345_v27 = vpop.f32.mrf.mxu0 }
 0x2a5   : > { %21303 = vst [vmem:[#allocation125_spill] sm:$0xff] %v17345_v27  ;;  %13823 = vmatmul.mubr.msk.f32.gmra.mxu1 %vm280_vm0, %v17251_v52 }
 0x2a6   : > { %v17349_v1 = vpop.f32.mrf.mxu1  ;;  %v17351_v3 = vpop.f32.mrf.mxu0  ;;  %13779 = vmatmul.mubr.msk.f32.gmra.mxu0 %vm280_vm0, %v16413_v38  ;;  %13825 = vmatprep.mubr.msk.f32.mxu1 %vm280_vm0, %v2002_v48 }
 0x2a7   : > { %21304 = vst [vmem:[#allocation124_spill] sm:$0xff] %v17351_v3  ;;  %13781 = vmatprep.mubr.msk.f32.mxu0 %vm280_vm0, %v21305_v0 }
 0x2a8   : > { %v17358_v35 = vpop.f32.mrf.mxu1  ;;  %v17360_v18 = vpop.f32.mrf.mxu0 }
 0x2a9   : > { %21306 = vst [vmem:[#allocation123_spill] sm:$0xff] %v17360_v18  ;;  %13826 = vmatmul.mubr.msk.f32.gmra.mxu1 %vm280_vm0, %v13347_v45 }
 0x2aa   : > { %v17363_v55 = vpop.f32.mrf.mxu1  ;;  %v17365_v52 = vpop.f32.mrf.mxu0  ;;  %13782 = vmatmul.mubr.msk.f32.gmra.mxu0 %vm280_vm0, %v16387_v36  ;;  %13828 = vmatprep.mubr.msk.f32.mxu1 %vm280_vm0, %v2012_v13 }
 0x2ab   : > { %21307 = vst [vmem:[#allocation122_spill] sm:$0xff] %v17365_v52 }
 0x2ac   : > { %v17370_v38 = vpop.f32.mrf.mxu1  ;;  %v17372_v48 = vpop.f32.mrf.mxu0 }
 0x2ad   : > { %21308 = vst [vmem:[#allocation108_spill] sm:$0xff] %v17372_v48  ;;  %13829 = vmatmul.mubr.msk.f32.gmra.mxu1 %vm280_vm0, %v13350_v17 }
 0x2ae   : > { %v17375_v0 = vpop.f32.mrf.mxu1  ;;  %v17377_v3 = vpop.f32.mrf.mxu0  ;;  %13831 = vmatprep.mubr.msk.f32.mxu1 %vm280_vm0, %v2022_v50 }
 0x2af   : > { %21309 = vst [vmem:[#allocation107_spill] sm:$0xff] %v17377_v3 }
 0x2b0   : > { %v17380_v45 = vpop.f32.mrf.mxu1  ;;  %v17382_v52 = vpop.f32.mrf.mxu0 }
 0x2b1   : > { %21310 = vst [vmem:[#allocation103_spill] sm:$0xff] %v17382_v52  ;;  %13832 = vmatmul.mubr.msk.f32.gmra.mxu1 %vm280_vm0, %v13353_v15 }
 0x2b2   : > { %v17385_v36 = vpop.f32.mrf.mxu1  ;;  %v17387_v13 = vpop.f32.mrf.mxu0  ;;  %13834 = vmatprep.mubr.msk.f32.mxu1 %vm280_vm0, %v2032_v29  ;;  %v21316_v29 = vld [vmem:[#allocation99_spill] sm:$0xff] }
 0x2b3   : > { %21311 = vst [vmem:[#allocation121_spill] sm:$0xff] %v17387_v13 }
 0x2b4   : > { %v17390_v48 = vpop.f32.mrf.mxu1  ;;  %v17392_v17 = vpop.f32.mrf.mxu0 }
 0x2b5   : > { %21312 = vst [vmem:[#allocation120_spill] sm:$0xff] %v17392_v17  ;;  %13835 = vmatmul.mubr.msk.f32.gmra.mxu1 %vm280_vm0, %v13356_v47 }
 0x2b6   : > { %v17395_v3 = vpop.f32.mrf.mxu0  ;;  %13837 = vmatprep.mubr.msk.f32.mxu1 %vm280_vm0, %v2042_v54  ;;  %v17398_v50 = vpop.f32.mrf.mxu1  ;;  %v21318_v54 = vld [vmem:[#allocation100_spill] sm:$0xff] }
 0x2b7   : > { %21313 = vst [vmem:[#allocation119_spill] sm:$0xff] %v17395_v3 }
 0x2b8   : > { %v17400_v52 = vpop.f32.mrf.mxu0  ;;  %v17402_v15 = vpop.f32.mrf.mxu1 }
 0x2b9   : > { %21314 = vst [vmem:[#allocation118_spill] sm:$0xff] %v17400_v52  ;;  %13838 = vmatmul.mubr.msk.f32.gmra.mxu1 %vm280_vm0, %v13359_v61 }
 0x2ba   : > { %v17405_v13 = vpop.f32.mrf.mxu0  ;;  %13840 = vmatprep.mubr.msk.f32.mxu1 %vm280_vm0, %v21316_v29  ;;  %v17409_v17 = vpop.f32.mrf.mxu1 }
 0x2bb   : > { %21315 = vst [vmem:[#allocation117_spill] sm:$0xff] %v17405_v13 }
 0x2bc   : > { %v17411_v47 = vpop.f32.mrf.mxu0  ;;  %v17413_v3 = vpop.f32.mrf.mxu1 }
 0x2bd   : > { %21317 = vst [vmem:[#allocation116_spill] sm:$0xff] %v17411_v47  ;;  %13841 = vmatmul.mubr.msk.f32.gmra.mxu1 %vm280_vm0, %v21318_v54 }
 0x2be   : > { %v17417_v18 = vpop.f32.mrf.mxu0  ;;  %13843 = vmatprep.mubr.msk.f32.mxu1 %vm280_vm0, %v17047_v26  ;;  %v17421_v61 = vpop.f32.mrf.mxu1 }
 0x2bf   : > { %21319 = vst [vmem:[#allocation131_spill] sm:$0xff] %v17417_v18  ;;  %v17435_v18 = vpop.permute.xlu1 %3524 }
 0x2c0   : > { %v17423_v13 = vpop.f32.mrf.mxu0  ;;  %v17425_v52 = vpop.f32.mrf.mxu1 }
 0x2c1   : > { %21320 = vst [vmem:[#allocation130_spill] sm:$0xff] %v17423_v13  ;;  %13844 = vmatmul.mubr.msk.f32.gmra.mxu1 %vm280_vm0, %v17042_v20 }
 0x2c2   : > { %v17429_v29 = vpop.f32.mrf.mxu0  ;;  %13846 = vmatprep.mubr.msk.f32.mxu1 %vm280_vm0, %v17060_v39  ;;  %v17433_v54 = vpop.f32.mrf.mxu1 }
 0x2c3   : > { %21321 = vst [vmem:[#allocation114_spill] sm:$0xff] %v17429_v29  ;;  %v4767_v29 = vpop.permute.xlu1 %4766 }
 0x2c4   : > { %v17437_v47 = vpop.f32.mrf.mxu0  ;;  %v17439_v26 = vpop.f32.mrf.mxu1  ;;  %13892 = vmatprep.subr.mxu0 %v4767_v29 }
 0x2c5   : > { %21322 = vst [vmem:[#allocation129_spill] sm:$0xff] %v17437_v47  ;;  %13847 = vmatmul.mubr.msk.f32.gmra.mxu1 %vm280_vm0, %v17055_v40  ;;  %13893 = vmatpush3.msra.mxu0 %v4767_v29 }
 0x2c6   : > { %v17443_v13 = vpop.f32.mrf.mxu0  ;;  %13849 = vmatprep.mubr.msk.f32.mxu1 %vm280_vm0, %v17073_v24  ;;  %v17447_v20 = vpop.f32.mrf.mxu1 }
 0x2c7   : > { %21323 = vst [vmem:[#allocation115_spill] sm:$0xff] %v17443_v13  ;;  %v4765_v24 = vpop.permute.xlu1 %4764 }
 0x2c8   : > { %v17449_v39 = vpop.f32.mrf.mxu0  ;;  %v17451_v63 = vpop.f32.mrf.mxu1  ;;  %13894 = vmatprep.subr.mxu0 %v4765_v24 }
 0x2c9   : > { %21324 = vst [vmem:[#allocation128_spill] sm:$0xff] %v17449_v39  ;;  %13850 = vmatmul.mubr.msk.f32.gmra.mxu1 %vm280_vm0, %v17068_v56  ;;  %13895 = vmatpush3.msra.mxu0 %v4765_v24 }
 0x2ca   : > { %v17455_v47 = vpop.f32.mrf.mxu0  ;;  %13852 = vmatprep.mubr.msk.f32.mxu1 %vm280_vm0, %v17086_v25  ;;  %v17459_v40 = vpop.f32.mrf.mxu1 }
 0x2cb   : > { %21325 = vst [vmem:[#allocation112_spill] sm:$0xff] %v17455_v47 }
 0x2cc   : > { %v17461_v13 = vpop.f32.mrf.mxu0  ;;  %v17463_v27 = vpop.f32.mrf.mxu1 }
 0x2cd   : > { %21326 = vst [vmem:[#allocation127_spill] sm:$0xff] %v17461_v13  ;;  %13853 = vmatmul.mubr.msk.f32.gmra.mxu1 %vm280_vm0, %v17081_v23 }
 0x2ce   : > { %v17467_v39 = vpop.f32.mrf.mxu0  ;;  %13855 = vmatprep.mubr.msk.f32.mxu1 %vm280_vm0, %v17099_v10  ;;  %v17471_v56 = vpop.f32.mrf.mxu1 }
 0x2cf   : > { %21327 = vst [vmem:[#allocation113_spill] sm:$0xff] %v17467_v39 }
 0x2d0   : > { %v17473_v25 = vpop.f32.mrf.mxu0  ;;  %v17475_v29 = vpop.f32.mrf.mxu1 }
 0x2d1   : > { %21328 = vst [vmem:[#allocation126_spill] sm:$0xff] %v17473_v25  ;;  %13856 = vmatmul.mubr.msk.f32.gmra.mxu1 %vm280_vm0, %v17094_v51 }
 0x2d2   : > { %v17479_v47 = vpop.f32.mrf.mxu0  ;;  %13858 = vmatprep.mubr.msk.f32.mxu1 %vm280_vm0, %v17111_v58  ;;  %v17483_v23 = vpop.f32.mrf.mxu1 }
 0x2d3   : > { %21329 = vst [vmem:[#allocation110_spill] sm:$0xff] %v17479_v47 }
 0x2d4   : > { %v17485_v24 = vpop.f32.mrf.mxu0  ;;  %v17487_v39 = vpop.f32.mrf.mxu1 }
 0x2d5   : > { %21330 = vst [vmem:[#allocation111_spill] sm:$0xff] %v17485_v24  ;;  %13859 = vmatmul.mubr.msk.f32.gmra.mxu1 %vm280_vm0, %v17106_v7 }
 0x2d6   : > { %v17491_v10 = vpop.f32.mrf.mxu0  ;;  %13861 = vmatprep.mubr.msk.f32.mxu1 %vm280_vm0, %v17123_v14  ;;  %v17495_v51 = vpop.f32.mrf.mxu1 }
 0x2d7   : > { %21331 = vst [vmem:[#allocation106_spill] sm:$0xff] %v17491_v10 }
 0x2d8   : > { %v17497_v47 = vpop.f32.mrf.mxu0  ;;  %v17499_v25 = vpop.f32.mrf.mxu1 }
 0x2d9   : > { %21332 = vst [vmem:[#allocation109_spill] sm:$0xff] %v17497_v47  ;;  %13862 = vmatmul.mubr.msk.f32.gmra.mxu1 %vm280_vm0, %v17119_v41 }
 0x2da   : > { %v17503_v58 = vpop.f32.mrf.mxu0  ;;  %13864 = vmatprep.mubr.msk.f32.mxu1 %vm280_vm0, %v17135_v8  ;;  %v17507_v7 = vpop.f32.mrf.mxu1 }
 0x2db   : > { %21333 = vst [vmem:[#allocation104_spill] sm:$0xff] %v17503_v58 }
 0x2dc   : > { %v17509_v10 = vpop.f32.mrf.mxu0  ;;  %v17511_v24 = vpop.f32.mrf.mxu1 }
 0x2dd   : > { %21334 = vst [vmem:[#allocation102_spill] sm:$0xff] %v17509_v10  ;;  %13865 = vmatmul.mubr.msk.f32.gmra.mxu1 %vm280_vm0, %v17131_v34 }
 0x2de   : > { %v17515_v14 = vpop.f32.mrf.mxu0  ;;  %13867 = vmatprep.mubr.msk.f32.mxu1 %vm280_vm0, %v17145_v49  ;;  %v17519_v41 = vpop.f32.mrf.mxu1 }
 0x2df   : > { %21335 = vst [vmem:[#allocation141_spill] sm:$0xff] %v17515_v14 }
 0x2e0   : > { %v17521_v58 = vpop.f32.mrf.mxu0  ;;  %v17523_v47 = vpop.f32.mrf.mxu1 }
 0x2e1   : > { %21336 = vst [vmem:[#allocation140_spill] sm:$0xff] %v17521_v58  ;;  %13868 = vmatmul.mubr.msk.f32.gmra.mxu1 %vm280_vm0, %v17141_v6 }
 0x2e2   : > { %v17527_v8 = vpop.f32.mrf.mxu0  ;;  %13870 = vmatprep.mubr.msk.f32.mxu1 %vm280_vm0, %v17157_v2  ;;  %v17531_v34 = vpop.f32.mrf.mxu1 }
 0x2e3   : > { %21337 = vst [vmem:[#allocation139_spill] sm:$0xff] %v17527_v8 }
 0x2e4   : > { %v17533_v14 = vpop.f32.mrf.mxu0  ;;  %v17535_v10 = vpop.f32.mrf.mxu1 }
 0x2e5   : > { %21338 = vst [vmem:[#allocation138_spill] sm:$0xff] %v17533_v14  ;;  %13871 = vmatmul.mubr.msk.f32.gmra.mxu1 %vm280_vm0, %v17153_v5 }
 0x2e6   : > { %v17539_v49 = vpop.f32.mrf.mxu0  ;;  %13873 = vmatprep.mubr.msk.f32.mxu1 %vm280_vm0, %v17343_v44  ;;  %v17543_v6 = vpop.f32.mrf.mxu1 }
 0x2e7   : > { %21339 = vst [vmem:[#allocation99_spill] sm:$0xff] %v17539_v49 }
 0x2e8   : > { %v17545_v8 = vpop.f32.mrf.mxu0  ;;  %v17547_v58 = vpop.f32.mrf.mxu1 }
 0x2e9   : > { %21340 = vst [vmem:[#allocation100_spill] sm:$0xff] %v17545_v8  ;;  %13874 = vmatmul.mubr.msk.f32.gmra.mxu1 %vm280_vm0, %v17334_v33 }
 0x2ea   : > { %v17551_v2 = vpop.f32.mrf.mxu0  ;;  %13876 = vmatprep.mubr.msk.f32.mxu1 %vm280_vm0, %v17358_v35  ;;  %v17555_v5 = vpop.f32.mrf.mxu1 }
 0x2eb   : > { %21341 = vst [vmem:[#allocation143_spill] sm:$0xff] %v17551_v2  ;;  %v3205_v2 = vadd.f32 %v17402_v15, %v17169_v9  ;;  %v3215_v9 = vadd.f32 %v17413_v3, %v17179_v46 }
 0x2ec   : > { %v17557_v49 = vpop.f32.mrf.mxu0  ;;  %v17559_v14 = vpop.f32.mrf.mxu1 }
 0x2ed   : > { %21342 = vst [vmem:[#allocation144_spill] sm:$0xff] %v17557_v49  ;;  %13877 = vmatmul.mubr.msk.f32.gmra.mxu1 %vm280_vm0, %v17349_v1  ;;  %v3527_v13 = vadd.f32 %v17435_v18, %v3205_v2  ;;  %v3529_v3 = vadd.f32 %v17435_v18, %v3215_v9  ;;  %v3225_v2 = vadd.f32 %v17425_v52, %v17189_v4 }
 0x2ee   : > { %v17563_v44 = vpop.f32.mrf.mxu0  ;;  %13879 = vmatprep.mubr.msk.f32.mxu1 %vm280_vm0, %v17370_v38  ;;  %v17567_v33 = vpop.f32.mrf.mxu1  ;;  %v3210_v38 = vadd.f32 %v17398_v50, %v17165_v21  ;;  %v3220_v21 = vadd.f32 %v17409_v17, %v17175_v19  ;;  %v3230_v17 = vadd.f32 %v17421_v61, %v17185_v22  ;;  %v3235_v9 = vadd.f32 %v17439_v26, %v17199_v31 }
 0x2ef   : > { %v3591_v46 = vmax.f32 %v3527_v13, 0.0  ;;  %v3593_v4 = vmax.f32 %v3529_v3, 0.0  ;;  %v3531_v52 = vadd.f32 %v17435_v18, %v3225_v2  ;;  %v3245_v26 = vadd.f32 %v17451_v63, %v17209_v43  ;;  %v21350_v63 = vld [vmem:[#allocation135_spill] sm:$0xff] }
 0x2f0   : > { %v17571_v35 = vpop.f32.mrf.mxu0  ;;  %v17573_v8 = vpop.f32.mrf.mxu1  ;;  %v3528_v50 = vadd.f32 %v17435_v18, %v3210_v38  ;;  %v3530_v13 = vadd.f32 %v17435_v18, %v3220_v21  ;;  %v3532_v61 = vadd.f32 %v17435_v18, %v3230_v17  ;;  %v3533_v31 = vadd.f32 %v17435_v18, %v3235_v9 }
 0x2f1   : > { %21343 = vst [vmem:[#allocation145_spill] sm:$0xff] %v17571_v35  ;;  %13880 = vmatmul.mubr.msk.f32.gmra.mxu1 %vm280_vm0, %v17363_v55  ;;  %v3595_v3 = vmax.f32 %v3531_v52, 0.0  ;;  %v3535_v43 = vadd.f32 %v17435_v18, %v3245_v26 }
 0x2f2   : > { %v17577_v49 = vpop.f32.mrf.mxu0  ;;  %13882 = vmatprep.mubr.msk.f32.mxu1 %vm280_vm0, %v17380_v45  ;;  %v17581_v1 = vpop.f32.mrf.mxu1  ;;  %v3592_v38 = vmax.f32 %v3528_v50, 0.0  ;;  %v3594_v22 = vmax.f32 %v3530_v13, 0.0  ;;  %v3240_v50 = vadd.f32 %v17433_v54, %v17195_v30  ;;  %v3596_v17 = vmax.f32 %v3532_v61, 0.0  ;;  %v21349_v54 = vld [vmem:[#allocation142_spill] sm:$0xff] }
 0x2f3   : > { %v3250_v52 = vadd.f32 %v17447_v20, %v21349_v54  ;;  %v3597_v9 = vmax.f32 %v3533_v31, 0.0  ;;  %v21352_v31 = vld [vmem:[#allocation136_spill] sm:$0xff]  ;;  %v3599_v54 = vmax.f32 %v3535_v43, 0.0  ;;  %v21355_v43 = vld [vmem:[#allocation134_spill] sm:$0xff] }
 0x2f4   : > { %v17588_v15 = vpop.f32.mrf.mxu0  ;;  %v17590_v35 = vpop.f32.mrf.mxu1  ;;  %v3534_v30 = vadd.f32 %v17435_v18, %v3240_v50  ;;  %v3260_v26 = vadd.f32 %v17459_v40, %v21352_v31 }
 0x2f5   : > { %21344 = vst [vmem:[#allocation146_spill] sm:$0xff] %v17588_v15  ;;  %13883 = vmatmul.mubr.msk.f32.gmra.mxu1 %vm280_vm0, %v17375_v0  ;;  %v3536_v20 = vadd.f32 %v17435_v18, %v3250_v52 }
 0x2f6   : > { %v17594_v55 = vpop.f32.mrf.mxu0  ;;  %13885 = vmatprep.mubr.msk.f32.mxu1 %vm280_vm0, %v17390_v48  ;;  %v17598_v45 = vpop.f32.mrf.mxu1  ;;  %v3598_v50 = vmax.f32 %v3534_v30, 0.0  ;;  %v3538_v40 = vadd.f32 %v17435_v18, %v3260_v26 }
 0x2f7   : > { %v3600_v52 = vmax.f32 %v3536_v20, 0.0 }
 0x2f8   : > { %v17606_v15 = vpop.f32.mrf.mxu0  ;;  %v17608_v0 = vpop.f32.mrf.mxu1  ;;  %v3602_v26 = vmax.f32 %v3538_v40, 0.0 }
 0x2f9   : > { %21345 = vst [vmem:[#allocation147_spill] sm:$0xff] %v17606_v15  ;;  %13886 = vmatmul.mubr.msk.f32.gmra.mxu1 %vm280_vm0, %v17385_v36 }
 0x2fa   : > { %v17612_v48 = vpop.f32.mrf.mxu0  ;;  %14000 = vmatprep.mubr.msk.f32.mxu1 %vm280_vm0, %v3591_v46  ;;  %v17615_v19 = vpop.f32.mrf.mxu1 }
 0x2fc   : > { %v17623_v15 = vpop.f32.mrf.mxu0  ;;  %v17625_v36 = vpop.f32.mrf.mxu1 }
 0x2fd   : > { %14001 = vmatmul.mubr.msk.f32.vlgmr.msra.gmra.mxu1 %vm280_vm0, %v3592_v38 }
 0x2fe   : > { %v17628_v46 = vpop.f32.mrf.mxu0  ;;  %14003 = vmatprep.mubr.msk.f32.mxu1 %vm280_vm0, %v3593_v4  ;;  %v17631_v21 = vpop.f32.mrf.mxu1 }
 0x2ff   : > { %21346 = vst [vmem:[#allocation148_spill] sm:$0xff] %v17628_v46 }
 0x300   : > { %v17639_v2 = vpop.f32.mrf.mxu0  ;;  %v17641_v38 = vpop.f32.mrf.mxu1 }
 0x301   : > { %21347 = vst [vmem:[#allocation149_spill] sm:$0xff] %v17639_v2  ;;  %14004 = vmatmul.mubr.msk.f32.gmra.mxu1 %vm280_vm0, %v3594_v22  ;;  %v3255_v2 = vadd.f32 %v17463_v27, %v21350_v63  ;;  %v21353_v63 = vld [vmem:[#allocation133_spill] sm:$0xff] }
 0x302   : > { %v17644_v4 = vpop.f32.mrf.mxu0  ;;  %14006 = vmatprep.mubr.msk.f32.mxu1 %vm280_vm0, %v3595_v3  ;;  %v17647_v13 = vpop.f32.mrf.mxu1 }
 0x303   : > { %21348 = vst [vmem:[#allocation150_spill] sm:$0xff] %v17644_v4  ;;  %v3537_v27 = vadd.f32 %v17435_v18, %v3255_v2  ;;  %v3270_v2 = vadd.f32 %v17471_v56, %v21355_v43 }
 0x304   : > { %v17655_v46 = vpop.f32.mrf.mxu0  ;;  %v17657_v22 = vpop.f32.mrf.mxu1 }
 0x305   : > { %21351 = vst [vmem:[#allocation142_spill] sm:$0xff] %v17655_v46  ;;  %14007 = vmatmul.mubr.msk.f32.gmra.mxu1 %vm280_vm0, %v3596_v17  ;;  %v3265_v46 = vadd.f32 %v17475_v29, %v21353_v63  ;;  %v3601_v31 = vmax.f32 %v3537_v27, 0.0  ;;  %v3275_v63 = vadd.f32 %v17487_v39, %v17263_v60  ;;  %v3540_v56 = vadd.f32 %v17435_v18, %v3270_v2 }
 0x306   : > { %v17660_v3 = vpop.f32.mrf.mxu0  ;;  %14009 = vmatprep.mubr.msk.f32.mxu1 %vm280_vm0, %v3597_v9  ;;  %v17663_v61 = vpop.f32.mrf.mxu1  ;;  %v3285_v39 = vadd.f32 %v17499_v25, %v17275_v12  ;;  %v3295_v25 = vadd.f32 %v17511_v24, %v17287_v16  ;;  %v3305_v16 = vadd.f32 %v17523_v47, %v17303_v57  ;;  %v3315_v47 = vadd.f32 %v17535_v10, %v17319_v32 }
 0x307   : > { %v3539_v29 = vadd.f32 %v17435_v18, %v3265_v46  ;;  %v3280_v46 = vadd.f32 %v17483_v23, %v17253_v59  ;;  %v3541_v60 = vadd.f32 %v17435_v18, %v3275_v63  ;;  %v3604_v40 = vmax.f32 %v3540_v56, 0.0 }
 0x308   : > { %v17671_v4 = vpop.f32.mrf.mxu0  ;;  %v17673_v17 = vpop.f32.mrf.mxu1  ;;  %v3290_v59 = vadd.f32 %v17495_v51, %v17269_v42  ;;  %v3543_v12 = vadd.f32 %v17435_v18, %v3285_v39  ;;  %v3300_v51 = vadd.f32 %v17507_v7, %v17285_v11  ;;  %v3310_v11 = vadd.f32 %v17519_v41, %v17297_v62 }
 0x309   : > { %21354 = vst [vmem:[#allocation135_spill] sm:$0xff] %v17671_v4  ;;  %14010 = vmatmul.mubr.msk.f32.gmra.mxu1 %vm280_vm0, %v3598_v50  ;;  %v3603_v27 = vmax.f32 %v3539_v29, 0.0  ;;  %v3542_v2 = vadd.f32 %v17435_v18, %v3280_v46  ;;  %v3605_v29 = vmax.f32 %v3541_v60, 0.0  ;;  %v3545_v60 = vadd.f32 %v17435_v18, %v3295_v25 }
 0x30a   : > { %v17676_v9 = vpop.f32.mrf.mxu0  ;;  %14012 = vmatprep.mubr.msk.f32.mxu1 %vm280_vm0, %v3599_v54  ;;  %v17679_v30 = vpop.f32.mrf.mxu1  ;;  %v3544_v42 = vadd.f32 %v17435_v18, %v3290_v59  ;;  %v3546_v59 = vadd.f32 %v17435_v18, %v3300_v51  ;;  %v3547_v57 = vadd.f32 %v17435_v18, %v3305_v16  ;;  %v3320_v62 = vadd.f32 %v17531_v34, %v17309_v37 }
 0x30b   : > { %v3606_v46 = vmax.f32 %v3542_v2, 0.0  ;;  %v3549_v32 = vadd.f32 %v17435_v18, %v3315_v47  ;;  %v3325_v10 = vadd.f32 %v17547_v58, %v17330_v53  ;;  %v3330_v37 = vadd.f32 %v17543_v6, %v17323_v28  ;;  %v21357_v28 = vld [vmem:[#allocation132_spill] sm:$0xff] }
 0x30c   : > { %v17687_v4 = vpop.f32.mrf.mxu0  ;;  %v17689_v50 = vpop.f32.mrf.mxu1  ;;  %v3608_v2 = vmax.f32 %v3544_v42, 0.0  ;;  %v3548_v42 = vadd.f32 %v17435_v18, %v3310_v11  ;;  %v3550_v16 = vadd.f32 %v17435_v18, %v3320_v62  ;;  %v3340_v6 = vadd.f32 %v17555_v5, %v21357_v28 }
 0x30d   : > { %14013 = vmatmul.mubr.msk.f32.gmra.mxu1 %vm280_vm0, %v3600_v52  ;;  %v3551_v11 = vadd.f32 %v17435_v18, %v3325_v10  ;;  %v3552_v47 = vadd.f32 %v17435_v18, %v3330_v37 }
 0x30e   : > { %v17692_v54 = vpop.f32.mrf.mxu0  ;;  %14015 = vmatprep.mubr.msk.f32.mxu1 %vm280_vm0, %v3601_v31  ;;  %v17695_v20 = vpop.f32.mrf.mxu1 }
 0x30f   : > { %v3616_v10 = vmax.f32 %v3552_v47, 0.0 }
 0x310   : > { %v17703_v43 = vpop.f32.mrf.mxu0  ;;  %v17705_v52 = vpop.f32.mrf.mxu1 }
 0x311   : > { %14016 = vmatmul.mubr.msk.f32.gmra.mxu1 %vm280_vm0, %v3602_v26 }
 0x312   : > { %v17708_v31 = vpop.f32.mrf.mxu0  ;;  %14018 = vmatprep.mubr.msk.f32.mxu1 %vm280_vm0, %v3603_v27  ;;  %v3607_v27 = vmax.f32 %v3543_v12, 0.0 }
 0x313   : > { %v17714_v23 = vpop.f32.mrf.mxu1 }
 0x314   : > { %v17719_v63 = vpop.f32.mrf.mxu0 }
 0x315   : > { %14019 = vmatmul.mubr.msk.f32.gmra.mxu1 %vm280_vm0, %v3604_v40  ;;  %v17722_v26 = vpop.f32.mrf.mxu1 }
 0x316   : > { %v17724_v56 = vpop.f32.mrf.mxu0  ;;  %14021 = vmatprep.mubr.msk.f32.mxu1 %vm280_vm0, %v3605_v29  ;;  %v3609_v29 = vmax.f32 %v3545_v60, 0.0  ;;  %v3612_v60 = vmax.f32 %v3548_v42, 0.0  ;;  %v3615_v42 = vmax.f32 %v3551_v11, 0.0 }
 0x318   : > { %v17733_v24 = vpop.f32.mrf.mxu0 }
 0x319   : > { %14022 = vmatmul.mubr.msk.f32.gmra.mxu1 %vm280_vm0, %v3606_v46  ;;  %v17736_v39 = vpop.f32.mrf.mxu1  ;;  %v3610_v46 = vmax.f32 %v3546_v59, 0.0  ;;  %v3613_v59 = vmax.f32 %v3549_v32, 0.0 }
 0x31a   : > { %v17738_v40 = vpop.f32.mrf.mxu0  ;;  %14024 = vmatprep.mubr.msk.f32.mxu1 %vm280_vm0, %v3607_v27  ;;  %v3611_v27 = vmax.f32 %v3547_v57, 0.0  ;;  %v3614_v57 = vmax.f32 %v3550_v16, 0.0  ;;  %v21359_v16 = vld [vmem:[#allocation124_spill] sm:$0xff] }
 0x31b   : > { %v17744_v7 = vpop.f32.mrf.mxu1  ;;  %v3350_v5 = vadd.f32 %v17567_v33, %v21359_v16  ;;  %v21362_v33 = vld [vmem:[#allocation122_spill] sm:$0xff] }
 0x31c   : > { %v17749_v12 = vpop.f32.mrf.mxu0 }
 0x31d   : > { %14025 = vmatmul.mubr.msk.f32.gmra.mxu1 %vm280_vm0, %v3608_v2  ;;  %v17752_v25 = vpop.f32.mrf.mxu1  ;;  %v3556_v47 = vadd.f32 %v17435_v18, %v3350_v5 }
 0x31e   : > { %14027 = vmatprep.mubr.msk.f32.mxu1 %vm280_vm0, %v3609_v29  ;;  %v17758_v41 = vpop.f32.mrf.mxu0  ;;  %v21356_v29 = vld [vmem:[#allocation125_spill] sm:$0xff] }
 0x31f   : > { %v17760_v51 = vpop.f32.mrf.mxu1  ;;  %v3335_v53 = vadd.f32 %v17559_v14, %v21356_v29 }
 0x320   : > { %v17770_v34 = vpop.f32.mrf.mxu0 }
 0x321   : > { %14028 = vmatmul.mubr.msk.f32.gmra.mxu1 %vm280_vm0, %v3610_v46  ;;  %v3553_v62 = vadd.f32 %v17435_v18, %v3335_v53 }
 0x322   : > { %14030 = vmatprep.mubr.msk.f32.mxu1 %vm280_vm0, %v3611_v27  ;;  %v17784_v46 = vpop.f32.mrf.mxu0  ;;  %v21358_v27 = vld [vmem:[#allocation123_spill] sm:$0xff] }
 0x323   : > { %v17772_v2 = vpop.f32.mrf.mxu1  ;;  %v3345_v14 = vadd.f32 %v17573_v8, %v21358_v27  ;;  %v3617_v11 = vmax.f32 %v3553_v62, 0.0  ;;  %v21361_v8 = vld [vmem:[#allocation108_spill] sm:$0xff] }
 0x324   : > { %v17796_v37 = vpop.f32.mrf.mxu0  ;;  %v3355_v53 = vadd.f32 %v17590_v35, %v21361_v8  ;;  %v21364_v35 = vld [vmem:[#allocation103_spill] sm:$0xff] }
 0x325   : > { %14031 = vmatmul.mubr.msk.f32.gmra.mxu1 %vm280_vm0, %v3612_v60  ;;  %v17778_v58 = vpop.f32.mrf.mxu1  ;;  %v3554_v60 = vadd.f32 %v17435_v18, %v3340_v6  ;;  %21360 = vst [vmem:[#allocation136_spill] sm:$0xff] %v17796_v37  ;;  %v3555_v29 = vadd.f32 %v17435_v18, %v3345_v14  ;;  %v3360_v6 = vadd.f32 %v17581_v1, %v21362_v33  ;;  %v21365_v1 = vld [vmem:[#allocation107_spill] sm:$0xff] }
 0x326   : > { %14033 = vmatprep.mubr.msk.f32.mxu1 %vm280_vm0, %v3613_v59  ;;  %v3557_v14 = vadd.f32 %v17435_v18, %v3355_v53  ;;  %v3365_v16 = vadd.f32 %v17608_v0, %v21364_v35  ;;  %v3370_v5 = vadd.f32 %v17598_v45, %v21365_v1  ;;  %v21367_v0 = vld [vmem:[#allocation120_spill] sm:$0xff]  ;;  %v21368_v45 = vld [vmem:[#allocation121_spill] sm:$0xff] }
 0x327   : > { %v3619_v27 = vmax.f32 %v3555_v29, 0.0  ;;  %v3375_v35 = vadd.f32 %v17625_v36, %v21367_v0  ;;  %v21370_v36 = vld [vmem:[#allocation118_spill] sm:$0xff] }
 0x328   : > { %v3621_v53 = vmax.f32 %v3557_v14, 0.0  ;;  %v3559_v33 = vadd.f32 %v17435_v18, %v3365_v16  ;;  %v3385_v0 = vadd.f32 %v17641_v38, %v21370_v36  ;;  %v21373_v38 = vld [vmem:[#allocation116_spill] sm:$0xff] }
 0x329   : > { %v17789_v32 = vpop.f32.mrf.mxu1  ;;  %14034 = vmatmul.mubr.msk.f32.gmra.mxu1 %vm280_vm0, %v3614_v57  ;;  %v3618_v57 = vmax.f32 %v3554_v60, 0.0  ;;  %v3558_v60 = vadd.f32 %v17435_v18, %v3360_v6  ;;  %v3380_v6 = vadd.f32 %v17615_v19, %v21368_v45  ;;  %v3561_v1 = vadd.f32 %v17435_v18, %v3375_v35  ;;  %v21371_v19 = vld [vmem:[#allocation119_spill] sm:$0xff] }
 0x32a   : > { %14036 = vmatprep.mubr.msk.f32.mxu1 %vm280_vm0, %v3615_v42  ;;  %v17810_v42 = vpop.f32.mrf.mxu0  ;;  %v3623_v16 = vmax.f32 %v3559_v33, 0.0  ;;  %v3563_v45 = vadd.f32 %v17435_v18, %v3385_v0  ;;  %v3395_v36 = vadd.f32 %v17657_v22, %v21373_v38 }
 0x32b   : > { %v17798_v59 = vpop.f32.mrf.mxu1  ;;  %21363 = vst [vmem:[#allocation133_spill] sm:$0xff] %v17810_v42  ;;  %v3625_v35 = vmax.f32 %v3561_v1, 0.0 }
 0x32c   : > { %v3627_v22 = vmax.f32 %v3563_v45, 0.0  ;;  %v3565_v38 = vadd.f32 %v17435_v18, %v3395_v36 }
 0x32d   : > { %v17803_v28 = vpop.f32.mrf.mxu1  ;;  %14037 = vmatmul.mubr.msk.f32.gmra.mxu1 %vm280_vm0, %v3616_v10  ;;  %v3620_v10 = vmax.f32 %v3556_v47, 0.0  ;;  %v3560_v47 = vadd.f32 %v17435_v18, %v3370_v5  ;;  %v3390_v5 = vadd.f32 %v17631_v21, %v21371_v19  ;;  %v21375_v19 = vld [vmem:[#allocation130_spill] sm:$0xff] }
 0x32e   : > { %14039 = vmatprep.mubr.msk.f32.mxu1 %vm280_vm0, %v3617_v11  ;;  %v17824_v11 = vpop.f32.mrf.mxu0  ;;  %v3405_v1 = vadd.f32 %v17673_v17, %v21375_v19  ;;  %v3629_v19 = vmax.f32 %v3565_v38, 0.0 }
 0x32f   : > { %v17812_v62 = vpop.f32.mrf.mxu1  ;;  %21366 = vst [vmem:[#allocation134_spill] sm:$0xff] %v17824_v11  ;;  %v3564_v21 = vadd.f32 %v17435_v18, %v3390_v5 }
 0x330   : > { %v3567_v36 = vadd.f32 %v17435_v18, %v3405_v1 }
 0x331   : > { %v17817_v8 = vpop.f32.mrf.mxu1  ;;  %14040 = vmatmul.mubr.msk.f32.gmra.mxu1 %vm280_vm0, %v3618_v57  ;;  %v3622_v57 = vmax.f32 %v3558_v60, 0.0  ;;  %v3562_v60 = vadd.f32 %v17435_v18, %v3380_v6  ;;  %v21374_v6 = vld [vmem:[#allocation117_spill] sm:$0xff]  ;;  %v3628_v17 = vmax.f32 %v3564_v21, 0.0 }
 0x332   : > { %14042 = vmatprep.mubr.msk.f32.mxu1 %vm280_vm0, %v3619_v27  ;;  %v17838_v27 = vpop.f32.mrf.mxu0  ;;  %v3631_v38 = vmax.f32 %v3567_v36, 0.0 }
 0x333   : > { %v17826_v29 = vpop.f32.mrf.mxu1  ;;  %21369 = vst [vmem:[#allocation125_spill] sm:$0xff] %v17838_v27 }
 0x335   : > { %v17831_v42 = vpop.f32.mrf.mxu1  ;;  %14043 = vmatmul.mubr.msk.f32.gmra.mxu1 %vm280_vm0, %v3620_v10  ;;  %v3624_v10 = vmax.f32 %v3560_v47, 0.0  ;;  %v3626_v47 = vmax.f32 %v3562_v60, 0.0 }
 0x336   : > { %14045 = vmatprep.mubr.msk.f32.mxu1 %vm280_vm0, %v3621_v53  ;;  %v17852_v53 = vpop.f32.mrf.mxu0 }
 0x337   : > { %v17840_v14 = vpop.f32.mrf.mxu1  ;;  %21372 = vst [vmem:[#allocation132_spill] sm:$0xff] %v17852_v53 }
 0x338   : > { %v17867_v0 = vpop.f32.mrf.mxu0 }
 0x339   : > { %v17845_v11 = vpop.f32.mrf.mxu1  ;;  %14046 = vmatmul.mubr.msk.f32.gmra.mxu1 %vm280_vm0, %v3622_v57  ;;  %21376 = vst [vmem:[#allocation123_spill] sm:$0xff] %v17867_v0  ;;  %v21381_v0 = vld [vmem:[#allocation146_spill] sm:$0xff] }
 0x33a   : > { %14048 = vmatprep.mubr.msk.f32.mxu1 %vm280_vm0, %v3623_v16  ;;  %v3400_v16 = vadd.f32 %v17647_v13, %v21374_v6  ;;  %v21379_v6 = vld [vmem:[#allocation131_spill] sm:$0xff] }
 0x33b   : > { %v17854_v33 = vpop.f32.mrf.mxu1  ;;  %v3410_v45 = vadd.f32 %v17663_v61, %v21379_v6  ;;  %v21383_v6 = vld [vmem:[#allocation128_spill] sm:$0xff] }
 0x33c   : > { %v3566_v5 = vadd.f32 %v17435_v18, %v3400_v16 }
 0x33d   : > { %v13794_v27 = vpop.f32.mrf.mxu1  ;;  %14049 = vmatmul.mubr.msk.f32.gmra.mxu1 %vm280_vm0, %v3624_v10  ;;  %v21377_v10 = vld [vmem:[#allocation145_spill] sm:$0xff] }
 0x33e   : > { %v4316_v57 = vadd.f32 %v13794_v27, %v17563_v44  ;;  %14051 = vmatprep.mubr.msk.f32.mxu1 %vm280_vm0, %v3625_v35  ;;  %v21378_v44 = vld [vmem:[#allocation137_spill] sm:$0xff]  ;;  %v3630_v1 = vmax.f32 %v3566_v5, 0.0 }
 0x33f   : > { %v4310_v53 = vpop.f32.mrf.mxu1 }
 0x340   : > { %v4311_v37 = vadd.f32 %v4310_v53, %v21377_v10  ;;  %v4633_v27 = vadd.f32 %v21378_v44, %v4316_v57  ;;  %v17880_v53 = vpop.f32.mrf.mxu0  ;;  %v21380_v10 = vld [vmem:[#allocation129_spill] sm:$0xff] }
 0x341   : > { %v13797_v35 = vpop.f32.mrf.mxu1  ;;  %14052 = vmatmul.mubr.msk.f32.gmra.mxu1 %vm280_vm0, %v3626_v47  ;;  %v3415_v47 = vadd.f32 %v17689_v50, %v21380_v10  ;;  %v3568_v50 = vadd.f32 %v17435_v18, %v3410_v45  ;;  %v21384_v10 = vld [vmem:[#allocation147_spill] sm:$0xff] }
 0x342   : > { %v4632_v60 = vadd.f32 %v21378_v44, %v4311_v37  ;;  %v4326_v13 = vadd.f32 %v13797_v35, %v17577_v49  ;;  %14054 = vmatprep.mubr.msk.f32.mxu1 %vm280_vm0, %v3627_v22  ;;  %v4697_v35 = vmax.f32 %v4633_v27, 0.0  ;;  %v17894_v27 = vpop.f32.mrf.mxu0 }
 0x343   : > { %v4320_v57 = vpop.f32.mrf.mxu1 }
 0x344   : > { %v4696_v37 = vmax.f32 %v4632_v60, 0.0  ;;  %v4321_v49 = vadd.f32 %v4320_v57, %v21381_v0  ;;  %v4635_v21 = vadd.f32 %v21378_v44, %v4326_v13  ;;  %v21382_v60 = vld [vmem:[#allocation114_spill] sm:$0xff] }
 0x345   : > { %v13800_v22 = vpop.f32.mrf.mxu1  ;;  %14055 = vmatmul.mubr.msk.f32.gmra.mxu1 %vm280_vm0, %v3628_v17  ;;  %v3420_v0 = vadd.f32 %v17679_v30, %v21382_v60  ;;  %v3569_v17 = vadd.f32 %v17435_v18, %v3415_v47  ;;  %v3632_v47 = vmax.f32 %v3568_v50, 0.0 }
 0x346   : > { %v4634_v61 = vadd.f32 %v21378_v44, %v4321_v49  ;;  %v4336_v16 = vadd.f32 %v13800_v22, %v17594_v55  ;;  %13896 = vmatprep.mubr.msk.f32.mxu0 %vm280_vm0, %v4696_v37  ;;  %14057 = vmatprep.mubr.msk.f32.mxu1 %vm280_vm0, %v3629_v19  ;;  %v3425_v55 = vadd.f32 %v17705_v52, %v21383_v6  ;;  %v4699_v5 = vmax.f32 %v4635_v21, 0.0  ;;  %v21385_v49 = vld [vmem:[#allocation115_spill] sm:$0xff] }
 0x347   : > { %v4330_v13 = vpop.f32.mrf.mxu1  ;;  %13897 = vmatmul.mubr.msk.f32.vlgmr.msra.gmra.mxu0 %vm280_vm0, %v4697_v35  ;;  %v3570_v52 = vadd.f32 %v17435_v18, %v3420_v0  ;;  %v3430_v35 = vadd.f32 %v17695_v20, %v21385_v49  ;;  %v21386_v21 = vld [vmem:[#allocation127_spill] sm:$0xff] }
 0x348   : > { %v4698_v57 = vmax.f32 %v4634_v61, 0.0  ;;  %v4331_v19 = vadd.f32 %v4330_v13, %v21384_v10  ;;  %v4637_v45 = vadd.f32 %v21378_v44, %v4336_v16  ;;  %v3435_v22 = vadd.f32 %v17722_v26, %v21386_v21  ;;  %v17912_v61 = vpop.f32.mrf.mxu0  ;;  %v21387_v26 = vld [vmem:[#allocation148_spill] sm:$0xff] }
 0x349   : > { %v13803_v36 = vpop.f32.mrf.mxu1  ;;  %14058 = vmatmul.mubr.msk.f32.gmra.mxu1 %vm280_vm0, %v3630_v1  ;;  %v3633_v1 = vmax.f32 %v3569_v17, 0.0  ;;  %v3634_v17 = vmax.f32 %v3570_v52, 0.0 }
 0x34a   : > { %v4636_v30 = vadd.f32 %v21378_v44, %v4331_v19  ;;  %v4346_v37 = vadd.f32 %v13803_v36, %v17612_v48  ;;  %13899 = vmatprep.mubr.msk.f32.mxu0 %vm280_vm0, %v4698_v57  ;;  %14060 = vmatprep.mubr.msk.f32.mxu1 %vm280_vm0, %v3631_v38  ;;  %v3571_v48 = vadd.f32 %v17435_v18, %v3425_v55  ;;  %v4701_v50 = vmax.f32 %v4637_v45, 0.0  ;;  %v21388_v57 = vld [vmem:[#allocation112_spill] sm:$0xff]  ;;  %v17927_v19 = vpop.f32.mrf.mxu0  ;;  %v21389_v36 = vld [vmem:[#allocation126_spill] sm:$0xff] }
 0x34b   : > { %v4340_v16 = vpop.f32.mrf.mxu1  ;;  %13900 = vmatmul.mubr.msk.f32.gmra.mxu0 %vm280_vm0, %v4699_v5  ;;  %v3572_v55 = vadd.f32 %v17435_v18, %v3430_v35  ;;  %v3573_v10 = vadd.f32 %v17435_v18, %v3435_v22  ;;  %v21391_v22 = vld [vmem:[#allocation150_spill] sm:$0xff] }
 0x34c   : > { %v4700_v60 = vmax.f32 %v4636_v30, 0.0  ;;  %v4341_v38 = vadd.f32 %v4340_v16, %v17623_v15  ;;  %v4639_v0 = vadd.f32 %v21378_v44, %v4346_v37  ;;  %v3440_v15 = vadd.f32 %v17714_v23, %v21388_v57 }
 0x34d   : > { %v13806_v13 = vpop.f32.mrf.mxu1  ;;  %14061 = vmatmul.mubr.msk.f32.gmra.mxu1 %vm280_vm0, %v3632_v47  ;;  %v3635_v45 = vmax.f32 %v3571_v48, 0.0  ;;  %v3445_v30 = vadd.f32 %v17744_v7, %v21389_v36  ;;  %v21390_v47 = vld [vmem:[#allocation149_spill] sm:$0xff]  ;;  %v3637_v48 = vmax.f32 %v3573_v10, 0.0  ;;  %v21395_v36 = vld [vmem:[#allocation110_spill] sm:$0xff] }
 0x34e   : > { %v4638_v20 = vadd.f32 %v21378_v44, %v4341_v38  ;;  %v4356_v6 = vadd.f32 %v13806_v13, %v21387_v26  ;;  %13902 = vmatprep.mubr.msk.f32.mxu0 %vm280_vm0, %v4700_v60  ;;  %14063 = vmatprep.mubr.msk.f32.mxu1 %vm280_vm0, %v3633_v1  ;;  %v4703_v52 = vmax.f32 %v4639_v0, 0.0  ;;  %v3636_v1 = vmax.f32 %v3572_v55, 0.0  ;;  %v21392_v60 = vld [vmem:[#allocation113_spill] sm:$0xff] }
 0x34f   : > { %v4350_v5 = vpop.f32.mrf.mxu1  ;;  %13903 = vmatmul.mubr.msk.f32.gmra.mxu0 %vm280_vm0, %v4701_v50  ;;  %v3574_v7 = vadd.f32 %v17435_v18, %v3440_v15  ;;  %v3450_v38 = vadd.f32 %v17736_v39, %v21392_v60  ;;  %v17942_v50 = vpop.f32.mrf.mxu0  ;;  %v3575_v13 = vadd.f32 %v17435_v18, %v3445_v30  ;;  %v3460_v30 = vadd.f32 %v17752_v25, %v21395_v36  ;;  %v21400_v36 = vld [vmem:[#allocation104_spill] sm:$0xff] }
 0x350   : > { %v4702_v37 = vmax.f32 %v4638_v20, 0.0  ;;  %v4351_v49 = vadd.f32 %v4350_v5, %v21390_v47  ;;  %v4641_v35 = vadd.f32 %v21378_v44, %v4356_v6  ;;  %v21393_v20 = vld [vmem:[#allocation111_spill] sm:$0xff] }
 0x351   : > { %v13809_v21 = vpop.f32.mrf.mxu1  ;;  %14064 = vmatmul.mubr.msk.f32.gmra.mxu1 %vm280_vm0, %v3634_v17  ;;  %v3455_v26 = vadd.f32 %v17760_v51, %v21393_v20  ;;  %v21394_v17 = vld [vmem:[#allocation142_spill] sm:$0xff]  ;;  %v3576_v51 = vadd.f32 %v17435_v18, %v3450_v38  ;;  %v3578_v60 = vadd.f32 %v17435_v18, %v3460_v30 }
 0x352   : > { %v4640_v23 = vadd.f32 %v21378_v44, %v4351_v49  ;;  %v4366_v16 = vadd.f32 %v13809_v21, %v21391_v22  ;;  %13905 = vmatprep.mubr.msk.f32.mxu0 %vm280_vm0, %v4702_v37  ;;  %14066 = vmatprep.mubr.msk.f32.mxu1 %vm280_vm0, %v3635_v45  ;;  %v4705_v55 = vmax.f32 %v4641_v35, 0.0  ;;  %v3638_v45 = vmax.f32 %v3574_v7, 0.0  ;;  %v21396_v37 = vld [vmem:[#allocation109_spill] sm:$0xff]  ;;  %v17960_v49 = vpop.f32.mrf.mxu0  ;;  %v21398_v38 = vld [vmem:[#allocation106_spill] sm:$0xff] }
 0x353   : > { %v4360_v0 = vpop.f32.mrf.mxu1  ;;  %13906 = vmatmul.mubr.msk.f32.gmra.mxu0 %vm280_vm0, %v4703_v52  ;;  %v3465_v47 = vadd.f32 %v17778_v58, %v21396_v37  ;;  %v3639_v35 = vmax.f32 %v3575_v13, 0.0 }
 0x354   : > { %v4704_v6 = vmax.f32 %v4640_v23, 0.0  ;;  %v4361_v57 = vadd.f32 %v4360_v0, %v21394_v17  ;;  %v4643_v15 = vadd.f32 %v21378_v44, %v4366_v16  ;;  %v21397_v23 = vld [vmem:[#allocation135_spill] sm:$0xff]  ;;  %v3470_v0 = vadd.f32 %v17772_v2, %v21398_v38  ;;  %v17975_v20 = vpop.f32.mrf.mxu0  ;;  %v21399_v17 = vld [vmem:[#allocation102_spill] sm:$0xff] }
 0x355   : > { %v13812_v10 = vpop.f32.mrf.mxu1  ;;  %14067 = vmatmul.mubr.msk.f32.gmra.mxu1 %vm280_vm0, %v3636_v1  ;;  %v3579_v13 = vadd.f32 %v17435_v18, %v3465_v47 }
 0x356   : > { %v4642_v39 = vadd.f32 %v21378_v44, %v4361_v57  ;;  %v4376_v5 = vadd.f32 %v13812_v10, %v17660_v3  ;;  %13908 = vmatprep.mubr.msk.f32.mxu0 %vm280_vm0, %v4704_v6  ;;  %14069 = vmatprep.mubr.msk.f32.mxu1 %vm280_vm0, %v3637_v48  ;;  %v3577_v3 = vadd.f32 %v17435_v18, %v3455_v26  ;;  %v4707_v16 = vmax.f32 %v4643_v15, 0.0  ;;  %v17990_v30 = vpop.f32.mrf.mxu0 }
 0x357   : > { %v4370_v52 = vpop.f32.mrf.mxu1  ;;  %13909 = vmatmul.mubr.msk.f32.gmra.mxu0 %vm280_vm0, %v4705_v55  ;;  %v3640_v48 = vmax.f32 %v3576_v51, 0.0  ;;  %v3643_v51 = vmax.f32 %v3579_v13, 0.0 }
 0x358   : > { %v4706_v21 = vmax.f32 %v4642_v39, 0.0  ;;  %v4371_v22 = vadd.f32 %v4370_v52, %v21397_v23  ;;  %v4645_v1 = vadd.f32 %v21378_v44, %v4376_v5  ;;  %v3641_v6 = vmax.f32 %v3577_v3, 0.0  ;;  %v21401_v52 = vld [vmem:[#allocation140_spill] sm:$0xff] }
 0x359   : > { %v13815_v7 = vpop.f32.mrf.mxu1  ;;  %14070 = vmatmul.mubr.msk.f32.gmra.mxu1 %vm280_vm0, %v3638_v45  ;;  %v3642_v45 = vmax.f32 %v3578_v60, 0.0 }
 0x35a   : > { %v4644_v25 = vadd.f32 %v21378_v44, %v4371_v22  ;;  %v4386_v58 = vadd.f32 %v13815_v7, %v17676_v9  ;;  %13911 = vmatprep.mubr.msk.f32.mxu0 %vm280_vm0, %v4706_v21  ;;  %14072 = vmatprep.mubr.msk.f32.mxu1 %vm280_vm0, %v3639_v35  ;;  %v3475_v9 = vadd.f32 %v17798_v59, %v21399_v17  ;;  %v4709_v15 = vmax.f32 %v4645_v1, 0.0  ;;  %v21402_v7 = vld [vmem:[#allocation141_spill] sm:$0xff] }
 0x35b   : > { %v4380_v26 = vpop.f32.mrf.mxu1  ;;  %13912 = vmatmul.mubr.msk.f32.gmra.mxu0 %vm280_vm0, %v4707_v16  ;;  %v3580_v59 = vadd.f32 %v17435_v18, %v3470_v0 }
 0x35c   : > { %v4708_v57 = vmax.f32 %v4644_v25, 0.0  ;;  %v4381_v55 = vadd.f32 %v4380_v26, %v17687_v4  ;;  %v4647_v10 = vadd.f32 %v21378_v44, %v4386_v58  ;;  %v3480_v4 = vadd.f32 %v17789_v32, %v21400_v36  ;;  %v21403_v25 = vld [vmem:[#allocation138_spill] sm:$0xff] }
 0x35d   : > { %v13818_v39 = vpop.f32.mrf.mxu1  ;;  %14073 = vmatmul.mubr.msk.f32.gmra.mxu1 %vm280_vm0, %v3640_v48  ;;  %v3581_v47 = vadd.f32 %v17435_v18, %v3475_v9  ;;  %v3644_v1 = vmax.f32 %v3580_v59, 0.0  ;;  %v3495_v58 = vadd.f32 %v17826_v29, %v21403_v25  ;;  %v18008_v48 = vpop.f32.mrf.mxu0  ;;  %v21408_v25 = vld [vmem:[#allocation143_spill] sm:$0xff] }
 0x35e   : > { %v4646_v2 = vadd.f32 %v21378_v44, %v4381_v55  ;;  %v4396_v5 = vadd.f32 %v13818_v39, %v17692_v54  ;;  %13914 = vmatprep.mubr.msk.f32.mxu0 %vm280_vm0, %v4708_v57  ;;  %14075 = vmatprep.mubr.msk.f32.mxu1 %vm280_vm0, %v3641_v6  ;;  %v3485_v54 = vadd.f32 %v17812_v62, %v21401_v52  ;;  %v4711_v21 = vmax.f32 %v4647_v10, 0.0  ;;  %v21404_v55 = vld [vmem:[#allocation139_spill] sm:$0xff] }
 0x35f   : > { %v4390_v37 = vpop.f32.mrf.mxu1  ;;  %13915 = vmatmul.mubr.msk.f32.gmra.mxu0 %vm280_vm0, %v4709_v15  ;;  %v3582_v62 = vadd.f32 %v17435_v18, %v3480_v4  ;;  %v3645_v38 = vmax.f32 %v3581_v47, 0.0  ;;  %v3585_v15 = vadd.f32 %v17435_v18, %v3495_v58  ;;  %v18023_v10 = vpop.f32.mrf.mxu0 }
 0x360   : > { %v4710_v35 = vmax.f32 %v4646_v2, 0.0  ;;  %v4391_v3 = vadd.f32 %v4390_v37, %v17703_v43  ;;  %v4649_v23 = vadd.f32 %v21378_v44, %v4396_v5  ;;  %v3490_v43 = vadd.f32 %v17803_v28, %v21402_v7  ;;  %v21405_v5 = vld [vmem:[#allocation100_spill] sm:$0xff] }
 0x361   : > { %v13821_v22 = vpop.f32.mrf.mxu1  ;;  %14076 = vmatmul.mubr.msk.f32.gmra.mxu1 %vm280_vm0, %v3642_v45  ;;  %v3646_v9 = vmax.f32 %v3582_v62, 0.0  ;;  %v3649_v52 = vmax.f32 %v3585_v15, 0.0 }
 0x362   : > { %v4648_v32 = vadd.f32 %v21378_v44, %v4391_v3  ;;  %v4406_v16 = vadd.f32 %v13821_v22, %v17708_v31  ;;  %13917 = vmatprep.mubr.msk.f32.mxu0 %vm280_vm0, %v4710_v35  ;;  %14078 = vmatprep.mubr.msk.f32.mxu1 %vm280_vm0, %v3643_v51  ;;  %v3583_v31 = vadd.f32 %v17435_v18, %v3485_v54  ;;  %v4713_v26 = vmax.f32 %v4649_v23, 0.0  ;;  %v21406_v54 = vld [vmem:[#allocation99_spill] sm:$0xff]  ;;  %v18038_v35 = vpop.f32.mrf.mxu0  ;;  %v21407_v23 = vld [vmem:[#allocation144_spill] sm:$0xff] }
 0x363   : > { %v4400_v60 = vpop.f32.mrf.mxu1  ;;  %13918 = vmatmul.mubr.msk.f32.gmra.mxu0 %vm280_vm0, %v4711_v21  ;;  %v3584_v57 = vadd.f32 %v17435_v18, %v3490_v43 }
 0x364   : > { %v4712_v0 = vmax.f32 %v4648_v32, 0.0  ;;  %v4401_v13 = vadd.f32 %v4400_v60, %v17719_v63  ;;  %v4651_v6 = vadd.f32 %v21378_v44, %v4406_v16  ;;  %v3500_v63 = vadd.f32 %v17817_v8, %v21404_v55  ;;  %v18054_v58 = vpop.f32.mrf.mxu0 }
 0x365   : > { %v13824_v17 = vpop.f32.mrf.mxu1  ;;  %14079 = vmatmul.mubr.msk.f32.gmra.mxu1 %vm280_vm0, %v3644_v1  ;;  %v3647_v2 = vmax.f32 %v3583_v31, 0.0  ;;  %v3648_v47 = vmax.f32 %v3584_v57, 0.0 }
 0x366   : > { %v4650_v28 = vadd.f32 %v21378_v44, %v4401_v13  ;;  %v4416_v29 = vadd.f32 %v13824_v17, %v17724_v56  ;;  %13920 = vmatprep.mubr.msk.f32.mxu0 %vm280_vm0, %v4712_v0  ;;  %14081 = vmatprep.mubr.msk.f32.mxu1 %vm280_vm0, %v3645_v38  ;;  %v3505_v56 = vadd.f32 %v17840_v14, %v21405_v5  ;;  %v4715_v51 = vmax.f32 %v4651_v6, 0.0 }
 0x367   : > { %v4410_v39 = vpop.f32.mrf.mxu1  ;;  %13921 = vmatmul.mubr.msk.f32.gmra.mxu0 %vm280_vm0, %v4713_v26  ;;  %v3586_v14 = vadd.f32 %v17435_v18, %v3500_v63  ;;  %v21409_v63 = vld [vmem:[#allocation136_spill] sm:$0xff] }
 0x368   : > { %v4714_v45 = vmax.f32 %v4650_v28, 0.0  ;;  %v4411_v59 = vadd.f32 %v4410_v39, %v17733_v24  ;;  %v4653_v36 = vadd.f32 %v21378_v44, %v4416_v29  ;;  %v3510_v24 = vadd.f32 %v17831_v42, %v21406_v54  ;;  %v21412_v54 = vld [vmem:[#allocation125_spill] sm:$0xff] }
 0x369   : > { %v13827_v4 = vpop.f32.mrf.mxu1  ;;  %14082 = vmatmul.mubr.msk.f32.gmra.mxu1 %vm280_vm0, %v3646_v9  ;;  %v3587_v21 = vadd.f32 %v17435_v18, %v3505_v56  ;;  %v3650_v43 = vmax.f32 %v3586_v14, 0.0  ;;  %v18066_v9 = vpop.f32.mrf.mxu0  ;;  %v21410_v56 = vld [vmem:[#allocation133_spill] sm:$0xff] }
 0x36a   : > { %v4652_v8 = vadd.f32 %v21378_v44, %v4411_v59  ;;  %v4426_v37 = vadd.f32 %v13827_v4, %v17738_v40  ;;  %13923 = vmatprep.mubr.msk.f32.mxu0 %vm280_vm0, %v4714_v45  ;;  %14084 = vmatprep.mubr.msk.f32.mxu1 %vm280_vm0, %v3647_v2  ;;  %v3515_v40 = vadd.f32 %v17854_v33, %v21407_v23  ;;  %v4717_v16 = vmax.f32 %v4653_v36, 0.0  ;;  %v21411_v4 = vld [vmem:[#allocation134_spill] sm:$0xff] }
 0x36b   : > { %v4420_v3 = vpop.f32.mrf.mxu1  ;;  %13924 = vmatmul.mubr.msk.f32.gmra.mxu0 %vm280_vm0, %v4715_v51  ;;  %v3588_v33 = vadd.f32 %v17435_v18, %v3510_v24  ;;  %v3651_v38 = vmax.f32 %v3587_v21, 0.0  ;;  %v18076_v59 = vpop.f32.mrf.mxu0 }
 0x36c   : > { %v4716_v22 = vmax.f32 %v4652_v8, 0.0  ;;  %v4421_v32 = vadd.f32 %v4420_v3, %v17749_v12  ;;  %v4655_v1 = vadd.f32 %v21378_v44, %v4426_v37  ;;  %v3520_v12 = vadd.f32 %v17845_v11, %v21408_v25  ;;  %v21413_v3 = vld [vmem:[#allocation6_spill] sm:$0xff] }
 0x36d   : > { %v13830_v62 = vpop.f32.mrf.mxu1  ;;  %14085 = vmatmul.mubr.msk.f32.gmra.mxu1 %vm280_vm0, %v3648_v47  ;;  %v3589_v31 = vadd.f32 %v17435_v18, %v3515_v40  ;;  %v3652_v28 = vmax.f32 %v3588_v33, 0.0  ;;  %v18086_v21 = vpop.f32.mrf.mxu0 }
 0x36e   : > { %v4654_v42 = vadd.f32 %v21378_v44, %v4421_v32  ;;  %v4436_v7 = vadd.f32 %v13830_v62, %v17758_v41  ;;  %13926 = vmatprep.mubr.msk.f32.mxu0 %vm280_vm0, %v4716_v22  ;;  %14087 = vmatprep.mubr.msk.f32.mxu1 %vm280_vm0, %v3649_v52  ;;  %v4719_v13 = vmax.f32 %v4655_v1, 0.0  ;;  %v3590_v29 = vadd.f32 %v17435_v18, %v3520_v12  ;;  %v21414_v22 = vld [vmem:[#allocation132_spill] sm:$0xff] }
 0x36f   : > { %v4430_v60 = vpop.f32.mrf.mxu1  ;;  %13927 = vmatmul.mubr.msk.f32.gmra.mxu0 %vm280_vm0, %v4717_v16  ;;  %v3653_v57 = vmax.f32 %v3589_v31, 0.0  ;;  %v18094_v33 = vpop.f32.mrf.mxu0 }
 0x370   : > { %v4718_v0 = vmax.f32 %v4654_v42, 0.0  ;;  %v4431_v41 = vadd.f32 %v4430_v60, %v17770_v34  ;;  %v4657_v26 = vadd.f32 %v21378_v44, %v4436_v7  ;;  %v3654_v18 = vmax.f32 %v3590_v29, 0.0  ;;  %v21415_v7 = vld [vmem:[#allocation123_spill] sm:$0xff] }
 0x371   : > { %v13833_v6 = vpop.f32.mrf.mxu1  ;;  %14088 = vmatmul.mubr.msk.f32.gmra.mxu1 %vm280_vm0, %v3650_v43 }
 0x372   : > { %v4656_v17 = vadd.f32 %v21378_v44, %v4431_v41  ;;  %v4446_v11 = vadd.f32 %v13833_v6, %v17784_v46  ;;  %13929 = vmatprep.mubr.msk.f32.mxu0 %vm280_vm0, %v4718_v0  ;;  %14090 = vmatprep.mubr.msk.f32.mxu1 %vm280_vm0, %v3651_v38  ;;  %v4721_v39 = vmax.f32 %v4657_v26, 0.0  ;;  %v18102_v26 = vpop.f32.mrf.mxu0 }
 0x373   : > { %v4440_v34 = vpop.f32.mrf.mxu1  ;;  %13930 = vmatmul.mubr.msk.f32.gmra.mxu0 %vm280_vm0, %v4719_v13 }
 0x374   : > { %v4720_v55 = vmax.f32 %v4656_v17, 0.0  ;;  %v4441_v15 = vadd.f32 %v4440_v34, %v21409_v63  ;;  %v4659_v2 = vadd.f32 %v21378_v44, %v4446_v11 }
 0x375   : > { %v13836_v46 = vpop.f32.mrf.mxu1  ;;  %14091 = vmatmul.mubr.msk.f32.gmra.mxu1 %vm280_vm0, %v3652_v28 }
 0x376   : > { %v4658_v5 = vadd.f32 %v21378_v44, %v4441_v15  ;;  %v4456_v45 = vadd.f32 %v13836_v46, %v21410_v56  ;;  %13932 = vmatprep.mubr.msk.f32.mxu0 %vm280_vm0, %v4720_v55  ;;  %14093 = vmatprep.mubr.msk.f32.mxu1 %vm280_vm0, %v3653_v57  ;;  %v4723_v37 = vmax.f32 %v4659_v2, 0.0 }
 0x377   : > { %v4450_v51 = vpop.f32.mrf.mxu1  ;;  %13933 = vmatmul.mubr.msk.f32.gmra.mxu0 %vm280_vm0, %v4721_v39 }
 0x378   : > { %v4722_v36 = vmax.f32 %v4658_v5, 0.0  ;;  %v4451_v8 = vadd.f32 %v4450_v51, %v21411_v4  ;;  %v4661_v47 = vadd.f32 %v21378_v44, %v4456_v45 }
 0x379   : > { %v13839_v14 = vpop.f32.mrf.mxu1  ;;  %14094 = vmatmul.mubr.msk.f32.gmra.mxu1 %vm280_vm0, %v3654_v18 }
 0x37a   : > { %v4660_v52 = vadd.f32 %v21378_v44, %v4451_v8  ;;  %v4466_v24 = vadd.f32 %v13839_v14, %v21412_v54  ;;  %13935 = vmatprep.mubr.msk.f32.mxu0 %vm280_vm0, %v4722_v36  ;;  %14184 = vmatprep.mubr.f32.mxu1 %v21413_v3  ;;  %v4725_v16 = vmax.f32 %v4661_v47, 0.0 }
 0x37b   : > { %v4460_v23 = vpop.f32.mrf.mxu1  ;;  %13936 = vmatmul.mubr.msk.f32.gmra.mxu0 %vm280_vm0, %v4723_v37 }
 0x37c   : > { %v4724_v40 = vmax.f32 %v4660_v52, 0.0  ;;  %v4461_v32 = vadd.f32 %v4460_v23, %v21414_v22  ;;  %v4663_v1 = vadd.f32 %v21378_v44, %v4466_v24 }
 0x37d   : > { %v13842_v62 = vpop.f32.mrf.mxu1 }
 0x37e   : > { %v4662_v42 = vadd.f32 %v21378_v44, %v4461_v32  ;;  %v4476_v43 = vadd.f32 %v13842_v62, %v21415_v7  ;;  %13938 = vmatprep.mubr.msk.f32.mxu0 %vm280_vm0, %v4724_v40  ;;  %v4727_v38 = vmax.f32 %v4663_v1, 0.0 }
 0x37f   : > { %v4470_v25 = vpop.f32.mrf.mxu1  ;;  %13939 = vmatmul.mubr.msk.f32.gmra.mxu0 %vm280_vm0, %v4725_v16 }
 0x380   : > { %v4726_v12 = vmax.f32 %v4662_v42, 0.0  ;;  %v4471_v60 = vadd.f32 %v4470_v25, %v17880_v53  ;;  %v4665_v31 = vadd.f32 %v21378_v44, %v4476_v43 }
 0x381   : > { %v13845_v0 = vpop.f32.mrf.mxu1 }
 0x382   : > { %v4664_v41 = vadd.f32 %v21378_v44, %v4471_v60  ;;  %v4486_v13 = vadd.f32 %v13845_v0, %v17894_v27  ;;  %13941 = vmatprep.mubr.msk.f32.mxu0 %vm280_vm0, %v4726_v12  ;;  %v4729_v28 = vmax.f32 %v4665_v31, 0.0  ;;  %v18110_v27 = vpop.f32.mrf.mxu0 }
 0x383   : > { %v4480_v6 = vpop.f32.mrf.mxu1  ;;  %13942 = vmatmul.mubr.msk.f32.gmra.mxu0 %vm280_vm0, %v4727_v38 }
 0x384   : > { %v4728_v17 = vmax.f32 %v4664_v41, 0.0  ;;  %v4481_v11 = vadd.f32 %v4480_v6, %v17912_v61  ;;  %v4667_v53 = vadd.f32 %v21378_v44, %v4486_v13 }
 0x385   : > { %v13848_v29 = vpop.f32.mrf.mxu1 }
 0x386   : > { %v4666_v34 = vadd.f32 %v21378_v44, %v4481_v11  ;;  %v4496_v57 = vadd.f32 %v13848_v29, %v17927_v19  ;;  %13944 = vmatprep.mubr.msk.f32.mxu0 %vm280_vm0, %v4728_v17  ;;  %v4731_v39 = vmax.f32 %v4667_v53, 0.0  ;;  %v18118_v19 = vpop.f32.mrf.mxu0 }
 0x387   : > { %v4490_v55 = vpop.f32.mrf.mxu1  ;;  %13945 = vmatmul.mubr.msk.f32.gmra.mxu0 %vm280_vm0, %v4729_v28 }
 0x388   : > { %v4730_v63 = vmax.f32 %v4666_v34, 0.0  ;;  %v4491_v15 = vadd.f32 %v4490_v55, %v17942_v50  ;;  %v4669_v61 = vadd.f32 %v21378_v44, %v4496_v57 }
 0x389   : > { %v13851_v2 = vpop.f32.mrf.mxu1 }
 0x38a   : > { %v4668_v46 = vadd.f32 %v21378_v44, %v4491_v15  ;;  %v4506_v5 = vadd.f32 %v13851_v2, %v17960_v49  ;;  %13947 = vmatprep.mubr.msk.f32.mxu0 %vm280_vm0, %v4730_v63  ;;  %v4733_v51 = vmax.f32 %v4669_v61, 0.0  ;;  %v18126_v49 = vpop.f32.mrf.mxu0 }
 0x38b   : > { %v4500_v56 = vpop.f32.mrf.mxu1  ;;  %13948 = vmatmul.mubr.msk.f32.gmra.mxu0 %vm280_vm0, %v4731_v39 }
 0x38c   : > { %v4732_v45 = vmax.f32 %v4668_v46, 0.0  ;;  %v4501_v18 = vadd.f32 %v4500_v56, %v17975_v20  ;;  %v4671_v50 = vadd.f32 %v21378_v44, %v4506_v5 }
 0x38d   : > { %v13854_v36 = vpop.f32.mrf.mxu1 }
 0x38e   : > { %v4670_v4 = vadd.f32 %v21378_v44, %v4501_v18  ;;  %v4516_v8 = vadd.f32 %v13854_v36, %v17990_v30  ;;  %13950 = vmatprep.mubr.msk.f32.mxu0 %vm280_vm0, %v4732_v45  ;;  %v4735_v52 = vmax.f32 %v4671_v50, 0.0  ;;  %v3981_v30 = vpop.f32.mrf.mxu0 }
 0x38f   : > { %v4510_v37 = vpop.f32.mrf.mxu1  ;;  %13951 = vmatmul.mubr.msk.f32.gmra.mxu0 %vm280_vm0, %v4733_v51 }
 0x390   : > { %v4734_v47 = vmax.f32 %v4670_v4, 0.0  ;;  %v4511_v14 = vadd.f32 %v4510_v37, %v18008_v48  ;;  %v4673_v20 = vadd.f32 %v21378_v44, %v4516_v8 }
 0x391   : > { %v13857_v54 = vpop.f32.mrf.mxu1 }
 0x392   : > { %v4672_v24 = vadd.f32 %v21378_v44, %v4511_v14  ;;  %v4526_v3 = vadd.f32 %v13857_v54, %v18023_v10  ;;  %13953 = vmatprep.mubr.msk.f32.mxu0 %vm280_vm0, %v4734_v47  ;;  %v4737_v32 = vmax.f32 %v4673_v20, 0.0  ;;  %v13771_v10 = vpop.f32.mrf.mxu0 }
 0x393   : > { %v4520_v23 = vpop.f32.mrf.mxu1  ;;  %13954 = vmatmul.mubr.msk.f32.gmra.mxu0 %vm280_vm0, %v4735_v52 }
 0x394   : > { %v4736_v40 = vmax.f32 %v4672_v24, 0.0  ;;  %v4521_v22 = vadd.f32 %v4520_v23, %v18038_v35  ;;  %v4675_v48 = vadd.f32 %v21378_v44, %v4526_v3 }
 0x395   : > { %v13860_v16 = vpop.f32.mrf.mxu1 }
 0x396   : > { %v4674_v1 = vadd.f32 %v21378_v44, %v4521_v22  ;;  %v4536_v62 = vadd.f32 %v13860_v16, %v18054_v58  ;;  %13956 = vmatprep.mubr.msk.f32.mxu0 %vm280_vm0, %v4736_v40  ;;  %v4739_v25 = vmax.f32 %v4675_v48, 0.0  ;;  %v3991_v58 = vpop.f32.mrf.mxu0 }
 0x397   : > { %v4530_v42 = vpop.f32.mrf.mxu1  ;;  %13957 = vmatmul.mubr.msk.f32.gmra.mxu0 %vm280_vm0, %v4737_v32 }
 0x398   : > { %v4738_v7 = vmax.f32 %v4674_v1, 0.0  ;;  %v4531_v43 = vadd.f32 %v4530_v42, %v18066_v9  ;;  %v4677_v35 = vadd.f32 %v21378_v44, %v4536_v62 }
 0x399   : > { %v13863_v12 = vpop.f32.mrf.mxu1 }
 0x39a   : > { %v4676_v60 = vadd.f32 %v21378_v44, %v4531_v43  ;;  %v4546_v38 = vadd.f32 %v13863_v12, %v18076_v59  ;;  %13959 = vmatprep.mubr.msk.f32.mxu0 %vm280_vm0, %v4738_v7  ;;  %v4741_v13 = vmax.f32 %v4677_v35, 0.0  ;;  %v13774_v59 = vpop.f32.mrf.mxu0 }
 0x39b   : > { %v4540_v31 = vpop.f32.mrf.mxu1  ;;  %13960 = vmatmul.mubr.msk.f32.gmra.mxu0 %vm280_vm0, %v4739_v25 }
 0x39c   : > { %v4740_v0 = vmax.f32 %v4676_v60, 0.0  ;;  %v4541_v41 = vadd.f32 %v4540_v31, %v18086_v21  ;;  %v4679_v9 = vadd.f32 %v21378_v44, %v4546_v38 }
 0x39d   : > { %v13866_v6 = vpop.f32.mrf.mxu1 }
 0x39e   : > { %v4678_v17 = vadd.f32 %v21378_v44, %v4541_v41  ;;  %v4556_v11 = vadd.f32 %v13866_v6, %v18094_v33  ;;  %13962 = vmatprep.mubr.msk.f32.mxu0 %vm280_vm0, %v4740_v0  ;;  %v4743_v34 = vmax.f32 %v4679_v9, 0.0  ;;  %v4001_v33 = vpop.f32.mrf.mxu0 }
 0x39f   : > { %v4550_v28 = vpop.f32.mrf.mxu1  ;;  %13963 = vmatmul.mubr.msk.f32.gmra.mxu0 %vm280_vm0, %v4741_v13 }
 0x3a0   : > { %v4742_v53 = vmax.f32 %v4678_v17, 0.0  ;;  %v4551_v29 = vadd.f32 %v4550_v28, %v18102_v26  ;;  %v4681_v21 = vadd.f32 %v21378_v44, %v4556_v11 }
 0x3a1   : > { %v13869_v57 = vpop.f32.mrf.mxu1 }
 0x3a2   : > { %v4680_v55 = vadd.f32 %v21378_v44, %v4551_v29  ;;  %v4566_v63 = vadd.f32 %v13869_v57, %v18110_v27  ;;  %13965 = vmatprep.mubr.msk.f32.mxu0 %vm280_vm0, %v4742_v53  ;;  %v4745_v2 = vmax.f32 %v4681_v21, 0.0  ;;  %v13777_v27 = vpop.f32.mrf.mxu0 }
 0x3a3   : > { %v4560_v15 = vpop.f32.mrf.mxu1  ;;  %13966 = vmatmul.mubr.msk.f32.gmra.mxu0 %vm280_vm0, %v4743_v34 }
 0x3a4   : > { %v4744_v39 = vmax.f32 %v4680_v55, 0.0  ;;  %v4561_v61 = vadd.f32 %v4560_v15, %v18118_v19  ;;  %v4683_v26 = vadd.f32 %v21378_v44, %v4566_v63  ;;  %v4011_v37 = vpop.f32.mrf.mxu0 }
 0x3a5   : > { %v13872_v46 = vpop.f32.mrf.mxu1 }
 0x3a6   : > { %v4682_v5 = vadd.f32 %v21378_v44, %v4561_v61  ;;  %v4576_v56 = vadd.f32 %v13872_v46, %v18126_v49  ;;  %13968 = vmatprep.mubr.msk.f32.mxu0 %vm280_vm0, %v4744_v39  ;;  %v4747_v50 = vmax.f32 %v4683_v26, 0.0 }
 0x3a7   : > { %v4570_v45 = vpop.f32.mrf.mxu1  ;;  %13969 = vmatmul.mubr.msk.f32.gmra.mxu0 %vm280_vm0, %v4745_v2  ;;  %v21416_v2 = vld [vmem:[#allocation5_spill] sm:$0xff] }
 0x3a8   : > { %v4746_v18 = vmax.f32 %v4682_v5, 0.0  ;;  %v4571_v51 = vadd.f32 %v4570_v45, %v3981_v30  ;;  %v4685_v36 = vadd.f32 %v21378_v44, %v4576_v56  ;;  %v13780_v30 = vpop.f32.mrf.mxu0 }
 0x3a9   : > { %v13875_v19 = vpop.f32.mrf.mxu1 }
 0x3aa   : > { %v4684_v4 = vadd.f32 %v21378_v44, %v4571_v51  ;;  %v4586_v8 = vadd.f32 %v13875_v19, %v13771_v10  ;;  %13971 = vmatprep.mubr.msk.f32.mxu0 %vm280_vm0, %v4746_v18  ;;  %v4749_v52 = vmax.f32 %v4685_v36, 0.0  ;;  %v4021_v10 = vpop.f32.mrf.mxu0 }
 0x3ab   : > { %v4580_v47 = vpop.f32.mrf.mxu1  ;;  %13972 = vmatmul.mubr.msk.f32.gmra.mxu0 %vm280_vm0, %v4747_v50 }
 0x3ac   : > { %v4748_v49 = vmax.f32 %v4684_v4, 0.0  ;;  %v4581_v14 = vadd.f32 %v4580_v47, %v3991_v58  ;;  %v4687_v20 = vadd.f32 %v21378_v44, %v4586_v8  ;;  %v13783_v58 = vpop.f32.mrf.mxu0 }
 0x3ad   : > { %v13878_v54 = vpop.f32.mrf.mxu1 }
 0x3ae   : > { %v4686_v24 = vadd.f32 %v21378_v44, %v4581_v14  ;;  %v4596_v3 = vadd.f32 %v13878_v54, %v13774_v59  ;;  %13974 = vmatprep.mubr.msk.f32.mxu0 %vm280_vm0, %v4748_v49  ;;  %v4751_v32 = vmax.f32 %v4687_v20, 0.0  ;;  %v4031_v59 = vpop.f32.mrf.mxu0 }
 0x3af   : > { %v4590_v23 = vpop.f32.mrf.mxu1  ;;  %13975 = vmatmul.mubr.msk.f32.gmra.mxu0 %vm280_vm0, %v4749_v52 }
 0x3b0   : > { %v4750_v40 = vmax.f32 %v4686_v24, 0.0  ;;  %v4591_v22 = vadd.f32 %v4590_v23, %v4001_v33  ;;  %v4689_v48 = vadd.f32 %v21378_v44, %v4596_v3 }
 0x3b1   : > { %v13881_v16 = vpop.f32.mrf.mxu1 }
 0x3b2   : > { %v4688_v1 = vadd.f32 %v21378_v44, %v4591_v22  ;;  %v4606_v62 = vadd.f32 %v13881_v16, %v13777_v27  ;;  %13977 = vmatprep.mubr.msk.f32.mxu0 %vm280_vm0, %v4750_v40  ;;  %v4753_v25 = vmax.f32 %v4689_v48, 0.0 }
 0x3b3   : > { %v4600_v42 = vpop.f32.mrf.mxu1  ;;  %13978 = vmatmul.mubr.msk.f32.gmra.mxu0 %vm280_vm0, %v4751_v32 }
 0x3b4   : > { %v4752_v7 = vmax.f32 %v4688_v1, 0.0  ;;  %v4601_v43 = vadd.f32 %v4600_v42, %v4011_v37  ;;  %v4691_v35 = vadd.f32 %v21378_v44, %v4606_v62 }
 0x3b5   : > { %v13884_v12 = vpop.f32.mrf.mxu1 }
 0x3b6   : > { %v4690_v60 = vadd.f32 %v21378_v44, %v4601_v43  ;;  %v4616_v38 = vadd.f32 %v13884_v12, %v13780_v30  ;;  %13980 = vmatprep.mubr.msk.f32.mxu0 %vm280_vm0, %v4752_v7  ;;  %v4755_v13 = vmax.f32 %v4691_v35, 0.0 }
 0x3b7   : > { %v4610_v31 = vpop.f32.mrf.mxu1  ;;  %13981 = vmatmul.mubr.msk.f32.gmra.mxu0 %vm280_vm0, %v4753_v25 }
 0x3b8   : > { %v4754_v0 = vmax.f32 %v4690_v60, 0.0  ;;  %v4611_v41 = vadd.f32 %v4610_v31, %v4021_v10  ;;  %v4693_v9 = vadd.f32 %v21378_v44, %v4616_v38 }
 0x3b9   : > { %v13887_v6 = vpop.f32.mrf.mxu1 }
 0x3ba   : > { %v4692_v17 = vadd.f32 %v21378_v44, %v4611_v41  ;;  %v4626_v11 = vadd.f32 %v13887_v6, %v13783_v58  ;;  %13983 = vmatprep.mubr.msk.f32.mxu0 %vm280_vm0, %v4754_v0  ;;  %v4757_v34 = vmax.f32 %v4693_v9, 0.0 }
 0x3bb   : > { %v4620_v28 = vpop.f32.mrf.mxu1  ;;  %13984 = vmatmul.mubr.msk.f32.gmra.mxu0 %vm280_vm0, %v4755_v13 }
 0x3bc   : > { %v4756_v53 = vmax.f32 %v4692_v17, 0.0  ;;  %v4621_v29 = vadd.f32 %v4620_v28, %v4031_v59  ;;  %v4695_v21 = vadd.f32 %v21378_v44, %v4626_v11  ;;  %v18270_v59 = vpop.permute.xlu1 %5942 }
 0x3bd   : > { %v18186_v57 = vpop.f32.mrf.mxu1 }
 0x3be   : > { %v4694_v55 = vadd.f32 %v21378_v44, %v4621_v29  ;;  %13986 = vmatprep.mubr.msk.f32.mxu0 %vm280_vm0, %v4756_v53  ;;  %v4759_v15 = vmax.f32 %v4695_v21, 0.0 }
 0x3bf   : > { %13987 = vmatmul.mubr.msk.f32.gmra.mxu0 %vm280_vm0, %v4757_v34  ;;  %v18191_v63 = vpop.f32.mrf.mxu1 }
 0x3c0   : > { %v4758_v33 = vmax.f32 %v4694_v55, 0.0 }
 0x3c1   : > { %v18193_v39 = vpop.f32.mrf.mxu1 }
 0x3c2   : > { %13989 = vmatprep.mubr.msk.f32.mxu0 %vm280_vm0, %v4758_v33 }
 0x3c3   : > { %13990 = vmatmul.mubr.msk.f32.gmra.mxu0 %vm280_vm0, %v4759_v15  ;;  %v18197_v61 = vpop.f32.mrf.mxu1 }
 0x3c4   : > { %14128 = vmatprep.mubr.f32.mxu0 %v21416_v2 }
 0x3c5   : > { %v18200_v26 = vpop.f32.mrf.mxu1 }
 0x3c7   : > { %v18202_v44 = vpop.f32.mrf.mxu1 }
 0x3c9   : > { %v18204_v46 = vpop.f32.mrf.mxu1 }
 0x3cb   : > { %v18206_v5 = vpop.f32.mrf.mxu1 }
 0x3cd   : > { %v18208_v56 = vpop.f32.mrf.mxu1 }
 0x3cf   : > { %v18210_v27 = vpop.f32.mrf.mxu1 }
 0x3d1   : > { %v14017_v45 = vpop.f32.mrf.mxu1 }
 0x3d3   : > { %v5673_v18 = vpop.f32.mrf.mxu1 }
 0x3d5   : > { %v14020_v51 = vpop.f32.mrf.mxu1 }
 0x3d7   : > { %v5683_v50 = vpop.f32.mrf.mxu1 }
 0x3d9   : > { %v14023_v36 = vpop.f32.mrf.mxu1 }
 0x3db   : > { %v5693_v19 = vpop.f32.mrf.mxu1 }
 0x3dd   : > { %v18212_v4 = vpop.f32.mrf.mxu1 }
 0x3df   : > { %v18214_v8 = vpop.f32.mrf.mxu1 }
 0x3e1   : > { %v18216_v37 = vpop.f32.mrf.mxu1 }
 0x3e3   : > { %v18218_v47 = vpop.f32.mrf.mxu1 }
 0x3e5   : > { %v18220_v49 = vpop.f32.mrf.mxu1 }
 0x3e7   : > { %v18222_v14 = vpop.f32.mrf.mxu1 }
 0x3e9   : > { %v18224_v52 = vpop.f32.mrf.mxu1 }
 0x3eb   : > { %v18226_v20 = vpop.f32.mrf.mxu1 }
 0x3ed   : > { %v18228_v54 = vpop.f32.mrf.mxu1 }
 0x3ef   : > { %v18230_v24 = vpop.f32.mrf.mxu1 }
 0x3f1   : > { %v18232_v3 = vpop.f32.mrf.mxu1 }
 0x3f3   : > { %v18234_v30 = vpop.f32.mrf.mxu1 }
 0x3f5   : > { %v18236_v23 = vpop.f32.mrf.mxu1 }
 0x3f7   : > { %v18238_v40 = vpop.f32.mrf.mxu1 }
 0x3f9   : > { %v18240_v22 = vpop.f32.mrf.mxu1 }
 0x3fb   : > { %v18242_v32 = vpop.f32.mrf.mxu1 }
 0x3fd   : > { %v18246_v16 = vpop.f32.mrf.mxu1 }
 0x3fe   : > { %21417 = vst [vmem:[#allocation124_spill] sm:$0xff] %v18246_v16 }
 0x3ff   : > { %v18252_v10 = vpop.f32.mrf.mxu1 }
 0x400   : > { %21418 = vst [vmem:[#allocation108_spill] sm:$0xff] %v18252_v10 }
 0x401   : > { %v18258_v43 = vpop.f32.mrf.mxu1 }
 0x403   : > { %v18262_v12 = vpop.f32.mrf.mxu1 }
 0x405   : > { %v18264_v58 = vpop.f32.mrf.mxu1 }
 0x407   : > { %v18244_v48 = vpop.f32.mrf.mxu0  ;;  %v18266_v41 = vpop.f32.mrf.mxu1 }
 0x409   : > { %v18248_v1 = vpop.f32.mrf.mxu0  ;;  %v18268_v6 = vpop.f32.mrf.mxu1 }
 0x40b   : > { %v18250_v62 = vpop.f32.mrf.mxu0  ;;  %v18272_v53 = vpop.f32.mrf.mxu1 }
 0x40d   : > { %v18254_v42 = vpop.f32.mrf.mxu0  ;;  %v18283_v10 = vpop.f32.mrf.mxu1 }
 0x40f   : > { %v18256_v7 = vpop.f32.mrf.mxu0 }
 0x411   : > { %v18260_v25 = vpop.f32.mrf.mxu0 }
 0x413   : > { %v13907_v35 = vpop.f32.mrf.mxu0 }
 0x415   : > { %v5064_v60 = vpop.f32.mrf.mxu0 }
 0x417   : > { %v13910_v38 = vpop.f32.mrf.mxu0 }
 0x419   : > { %v5074_v31 = vpop.f32.mrf.mxu0 }
 0x41b   : > { %v13913_v0 = vpop.f32.mrf.mxu0 }
 0x41d   : > { %v5084_v13 = vpop.f32.mrf.mxu0 }
 0x41f   : > { %v13916_v9 = vpop.f32.mrf.mxu0 }
 0x420   : > { %v5689_v34 = vadd.f32 %v14020_v51, %v13916_v9 }
 0x421   : > { %v5094_v17 = vpop.f32.mrf.mxu0 }
 0x422   : > { %v5684_v15 = vadd.f32 %v5683_v50, %v5094_v17  ;;  %v18289_v51 = vadd.f32 %v18270_v59, %v5689_v34  ;;  %v5674_v50 = vadd.f32 %v5673_v18, %v5084_v13  ;;  %v18299_v17 = vpop.f32.mrf.mxu1  ;;  %v5664_v18 = vadd.f32 %v18210_v27, %v5074_v31 }
 0x423   : > { %v13919_v11 = vpop.f32.mrf.mxu0  ;;  %v5654_v27 = vadd.f32 %v18206_v5, %v5064_v60  ;;  %v5644_v60 = vadd.f32 %v18202_v44, %v18260_v25  ;;  %v5634_v25 = vadd.f32 %v18197_v61, %v18254_v42  ;;  %v5624_v61 = vadd.f32 %v18191_v63, %v18248_v1 }
 0x424   : > { %v5699_v28 = vadd.f32 %v14023_v36, %v13919_v11  ;;  %v5679_v36 = vadd.f32 %v14017_v45, %v13913_v0  ;;  %v18296_v9 = vadd.f32 %v18270_v59, %v5684_v15  ;;  %v5669_v45 = vadd.f32 %v18208_v56, %v13910_v38 }
 0x425   : > { %v5104_v29 = vpop.f32.mrf.mxu0  ;;  %v18314_v13 = vadd.f32 %v18270_v59, %v5674_v50  ;;  %v5659_v56 = vadd.f32 %v18204_v46, %v13907_v35  ;;  %v18332_v31 = vadd.f32 %v18270_v59, %v5664_v18  ;;  %v5649_v46 = vadd.f32 %v18200_v26, %v18256_v7 }
 0x426   : > { %v18275_v21 = vadd.f32 %v18270_v59, %v5699_v28  ;;  %v5694_v55 = vadd.f32 %v5693_v19, %v5104_v29  ;;  %v18306_v0 = vadd.f32 %v18270_v59, %v5679_v36  ;;  %v18317_v29 = vpop.f32.mrf.mxu1  ;;  %v18324_v38 = vadd.f32 %v18270_v59, %v5669_v45 }
 0x427   : > { %v18277_v33 = vpop.f32.mrf.mxu0  ;;  %v18343_v35 = vadd.f32 %v18270_v59, %v5659_v56  ;;  %v18352_v50 = vadd.f32 %v18270_v59, %v5654_v27  ;;  %v5639_v7 = vadd.f32 %v18193_v39, %v18250_v62  ;;  %v18363_v18 = vadd.f32 %v18270_v59, %v5649_v46 }
 0x428   : > { %v18280_v2 = vadd.f32 %v18270_v59, %v5694_v55  ;;  %14096 = vmatprep.subr.mxu0 %v18275_v21  ;;  %v18335_v15 = vpop.f32.mrf.mxu1  ;;  %v18370_v56 = vadd.f32 %v18270_v59, %v5644_v60  ;;  %v5629_v39 = vadd.f32 %v18186_v57, %v18244_v48  ;;  %v18386_v42 = vadd.f32 %v18270_v59, %v5634_v25 }
 0x429   : > { %v18285_v16 = vpop.f32.mrf.mxu0  ;;  %14097 = vmatpush3.msra.mxu0 %v18275_v21  ;;  %21419 = vst [vmem:[#allocation122_spill] sm:$0xff] %v18343_v35  ;;  %21420 = vst [vmem:[#allocation103_spill] sm:$0xff] %v18363_v18  ;;  %v18379_v62 = vadd.f32 %v18270_v59, %v5639_v7  ;;  %v18398_v63 = vadd.f32 %v18270_v59, %v5624_v61 }
 0x42a   : > { %14098 = vmatprep.subr.mxu0 %v18280_v2  ;;  %v18355_v45 = vpop.f32.mrf.mxu1  ;;  %21421 = vst [vmem:[#allocation107_spill] sm:$0xff] %v18370_v56  ;;  %21423 = vst [vmem:[#allocation121_spill] sm:$0xff] %v18386_v42  ;;  %v18394_v57 = vadd.f32 %v18270_v59, %v5629_v39 }
 0x42b   : > { %v18292_v19 = vpop.f32.mrf.mxu0  ;;  %14099 = vmatpush3.msra.mxu0 %v18280_v2  ;;  %21422 = vst [vmem:[#allocation120_spill] sm:$0xff] %v18379_v62 }
 0x42c   : > { %14100 = vmatprep.subr.mxu0 %v18289_v51  ;;  %v18373_v27 = vpop.f32.mrf.mxu1 }
 0x42d   : > { %v18301_v11 = vpop.f32.mrf.mxu0  ;;  %14101 = vmatpush3.msra.mxu0 %v18289_v51 }
 0x42e   : > { %14102 = vmatprep.subr.mxu0 %v18296_v9  ;;  %v18389_v60 = vpop.f32.mrf.mxu1 }
 0x42f   : > { %v18309_v28 = vpop.f32.mrf.mxu0  ;;  %14103 = vmatpush3.msra.mxu0 %v18296_v9 }
 0x430   : > { %14104 = vmatprep.subr.mxu0 %v18306_v0  ;;  %v18402_v7 = vpop.f32.mrf.mxu1 }
 0x431   : > { %v18319_v34 = vpop.f32.mrf.mxu0  ;;  %14105 = vmatpush3.msra.mxu0 %v18306_v0 }
 0x432   : > { %14106 = vmatprep.subr.mxu0 %v18314_v13 }
 0x433   : > { %v18327_v55 = vpop.f32.mrf.mxu0  ;;  %14107 = vmatpush3.msra.mxu0 %v18314_v13 }
 0x434   : > { %14108 = vmatprep.subr.mxu0 %v18324_v38 }
 0x435   : > { %v18337_v36 = vpop.f32.mrf.mxu0  ;;  %14109 = vmatpush3.msra.mxu0 %v18324_v38 }
 0x436   : > { %14110 = vmatprep.subr.mxu0 %v18332_v31 }
 0x437   : > { %v18346_v5 = vpop.f32.mrf.mxu0  ;;  %14111 = vmatpush3.msra.mxu0 %v18332_v31 }
 0x438   : > { %14112 = vmatprep.subr.mxu0 %v18343_v35 }
 0x439   : > { %v18357_v26 = vpop.f32.mrf.mxu0  ;;  %14113 = vmatpush3.msra.mxu0 %v18343_v35 }
 0x43a   : > { %14114 = vmatprep.subr.mxu0 %v18352_v50 }
 0x43b   : > { %v13937_v44 = vpop.f32.mrf.mxu0  ;;  %14115 = vmatpush3.msra.mxu0 %v18352_v50 }
 0x43c   : > { %14116 = vmatprep.subr.mxu0 %v18363_v18 }
 0x43d   : > { %v5164_v35 = vpop.f32.mrf.mxu0  ;;  %14117 = vmatpush3.msra.mxu0 %v18363_v18 }
 0x43e   : > { %14118 = vmatprep.subr.mxu0 %v18370_v56 }
 0x43f   : > { %v13940_v46 = vpop.f32.mrf.mxu0  ;;  %14119 = vmatpush3.msra.mxu0 %v18370_v56 }
 0x440   : > { %14120 = vmatprep.subr.mxu0 %v18379_v62 }
 0x441   : > { %v5174_v18 = vpop.f32.mrf.mxu0  ;;  %14121 = vmatpush3.msra.mxu0 %v18379_v62  ;;  %v5769_v62 = vadd.f32 %v18236_v23, %v13940_v46  ;;  %v18420_v23 = vpop.f32.mrf.mxu1 }
 0x442   : > { %14122 = vmatprep.subr.mxu0 %v18386_v42 }
 0x443   : > { %v13943_v48 = vpop.f32.mrf.mxu0  ;;  %14123 = vmatpush3.msra.mxu0 %v18386_v42  ;;  %v21426_v42 = vld [vmem:[#allocation7_spill] sm:$0xff] }
 0x444   : > { %v5779_v1 = vadd.f32 %v18240_v22, %v13943_v48  ;;  %14124 = vmatprep.subr.mxu0 %v18394_v57  ;;  %v5764_v22 = vadd.f32 %v18238_v40, %v5174_v18  ;;  %v5754_v18 = vadd.f32 %v18234_v30, %v5164_v35 }
 0x445   : > { %v5184_v25 = vpop.f32.mrf.mxu0  ;;  %14125 = vmatpush3.msra.mxu0 %v18394_v57 }
 0x446   : > { %v18407_v39 = vadd.f32 %v18270_v59, %v5779_v1  ;;  %v5774_v56 = vadd.f32 %v18242_v32, %v5184_v25  ;;  %14126 = vmatprep.subr.mxu0 %v18398_v63  ;;  %v21427_v32 = vld [vmem:[#allocation13_spill] sm:$0xff]  ;;  %v5759_v1 = vadd.f32 %v18232_v3, %v13937_v44  ;;  %v18428_v25 = vadd.f32 %v18270_v59, %v5769_v62 }
 0x447   : > { %v18411_v61 = vpop.f32.mrf.mxu0  ;;  %14127 = vmatpush3.msra.mxu0 %v18398_v63  ;;  %v21431_v44 = vld [vmem:[#allocation21_spill] sm:$0xff]  ;;  %v5749_v62 = vadd.f32 %v18228_v54, %v18346_v5 }
 0x448   : > { %21424 = vst [vmem:[#allocation118_spill] sm:$0xff] %v18407_v39  ;;  %v18416_v48 = vadd.f32 %v18270_v59, %v5774_v56  ;;  %14129 = vmatmul.mubr.f32.vlgmr.msra.gmra.mxu0 %v21426_v42  ;;  %14152 = vmatprep.subr.mxu1 %v18407_v39  ;;  %21428 = vst [vmem:[#allocation116_spill] sm:$0xff] %v18428_v25  ;;  %v18436_v56 = vadd.f32 %v18270_v59, %v5764_v22  ;;  %v21430_v42 = vld [vmem:[#allocation17_spill] sm:$0xff] }
 0x449   : > { %v18422_v46 = vpop.f32.mrf.mxu0  ;;  %14153 = vmatpush3.msra.mxu1 %v18407_v39  ;;  %14131 = vmatprep.mubr.f32.mxu0 %v21427_v32  ;;  %v18440_v32 = vpop.f32.mrf.mxu1  ;;  %v18449_v30 = vadd.f32 %v18270_v59, %v5759_v1  ;;  %v5744_v22 = vadd.f32 %v18230_v24, %v18357_v26  ;;  %v21435_v1 = vld [vmem:[#allocation29_spill] sm:$0xff]  ;;  %v18471_v24 = vadd.f32 %v18270_v59, %v5749_v62 }
 0x44a   : > { %21425 = vst [vmem:[#allocation119_spill] sm:$0xff] %v18416_v48  ;;  %14154 = vmatprep.subr.mxu1 %v18416_v48  ;;  %21429 = vst [vmem:[#allocation117_spill] sm:$0xff] %v18436_v56  ;;  %v21439_v62 = vld [vmem:[#allocation37_spill] sm:$0xff] }
 0x44b   : > { %v18431_v40 = vpop.f32.mrf.mxu0  ;;  %14155 = vmatpush3.msra.mxu1 %v18416_v48  ;;  %21432 = vst [vmem:[#allocation130_spill] sm:$0xff] %v18449_v30  ;;  %v18462_v54 = vpop.f32.mrf.mxu1  ;;  %21436 = vst [vmem:[#allocation137_spill] sm:$0xff] %v18471_v24 }
 0x44c   : > { %14132 = vmatmul.mubr.f32.gmra.mxu0 %v21430_v42  ;;  %14156 = vmatprep.subr.mxu1 %v18428_v25  ;;  %v18458_v42 = vadd.f32 %v18270_v59, %v5754_v18  ;;  %v18480_v18 = vadd.f32 %v18270_v59, %v5744_v22 }
 0x44d   : > { %v18442_v3 = vpop.f32.mrf.mxu0  ;;  %14157 = vmatpush3.msra.mxu1 %v18428_v25  ;;  %14134 = vmatprep.mubr.f32.mxu0 %v21431_v44  ;;  %v21434_v25 = vld [vmem:[#allocation25_spill] sm:$0xff]  ;;  %v5739_v44 = vadd.f32 %v18224_v52, %v18327_v55  ;;  %v18484_v52 = vpop.f32.mrf.mxu1 }
 0x44e   : > { %14158 = vmatprep.subr.mxu1 %v18436_v56  ;;  %21433 = vst [vmem:[#allocation145_spill] sm:$0xff] %v18458_v42  ;;  %21437 = vst [vmem:[#allocation131_spill] sm:$0xff] %v18480_v18 }
 0x44f   : > { %v18452_v35 = vpop.f32.mrf.mxu0  ;;  %14159 = vmatpush3.msra.mxu1 %v18436_v56 }
 0x450   : > { %14135 = vmatmul.mubr.f32.gmra.mxu0 %v21434_v25  ;;  %14160 = vmatprep.subr.mxu1 %v18449_v30  ;;  %v5734_v25 = vadd.f32 %v18226_v20, %v18337_v36  ;;  %v18493_v20 = vadd.f32 %v18270_v59, %v5739_v44  ;;  %v21443_v44 = vld [vmem:[#allocation45_spill] sm:$0xff] }
 0x451   : > { %v18464_v5 = vpop.f32.mrf.mxu0  ;;  %14161 = vmatpush3.msra.mxu1 %v18449_v30  ;;  %14137 = vmatprep.mubr.f32.mxu0 %v21435_v1  ;;  %v21438_v30 = vld [vmem:[#allocation33_spill] sm:$0xff]  ;;  %v5729_v1 = vadd.f32 %v18220_v49, %v18309_v28  ;;  %v18506_v49 = vpop.f32.mrf.mxu1 }
 0x452   : > { %14162 = vmatprep.subr.mxu1 %v18458_v42  ;;  %21440 = vst [vmem:[#allocation129_spill] sm:$0xff] %v18493_v20  ;;  %v18502_v22 = vadd.f32 %v18270_v59, %v5734_v25 }
 0x453   : > { %v18474_v26 = vpop.f32.mrf.mxu0  ;;  %14163 = vmatpush3.msra.mxu1 %v18458_v42 }
 0x454   : > { %14138 = vmatmul.mubr.f32.gmra.mxu0 %v21438_v30  ;;  %14164 = vmatprep.subr.mxu1 %v18471_v24  ;;  %v5724_v30 = vadd.f32 %v18222_v14, %v18319_v34  ;;  %21441 = vst [vmem:[#allocation146_spill] sm:$0xff] %v18502_v22  ;;  %v18515_v14 = vadd.f32 %v18270_v59, %v5729_v1 }
 0x455   : > { %v18486_v55 = vpop.f32.mrf.mxu0  ;;  %14165 = vmatpush3.msra.mxu1 %v18471_v24  ;;  %14140 = vmatprep.mubr.f32.mxu0 %v21439_v62  ;;  %v21442_v24 = vld [vmem:[#allocation41_spill] sm:$0xff]  ;;  %v5719_v62 = vadd.f32 %v18216_v37, %v18292_v19  ;;  %v5709_v1 = vadd.f32 %v18212_v4, %v18277_v33 }
 0x456   : > { %14166 = vmatprep.subr.mxu1 %v18480_v18  ;;  %21444 = vst [vmem:[#allocation114_spill] sm:$0xff] %v18515_v14  ;;  %v18522_v25 = vadd.f32 %v18270_v59, %v5724_v30  ;;  %v21447_v19 = vld [vmem:[#allocation53_spill] sm:$0xff] }
 0x457   : > { %v18496_v36 = vpop.f32.mrf.mxu0  ;;  %14167 = vmatpush3.msra.mxu1 %v18480_v18  ;;  %v21450_v30 = vld [vmem:[#allocation57_spill] sm:$0xff] }
 0x458   : > { %14141 = vmatmul.mubr.f32.gmra.mxu0 %v21442_v24  ;;  %14168 = vmatprep.subr.mxu1 %v18493_v20  ;;  %v5714_v24 = vadd.f32 %v18218_v47, %v18301_v11  ;;  %21445 = vst [vmem:[#allocation128_spill] sm:$0xff] %v18522_v25  ;;  %v5704_v11 = vadd.f32 %v18214_v8, %v18285_v16  ;;  %v21451_v33 = vld [vmem:[#allocation61_spill] sm:$0xff] }
 0x459   : > { %v18508_v28 = vpop.f32.mrf.mxu0  ;;  %14169 = vmatpush3.msra.mxu1 %v18493_v20  ;;  %14143 = vmatprep.mubr.f32.mxu0 %v21443_v44  ;;  %v21446_v20 = vld [vmem:[#allocation49_spill] sm:$0xff]  ;;  %v18526_v44 = vpop.f32.mrf.mxu1 }
 0x45a   : > { %14170 = vmatprep.subr.mxu1 %v18502_v22  ;;  %v18554_v16 = vadd.f32 %v18270_v59, %v5704_v11 }
 0x45b   : > { %v13961_v34 = vpop.f32.mrf.mxu0  ;;  %14171 = vmatpush3.msra.mxu1 %v18502_v22  ;;  %v18533_v22 = vadd.f32 %v18270_v59, %v5719_v62  ;;  %v18549_v62 = vadd.f32 %v18270_v59, %v5709_v1  ;;  %v21455_v1 = vld [vmem:[#allocation9_spill] sm:$0xff] }
 0x45c   : > { %14144 = vmatmul.mubr.f32.gmra.mxu0 %v21446_v20  ;;  %14172 = vmatprep.subr.mxu1 %v18515_v14  ;;  %v18540_v20 = vadd.f32 %v18270_v59, %v5714_v24  ;;  %21453 = vst [vmem:[#allocation148_spill] sm:$0xff] %v18554_v16 }
 0x45d   : > { %v5244_v37 = vpop.f32.mrf.mxu0  ;;  %14173 = vmatpush3.msra.mxu1 %v18515_v14  ;;  %14146 = vmatprep.mubr.f32.mxu0 %v21447_v19  ;;  %21448 = vst [vmem:[#allocation147_spill] sm:$0xff] %v18533_v22  ;;  %v18544_v19 = vpop.f32.mrf.mxu1  ;;  %21452 = vst [vmem:[#allocation127_spill] sm:$0xff] %v18549_v62  ;;  %v21474_v14 = vld [vmem:[#allocation42_spill] sm:$0xff] }
 0x45e   : > { %14174 = vmatprep.subr.mxu1 %v18522_v25  ;;  %21449 = vst [vmem:[#allocation115_spill] sm:$0xff] %v18540_v20 }
 0x45f   : > { %v13964_v47 = vpop.f32.mrf.mxu0  ;;  %14175 = vmatpush3.msra.mxu1 %v18522_v25 }
 0x460   : > { %14147 = vmatmul.mubr.f32.gmra.mxu0 %v21450_v30  ;;  %14176 = vmatprep.subr.mxu1 %v18533_v22  ;;  %v21454_v30 = vld [vmem:[#allocation65_spill] sm:$0xff]  ;;  %v5849_v25 = vadd.f32 %v18355_v45, %v13964_v47 }
 0x461   : > { %v5254_v4 = vpop.f32.mrf.mxu0  ;;  %14177 = vmatpush3.msra.mxu1 %v18533_v22  ;;  %14149 = vmatprep.mubr.f32.mxu0 %v21451_v33  ;;  %v18559_v22 = vpop.f32.mrf.mxu1 }
 0x462   : > { %14178 = vmatprep.subr.mxu1 %v18540_v20 }
 0x463   : > { %v13967_v8 = vpop.f32.mrf.mxu0  ;;  %14179 = vmatpush3.msra.mxu1 %v18540_v20  ;;  %v18578_v45 = vpop.f32.mrf.mxu1 }
 0x464   : > { %v5859_v24 = vadd.f32 %v18389_v60, %v13967_v8  ;;  %14150 = vmatmul.mubr.f32.gmra.mxu0 %v21454_v30  ;;  %14180 = vmatprep.subr.mxu1 %v18549_v62  ;;  %v5844_v8 = vadd.f32 %v18373_v27, %v5254_v4  ;;  %v5834_v4 = vadd.f32 %v18335_v15, %v5244_v37 }
 0x465   : > { %v5264_v33 = vpop.f32.mrf.mxu0  ;;  %14181 = vmatpush3.msra.mxu1 %v18549_v62  ;;  %14240 = vmatprep.mubr.f32.mxu0 %v21455_v1  ;;  %v21458_v62 = vld [vmem:[#allocation8_spill] sm:$0xff]  ;;  %v21462_v1 = vld [vmem:[#allocation18_spill] sm:$0xff] }
 0x466   : > { %v18565_v20 = vadd.f32 %v18270_v59, %v5859_v24  ;;  %v5854_v11 = vadd.f32 %v18402_v7, %v5264_v33  ;;  %14182 = vmatprep.subr.mxu1 %v18554_v16  ;;  %v21459_v7 = vld [vmem:[#allocation14_spill] sm:$0xff]  ;;  %v5839_v24 = vadd.f32 %v18317_v29, %v13961_v34  ;;  %v18586_v33 = vadd.f32 %v18270_v59, %v5849_v25 }
 0x467   : > { %v18569_v60 = vpop.f32.mrf.mxu0  ;;  %14183 = vmatpush3.msra.mxu1 %v18554_v16  ;;  %v21463_v34 = vld [vmem:[#allocation22_spill] sm:$0xff]  ;;  %v5829_v25 = vadd.f32 %v18283_v10, %v18496_v36 }
 0x468   : > { %21456 = vst [vmem:[#allocation112_spill] sm:$0xff] %v18565_v20  ;;  %v18574_v30 = vadd.f32 %v18270_v59, %v5854_v11  ;;  %14185 = vmatmul.mubr.f32.vlgmr.msra.gmra.mxu1 %v21458_v62  ;;  %14208 = vmatprep.subr.mxu0 %v18565_v20  ;;  %21460 = vst [vmem:[#allocation149_spill] sm:$0xff] %v18586_v33  ;;  %v18594_v62 = vadd.f32 %v18270_v59, %v5844_v8  ;;  %v18598_v11 = vpop.f32.mrf.mxu1  ;;  %v21470_v16 = vld [vmem:[#allocation34_spill] sm:$0xff] }
 0x469   : > { %v18580_v47 = vpop.f32.mrf.mxu0  ;;  %14209 = vmatpush3.msra.mxu0 %v18565_v20  ;;  %14187 = vmatprep.mubr.f32.mxu1 %v21459_v7  ;;  %v18607_v15 = vadd.f32 %v18270_v59, %v5839_v24  ;;  %v5824_v8 = vadd.f32 %v18299_v17, %v18508_v28  ;;  %v18616_v7 = vadd.f32 %v18270_v59, %v5834_v4  ;;  %v21467_v24 = vld [vmem:[#allocation30_spill] sm:$0xff] }
 0x46a   : > { %21457 = vst [vmem:[#allocation126_spill] sm:$0xff] %v18574_v30  ;;  %14210 = vmatprep.subr.mxu0 %v18574_v30  ;;  %21461 = vst [vmem:[#allocation150_spill] sm:$0xff] %v18594_v62  ;;  %v18620_v10 = vpop.f32.mrf.mxu1  ;;  %v18629_v17 = vadd.f32 %v18270_v59, %v5829_v25  ;;  %v5814_v4 = vadd.f32 %v18272_v53, %v18486_v55  ;;  %v21471_v25 = vld [vmem:[#allocation38_spill] sm:$0xff] }
 0x46b   : > { %v18589_v27 = vpop.f32.mrf.mxu0  ;;  %14211 = vmatpush3.msra.mxu0 %v18574_v30  ;;  %21464 = vst [vmem:[#allocation113_spill] sm:$0xff] %v18607_v15  ;;  %21465 = vst [vmem:[#allocation111_spill] sm:$0xff] %v18616_v7 }
 0x46c   : > { %14188 = vmatmul.mubr.f32.gmra.mxu1 %v21462_v1  ;;  %14212 = vmatprep.subr.mxu0 %v18586_v33  ;;  %v21466_v1 = vld [vmem:[#allocation26_spill] sm:$0xff]  ;;  %21468 = vst [vmem:[#allocation142_spill] sm:$0xff] %v18629_v17 }
 0x46d   : > { %v18600_v29 = vpop.f32.mrf.mxu0  ;;  %14213 = vmatpush3.msra.mxu0 %v18586_v33  ;;  %14190 = vmatprep.mubr.f32.mxu1 %v21463_v34  ;;  %v5819_v34 = vadd.f32 %v18268_v6, %v18474_v26  ;;  %v18642_v6 = vpop.f32.mrf.mxu1 }
 0x46e   : > { %14214 = vmatprep.subr.mxu0 %v18594_v62 }
 0x46f   : > { %v18610_v37 = vpop.f32.mrf.mxu0  ;;  %14215 = vmatpush3.msra.mxu0 %v18594_v62  ;;  %v18651_v53 = vadd.f32 %v18270_v59, %v5819_v34  ;;  %v21475_v34 = vld [vmem:[#allocation46_spill] sm:$0xff] }
 0x470   : > { %14191 = vmatmul.mubr.f32.gmra.mxu1 %v21466_v1  ;;  %14216 = vmatprep.subr.mxu0 %v18607_v15  ;;  %v18638_v1 = vadd.f32 %v18270_v59, %v5824_v8  ;;  %v18660_v8 = vadd.f32 %v18270_v59, %v5814_v4  ;;  %v5794_v4 = vadd.f32 %v18262_v12, %v18442_v3  ;;  %v21482_v12 = vld [vmem:[#allocation124_spill] sm:$0xff] }
 0x471   : > { %v18622_v36 = vpop.f32.mrf.mxu0  ;;  %14217 = vmatpush3.msra.mxu0 %v18607_v15  ;;  %14193 = vmatprep.mubr.f32.mxu1 %v21467_v24  ;;  %v5809_v24 = vadd.f32 %v18264_v58, %v18452_v35  ;;  %21472 = vst [vmem:[#allocation109_spill] sm:$0xff] %v18651_v53  ;;  %v14092_v58 = vpop.f32.mrf.mxu1  ;;  %v5789_v3 = vadd.f32 %v21482_v12, %v18411_v61  ;;  %v21486_v61 = vld [vmem:[#allocation58_spill] sm:$0xff] }
 0x472   : > { %14218 = vmatprep.subr.mxu0 %v18616_v7  ;;  %21469 = vst [vmem:[#allocation110_spill] sm:$0xff] %v18638_v1  ;;  %21473 = vst [vmem:[#allocation135_spill] sm:$0xff] %v18660_v8 }
 0x473   : > { %v18632_v28 = vpop.f32.mrf.mxu0  ;;  %14219 = vmatpush3.msra.mxu0 %v18616_v7 }
 0x474   : > { %14194 = vmatmul.mubr.f32.gmra.mxu1 %v21470_v16  ;;  %14220 = vmatprep.subr.mxu0 %v18629_v17  ;;  %v5804_v16 = vadd.f32 %v18266_v41, %v18464_v5  ;;  %v5799_v41 = vadd.f32 %v18258_v43, %v18431_v40  ;;  %v18676_v5 = vadd.f32 %v18270_v59, %v5809_v24  ;;  %v21479_v43 = vld [vmem:[#allocation50_spill] sm:$0xff]  ;;  %v5923_v40 = vpop.f32.mrf.mxu1 }
 0x475   : > { %v18644_v26 = vpop.f32.mrf.mxu0  ;;  %14221 = vmatpush3.msra.mxu0 %v18629_v17  ;;  %14196 = vmatprep.mubr.f32.mxu1 %v21471_v25  ;;  %v18671_v25 = vld [vmem:[%s20600_s2 + $0x58] sm:$0xff] }
 0x476   : > { %14222 = vmatprep.subr.mxu0 %v18638_v1  ;;  %21476 = vst [vmem:[#allocation106_spill] sm:$0xff] %v18671_v25  ;;  %21477 = vst [vmem:[#allocation102_spill] sm:$0xff] %v18676_v5  ;;  %8477 = vrot.lane.b32.xlu0 %v18671_v25, %s15347_s25 }
 0x477   : > { %v18654_v55 = vpop.f32.mrf.mxu0  ;;  %14223 = vmatpush3.msra.mxu0 %v18638_v1  ;;  %8874 = vrot.lane.b32.xlu1 %v18671_v25, %s15346_s24  ;;  %v18696_v25 = vld [vmem:[%s20600_s2 + $0x50] sm:$0xff]  ;;  %v21487_v1 = vld [vmem:[#allocation62_spill] sm:$0xff] }
 0x478   : > { %14197 = vmatmul.mubr.f32.gmra.mxu1 %v21474_v14  ;;  %14224 = vmatprep.subr.mxu0 %v18651_v53  ;;  %21481 = vst [vmem:[#allocation140_spill] sm:$0xff] %v18696_v25 }
 0x479   : > { %v18664_v35 = vpop.f32.mrf.mxu0  ;;  %14225 = vmatpush3.msra.mxu0 %v18651_v53  ;;  %14199 = vmatprep.mubr.f32.mxu1 %v21475_v34  ;;  %v18687_v34 = vadd.f32 %v18270_v59, %v5804_v16  ;;  %v21480_v53 = vld [vmem:[#allocation54_spill] sm:$0xff]  ;;  %v18701_v16 = vadd.f32 %v18270_v59, %v5799_v41  ;;  %v14095_v41 = vpop.f32.mrf.mxu1 }
 0x47a   : > { %14226 = vmatprep.subr.mxu0 %v18660_v8  ;;  %8475 = vrot.lane.b32.xlu0 %v18696_v25, %s15347_s25 }
 0x47b   : > { %v13985_v14 = vpop.f32.mrf.mxu0  ;;  %14227 = vmatpush3.msra.mxu0 %v18660_v8  ;;  %21478 = vst [vmem:[#allocation104_spill] sm:$0xff] %v18687_v34  ;;  %21483 = vst [vmem:[#allocation141_spill] sm:$0xff] %v18701_v16  ;;  %8872 = vrot.lane.b32.xlu1 %v18696_v25, %s15346_s24  ;;  %v18712_v8 = vadd.f32 %v18270_v59, %v5794_v4  ;;  %v18721_v25 = vld [vmem:[%s20600_s2 + $0x48] sm:$0xff] }
 0x47c   : > { %14200 = vmatmul.mubr.f32.gmra.mxu1 %v21479_v43  ;;  %14228 = vmatprep.subr.mxu0 %v18676_v5  ;;  %21488 = vst [vmem:[#allocation139_spill] sm:$0xff] %v18721_v25 }
 0x47d   : > { %v5324_v24 = vpop.f32.mrf.mxu0  ;;  %14229 = vmatpush3.msra.mxu0 %v18676_v5  ;;  %14202 = vmatprep.mubr.f32.mxu1 %v21480_v53  ;;  %v21484_v53 = vld [vmem:[#allocation108_spill] sm:$0xff]  ;;  %21485 = vst [vmem:[#allocation138_spill] sm:$0xff] %v18712_v8 }
 0x47e   : > { %14230 = vmatprep.subr.mxu0 %v18687_v34  ;;  %v5784_v5 = vadd.f32 %v21484_v53, %v18422_v46  ;;  %v18724_v46 = vadd.f32 %v18270_v59, %v5789_v3  ;;  %8473 = vrot.lane.b32.xlu0 %v18721_v25, %s15347_s25  ;;  %v5933_v3 = vpop.f32.mrf.mxu1 }
 0x47f   : > { %v13988_v43 = vpop.f32.mrf.mxu0  ;;  %14231 = vmatpush3.msra.mxu0 %v18687_v34  ;;  %8870 = vrot.lane.b32.xlu1 %v18721_v25, %s15346_s24  ;;  %v21491_v34 = vld [vmem:[#allocation10_spill] sm:$0xff] }
 0x480   : > { %14203 = vmatmul.mubr.f32.gmra.mxu1 %v21486_v61  ;;  %14232 = vmatprep.subr.mxu0 %v18701_v16  ;;  %21489 = vst [vmem:[#allocation100_spill] sm:$0xff] %v18724_v46  ;;  %v21490_v61 = vld [vmem:[#allocation66_spill] sm:$0xff] }
 0x481   : > { %v5334_v12 = vpop.f32.mrf.mxu0  ;;  %14233 = vmatpush3.msra.mxu0 %v18701_v16  ;;  %14205 = vmatprep.mubr.f32.mxu1 %v21487_v1  ;;  %v18733_v1 = vadd.f32 %v18270_v59, %v5784_v5 }
 0x482   : > { %14234 = vmatprep.subr.mxu0 %v18712_v8 }
 0x483   : > { %v13991_v4 = vpop.f32.mrf.mxu0  ;;  %14235 = vmatpush3.msra.mxu0 %v18712_v8  ;;  %v18742_v8 = vld [vmem:[%s20600_s2 + $0x40] sm:$0xff] }
 0x484   : > { %v5939_v53 = vadd.f32 %v14095_v41, %v13991_v4  ;;  %14206 = vmatmul.mubr.f32.gmra.mxu1 %v21490_v61  ;;  %14236 = vmatprep.subr.mxu0 %v18724_v46  ;;  %v5929_v41 = vadd.f32 %v14092_v58, %v13988_v43  ;;  %v21494_v4 = vld [vmem:[#allocation11_spill] sm:$0xff]  ;;  %v5919_v43 = vadd.f32 %v18620_v10, %v13985_v14 }
 0x485   : > { %v5344_v16 = vpop.f32.mrf.mxu0  ;;  %14237 = vmatpush3.msra.mxu0 %v18724_v46  ;;  %14296 = vmatprep.mubr.f32.mxu1 %v21491_v34  ;;  %v5914_v61 = vadd.f32 %v18642_v6, %v5324_v24  ;;  %v21499_v14 = vld [vmem:[#allocation23_spill] sm:$0xff] }
 0x486   : > { %v18745_v25 = vadd.f32 %v18270_v59, %v5939_v53  ;;  %v5934_v5 = vadd.f32 %v5933_v3, %v5344_v16  ;;  %14238 = vmatprep.subr.mxu0 %v18733_v1  ;;  %8471 = vrot.lane.b32.xlu0 %v18742_v8, %s15347_s25  ;;  %v5924_v53 = vadd.f32 %v5923_v40, %v5334_v12  ;;  %v21496_v16 = vld [vmem:[#allocation15_spill] sm:$0xff]  ;;  %s15351_s25 = smov [#allocation2]  }
 0x487   : > { %14239 = vmatpush3.msra.mxu0 %v18733_v1  ;;  %8868 = vrot.lane.b32.xlu1 %v18742_v8, %s15346_s24  ;;  %v18763_v58 = vadd.f32 %v18270_v59, %v5929_v41  ;;  %v21497_v12 = vld [vmem:[#allocation19_spill] sm:$0xff]  ;;  %v18781_v10 = vadd.f32 %v18270_v59, %v5919_v43  ;;  %v5909_v3 = vadd.f32 %v18578_v45, %v18654_v55  ;;  %v21508_v43 = vld [vmem:[#allocation122_spill] sm:$0xff]  ;;  %s15288_s17 = sshll.u32 %s15351_s25, 4  ;;  %s15289_s17 = int_to_ptr.vmem [resolvable:$false] %s15288_s17 }
 0x488   : > { %21492 = vst [vmem:[#allocation99_spill] sm:$0xff] %v18745_v25  ;;  %v18754_v34 = vadd.f32 %v18270_v59, %v5934_v5  ;;  %14241 = vmatmul.mubr.f32.vlgmr.msra.gmra.mxu0 %v21494_v4  ;;  %14264 = vmatprep.subr.mxu1 %v18745_v25  ;;  %v18771_v40 = vadd.f32 %v18270_v59, %v5924_v53  ;;  %v21501_v24 = vld [vmem:[#allocation27_spill] sm:$0xff]  ;;  %s15290_s16 = scalar_lea.vmem %s15289_s17, 256  ;;  %p15291_p1 = scmp.lt.s32.totalorder %s10392_s6, %s15289_s17 }
 0x489   : > { %14320 = vmatprep.subr.mxu0 %v18275_v21  ;;  %14265 = vmatpush3.msra.mxu1 %v18745_v25  ;;  %21495 = vst [vmem:[#allocation143_spill] sm:$0xff] %v18763_v58  ;;  %21498 = vst [vmem:[#allocation136_spill] sm:$0xff] %v18781_v10  ;;  %v18790_v6 = vadd.f32 %v18270_v59, %v5914_v61  ;;  %v5904_v5 = vadd.f32 %v18598_v11, %v18664_v35  ;;  %v21503_v55 = vld [vmem:[#allocation31_spill] sm:$0xff]  ;;  %p15292_p2 = scmp.lt.s32.totalorder %s15290_s16, %s15284_s11 }
 0x48a   : > { %21493 = vst [vmem:[#allocation144_spill] sm:$0xff] %v18754_v34  ;;  %14321 = vmatpush3.msra.mxu0 %v18275_v21  ;;  %14266 = vmatprep.subr.mxu1 %v18754_v34  ;;  %v18801_v45 = vadd.f32 %v18270_v59, %v5909_v3  ;;  %v5899_v41 = vadd.f32 %v18544_v19, %v18632_v28  ;;  %v21505_v35 = vld [vmem:[#allocation35_spill] sm:$0xff] }
 0x48b   : > { %14322 = vmatprep.subr.mxu0 %v18280_v2  ;;  %14243 = vmatprep.mubr.f32.mxu0 %v21496_v16  ;;  %21500 = vst [vmem:[#allocation133_spill] sm:$0xff] %v18790_v6  ;;  %v18810_v11 = vadd.f32 %v18270_v59, %v5904_v5  ;;  %v5894_v4 = vadd.f32 %v18559_v22, %v18644_v26  ;;  %v21506_v28 = vld [vmem:[#allocation39_spill] sm:$0xff]  ;;  %v21515_v5 = vld [vmem:[#allocation120_spill] sm:$0xff]  ;;  %p15293_p3 = por %p15292_p2, %p15291_p1 }
 0x48c   : > { %14267 = vmatpush3.msra.mxu1 %v18754_v34  ;;  %14323 = vmatpush3.msra.mxu0 %v18280_v2  ;;  %21502 = vst [vmem:[#allocation134_spill] sm:$0xff] %v18801_v45  ;;  %v18821_v19 = vadd.f32 %v18270_v59, %v5899_v41  ;;  %v5889_v53 = vadd.f32 %v18506_v49, %v18610_v37  ;;  %v21507_v26 = vld [vmem:[#allocation43_spill] sm:$0xff] }
 0x48d   : > { %14244 = vmatmul.mubr.f32.gmra.mxu0 %v21497_v12  ;;  %14268 = vmatprep.subr.mxu1 %v18763_v58  ;;  %21504 = vst [vmem:[#allocation125_spill] sm:$0xff] %v18810_v11  ;;  %v18830_v22 = vadd.f32 %v18270_v59, %v5894_v4  ;;  %v5884_v16 = vadd.f32 %v18526_v44, %v18622_v36  ;;  %v21509_v37 = vld [vmem:[#allocation47_spill] sm:$0xff]  ;;  %p15294_p4 = pnand %p15293_p3, %p15287_p0 }
 0x48e   : > { %14324 = vmatprep.subr.mxu0 %v18289_v51  ;;  %14269 = vmatpush3.msra.mxu1 %v18763_v58  ;;  %v18841_v49 = vadd.f32 %v18270_v59, %v5889_v53  ;;  %v5879_v12 = vadd.f32 %v18462_v54, %v18589_v27  ;;  %v21510_v36 = vld [vmem:[#allocation51_spill] sm:$0xff]  ;;  %v5874_v61 = vadd.f32 %v18484_v52, %v18600_v29 }
 0x48f   : > { %14325 = vmatpush3.msra.mxu0 %v18289_v51  ;;  %14270 = vmatprep.subr.mxu1 %v18771_v40  ;;  %v18850_v44 = vadd.f32 %v18270_v59, %v5884_v16  ;;  %v21512_v27 = vld [vmem:[#allocation107_spill] sm:$0xff] }
 0x490   : > { %14326 = vmatprep.subr.mxu0 %v18296_v9  ;;  %14246 = vmatprep.mubr.f32.mxu0 %v21499_v14  ;;  %v21511_v14 = vld [vmem:[#allocation103_spill] sm:$0xff]  ;;  %v18861_v54 = vadd.f32 %v18270_v59, %v5879_v12  ;;  %v18870_v52 = vadd.f32 %v18270_v59, %v5874_v61  ;;  %v21527_v12 = vld [vmem:[#allocation20_spill] sm:$0xff] }
 0x491   : > { %14271 = vmatpush3.msra.mxu1 %v18771_v40  ;;  %14327 = vmatpush3.msra.mxu0 %v18296_v9  ;;  %v21513_v3 = vld [vmem:[#allocation55_spill] sm:$0xff] }
 0x492   : > { %14247 = vmatmul.mubr.f32.gmra.mxu0 %v21501_v24  ;;  %14272 = vmatprep.subr.mxu1 %v18781_v10  ;;  %v5869_v24 = vadd.f32 %v18420_v23, %v18569_v60  ;;  %v21514_v29 = vld [vmem:[#allocation59_spill] sm:$0xff]  ;;  %v21516_v60 = vld [vmem:[#allocation121_spill] sm:$0xff] }
 0x493   : > { %14328 = vmatprep.subr.mxu0 %v18306_v0  ;;  %14273 = vmatpush3.msra.mxu1 %v18781_v10  ;;  %v21517_v41 = vld [vmem:[#allocation63_spill] sm:$0xff] }
 0x494   : > { %14329 = vmatpush3.msra.mxu0 %v18306_v0  ;;  %14274 = vmatprep.subr.mxu1 %v18790_v6  ;;  %v18881_v23 = vadd.f32 %v18270_v59, %v5869_v24  ;;  %v21531_v24 = vld [vmem:[#allocation76_spill] sm:$0xff] }
 0x495   : > { %14330 = vmatprep.subr.mxu0 %v18314_v13  ;;  %14249 = vmatprep.mubr.f32.mxu0 %v21503_v55  ;;  %v5864_v55 = vadd.f32 %v18440_v32, %v18580_v47  ;;  %v21519_v47 = vld [vmem:[#allocation69_spill] sm:$0xff] }
 0x496   : > { %14275 = vmatpush3.msra.mxu1 %v18790_v6  ;;  %14331 = vmatpush3.msra.mxu0 %v18314_v13  ;;  %v21520_v4 = vunpack.i.l.bf16 %v21519_v47 }
 0x497   : > { %14250 = vmatmul.mubr.f32.gmra.mxu0 %v21505_v35  ;;  %14276 = vmatprep.subr.mxu1 %v18801_v45  ;;  %v21518_v35 = vld [vmem:[#allocation67_spill] sm:$0xff]  ;;  %v18890_v32 = vadd.f32 %v18270_v59, %v5864_v55  ;;  %v21522_v59 = vld [vmem:[#allocation70_spill] sm:$0xff]  ;;  %v21533_v55 = vld [vmem:[#allocation24_spill] sm:$0xff] }
 0x498   : > { %14332 = vmatprep.subr.mxu0 %v18324_v38  ;;  %14277 = vmatpush3.msra.mxu1 %v18801_v45  ;;  %v21523_v53 = vunpack.i.l.bf16 %v21522_v59 }
 0x499   : > { %14333 = vmatpush3.msra.mxu0 %v18324_v38  ;;  %14278 = vmatprep.subr.mxu1 %v18810_v11 }
 0x49a   : > { %14334 = vmatprep.subr.mxu0 %v18332_v31  ;;  %14252 = vmatprep.mubr.f32.mxu0 %v21506_v28  ;;  %v21521_v28 = vld [vmem:[#allocation12_spill] sm:$0xff] }
 0x49b   : > { %14279 = vmatpush3.msra.mxu1 %v18810_v11  ;;  %14335 = vmatpush3.msra.mxu0 %v18332_v31 }
 0x49c   : > { %14253 = vmatmul.mubr.f32.gmra.mxu0 %v21507_v26  ;;  %14280 = vmatprep.subr.mxu1 %v18821_v19  ;;  %v21524_v26 = vld [vmem:[#allocation72_spill] sm:$0xff] }
 0x49d   : > { %14336 = vmatprep.subr.mxu0 %v21508_v43  ;;  %14281 = vmatpush3.msra.mxu1 %v18821_v19  ;;  %v21525_v16 = vunpack.i.l.bf16 %v21524_v26 }
 0x49e   : > { %14337 = vmatpush3.msra.mxu0 %v21508_v43  ;;  %14282 = vmatprep.subr.mxu1 %v18830_v22 }
 0x49f   : > { %14338 = vmatprep.subr.mxu0 %v18352_v50  ;;  %14255 = vmatprep.mubr.f32.mxu0 %v21509_v37  ;;  %v21526_v37 = vld [vmem:[#allocation16_spill] sm:$0xff] }
 0x4a0   : > { %14283 = vmatpush3.msra.mxu1 %v18830_v22  ;;  %14339 = vmatpush3.msra.mxu0 %v18352_v50 }
 0x4a1   : > { %14256 = vmatmul.mubr.f32.gmra.mxu0 %v21510_v36  ;;  %14284 = vmatprep.subr.mxu1 %v18841_v49  ;;  %v21528_v36 = vld [vmem:[#allocation74_spill] sm:$0xff] }
 0x4a2   : > { %14340 = vmatprep.subr.mxu0 %v21511_v14  ;;  %14285 = vmatpush3.msra.mxu1 %v18841_v49  ;;  %v21529_v61 = vunpack.i.l.bf16 %v21528_v36 }
 0x4a3   : > { %14341 = vmatpush3.msra.mxu0 %v21511_v14  ;;  %14286 = vmatprep.subr.mxu1 %v18850_v44 }
 0x4a4   : > { %14342 = vmatprep.subr.mxu0 %v21512_v27  ;;  %14258 = vmatprep.mubr.f32.mxu0 %v21513_v3  ;;  %v21530_v3 = vld [vmem:[#allocation116_spill] sm:$0xff] }
 0x4a5   : > { %14287 = vmatpush3.msra.mxu1 %v18850_v44  ;;  %14343 = vmatpush3.msra.mxu0 %v21512_v27 }
 0x4a6   : > { %14259 = vmatmul.mubr.f32.gmra.mxu0 %v21514_v29  ;;  %14288 = vmatprep.subr.mxu1 %v18861_v54  ;;  %v21532_v29 = vunpack.i.l.bf16 %v21531_v24 }
 0x4a7   : > { %14344 = vmatprep.subr.mxu0 %v21515_v5  ;;  %14289 = vmatpush3.msra.mxu1 %v18861_v54 }
 0x4a8   : > { %14345 = vmatpush3.msra.mxu0 %v21515_v5  ;;  %14290 = vmatprep.subr.mxu1 %v18870_v52 }
 0x4a9   : > { %14346 = vmatprep.subr.mxu0 %v21516_v60  ;;  %14261 = vmatprep.mubr.f32.mxu0 %v21517_v41  ;;  %v21534_v41 = vld [vmem:[#allocation28_spill] sm:$0xff] }
 0x4aa   : > { %14291 = vmatpush3.msra.mxu1 %v18870_v52  ;;  %14347 = vmatpush3.msra.mxu0 %v21516_v60 }
 0x4ab   : > { %14262 = vmatmul.mubr.f32.gmra.mxu0 %v21518_v35  ;;  %14292 = vmatprep.subr.mxu1 %v18881_v23  ;;  %v21535_v35 = vld [vmem:[#allocation78_spill] sm:$0xff] }
 0x4ac   : > { %14348 = vmatprep.subr.mxu0 %v18394_v57  ;;  %14293 = vmatpush3.msra.mxu1 %v18881_v23 }
 0x4ad   : > { %14349 = vmatpush3.msra.mxu0 %v18394_v57  ;;  %14352 = vmatprep.mubr.f32.mxu0 %v21520_v4  ;;  %v21536_v4 = vunpack.i.l.bf16 %v21535_v35 }
 0x4ae   : > { %14294 = vmatprep.subr.mxu1 %v18890_v32  ;;  %14350 = vmatprep.subr.mxu0 %v18398_v63 }
 0x4af   : > { %14295 = vmatpush3.msra.mxu1 %v18890_v32  ;;  %14351 = vmatpush3.msra.mxu0 %v18398_v63 }
 0x4b0   : > { %14297 = vmatmul.mubr.f32.vlgmr.msra.gmra.mxu1 %v21521_v28  ;;  %14353 = vmatmul.mubr.f32.vlgmr.msra.gmra.mxu0 %v21523_v53  ;;  %v21537_v28 = vld [vmem:[#allocation130_spill] sm:$0xff]  ;;  %v21538_v53 = vld [vmem:[#allocation79_spill] sm:$0xff] }
 0x4b1   : > { %14376 = vmatprep.subr.mxu1 %v18407_v39  ;;  %14432 = vmatprep.subr.mxu0 %v18565_v20 }
 0x4b2   : > { %14355 = vmatprep.mubr.f32.mxu0 %v21525_v16  ;;  %14377 = vmatpush3.msra.mxu1 %v18407_v39  ;;  %v21539_v16 = vunpack.i.l.bf16 %v21538_v53 }
 0x4b3   : > { %14433 = vmatpush3.msra.mxu0 %v18565_v20  ;;  %14378 = vmatprep.subr.mxu1 %v18416_v48 }
 0x4b4   : > { %14434 = vmatprep.subr.mxu0 %v18574_v30  ;;  %14299 = vmatprep.mubr.f32.mxu1 %v21526_v37  ;;  %v21540_v37 = vld [vmem:[#allocation32_spill] sm:$0xff] }
 0x4b5   : > { %14379 = vmatpush3.msra.mxu1 %v18416_v48  ;;  %14435 = vmatpush3.msra.mxu0 %v18574_v30  ;;  %v21553_v30 = vld [vmem:[#allocation109_spill] sm:$0xff]  ;;  %v21567_v48 = vld [vmem:[#allocation104_spill] sm:$0xff] }
 0x4b6   : > { %14300 = vmatmul.mubr.f32.gmra.mxu1 %v21527_v12  ;;  %14356 = vmatmul.mubr.f32.gmra.mxu0 %v21529_v61  ;;  %v21541_v12 = vld [vmem:[#allocation36_spill] sm:$0xff]  ;;  %v21542_v61 = vld [vmem:[#allocation81_spill] sm:$0xff] }
 0x4b7   : > { %14380 = vmatprep.subr.mxu1 %v21530_v3  ;;  %14436 = vmatprep.subr.mxu0 %v18586_v33 }
 0x4b8   : > { %14358 = vmatprep.mubr.f32.mxu0 %v21532_v29  ;;  %14381 = vmatpush3.msra.mxu1 %v21530_v3  ;;  %v21543_v29 = vunpack.i.l.bf16 %v21542_v61 }
 0x4b9   : > { %14437 = vmatpush3.msra.mxu0 %v18586_v33  ;;  %14382 = vmatprep.subr.mxu1 %v18436_v56  ;;  %v21554_v33 = vld [vmem:[#allocation87_spill] sm:$0xff] }
 0x4ba   : > { %14438 = vmatprep.subr.mxu0 %v18594_v62  ;;  %14302 = vmatprep.mubr.f32.mxu1 %v21533_v55  ;;  %v21544_v55 = vld [vmem:[#allocation137_spill] sm:$0xff] }
 0x4bb   : > { %14383 = vmatpush3.msra.mxu1 %v18436_v56  ;;  %14439 = vmatpush3.msra.mxu0 %v18594_v62  ;;  %v21555_v62 = vunpack.i.l.bf16 %v21554_v33  ;;  %v21573_v56 = vld [vmem:[#allocation141_spill] sm:$0xff] }
 0x4bc   : > { %14303 = vmatmul.mubr.f32.gmra.mxu1 %v21534_v41  ;;  %14359 = vmatmul.mubr.f32.gmra.mxu0 %v21536_v4  ;;  %v21545_v41 = vld [vmem:[#allocation83_spill] sm:$0xff] }
 0x4bd   : > { %14384 = vmatprep.subr.mxu1 %v21537_v28  ;;  %14440 = vmatprep.subr.mxu0 %v18607_v15  ;;  %v21546_v4 = vunpack.i.l.bf16 %v21545_v41 }
 0x4be   : > { %14361 = vmatprep.mubr.f32.mxu0 %v21539_v16  ;;  %14385 = vmatpush3.msra.mxu1 %v21537_v28  ;;  %v21547_v16 = vld [vmem:[#allocation110_spill] sm:$0xff] }
 0x4bf   : > { %14441 = vmatpush3.msra.mxu0 %v18607_v15  ;;  %14386 = vmatprep.subr.mxu1 %v18458_v42  ;;  %v21557_v15 = vld [vmem:[#allocation135_spill] sm:$0xff] }
 0x4c0   : > { %14442 = vmatprep.subr.mxu0 %v18616_v7  ;;  %14305 = vmatprep.mubr.f32.mxu1 %v21540_v37  ;;  %v21548_v37 = vld [vmem:[#allocation40_spill] sm:$0xff] }
 0x4c1   : > { %14387 = vmatpush3.msra.mxu1 %v18458_v42  ;;  %14443 = vmatpush3.msra.mxu0 %v18616_v7  ;;  %v21558_v7 = vld [vmem:[#allocation48_spill] sm:$0xff]  ;;  %v21577_v42 = vld [vmem:[#allocation138_spill] sm:$0xff] }
 0x4c2   : > { %14306 = vmatmul.mubr.f32.gmra.mxu1 %v21541_v12  ;;  %14362 = vmatmul.mubr.f32.gmra.mxu0 %v21543_v29  ;;  %v21549_v12 = vld [vmem:[#allocation44_spill] sm:$0xff]  ;;  %v21550_v29 = vld [vmem:[#allocation85_spill] sm:$0xff] }
 0x4c3   : > { %14388 = vmatprep.subr.mxu1 %v21544_v55  ;;  %14444 = vmatprep.subr.mxu0 %v18629_v17  ;;  %v21551_v20 = vunpack.i.l.bf16 %v21550_v29 }
 0x4c4   : > { %14364 = vmatprep.mubr.f32.mxu0 %v21546_v4  ;;  %14389 = vmatpush3.msra.mxu1 %v21544_v55  ;;  %v21552_v4 = vld [vmem:[#allocation129_spill] sm:$0xff] }
 0x4c5   : > { %14445 = vmatpush3.msra.mxu0 %v18629_v17  ;;  %14390 = vmatprep.subr.mxu1 %v18480_v18 }
 0x4c6   : > { %14446 = vmatprep.subr.mxu0 %v21547_v16  ;;  %14308 = vmatprep.mubr.f32.mxu1 %v21548_v37  ;;  %v21556_v37 = vld [vmem:[#allocation146_spill] sm:$0xff] }
 0x4c7   : > { %14391 = vmatpush3.msra.mxu1 %v18480_v18  ;;  %14447 = vmatpush3.msra.mxu0 %v21547_v16  ;;  %v21563_v16 = vld [vmem:[#allocation102_spill] sm:$0xff] }
 0x4c8   : > { %14309 = vmatmul.mubr.f32.gmra.mxu1 %v21549_v12  ;;  %14365 = vmatmul.mubr.f32.gmra.mxu0 %v21551_v20  ;;  %v21559_v20 = vld [vmem:[#allocation52_spill] sm:$0xff] }
 0x4c9   : > { %14392 = vmatprep.subr.mxu1 %v21552_v4  ;;  %14448 = vmatprep.subr.mxu0 %v21553_v30  ;;  %v21560_v12 = vld [vmem:[#allocation88_spill] sm:$0xff] }
 0x4ca   : > { %14367 = vmatprep.mubr.f32.mxu0 %v21555_v62  ;;  %14393 = vmatpush3.msra.mxu1 %v21552_v4  ;;  %v21561_v17 = vunpack.i.l.bf16 %v21560_v12  ;;  %v21562_v62 = vld [vmem:[#allocation114_spill] sm:$0xff] }
 0x4cb   : > { %14449 = vmatpush3.msra.mxu0 %v21553_v30  ;;  %14394 = vmatprep.subr.mxu1 %v21556_v37  ;;  %v21564_v30 = vld [vmem:[#allocation90_spill] sm:$0xff] }
 0x4cc   : > { %14450 = vmatprep.subr.mxu0 %v21557_v15  ;;  %14311 = vmatprep.mubr.f32.mxu1 %v21558_v7  ;;  %v21565_v39 = vunpack.i.l.bf16 %v21564_v30  ;;  %v21566_v7 = vld [vmem:[#allocation128_spill] sm:$0xff] }
 0x4cd   : > { %14395 = vmatpush3.msra.mxu1 %v21556_v37  ;;  %14451 = vmatpush3.msra.mxu0 %v21557_v15  ;;  %v21568_v15 = vld [vmem:[#allocation56_spill] sm:$0xff] }
 0x4ce   : > { %14312 = vmatmul.mubr.f32.gmra.mxu1 %v21559_v20  ;;  %14368 = vmatmul.mubr.f32.gmra.mxu0 %v21561_v17  ;;  %v21569_v17 = vld [vmem:[#allocation60_spill] sm:$0xff] }
 0x4cf   : > { %14396 = vmatprep.subr.mxu1 %v21562_v62  ;;  %14452 = vmatprep.subr.mxu0 %v21563_v16  ;;  %v21570_v20 = vld [vmem:[#allocation92_spill] sm:$0xff] }
 0x4d0   : > { %14370 = vmatprep.mubr.f32.mxu0 %v21565_v39  ;;  %14397 = vmatpush3.msra.mxu1 %v21562_v62  ;;  %v21571_v3 = vunpack.i.l.bf16 %v21570_v20  ;;  %v21572_v39 = vld [vmem:[#allocation147_spill] sm:$0xff] }
 0x4d1   : > { %14453 = vmatpush3.msra.mxu0 %v21563_v16  ;;  %14398 = vmatprep.subr.mxu1 %v21566_v7  ;;  %v21574_v16 = vld [vmem:[#allocation94_spill] sm:$0xff] }
 0x4d2   : > { %14454 = vmatprep.subr.mxu0 %v21567_v48  ;;  %14314 = vmatprep.mubr.f32.mxu1 %v21568_v15  ;;  %v21575_v28 = vunpack.i.l.bf16 %v21574_v16  ;;  %v21576_v15 = vld [vmem:[#allocation115_spill] sm:$0xff] }
 0x4d3   : > { %14399 = vmatpush3.msra.mxu1 %v21566_v7  ;;  %14455 = vmatpush3.msra.mxu0 %v21567_v48  ;;  %v21578_v48 = vld [vmem:[#allocation64_spill] sm:$0xff] }
 0x4d4   : > { %14315 = vmatmul.mubr.f32.gmra.mxu1 %v21569_v17  ;;  %14371 = vmatmul.mubr.f32.gmra.mxu0 %v21571_v3  ;;  %v21579_v3 = vld [vmem:[#allocation68_spill] sm:$0xff]  ;;  %v21580_v17 = vld [vmem:[#allocation95_spill] sm:$0xff] }
 0x4d5   : > { %14400 = vmatprep.subr.mxu1 %v21572_v39  ;;  %14456 = vmatprep.subr.mxu0 %v21573_v56  ;;  %v21581_v55 = vunpack.i.l.bf16 %v21580_v17 }
 0x4d6   : > { %14373 = vmatprep.mubr.f32.mxu0 %v21575_v28  ;;  %14401 = vmatpush3.msra.mxu1 %v21572_v39  ;;  %v21582_v28 = vld [vmem:[#allocation127_spill] sm:$0xff] }
 0x4d7   : > { %14457 = vmatpush3.msra.mxu0 %v21573_v56  ;;  %14402 = vmatprep.subr.mxu1 %v21576_v15  ;;  %v21583_v56 = vunpack.i.h.bf16 %v21519_v47 }
 0x4d8   : > { %14458 = vmatprep.subr.mxu0 %v21577_v42  ;;  %14317 = vmatprep.mubr.f32.mxu1 %v21578_v48  ;;  %v21584_v48 = vld [vmem:[#allocation71_spill] sm:$0xff] }
 0x4d9   : > { %14403 = vmatpush3.msra.mxu1 %v21576_v15  ;;  %14459 = vmatpush3.msra.mxu0 %v21577_v42  ;;  %v21585_v18 = vunpack.i.l.bf16 %v21584_v48  ;;  %v21586_v42 = vld [vmem:[#allocation148_spill] sm:$0xff] }
 0x4da   : > { %14318 = vmatmul.mubr.f32.gmra.mxu1 %v21579_v3  ;;  %14374 = vmatmul.mubr.f32.gmra.mxu0 %v21581_v55  ;;  %v21587_v55 = vunpack.i.h.bf16 %v21522_v59  ;;  %v21588_v3 = vld [vmem:[#allocation73_spill] sm:$0xff] }
 0x4db   : > { %14404 = vmatprep.subr.mxu1 %v21582_v28  ;;  %14460 = vmatprep.subr.mxu0 %v18724_v46  ;;  %v21589_v4 = vunpack.i.l.bf16 %v21588_v3  ;;  %v21594_v59 = vld [vmem:[#allocation77_spill] sm:$0xff] }
 0x4dc   : > { %14405 = vmatpush3.msra.mxu1 %v21582_v28  ;;  %14408 = vmatprep.mubr.f32.mxu1 %v21583_v56  ;;  %v21590_v56 = vunpack.i.h.bf16 %v21524_v26  ;;  %v21597_v26 = vunpack.i.h.bf16 %v21531_v24  ;;  %v21604_v24 = vunpack.i.h.bf16 %v21535_v35  ;;  %v21610_v35 = vunpack.i.h.bf16 %v21542_v61 }
 0x4dd   : > { %14461 = vmatpush3.msra.mxu0 %v18724_v46  ;;  %14464 = vmatprep.mubr.f32.mxu0 %v21585_v18  ;;  %v21591_v18 = vld [vmem:[#allocation75_spill] sm:$0xff]  ;;  %v21593_v46 = vld [vmem:[#allocation106_spill] sm:$0xff]  ;;  %v21616_v61 = vunpack.i.h.bf16 %v21550_v29  ;;  %v21622_v29 = vunpack.i.h.bf16 %v21560_v12  ;;  %v21628_v12 = vunpack.i.h.bf16 %v21570_v20  ;;  %v21632_v20 = vld [vmem:[#allocation105_spill] sm:$0xff] }
 0x4de   : > { %14406 = vmatprep.subr.mxu1 %v21586_v42  ;;  %14462 = vmatprep.subr.mxu0 %v18733_v1  ;;  %v21592_v47 = vunpack.i.l.bf16 %v21591_v18 }
 0x4df   : > { %14407 = vmatpush3.msra.mxu1 %v21586_v42  ;;  %14463 = vmatpush3.msra.mxu0 %v18733_v1 }
 0x4e0   : > { %14409 = vmatmul.mubr.f32.vlgmr.msra.gmra.mxu1 %v21587_v55  ;;  %14465 = vmatmul.mubr.f32.vlgmr.msra.gmra.mxu0 %v21589_v4  ;;  %v21595_v55 = vunpack.i.l.bf16 %v21594_v59  ;;  %v21596_v4 = vunpack.i.h.bf16 %v21528_v36  ;;  %v21602_v36 = vld [vmem:[#allocation84_spill] sm:$0xff] }
 0x4e1   : > { %14488 = vmatprep.subr.mxu1 %v18745_v25  ;;  %14411 = vmatprep.mubr.f32.mxu1 %v21590_v56  ;;  %v21598_v56 = vld [vmem:[#allocation80_spill] sm:$0xff] }
 0x4e2   : > { %14467 = vmatprep.mubr.f32.mxu0 %v21592_v47  ;;  %14489 = vmatpush3.msra.mxu1 %v18745_v25  ;;  %v21599_v47 = vunpack.i.l.bf16 %v21598_v56  ;;  %v21600_v25 = vld [vmem:[#allocation82_spill] sm:$0xff] }
 0x4e3   : > { %14490 = vmatprep.subr.mxu1 %v18754_v34  ;;  %14544 = vmatprep.subr.mxu0 %v21593_v46 }
 0x4e4   : > { %14491 = vmatpush3.msra.mxu1 %v18754_v34  ;;  %14468 = vmatmul.mubr.f32.gmra.mxu0 %v21595_v55  ;;  %v21601_v34 = vunpack.i.l.bf16 %v21600_v25  ;;  %v21603_v55 = vunpack.i.l.bf16 %v21602_v36 }
 0x4e5   : > { %14412 = vmatmul.mubr.f32.gmra.mxu1 %v21596_v4  ;;  %14492 = vmatprep.subr.mxu1 %v18763_v58  ;;  %v21605_v4 = vunpack.i.h.bf16 %v21538_v53  ;;  %v21611_v53 = vunpack.i.h.bf16 %v21545_v41  ;;  %v21617_v41 = vunpack.i.h.bf16 %v21554_v33  ;;  %v21623_v33 = vunpack.i.h.bf16 %v21564_v30 }
 0x4e6   : > { %14414 = vmatprep.mubr.f32.mxu1 %v21597_v26  ;;  %14470 = vmatprep.mubr.f32.mxu0 %v21599_v47  ;;  %v21629_v30 = vunpack.i.h.bf16 %v21574_v16  ;;  %v21634_v16 = vld [vmem:[#allocation139_spill] sm:$0xff] }
 0x4e7   : > { %14493 = vmatpush3.msra.mxu1 %v18763_v58  ;;  %14545 = vmatpush3.msra.mxu0 %v21593_v46  ;;  %v21606_v46 = vld [vmem:[#allocation86_spill] sm:$0xff] }
 0x4e8   : > { %14494 = vmatprep.subr.mxu1 %v18771_v40  ;;  %14471 = vmatmul.mubr.f32.gmra.mxu0 %v21601_v34  ;;  %v21607_v26 = vunpack.i.l.bf16 %v21606_v46  ;;  %v21608_v34 = vld [vmem:[#allocation89_spill] sm:$0xff] }
 0x4e9   : > { %14495 = vmatpush3.msra.mxu1 %v18771_v40  ;;  %14473 = vmatprep.mubr.f32.mxu0 %v21603_v55  ;;  %v21609_v47 = vunpack.i.l.bf16 %v21608_v34  ;;  %v21612_v55 = vld [vmem:[#allocation91_spill] sm:$0xff] }
 0x4ea   : > { %14415 = vmatmul.mubr.f32.gmra.mxu1 %v21604_v24  ;;  %14496 = vmatprep.subr.mxu1 %v18781_v10  ;;  %v21613_v24 = vunpack.i.l.bf16 %v21612_v55 }
 0x4eb   : > { %14417 = vmatprep.mubr.f32.mxu1 %v21605_v4  ;;  %14497 = vmatpush3.msra.mxu1 %v18781_v10  ;;  %v21614_v4 = vld [vmem:[#allocation93_spill] sm:$0xff] }
 0x4ec   : > { %14498 = vmatprep.subr.mxu1 %v18790_v6  ;;  %14474 = vmatmul.mubr.f32.gmra.mxu0 %v21607_v26  ;;  %v21615_v26 = vunpack.i.l.bf16 %v21614_v4 }
 0x4ed   : > { %14499 = vmatpush3.msra.mxu1 %v18790_v6  ;;  %14476 = vmatprep.mubr.f32.mxu0 %v21609_v47  ;;  %v7753_v47 = vpop.permute.xlu0 %7752 }
 0x4ee   : > { %14418 = vmatmul.mubr.f32.gmra.mxu1 %v21610_v35  ;;  %14500 = vmatprep.subr.mxu1 %v18801_v45  ;;  %v21618_v35 = vld [vmem:[#allocation96_spill] sm:$0xff] }
 0x4ef   : > { %14420 = vmatprep.mubr.f32.mxu1 %v21611_v53  ;;  %14501 = vmatpush3.msra.mxu1 %v18801_v45  ;;  %v21619_v53 = vunpack.i.l.bf16 %v21618_v35 }
 0x4f0   : > { %14502 = vmatprep.subr.mxu1 %v18810_v11  ;;  %14477 = vmatmul.mubr.f32.gmra.mxu0 %v21613_v24  ;;  %v21620_v24 = vld [vmem:[#allocation97_spill] sm:$0xff] }
 0x4f1   : > { %14503 = vmatpush3.msra.mxu1 %v18810_v11  ;;  %14479 = vmatprep.mubr.f32.mxu0 %v21615_v26  ;;  %v21621_v26 = vunpack.i.l.bf16 %v21620_v24 }
 0x4f2   : > { %14421 = vmatmul.mubr.f32.gmra.mxu1 %v21616_v61  ;;  %14504 = vmatprep.subr.mxu1 %v18821_v19  ;;  %v21624_v61 = vld [vmem:[#allocation98_spill] sm:$0xff] }
 0x4f3   : > { %14423 = vmatprep.mubr.f32.mxu1 %v21617_v41  ;;  %14505 = vmatpush3.msra.mxu1 %v18821_v19  ;;  %v21625_v41 = vunpack.i.l.bf16 %v21624_v61 }
 0x4f4   : > { %14506 = vmatprep.subr.mxu1 %v18830_v22  ;;  %14480 = vmatmul.mubr.f32.gmra.mxu0 %v21619_v53  ;;  %v21626_v53 = vld [vmem:[#allocation101_spill] sm:$0xff] }
 0x4f5   : > { %14507 = vmatpush3.msra.mxu1 %v18830_v22  ;;  %14482 = vmatprep.mubr.f32.mxu0 %v21621_v26  ;;  %v21627_v58 = vunpack.i.l.bf16 %v21626_v53  ;;  %v7749_v26 = vpop.permute.xlu0 %7748 }
 0x4f6   : > { %14424 = vmatmul.mubr.f32.gmra.mxu1 %v21622_v29  ;;  %14508 = vmatprep.subr.mxu1 %v18841_v49  ;;  %v21630_v29 = vld [vmem:[#allocation140_spill] sm:$0xff] }
 0x4f7   : > { %14426 = vmatprep.mubr.f32.mxu1 %v21623_v33  ;;  %14509 = vmatpush3.msra.mxu1 %v18841_v49  ;;  %v21631_v33 = vunpack.i.h.bf16 %v21580_v17 }
 0x4f8   : > { %14510 = vmatprep.subr.mxu1 %v18850_v44  ;;  %14483 = vmatmul.mubr.f32.gmra.mxu0 %v21625_v41  ;;  %v21633_v41 = vunpack.i.l.bf16 %v21632_v20 }
 0x4f9   : > { %14511 = vmatpush3.msra.mxu1 %v18850_v44  ;;  %14485 = vmatprep.mubr.f32.mxu0 %v21627_v58  ;;  %v8478_v58 = vpop.permute.xlu0 %8477 }
 0x4fa   : > { %14427 = vmatmul.mubr.f32.gmra.mxu1 %v21628_v12  ;;  %14512 = vmatprep.subr.mxu1 %v18861_v54  ;;  %v21635_v12 = vunpack.i.h.bf16 %v21584_v48  ;;  %v21637_v48 = vunpack.i.h.bf16 %v21591_v18 }
 0x4fb   : > { %14429 = vmatprep.mubr.f32.mxu1 %v21629_v30  ;;  %14513 = vmatpush3.msra.mxu1 %v18861_v54  ;;  %v21636_v30 = vunpack.i.h.bf16 %v21588_v3 }
 0x4fc   : > { %14514 = vmatprep.subr.mxu1 %v18870_v52  ;;  %14546 = vmatprep.subr.mxu0 %v21630_v29 }
 0x4fd   : > { %14515 = vmatpush3.msra.mxu1 %v18870_v52  ;;  %14547 = vmatpush3.msra.mxu0 %v21630_v29  ;;  %v8476_v17 = vpop.permute.xlu0 %8475  ;;  %v7751_v29 = vpop.permute.xlu1 %7750 }
 0x4fe   : > { %14430 = vmatmul.mubr.f32.gmra.mxu1 %v21631_v33  ;;  %14486 = vmatmul.mubr.f32.gmra.mxu0 %v21633_v41  ;;  %v21639_v33 = vunpack.i.h.bf16 %v21598_v56 }
 0x4ff   : > { %14516 = vmatprep.subr.mxu1 %v18881_v23  ;;  %14548 = vmatprep.subr.mxu0 %v21634_v16 }
 0x500   : > { %14517 = vmatpush3.msra.mxu1 %v18881_v23  ;;  %14520 = vmatprep.mubr.f32.mxu1 %v21635_v12 }
 0x501   : > { %14549 = vmatpush3.msra.mxu0 %v21634_v16  ;;  %14552 = vmatprep.mubr.msk.f32.mxu0 %vm280_vm0, %v18398_v63  ;;  %v8474_v18 = vpop.permute.xlu0 %8473  ;;  %v7747_v16 = vpop.permute.xlu1 %7746 }
 0x502   : > { %14518 = vmatprep.subr.mxu1 %v18890_v32  ;;  %14550 = vmatprep.subr.mxu0 %v18742_v8 }
 0x503   : > { %14519 = vmatpush3.msra.mxu1 %v18890_v32  ;;  %14551 = vmatpush3.msra.mxu0 %v18742_v8  ;;  %v21638_v8 = vunpack.i.h.bf16 %v21594_v59 }
 0x504   : > { %14521 = vmatmul.mubr.f32.vlgmr.msra.gmra.mxu1 %v21636_v30  ;;  %14553 = vmatmul.mubr.msk.f32.vlgmr.msra.gmra.mxu0 %vm280_vm0, %v18394_v57 }
 0x505   : > { %14523 = vmatprep.mubr.f32.mxu1 %v21637_v48  ;;  %14555 = vmatprep.mubr.msk.f32.mxu0 %vm280_vm0, %v21516_v60  ;;  %v8472_v12 = vpop.permute.xlu0 %8471  ;;  %v21644_v48 = vunpack.i.h.bf16 %v21612_v55  ;;  %v21647_v55 = vunpack.i.h.bf16 %v21620_v24  ;;  %v21650_v24 = vunpack.i.h.bf16 %v21632_v20 }
 0x506   : > { %14648 = vmatprep.subr.mxu1 %v7753_v47  ;;  %14752 = vmatprep.subr.mxu0 %v8478_v58 }
 0x507   : > { %14649 = vmatpush3.msra.mxu1 %v7753_v47  ;;  %14753 = vmatpush3.msra.mxu0 %v8478_v58  ;;  %v21640_v47 = vunpack.i.h.bf16 %v21600_v25  ;;  %v21641_v58 = vunpack.i.h.bf16 %v21602_v36  ;;  %v21642_v25 = vunpack.i.h.bf16 %v21606_v46  ;;  %v21643_v36 = vunpack.i.h.bf16 %v21608_v34 }
 0x508   : > { %14524 = vmatmul.mubr.f32.gmra.mxu1 %v21638_v8  ;;  %14556 = vmatmul.mubr.msk.f32.gmra.mxu0 %vm280_vm0, %v21515_v5  ;;  %v14130_v3 = vpop.f32.mrf.mxu0  ;;  %v21645_v46 = vunpack.i.h.bf16 %v21614_v4  ;;  %v21648_v4 = vunpack.i.h.bf16 %v21624_v61 }
 0x509   : > { %14526 = vmatprep.mubr.f32.mxu1 %v21639_v33  ;;  %14558 = vmatprep.mubr.msk.f32.mxu0 %vm280_vm0, %v21512_v27  ;;  %v21649_v33 = vunpack.i.h.bf16 %v21626_v53 }
 0x50a   : > { %14650 = vmatprep.subr.mxu1 %v7751_v29  ;;  %v6075_v41 = vpop.f32.mrf.mxu0  ;;  %14754 = vmatprep.subr.mxu0 %v8476_v17 }
 0x50b   : > { %14651 = vmatpush3.msra.mxu1 %v7751_v29  ;;  %14755 = vmatpush3.msra.mxu0 %v8476_v17  ;;  %v21646_v29 = vunpack.i.h.bf16 %v21618_v35 }
 0x50c   : > { %14527 = vmatmul.mubr.f32.gmra.mxu1 %v21640_v47  ;;  %14559 = vmatmul.mubr.msk.f32.gmra.mxu0 %vm280_vm0, %v21511_v14  ;;  %v14133_v59 = vpop.f32.mrf.mxu0 }
 0x50d   : > { %14529 = vmatprep.mubr.f32.mxu1 %v21641_v58  ;;  %14561 = vmatprep.mubr.msk.f32.mxu0 %vm280_vm0, %v18352_v50 }
 0x50e   : > { %14652 = vmatprep.subr.mxu1 %v7749_v26  ;;  %v6085_v56 = vpop.f32.mrf.mxu0  ;;  %14756 = vmatprep.subr.mxu0 %v8474_v18 }
 0x50f   : > { %14653 = vmatpush3.msra.mxu1 %v7749_v26  ;;  %14757 = vmatpush3.msra.mxu0 %v8474_v18  ;;  %v8875_v26 = vpop.permute.xlu1 %8874 }
 0x510   : > { %14530 = vmatmul.mubr.f32.gmra.mxu1 %v21642_v25  ;;  %14562 = vmatmul.mubr.msk.f32.gmra.mxu0 %vm280_vm0, %v21508_v43  ;;  %v14136_v17 = vpop.f32.mrf.mxu0 }
 0x511   : > { %14532 = vmatprep.mubr.f32.mxu1 %v21643_v36  ;;  %14564 = vmatprep.mubr.msk.f32.mxu0 %vm280_vm0, %v18332_v31  ;;  %v21652_v36 = vld [vmem:[#allocation131_spill] sm:$0xff] }
 0x512   : > { %14654 = vmatprep.subr.mxu1 %v7747_v16  ;;  %v6095_v30 = vpop.f32.mrf.mxu0  ;;  %14758 = vmatprep.subr.mxu0 %v8472_v12 }
 0x513   : > { %14655 = vmatpush3.msra.mxu1 %v7747_v16  ;;  %14759 = vmatpush3.msra.mxu0 %v8472_v12  ;;  %v8873_v18 = vpop.permute.xlu1 %8872  ;;  %v21651_v12 = vld [vmem:[#allocation129_spill] sm:$0xff] }
 0x514   : > { %14533 = vmatmul.mubr.f32.gmra.mxu1 %v21644_v48  ;;  %14565 = vmatmul.mubr.msk.f32.gmra.mxu0 %vm280_vm0, %v18324_v38  ;;  %v14139_v34 = vpop.f32.mrf.mxu0  ;;  %v21654_v48 = vld [vmem:[#allocation145_spill] sm:$0xff] }
 0x515   : > { %14535 = vmatprep.mubr.f32.mxu1 %v21645_v46  ;;  %14567 = vmatprep.mubr.msk.f32.mxu0 %vm280_vm0, %v18314_v13 }
 0x516   : > { %14856 = vmatprep.subr.mxu1 %v8875_v26  ;;  %v6105_v8 = vpop.f32.mrf.mxu0 }
 0x517   : > { %v8871_v20 = vpop.permute.xlu1 %8870 }
 0x518   : > { %14536 = vmatmul.mubr.f32.gmra.mxu1 %v21646_v29  ;;  %14568 = vmatmul.mubr.msk.f32.gmra.mxu0 %vm280_vm0, %v18306_v0  ;;  %v14142_v35 = vpop.f32.mrf.mxu0  ;;  %v21655_v29 = vld [vmem:[#allocation130_spill] sm:$0xff] }
 0x519   : > { %14538 = vmatprep.mubr.f32.mxu1 %v21647_v55  ;;  %14570 = vmatprep.mubr.msk.f32.mxu0 %vm280_vm0, %v18296_v9  ;;  %v21656_v55 = vld [vmem:[#allocation117_spill] sm:$0xff] }
 0x51a   : > { %v6115_v61 = vpop.f32.mrf.mxu0 }
 0x51c   : > { %14539 = vmatmul.mubr.f32.gmra.mxu1 %v21648_v4  ;;  %14571 = vmatmul.mubr.msk.f32.gmra.mxu0 %vm280_vm0, %v18289_v51  ;;  %v14145_v53 = vpop.f32.mrf.mxu0 }
 0x51d   : > { %14541 = vmatprep.mubr.f32.mxu1 %v21649_v33  ;;  %14573 = vmatprep.mubr.msk.f32.mxu0 %vm280_vm0, %v18280_v2  ;;  %v21657_v33 = vld [vmem:[#allocation116_spill] sm:$0xff] }
 0x520   : > { %14542 = vmatmul.mubr.f32.gmra.mxu1 %v21650_v24  ;;  %14574 = vmatmul.mubr.msk.f32.gmra.mxu0 %vm280_vm0, %v18275_v21 }
 0x521   : > { %14576 = vmatprep.mubr.msk.f32.mxu0 %vm280_vm0, %v21586_v42  ;;  %14656 = vmatprep.mubr.msk.f32.mxu1 %vm280_vm0, %v6075_v41 }
 0x524   : > { %14577 = vmatmul.mubr.msk.f32.gmra.mxu0 %vm280_vm0, %v21582_v28  ;;  %14657 = vmatmul.mubr.msk.f32.vlgmr.msra.gmra.mxu1 %vm280_vm0, %v14130_v3  ;;  %v6125_v3 = vpop.f32.mrf.mxu0 }
 0x525   : > { %14579 = vmatprep.mubr.msk.f32.mxu0 %vm280_vm0, %v21576_v15  ;;  %14659 = vmatprep.mubr.msk.f32.mxu1 %vm280_vm0, %v6085_v56  ;;  %v8869_v56 = vpop.permute.xlu1 %8868 }
 0x526   : > { %14857 = vmatpush3.msra.mxu1 %v8875_v26  ;;  %v21653_v26 = vld [vmem:[#allocation137_spill] sm:$0xff] }
 0x527   : > { %14858 = vmatprep.subr.mxu1 %v8873_v18 }
 0x528   : > { %14580 = vmatmul.mubr.msk.f32.gmra.mxu0 %vm280_vm0, %v21572_v39  ;;  %14660 = vmatmul.mubr.msk.f32.gmra.mxu1 %vm280_vm0, %v14133_v59  ;;  %v14186_v41 = vpop.f32.mrf.mxu1  ;;  %v14148_v59 = vpop.f32.mrf.mxu0 }
 0x529   : > { %14582 = vmatprep.mubr.msk.f32.mxu0 %vm280_vm0, %v21566_v7  ;;  %14662 = vmatprep.mubr.msk.f32.mxu1 %vm280_vm0, %v6095_v30 }
 0x52a   : > { %v6220_v47 = vpop.f32.mrf.mxu1  ;;  %14859 = vmatpush3.msra.mxu1 %v8873_v18  ;;  %v21659_v18 = vld [vmem:[#allocation118_spill] sm:$0xff] }
 0x52b   : > { %14860 = vmatprep.subr.mxu1 %v8871_v20 }
 0x52c   : > { %14583 = vmatmul.mubr.msk.f32.gmra.mxu0 %vm280_vm0, %v21562_v62  ;;  %14663 = vmatmul.mubr.msk.f32.gmra.mxu1 %vm280_vm0, %v14136_v17  ;;  %v14189_v58 = vpop.f32.mrf.mxu1  ;;  %v6135_v17 = vpop.f32.mrf.mxu0 }
 0x52d   : > { %14585 = vmatprep.mubr.msk.f32.mxu0 %vm280_vm0, %v21556_v37  ;;  %14665 = vmatprep.mubr.msk.f32.mxu1 %vm280_vm0, %v6105_v8 }
 0x52e   : > { %v6230_v16 = vpop.f32.mrf.mxu1  ;;  %14861 = vmatpush3.msra.mxu1 %v8871_v20  ;;  %v14151_v46 = vpop.f32.mrf.mxu0  ;;  %v21661_v20 = vld [vmem:[#allocation138_spill] sm:$0xff] }
 0x52f   : > { %14862 = vmatprep.subr.mxu1 %v8869_v56 }
 0x530   : > { %14586 = vmatmul.mubr.msk.f32.gmra.mxu0 %vm280_vm0, %v21651_v12  ;;  %14666 = vmatmul.mubr.msk.f32.gmra.mxu1 %vm280_vm0, %v14139_v34  ;;  %v14192_v25 = vpop.f32.mrf.mxu1  ;;  %v6145_v8 = vpop.f32.mrf.mxu0 }
 0x531   : > { %14588 = vmatprep.mubr.msk.f32.mxu0 %vm280_vm0, %v21652_v36  ;;  %14668 = vmatprep.mubr.msk.f32.mxu1 %vm280_vm0, %v6115_v61 }
 0x532   : > { %v6240_v30 = vpop.f32.mrf.mxu1  ;;  %14863 = vmatpush3.msra.mxu1 %v8869_v56  ;;  %v21662_v56 = vld [vmem:[#allocation141_spill] sm:$0xff] }
 0x534   : > { %14589 = vmatmul.mubr.msk.f32.gmra.mxu0 %vm280_vm0, %v21653_v26  ;;  %14669 = vmatmul.mubr.msk.f32.gmra.mxu1 %vm280_vm0, %v14142_v35  ;;  %v14195_v34 = vpop.f32.mrf.mxu1  ;;  %v21658_v35 = vld [vmem:[#allocation119_spill] sm:$0xff] }
 0x535   : > { %14591 = vmatprep.mubr.msk.f32.mxu0 %vm280_vm0, %v21654_v48  ;;  %14671 = vmatprep.mubr.msk.f32.mxu1 %vm280_vm0, %v6125_v3 }
 0x536   : > { %v6250_v4 = vpop.f32.mrf.mxu1 }
 0x538   : > { %14592 = vmatmul.mubr.msk.f32.gmra.mxu0 %vm280_vm0, %v21655_v29  ;;  %14672 = vmatmul.mubr.msk.f32.gmra.mxu1 %vm280_vm0, %v14145_v53  ;;  %v14198_v24 = vpop.f32.mrf.mxu1  ;;  %v21660_v53 = vld [vmem:[#allocation100_spill] sm:$0xff] }
 0x539   : > { %14594 = vmatprep.mubr.msk.f32.mxu0 %vm280_vm0, %v21656_v55  ;;  %14674 = vmatprep.mubr.msk.f32.mxu1 %vm280_vm0, %v6135_v17  ;;  %v21663_v17 = vld [vmem:[#allocation104_spill] sm:$0xff] }
 0x53a   : > { %v6260_v61 = vpop.f32.mrf.mxu1 }
 0x53c   : > { %14595 = vmatmul.mubr.msk.f32.gmra.mxu0 %vm280_vm0, %v21657_v33  ;;  %14675 = vmatmul.mubr.msk.f32.gmra.mxu1 %vm280_vm0, %v14148_v59  ;;  %v14201_v3 = vpop.f32.mrf.mxu1 }
 0x53d   : > { %14597 = vmatprep.mubr.msk.f32.mxu0 %vm280_vm0, %v21658_v35  ;;  %14677 = vmatprep.mubr.msk.f32.mxu1 %vm280_vm0, %v6145_v8 }
 0x540   : > { %14598 = vmatmul.mubr.msk.f32.gmra.mxu0 %vm280_vm0, %v21659_v18  ;;  %14678 = vmatmul.mubr.msk.f32.gmra.mxu1 %vm280_vm0, %v14151_v46 }
 0x541   : > { %14600 = vmatprep.mubr.msk.f32.mxu0 %vm280_vm0, %v18733_v1  ;;  %14680 = vmatprep.mubr.msk.f32.mxu1 %vm280_vm0, %v6220_v47  ;;  %v6270_v47 = vpop.f32.mrf.mxu1 }
 0x544   : > { %14601 = vmatmul.mubr.msk.f32.gmra.mxu0 %vm280_vm0, %v21660_v53  ;;  %14681 = vmatmul.mubr.msk.f32.gmra.mxu1 %vm280_vm0, %v14186_v41  ;;  %v21664_v41 = vld [vmem:[#allocation102_spill] sm:$0xff]  ;;  %v21670_v53 = vld [vmem:[#allocation113_spill] sm:$0xff] }
 0x545   : > { %14603 = vmatprep.mubr.msk.f32.mxu0 %vm280_vm0, %v21661_v20  ;;  %14683 = vmatprep.mubr.msk.f32.mxu1 %vm280_vm0, %v6230_v16  ;;  %v21665_v16 = vld [vmem:[#allocation135_spill] sm:$0xff]  ;;  %v21666_v20 = vld [vmem:[#allocation109_spill] sm:$0xff] }
 0x548   : > { %14604 = vmatmul.mubr.msk.f32.gmra.mxu0 %vm280_vm0, %v21662_v56  ;;  %14684 = vmatmul.mubr.msk.f32.gmra.mxu1 %vm280_vm0, %v14189_v58  ;;  %v14242_v59 = vpop.f32.mrf.mxu0  ;;  %v14204_v58 = vpop.f32.mrf.mxu1 }
 0x549   : > { %14606 = vmatprep.mubr.msk.f32.mxu0 %vm280_vm0, %v21663_v17  ;;  %14686 = vmatprep.mubr.msk.f32.mxu1 %vm280_vm0, %v6240_v30  ;;  %v21667_v30 = vld [vmem:[#allocation110_spill] sm:$0xff] }
 0x54a   : > { %v6365_v46 = vpop.f32.mrf.mxu0  ;;  %v21668_v17 = vld [vmem:[#allocation142_spill] sm:$0xff] }
 0x54c   : > { %14607 = vmatmul.mubr.msk.f32.gmra.mxu0 %vm280_vm0, %v21664_v41  ;;  %14687 = vmatmul.mubr.msk.f32.gmra.mxu1 %vm280_vm0, %v14192_v25  ;;  %v6280_v41 = vpop.f32.mrf.mxu1 }
 0x54d   : > { %14609 = vmatprep.mubr.msk.f32.mxu0 %vm280_vm0, %v21665_v16  ;;  %14689 = vmatprep.mubr.msk.f32.mxu1 %vm280_vm0, %v6250_v4  ;;  %v14245_v8 = vpop.f32.mrf.mxu0  ;;  %v21669_v16 = vld [vmem:[#allocation111_spill] sm:$0xff] }
 0x54f   : > { %v6375_v56 = vpop.f32.mrf.mxu0 }
 0x550   : > { %14610 = vmatmul.mubr.msk.f32.gmra.mxu0 %vm280_vm0, %v21666_v20  ;;  %14690 = vmatmul.mubr.msk.f32.gmra.mxu1 %vm280_vm0, %v14195_v34  ;;  %v14207_v20 = vpop.f32.mrf.mxu1 }
 0x551   : > { %14612 = vmatprep.mubr.msk.f32.mxu0 %vm280_vm0, %v21667_v30  ;;  %14692 = vmatprep.mubr.msk.f32.mxu1 %vm280_vm0, %v6260_v61  ;;  %v21671_v61 = vld [vmem:[#allocation150_spill] sm:$0xff]  ;;  %v21672_v30 = vld [vmem:[#allocation149_spill] sm:$0xff] }
 0x552   : > { %v14248_v25 = vpop.f32.mrf.mxu0 }
 0x554   : > { %14613 = vmatmul.mubr.msk.f32.gmra.mxu0 %vm280_vm0, %v21668_v17  ;;  %14693 = vmatmul.mubr.msk.f32.gmra.mxu1 %vm280_vm0, %v14198_v24  ;;  %v6385_v4 = vpop.f32.mrf.mxu0  ;;  %v6290_v24 = vpop.f32.mrf.mxu1 }
 0x555   : > { %14615 = vmatprep.mubr.msk.f32.mxu0 %vm280_vm0, %v21669_v16  ;;  %14695 = vmatprep.mubr.msk.f32.mxu1 %vm280_vm0, %v6270_v47  ;;  %v21673_v16 = vld [vmem:[#allocation126_spill] sm:$0xff] }
 0x557   : > { %v14251_v34 = vpop.f32.mrf.mxu0 }
 0x558   : > { %14616 = vmatmul.mubr.msk.f32.gmra.mxu0 %vm280_vm0, %v21670_v53  ;;  %14696 = vmatmul.mubr.msk.f32.gmra.mxu1 %vm280_vm0, %v14201_v3  ;;  %v21674_v3 = vld [vmem:[#allocation112_spill] sm:$0xff] }
 0x559   : > { %14618 = vmatprep.mubr.msk.f32.mxu0 %vm280_vm0, %v21671_v61  ;;  %14698 = vmatprep.mubr.msk.f32.mxu1 %vm280_vm0, %v6280_v41  ;;  %v6395_v17 = vpop.f32.mrf.mxu0 }
 0x55c   : > { %14619 = vmatmul.mubr.msk.f32.gmra.mxu0 %vm280_vm0, %v21672_v30  ;;  %14699 = vmatmul.mubr.msk.f32.gmra.mxu1 %vm280_vm0, %v14204_v58  ;;  %v14254_v47 = vpop.f32.mrf.mxu0 }
 0x55d   : > { %14621 = vmatprep.mubr.msk.f32.mxu0 %vm280_vm0, %v21673_v16  ;;  %14701 = vmatprep.mubr.msk.f32.mxu1 %vm280_vm0, %v6290_v24 }
 0x55e   : > { %v6405_v53 = vpop.f32.mrf.mxu0 }
 0x560   : > { %14622 = vmatmul.mubr.msk.f32.gmra.mxu0 %vm280_vm0, %v21674_v3  ;;  %14702 = vmatmul.mubr.msk.f32.gmra.mxu1 %vm280_vm0, %v14207_v20 }
 0x561   : > { %14624 = vmatprep.mubr.msk.f32.mxu0 %vm280_vm0, %v18890_v32  ;;  %14704 = vmatprep.mubr.msk.f32.mxu1 %vm280_vm0, %v6365_v46  ;;  %v14257_v41 = vpop.f32.mrf.mxu0 }
 0x563   : > { %v6415_v30 = vpop.f32.mrf.mxu0 }
 0x564   : > { %14625 = vmatmul.mubr.msk.f32.gmra.mxu0 %vm280_vm0, %v18881_v23  ;;  %14705 = vmatmul.mubr.msk.f32.gmra.mxu1 %vm280_vm0, %v14242_v59  ;;  %v11097_v59 = vld [vmem:[%s20600_s2 + $0x63] ss:$0 sm:$0xff] }
 0x565   : > { %14627 = vmatprep.mubr.msk.f32.mxu0 %vm280_vm0, %v18870_v52  ;;  %14707 = vmatprep.mubr.msk.f32.mxu1 %vm280_vm0, %v6375_v56 }
 0x566   : > { %v14260_v58 = vpop.f32.mrf.mxu0  ;;  %9458 = vrot.lane.b32.xlu0 %v11097_v59, %s15346_s24 }
 0x568   : > { %14628 = vmatmul.mubr.msk.f32.gmra.mxu0 %vm280_vm0, %v18861_v54  ;;  %14708 = vmatmul.mubr.msk.f32.gmra.mxu1 %vm280_vm0, %v14245_v8  ;;  %v6425_v20 = vpop.f32.mrf.mxu0 }
 0x569   : > { %14630 = vmatprep.mubr.msk.f32.mxu0 %vm280_vm0, %v18850_v44  ;;  %14710 = vmatprep.mubr.msk.f32.mxu1 %vm280_vm0, %v6385_v4 }
 0x56b   : > { %v14263_v46 = vpop.f32.mrf.mxu0 }
 0x56c   : > { %14631 = vmatmul.mubr.msk.f32.gmra.mxu0 %vm280_vm0, %v18841_v49  ;;  %14711 = vmatmul.mubr.msk.f32.gmra.mxu1 %vm280_vm0, %v14248_v25 }
 0x56d   : > { %14633 = vmatprep.mubr.msk.f32.mxu0 %vm280_vm0, %v18830_v22  ;;  %14713 = vmatprep.mubr.msk.f32.mxu1 %vm280_vm0, %v6395_v17  ;;  %v6435_v56 = vpop.f32.mrf.mxu0 }
 0x570   : > { %14634 = vmatmul.mubr.msk.f32.gmra.mxu0 %vm280_vm0, %v18821_v19  ;;  %14714 = vmatmul.mubr.msk.f32.gmra.mxu1 %vm280_vm0, %v14251_v34  ;;  %v14298_v8 = vpop.f32.mrf.mxu1  ;;  %v19302_v4 = vpop.f32.mrf.mxu0 }
 0x571   : > { %14636 = vmatprep.mubr.msk.f32.mxu0 %vm280_vm0, %v18810_v11  ;;  %14716 = vmatprep.mubr.msk.f32.mxu1 %vm280_vm0, %v6405_v53  ;;  %v21677_v11 = vld [vmem:[#allocation99_spill] sm:$0xff] }
 0x572   : > { %v6510_v25 = vpop.f32.mrf.mxu1  ;;  %v19307_v24 = vpop.f32.mrf.mxu0 }
 0x574   : > { %14637 = vmatmul.mubr.msk.f32.gmra.mxu0 %vm280_vm0, %v18801_v45  ;;  %14717 = vmatmul.mubr.msk.f32.gmra.mxu1 %vm280_vm0, %v14254_v47  ;;  %v21675_v47 = vld [vmem:[#allocation143_spill] sm:$0xff]  ;;  %v21676_v45 = vld [vmem:[#allocation144_spill] sm:$0xff] }
 0x575   : > { %14639 = vmatprep.mubr.msk.f32.mxu0 %vm280_vm0, %v18790_v6  ;;  %14719 = vmatprep.mubr.msk.f32.mxu1 %vm280_vm0, %v6415_v30 }
 0x576   : > { %v14301_v17 = vpop.f32.mrf.mxu1  ;;  %v19315_v34 = vpop.f32.mrf.mxu0 }
 0x578   : > { %14640 = vmatmul.mubr.msk.f32.gmra.mxu0 %vm280_vm0, %v18781_v10  ;;  %14720 = vmatmul.mubr.msk.f32.gmra.mxu1 %vm280_vm0, %v14257_v41  ;;  %v6520_v53 = vpop.f32.mrf.mxu1  ;;  %v19320_v59 = vpop.f32.mrf.mxu0 }
 0x579   : > { %14642 = vmatprep.mubr.msk.f32.mxu0 %vm280_vm0, %v18771_v40  ;;  %14722 = vmatprep.mubr.msk.f32.mxu1 %vm280_vm0, %v6425_v20 }
 0x57c   : > { %14643 = vmatmul.mubr.msk.f32.gmra.mxu0 %vm280_vm0, %v21675_v47  ;;  %14723 = vmatmul.mubr.msk.f32.gmra.mxu1 %vm280_vm0, %v14260_v58  ;;  %v14304_v30 = vpop.f32.mrf.mxu1  ;;  %v19328_v6 = vpop.f32.mrf.mxu0 }
 0x57d   : > { %14645 = vmatprep.mubr.msk.f32.mxu0 %vm280_vm0, %v21676_v45  ;;  %14725 = vmatprep.mubr.msk.f32.mxu1 %vm280_vm0, %v6435_v56 }
 0x57e   : > { %v6530_v41 = vpop.f32.mrf.mxu1  ;;  %v19333_v10 = vpop.f32.mrf.mxu0 }
 0x580   : > { %14646 = vmatmul.mubr.msk.f32.gmra.mxu0 %vm280_vm0, %v21677_v11  ;;  %14726 = vmatmul.mubr.msk.f32.gmra.mxu1 %vm280_vm0, %v14263_v46 }
 0x581   : > { %14760 = vmatprep.mubr.msk.f32.mxu0 %vm280_vm0, %v18398_v63  ;;  %14728 = vmatprep.mubr.msk.f32.mxu1 %vm280_vm0, %v6510_v25 }
 0x582   : > { %v14307_v58 = vpop.f32.mrf.mxu1  ;;  %v19341_v20 = vpop.f32.mrf.mxu0 }
 0x584   : > { %14761 = vmatmul.mubr.msk.f32.vlgmr.msra.gmra.mxu0 %vm280_vm0, %v18394_v57  ;;  %14729 = vmatmul.mubr.msk.f32.gmra.mxu1 %vm280_vm0, %v14298_v8  ;;  %v6540_v56 = vpop.f32.mrf.mxu1  ;;  %v19346_v45 = vpop.f32.mrf.mxu0 }
 0x585   : > { %14763 = vmatprep.mubr.msk.f32.mxu0 %vm280_vm0, %v21516_v60  ;;  %14731 = vmatprep.mubr.msk.f32.mxu1 %vm280_vm0, %v6520_v53 }
 0x588   : > { %14764 = vmatmul.mubr.msk.f32.gmra.mxu0 %vm280_vm0, %v21515_v5  ;;  %14732 = vmatmul.mubr.msk.f32.gmra.mxu1 %vm280_vm0, %v14301_v17  ;;  %v14310_v63 = vpop.f32.mrf.mxu1  ;;  %v19354_v46 = vpop.f32.mrf.mxu0 }
 0x589   : > { %14766 = vmatprep.mubr.msk.f32.mxu0 %vm280_vm0, %v21512_v27  ;;  %14734 = vmatprep.mubr.msk.f32.mxu1 %vm280_vm0, %v6530_v41 }
 0x58a   : > { %v6550_v57 = vpop.f32.mrf.mxu1  ;;  %v19359_v8 = vpop.f32.mrf.mxu0 }
 0x58c   : > { %14767 = vmatmul.mubr.msk.f32.gmra.mxu0 %vm280_vm0, %v21511_v14  ;;  %14735 = vmatmul.mubr.msk.f32.gmra.mxu1 %vm280_vm0, %v14304_v30 }
 0x58d   : > { %14769 = vmatprep.mubr.msk.f32.mxu0 %vm280_vm0, %v18352_v50  ;;  %14737 = vmatprep.mubr.msk.f32.mxu1 %vm280_vm0, %v6540_v56 }
 0x58e   : > { %v14313_v5 = vpop.f32.mrf.mxu1  ;;  %v19367_v60 = vpop.f32.mrf.mxu0 }
 0x590   : > { %14770 = vmatmul.mubr.msk.f32.gmra.mxu0 %vm280_vm0, %v21508_v43  ;;  %14738 = vmatmul.mubr.msk.f32.gmra.mxu1 %vm280_vm0, %v14307_v58  ;;  %v6560_v27 = vpop.f32.mrf.mxu1  ;;  %v19372_v25 = vpop.f32.mrf.mxu0 }
 0x591   : > { %14772 = vmatprep.mubr.msk.f32.mxu0 %vm280_vm0, %v18332_v31  ;;  %14740 = vmatprep.mubr.msk.f32.mxu1 %vm280_vm0, %v6550_v57  ;;  %v21678_v57 = vld [vmem:[#allocation100_spill] sm:$0xff] }
 0x594   : > { %14773 = vmatmul.mubr.msk.f32.gmra.mxu0 %vm280_vm0, %v18324_v38  ;;  %14741 = vmatmul.mubr.msk.f32.gmra.mxu1 %vm280_vm0, %v14310_v63  ;;  %v14316_v50 = vpop.f32.mrf.mxu1  ;;  %v19380_v14 = vpop.f32.mrf.mxu0 }
 0x595   : > { %14775 = vmatprep.mubr.msk.f32.mxu0 %vm280_vm0, %v18314_v13  ;;  %14743 = vmatprep.mubr.msk.f32.mxu1 %vm280_vm0, %v6560_v27  ;;  %v21680_v27 = vld [vmem:[#allocation141_spill] sm:$0xff] }
 0x596   : > { %v6570_v43 = vpop.f32.mrf.mxu1  ;;  %v19385_v17 = vpop.f32.mrf.mxu0 }
 0x598   : > { %14776 = vmatmul.mubr.msk.f32.gmra.mxu0 %vm280_vm0, %v18306_v0  ;;  %14744 = vmatmul.mubr.msk.f32.gmra.mxu1 %vm280_vm0, %v14313_v5 }
 0x599   : > { %14778 = vmatprep.mubr.msk.f32.mxu0 %vm280_vm0, %v18296_v9  ;;  %14746 = vmatprep.mubr.msk.f32.mxu1 %vm280_vm0, %v6570_v43 }
 0x59a   : > { %v14319_v38 = vpop.f32.mrf.mxu1  ;;  %v19393_v31 = vpop.f32.mrf.mxu0 }
 0x59c   : > { %14779 = vmatmul.mubr.msk.f32.gmra.mxu0 %vm280_vm0, %v18289_v51  ;;  %14747 = vmatmul.mubr.msk.f32.gmra.mxu1 %vm280_vm0, %v14316_v50  ;;  %v6580_v13 = vpop.f32.mrf.mxu1  ;;  %v6725_v53 = vpop.f32.mrf.mxu0 }
 0x59d   : > { %14781 = vmatprep.mubr.msk.f32.mxu0 %vm280_vm0, %v18280_v2  ;;  %14749 = vmatprep.mubr.msk.f32.mxu1 %vm280_vm0, %v6580_v13 }
 0x5a0   : > { %14782 = vmatmul.mubr.msk.f32.gmra.mxu0 %vm280_vm0, %v18275_v21  ;;  %v19403_v9 = vpop.f32.mrf.mxu1  ;;  %v19405_v0 = vpop.f32.mrf.mxu0  ;;  %14750 = vmatmul.mubr.msk.f32.gmra.mxu1 %vm280_vm0, %v14319_v38  ;;  %v21682_v38 = vld [vmem:[#allocation102_spill] sm:$0xff] }
 0x5a1   : > { %14784 = vmatprep.mubr.msk.f32.mxu0 %vm280_vm0, %v21586_v42  ;;  %14864 = vmatprep.mubr.msk.f32.mxu1 %vm280_vm0, %v19307_v24 }
 0x5a2   : > { %v6800_v51 = vpop.f32.mrf.mxu1  ;;  %v19412_v30 = vpop.f32.mrf.mxu0 }
 0x5a4   : > { %14785 = vmatmul.mubr.msk.f32.gmra.mxu0 %vm280_vm0, %v21582_v28  ;;  %v19416_v2 = vpop.f32.mrf.mxu0  ;;  %14865 = vmatmul.mubr.msk.f32.vlgmr.msra.gmra.mxu1 %vm280_vm0, %v19302_v4 }
 0x5a5   : > { %14787 = vmatprep.mubr.msk.f32.mxu0 %vm280_vm0, %v21576_v15  ;;  %v19422_v21 = vpop.f32.mrf.mxu1  ;;  %14867 = vmatprep.mubr.msk.f32.mxu1 %vm280_vm0, %v19320_v59 }
 0x5a6   : > { %v19426_v42 = vpop.f32.mrf.mxu0 }
 0x5a7   : > { %v6810_v24 = vpop.f32.mrf.mxu1 }
 0x5a8   : > { %14788 = vmatmul.mubr.msk.f32.gmra.mxu0 %vm280_vm0, %v21572_v39  ;;  %v19430_v28 = vpop.f32.mrf.mxu0  ;;  %14868 = vmatmul.mubr.msk.f32.gmra.mxu1 %vm280_vm0, %v19315_v34 }
 0x5a9   : > { %14790 = vmatprep.mubr.msk.f32.mxu0 %vm280_vm0, %v21566_v7  ;;  %14870 = vmatprep.mubr.msk.f32.mxu1 %vm280_vm0, %v19333_v10 }
 0x5aa   : > { %v19438_v15 = vpop.f32.mrf.mxu1  ;;  %v19440_v4 = vpop.f32.mrf.mxu0 }
 0x5ac   : > { %14791 = vmatmul.mubr.msk.f32.gmra.mxu0 %vm280_vm0, %v21562_v62  ;;  %v6820_v59 = vpop.f32.mrf.mxu1  ;;  %v19444_v39 = vpop.f32.mrf.mxu0  ;;  %14871 = vmatmul.mubr.msk.f32.gmra.mxu1 %vm280_vm0, %v19328_v6 }
 0x5ad   : > { %14793 = vmatprep.mubr.msk.f32.mxu0 %vm280_vm0, %v21556_v37  ;;  %14873 = vmatprep.mubr.msk.f32.mxu1 %vm280_vm0, %v19346_v45 }
 0x5ae   : > { %v19452_v10 = vpop.f32.mrf.mxu1  ;;  %v19454_v7 = vpop.f32.mrf.mxu0 }
 0x5b0   : > { %14794 = vmatmul.mubr.msk.f32.gmra.mxu0 %vm280_vm0, %v21651_v12  ;;  %v6830_v62 = vpop.f32.mrf.mxu1  ;;  %v19458_v34 = vpop.f32.mrf.mxu0  ;;  %14874 = vmatmul.mubr.msk.f32.gmra.mxu1 %vm280_vm0, %v19341_v20 }
 0x5b1   : > { %14796 = vmatprep.mubr.msk.f32.mxu0 %vm280_vm0, %v21652_v36  ;;  %14876 = vmatprep.mubr.msk.f32.mxu1 %vm280_vm0, %v19359_v8 }
 0x5b2   : > { %v19466_v6 = vpop.f32.mrf.mxu1  ;;  %v19468_v45 = vpop.f32.mrf.mxu0 }
 0x5b4   : > { %14797 = vmatmul.mubr.msk.f32.gmra.mxu0 %vm280_vm0, %v21653_v26  ;;  %v6840_v37 = vpop.f32.mrf.mxu1  ;;  %v19472_v12 = vpop.f32.mrf.mxu0  ;;  %14877 = vmatmul.mubr.msk.f32.gmra.mxu1 %vm280_vm0, %v19354_v46 }
 0x5b5   : > { %14799 = vmatprep.mubr.msk.f32.mxu0 %vm280_vm0, %v21654_v48  ;;  %14879 = vmatprep.mubr.msk.f32.mxu1 %vm280_vm0, %v19372_v25  ;;  %v21681_v25 = vld [vmem:[#allocation104_spill] sm:$0xff] }
 0x5b6   : > { %v19480_v36 = vpop.f32.mrf.mxu1  ;;  %v19482_v41 = vpop.f32.mrf.mxu0 }
 0x5b8   : > { %14800 = vmatmul.mubr.msk.f32.gmra.mxu0 %vm280_vm0, %v21655_v29  ;;  %v6850_v26 = vpop.f32.mrf.mxu1  ;;  %v19486_v58 = vpop.f32.mrf.mxu0  ;;  %14880 = vmatmul.mubr.msk.f32.gmra.mxu1 %vm280_vm0, %v19367_v60 }
 0x5b9   : > { %14802 = vmatprep.mubr.msk.f32.mxu0 %vm280_vm0, %v21656_v55  ;;  %14882 = vmatprep.mubr.msk.f32.mxu1 %vm280_vm0, %v19385_v17 }
 0x5ba   : > { %v19494_v48 = vpop.f32.mrf.mxu1  ;;  %v19496_v20 = vpop.f32.mrf.mxu0 }
 0x5bc   : > { %14803 = vmatmul.mubr.msk.f32.gmra.mxu0 %vm280_vm0, %v21657_v33  ;;  %v6860_v29 = vpop.f32.mrf.mxu1  ;;  %14883 = vmatmul.mubr.msk.f32.gmra.mxu1 %vm280_vm0, %v19380_v14 }
 0x5bd   : > { %14805 = vmatprep.mubr.msk.f32.mxu0 %vm280_vm0, %v21658_v35  ;;  %14885 = vmatprep.mubr.msk.f32.mxu1 %vm280_vm0, %v6725_v53 }
 0x5be   : > { %v19505_v55 = vpop.f32.mrf.mxu1  ;;  %v19507_v56 = vpop.f32.mrf.mxu0 }
 0x5c0   : > { %14806 = vmatmul.mubr.msk.f32.gmra.mxu0 %vm280_vm0, %v21659_v18  ;;  %v6870_v63 = vpop.f32.mrf.mxu1  ;;  %v19511_v46 = vpop.f32.mrf.mxu0  ;;  %14886 = vmatmul.mubr.msk.f32.gmra.mxu1 %vm280_vm0, %v19393_v31  ;;  %v21679_v18 = vld [vmem:[#allocation138_spill] sm:$0xff]  ;;  %v21683_v31 = vld [vmem:[#allocation135_spill] sm:$0xff] }
 0x5c1   : > { %14808 = vmatprep.mubr.msk.f32.mxu0 %vm280_vm0, %v18733_v1  ;;  %14888 = vmatprep.mubr.msk.f32.mxu1 %vm280_vm0, %v6800_v51 }
 0x5c4   : > { %v19518_v33 = vpop.f32.mrf.mxu1  ;;  %v19520_v35 = vpop.f32.mrf.mxu0  ;;  %14809 = vmatmul.mubr.msk.f32.gmra.mxu0 %vm280_vm0, %v21678_v57  ;;  %14889 = vmatmul.mubr.msk.f32.gmra.mxu1 %vm280_vm0, %v19403_v9 }
 0x5c5   : > { %14811 = vmatprep.mubr.msk.f32.mxu0 %vm280_vm0, %v21679_v18  ;;  %14891 = vmatprep.mubr.msk.f32.mxu1 %vm280_vm0, %v6810_v24  ;;  %v21685_v24 = vld [vmem:[#allocation110_spill] sm:$0xff] }
 0x5c6   : > { %v19529_v8 = vpop.f32.mrf.mxu1  ;;  %v19531_v1 = vpop.f32.mrf.mxu0  ;;  %v21686_v18 = vld [vmem:[#allocation142_spill] sm:$0xff] }
 0x5c8   : > { %v19533_v5 = vpop.f32.mrf.mxu1  ;;  %v19535_v60 = vpop.f32.mrf.mxu0  ;;  %14812 = vmatmul.mubr.msk.f32.gmra.mxu0 %vm280_vm0, %v21680_v27  ;;  %14892 = vmatmul.mubr.msk.f32.gmra.mxu1 %vm280_vm0, %v19422_v21  ;;  %v21684_v21 = vld [vmem:[#allocation109_spill] sm:$0xff] }
 0x5c9   : > { %14814 = vmatprep.mubr.msk.f32.mxu0 %vm280_vm0, %v21681_v25  ;;  %14894 = vmatprep.mubr.msk.f32.mxu1 %vm280_vm0, %v6820_v59 }
 0x5ca   : > { %v19544_v50 = vpop.f32.mrf.mxu1  ;;  %v19546_v14 = vpop.f32.mrf.mxu0 }
 0x5cc   : > { %v19548_v43 = vpop.f32.mrf.mxu1  ;;  %v19550_v17 = vpop.f32.mrf.mxu0  ;;  %14815 = vmatmul.mubr.msk.f32.gmra.mxu0 %vm280_vm0, %v21682_v38  ;;  %14895 = vmatmul.mubr.msk.f32.gmra.mxu1 %vm280_vm0, %v19438_v15 }
 0x5cd   : > { %14817 = vmatprep.mubr.msk.f32.mxu0 %vm280_vm0, %v21683_v31  ;;  %14897 = vmatprep.mubr.msk.f32.mxu1 %vm280_vm0, %v6830_v62  ;;  %v21688_v31 = vld [vmem:[#allocation113_spill] sm:$0xff] }
 0x5ce   : > { %v19559_v13 = vpop.f32.mrf.mxu1  ;;  %v19561_v53 = vpop.f32.mrf.mxu0 }
 0x5d0   : > { %v19563_v9 = vpop.f32.mrf.mxu1  ;;  %v19565_v51 = vpop.f32.mrf.mxu0  ;;  %14818 = vmatmul.mubr.msk.f32.gmra.mxu0 %vm280_vm0, %v21684_v21  ;;  %14898 = vmatmul.mubr.msk.f32.gmra.mxu1 %vm280_vm0, %v19452_v10  ;;  %v21687_v10 = vld [vmem:[#allocation111_spill] sm:$0xff] }
 0x5d1   : > { %14820 = vmatprep.mubr.msk.f32.mxu0 %vm280_vm0, %v21685_v24  ;;  %14900 = vmatprep.mubr.msk.f32.mxu1 %vm280_vm0, %v6840_v37 }
 0x5d2   : > { %v19574_v15 = vpop.f32.mrf.mxu1  ;;  %v19576_v59 = vpop.f32.mrf.mxu0 }
 0x5d4   : > { %v19578_v62 = vpop.f32.mrf.mxu1  ;;  %v19580_v57 = vpop.f32.mrf.mxu0  ;;  %14821 = vmatmul.mubr.msk.f32.gmra.mxu0 %vm280_vm0, %v21686_v18  ;;  %14901 = vmatmul.mubr.msk.f32.gmra.mxu1 %vm280_vm0, %v19466_v6  ;;  %v21689_v18 = vld [vmem:[#allocation149_spill] sm:$0xff] }
 0x5d5   : > { %14823 = vmatprep.mubr.msk.f32.mxu0 %vm280_vm0, %v21687_v10  ;;  %14903 = vmatprep.mubr.msk.f32.mxu1 %vm280_vm0, %v6850_v26 }
 0x5d6   : > { %v19589_v37 = vpop.f32.mrf.mxu1  ;;  %v19591_v27 = vpop.f32.mrf.mxu0 }
 0x5d8   : > { %v19593_v25 = vpop.f32.mrf.mxu1  ;;  %v19595_v38 = vpop.f32.mrf.mxu0  ;;  %14824 = vmatmul.mubr.msk.f32.gmra.mxu0 %vm280_vm0, %v21688_v31  ;;  %14904 = vmatmul.mubr.msk.f32.gmra.mxu1 %vm280_vm0, %v19480_v36 }
 0x5d9   : > { %14826 = vmatprep.mubr.msk.f32.mxu0 %vm280_vm0, %v21671_v61  ;;  %14906 = vmatprep.mubr.msk.f32.mxu1 %vm280_vm0, %v6860_v29 }
 0x5da   : > { %v19604_v6 = vpop.f32.mrf.mxu1  ;;  %v19606_v26 = vpop.f32.mrf.mxu0 }
 0x5dc   : > { %v19608_v21 = vpop.f32.mrf.mxu1  ;;  %v19610_v24 = vpop.f32.mrf.mxu0  ;;  %14827 = vmatmul.mubr.msk.f32.gmra.mxu0 %vm280_vm0, %v21689_v18  ;;  %14907 = vmatmul.mubr.msk.f32.gmra.mxu1 %vm280_vm0, %v19494_v48 }
 0x5dd   : > { %14829 = vmatprep.mubr.msk.f32.mxu0 %vm280_vm0, %v21673_v16  ;;  %14909 = vmatprep.mubr.msk.f32.mxu1 %vm280_vm0, %v6870_v63 }
 0x5de   : > { %v19619_v61 = vpop.f32.mrf.mxu1  ;;  %v19621_v36 = vpop.f32.mrf.mxu0 }
 0x5e0   : > { %v19623_v29 = vpop.f32.mrf.mxu1  ;;  %v19625_v10 = vpop.f32.mrf.mxu0  ;;  %14830 = vmatmul.mubr.msk.f32.gmra.mxu0 %vm280_vm0, %v21674_v3  ;;  %14910 = vmatmul.mubr.msk.f32.gmra.mxu1 %vm280_vm0, %v19505_v55 }
 0x5e1   : > { %14832 = vmatprep.mubr.msk.f32.mxu0 %vm280_vm0, %v18890_v32  ;;  %14912 = vmatprep.mubr.msk.f32.mxu1 %vm280_vm0, %v19412_v30 }
 0x5e2   : > { %v19635_v16 = vpop.f32.mrf.mxu1  ;;  %v19637_v48 = vpop.f32.mrf.mxu0 }
 0x5e4   : > { %v19639_v63 = vpop.f32.mrf.mxu0  ;;  %14833 = vmatmul.mubr.msk.f32.gmra.mxu0 %vm280_vm0, %v18881_v23  ;;  %v14658_v31 = vpop.f32.mrf.mxu1  ;;  %14913 = vmatmul.mubr.msk.f32.gmra.mxu1 %vm280_vm0, %v19405_v0 }
 0x5e5   : > { %14835 = vmatprep.mubr.msk.f32.mxu0 %vm280_vm0, %v18870_v52  ;;  %v19648_v32 = vadd.f32 %v14658_v31, %v19520_v35  ;;  %14915 = vmatprep.mubr.msk.f32.mxu1 %vm280_vm0, %v19426_v42  ;;  %v21701_v31 = vld [vmem:[#allocation134_spill] sm:$0xff] }
 0x5e6   : > { %v19652_v3 = vpop.f32.mrf.mxu0  ;;  %v8016_v30 = vpop.f32.mrf.mxu1 }
 0x5e7   : > { %21690 = vst [vmem:[#allocation6_spill] sm:$0xff] %v19648_v32  ;;  %21691 = vst [vmem:[#allocation132_spill] sm:$0xff] %v19652_v3  ;;  %v19655_v55 = vadd.f32 %v8016_v30, %v19531_v1 }
 0x5e8   : > { %v19657_v23 = vpop.f32.mrf.mxu0  ;;  %14836 = vmatmul.mubr.msk.f32.gmra.mxu0 %vm280_vm0, %v18861_v54  ;;  %v14661_v0 = vpop.f32.mrf.mxu1  ;;  %14916 = vmatmul.mubr.msk.f32.gmra.mxu1 %vm280_vm0, %v19416_v2 }
 0x5e9   : > { %21692 = vst [vmem:[#allocation123_spill] sm:$0xff] %v19655_v55  ;;  %14838 = vmatprep.mubr.msk.f32.mxu0 %vm280_vm0, %v18850_v44  ;;  %v19666_v52 = vadd.f32 %v14661_v0, %v19535_v60  ;;  %14918 = vmatprep.mubr.msk.f32.mxu1 %vm280_vm0, %v19440_v4 }
 0x5ea   : > { %v19670_v42 = vpop.f32.mrf.mxu0  ;;  %v8026_v35 = vpop.f32.mrf.mxu1 }
 0x5eb   : > { %21693 = vst [vmem:[#allocation5_spill] sm:$0xff] %v19666_v52  ;;  %21694 = vst [vmem:[#allocation7_spill] sm:$0xff] %v19670_v42  ;;  %v19673_v1 = vadd.f32 %v8026_v35, %v19546_v14  ;;  %v19732_v35 = vld [vmem:[%s20600_s2 + $0x60] sm:$0x3] }
 0x5ec   : > { %v19675_v54 = vpop.f32.mrf.mxu0  ;;  %14839 = vmatmul.mubr.msk.f32.gmra.mxu0 %vm280_vm0, %v18841_v49  ;;  %v14664_v2 = vpop.f32.mrf.mxu1  ;;  %14919 = vmatmul.mubr.msk.f32.gmra.mxu1 %vm280_vm0, %v19430_v28  ;;  %21705 = vst [vmem:[#allocation41_spill] sm:$0xff] %v19732_v35 }
 0x5ed   : > { %21695 = vst [vmem:[#allocation13_spill] sm:$0xff] %v19673_v1  ;;  %14841 = vmatprep.mubr.msk.f32.mxu0 %vm280_vm0, %v18830_v22  ;;  %v19684_v44 = vadd.f32 %v14664_v2, %v19550_v17  ;;  %14921 = vmatprep.mubr.msk.f32.mxu1 %vm280_vm0, %v19454_v7  ;;  %v21698_v22 = vld [vmem:[#allocation125_spill] sm:$0xff]  ;;  %v21706_v2 = vld [vmem:[#allocation136_spill] sm:$0xff] }
 0x5ee   : > { %v19688_v4 = vpop.f32.mrf.mxu0  ;;  %v8036_v60 = vpop.f32.mrf.mxu1  ;;  %9590 = vrot.lane.b32.xlu1 %v19732_v35, %s15346_s24 }
 0x5ef   : > { %21696 = vst [vmem:[#allocation17_spill] sm:$0xff] %v19684_v44  ;;  %v19691_v14 = vadd.f32 %v8036_v60, %v19561_v53 }
 0x5f0   : > { %v19693_v49 = vpop.f32.mrf.mxu0  ;;  %14842 = vmatmul.mubr.msk.f32.gmra.mxu0 %vm280_vm0, %v18821_v19  ;;  %v14667_v28 = vpop.f32.mrf.mxu1  ;;  %14922 = vmatmul.mubr.msk.f32.gmra.mxu1 %vm280_vm0, %v19444_v39 }
 0x5f1   : > { %21697 = vst [vmem:[#allocation21_spill] sm:$0xff] %v19691_v14  ;;  %14844 = vmatprep.mubr.msk.f32.mxu0 %vm280_vm0, %v21698_v22  ;;  %v19702_v7 = vadd.f32 %v14667_v28, %v19565_v51  ;;  %14924 = vmatprep.mubr.msk.f32.mxu1 %vm280_vm0, %v19468_v45  ;;  %v21702_v51 = vld [vmem:[#allocation133_spill] sm:$0xff] }
 0x5f2   : > { %v19706_v17 = vpop.f32.mrf.mxu0  ;;  %v8046_v53 = vpop.f32.mrf.mxu1 }
 0x5f3   : > { %21699 = vst [vmem:[#allocation25_spill] sm:$0xff] %v19702_v7  ;;  %v19709_v18 = vadd.f32 %v8046_v53, %v19576_v59 }
 0x5f4   : > { %v19711_v19 = vpop.f32.mrf.mxu0  ;;  %14845 = vmatmul.mubr.msk.f32.gmra.mxu0 %vm280_vm0, %v21701_v31  ;;  %v14670_v39 = vpop.f32.mrf.mxu1  ;;  %14925 = vmatmul.mubr.msk.f32.gmra.mxu1 %vm280_vm0, %v19458_v34 }
 0x5f5   : > { %21700 = vst [vmem:[#allocation29_spill] sm:$0xff] %v19709_v18  ;;  %14847 = vmatprep.mubr.msk.f32.mxu0 %vm280_vm0, %v21702_v51  ;;  %v19720_v45 = vadd.f32 %v14670_v39, %v19580_v57  ;;  %14927 = vmatprep.mubr.msk.f32.mxu1 %vm280_vm0, %v19482_v41 }
 0x5f6   : > { %v19724_v59 = vpop.f32.mrf.mxu0  ;;  %v8056_v30 = vpop.f32.mrf.mxu1 }
 0x5f7   : > { %21703 = vst [vmem:[#allocation33_spill] sm:$0xff] %v19720_v45  ;;  %v19727_v0 = vadd.f32 %v8056_v30, %v19591_v27 }
 0x5f8   : > { %v19734_v34 = vpop.f32.mrf.mxu0  ;;  %14848 = vmatmul.mubr.msk.f32.gmra.mxu0 %vm280_vm0, %v21706_v2  ;;  %v14673_v57 = vpop.f32.mrf.mxu1  ;;  %14928 = vmatmul.mubr.msk.f32.gmra.mxu1 %vm280_vm0, %v19472_v12  ;;  %v21709_v12 = vld [vmem:[#allocation144_spill] sm:$0xff] }
 0x5f9   : > { %21704 = vst [vmem:[#allocation37_spill] sm:$0xff] %v19727_v0  ;;  %14850 = vmatprep.mubr.msk.f32.mxu0 %vm280_vm0, %v18771_v40  ;;  %v19743_v41 = vadd.f32 %v14673_v57, %v19595_v38  ;;  %14930 = vmatprep.mubr.msk.f32.mxu1 %vm280_vm0, %v19496_v20 }
 0x5fa   : > { %v19747_v27 = vpop.f32.mrf.mxu0  ;;  %v8066_v60 = vpop.f32.mrf.mxu1 }
 0x5fb   : > { %21707 = vst [vmem:[#allocation45_spill] sm:$0xff] %v19743_v41  ;;  %v19752_v28 = vadd.f32 %v8066_v60, %v19606_v26 }
 0x5fc   : > { %v19754_v22 = vpop.f32.mrf.mxu0  ;;  %14851 = vmatmul.mubr.msk.f32.gmra.mxu0 %vm280_vm0, %v21675_v47  ;;  %v14676_v40 = vpop.f32.mrf.mxu1  ;;  %14931 = vmatmul.mubr.msk.f32.gmra.mxu1 %vm280_vm0, %v19486_v58 }
 0x5fd   : > { %21708 = vst [vmem:[#allocation49_spill] sm:$0xff] %v19752_v28  ;;  %14853 = vmatprep.mubr.msk.f32.mxu0 %vm280_vm0, %v21709_v12  ;;  %v19763_v20 = vadd.f32 %v14676_v40, %v19610_v24  ;;  %14933 = vmatprep.mubr.msk.f32.mxu1 %vm280_vm0, %v19511_v46 }
 0x5fe   : > { %v19767_v38 = vpop.f32.mrf.mxu0  ;;  %v8076_v26 = vpop.f32.mrf.mxu1 }
 0x5ff   : > { %21710 = vst [vmem:[#allocation53_spill] sm:$0xff] %v19763_v20  ;;  %v19770_v53 = vadd.f32 %v8076_v26, %v19621_v36 }
 0x600   : > { %v19772_v47 = vpop.f32.mrf.mxu0  ;;  %14854 = vmatmul.mubr.msk.f32.gmra.mxu0 %vm280_vm0, %v21677_v11  ;;  %v14679_v58 = vpop.f32.mrf.mxu1  ;;  %14934 = vmatmul.mubr.msk.f32.gmra.mxu1 %vm280_vm0, %v19507_v56 }
 0x601   : > { %21711 = vst [vmem:[#allocation57_spill] sm:$0xff] %v19770_v53  ;;  %v19779_v24 = vadd.f32 %v14679_v58, %v19625_v10  ;;  %14936 = vmatprep.mubr.msk.f32.mxu1 %vm280_vm0, %v19529_v8 }
 0x602   : > { %v19783_v46 = vpop.f32.mrf.mxu0  ;;  %v8086_v31 = vpop.f32.mrf.mxu1 }
 0x603   : > { %21712 = vst [vmem:[#allocation61_spill] sm:$0xff] %v19779_v24  ;;  %v19786_v36 = vadd.f32 %v8086_v31, %v19637_v48 }
 0x604   : > { %v19788_v39 = vpop.f32.mrf.mxu0  ;;  %v14682_v51 = vpop.f32.mrf.mxu1  ;;  %14937 = vmatmul.mubr.msk.f32.gmra.mxu1 %vm280_vm0, %v19518_v33 }
 0x605   : > { %21713 = vst [vmem:[#allocation65_spill] sm:$0xff] %v19786_v36  ;;  %v19793_v11 = vadd.f32 %v14682_v51, %v19639_v63  ;;  %14939 = vmatprep.mubr.msk.f32.mxu1 %vm280_vm0, %v19544_v50 }
 0x606   : > { %v7587_v56 = vpop.f32.mrf.mxu0  ;;  %v19797_v8 = vpop.f32.mrf.mxu1 }
 0x607   : > { %21714 = vst [vmem:[#allocation9_spill] sm:$0xff] %v19793_v11  ;;  %21715 = vst [vmem:[#allocation8_spill] sm:$0xff] %v19797_v8 }
 0x608   : > { %v14605_v10 = vpop.f32.mrf.mxu0  ;;  %v14685_v30 = vpop.f32.mrf.mxu1  ;;  %14940 = vmatmul.mubr.msk.f32.gmra.mxu1 %vm280_vm0, %v19533_v5 }
 0x609   : > { %v19802_v48 = vadd.f32 %v14685_v30, %v19657_v23  ;;  %14942 = vmatprep.mubr.msk.f32.mxu1 %vm280_vm0, %v19559_v13 }
 0x60a   : > { %v7597_v33 = vpop.f32.mrf.mxu0  ;;  %v19806_v63 = vpop.f32.mrf.mxu1 }
 0x60b   : > { %21716 = vst [vmem:[#allocation14_spill] sm:$0xff] %v19802_v48  ;;  %21717 = vst [vmem:[#allocation18_spill] sm:$0xff] %v19806_v63 }
 0x60c   : > { %v14608_v2 = vpop.f32.mrf.mxu0  ;;  %v14688_v57 = vpop.f32.mrf.mxu1  ;;  %14943 = vmatmul.mubr.msk.f32.gmra.mxu1 %vm280_vm0, %v19548_v43 }
 0x60d   : > { %v19811_v50 = vadd.f32 %v14688_v57, %v19675_v54  ;;  %14945 = vmatprep.mubr.msk.f32.mxu1 %vm280_vm0, %v19574_v15 }
 0x60e   : > { %v7607_v5 = vpop.f32.mrf.mxu0  ;;  %v8116_v23 = vpop.f32.mrf.mxu1 }
 0x60f   : > { %21718 = vst [vmem:[#allocation22_spill] sm:$0xff] %v19811_v50  ;;  %v19816_v60 = vadd.f32 %v8116_v23, %v19688_v4 }
 0x610   : > { %v14611_v13 = vpop.f32.mrf.mxu0  ;;  %v14691_v40 = vpop.f32.mrf.mxu1  ;;  %14946 = vmatmul.mubr.msk.f32.gmra.mxu1 %vm280_vm0, %v19563_v9 }
 0x611   : > { %21719 = vst [vmem:[#allocation26_spill] sm:$0xff] %v19816_v60  ;;  %v19821_v12 = vadd.f32 %v14691_v40, %v19693_v49  ;;  %14948 = vmatprep.mubr.msk.f32.mxu1 %vm280_vm0, %v19589_v37 }
 0x612   : > { %v7617_v43 = vpop.f32.mrf.mxu0  ;;  %v8126_v54 = vpop.f32.mrf.mxu1 }
 0x613   : > { %21720 = vst [vmem:[#allocation30_spill] sm:$0xff] %v19821_v12  ;;  %v19826_v15 = vadd.f32 %v8126_v54, %v19706_v17 }
 0x614   : > { %v14614_v26 = vpop.f32.mrf.mxu0  ;;  %v14694_v58 = vpop.f32.mrf.mxu1  ;;  %14949 = vmatmul.mubr.msk.f32.gmra.mxu1 %vm280_vm0, %v19578_v62 }
 0x615   : > { %21721 = vst [vmem:[#allocation34_spill] sm:$0xff] %v19826_v15  ;;  %v19831_v4 = vadd.f32 %v14694_v58, %v19711_v19  ;;  %14951 = vmatprep.mubr.msk.f32.mxu1 %vm280_vm0, %v19604_v6 }
 0x616   : > { %v7627_v9 = vpop.f32.mrf.mxu0  ;;  %v8136_v49 = vpop.f32.mrf.mxu1 }
 0x617   : > { %21722 = vst [vmem:[#allocation38_spill] sm:$0xff] %v19831_v4  ;;  %v19836_v37 = vadd.f32 %v8136_v49, %v19724_v59 }
 0x618   : > { %v14617_v31 = vpop.f32.mrf.mxu0  ;;  %v14697_v51 = vpop.f32.mrf.mxu1  ;;  %14952 = vmatmul.mubr.msk.f32.gmra.mxu1 %vm280_vm0, %v19593_v25 }
 0x619   : > { %21723 = vst [vmem:[#allocation42_spill] sm:$0xff] %v19836_v37  ;;  %v19841_v17 = vadd.f32 %v14697_v51, %v19734_v34  ;;  %14954 = vmatprep.mubr.msk.f32.mxu1 %vm280_vm0, %v19619_v61 }
 0x61a   : > { %v7637_v62 = vpop.f32.mrf.mxu0  ;;  %v8146_v19 = vpop.f32.mrf.mxu1 }
 0x61b   : > { %21724 = vst [vmem:[#allocation46_spill] sm:$0xff] %v19841_v17  ;;  %v19846_v6 = vadd.f32 %v8146_v19, %v19747_v27 }
 0x61c   : > { %v14620_v30 = vpop.f32.mrf.mxu0  ;;  %v14700_v57 = vpop.f32.mrf.mxu1  ;;  %14955 = vmatmul.mubr.msk.f32.gmra.mxu1 %vm280_vm0, %v19608_v21 }
 0x61d   : > { %21725 = vst [vmem:[#allocation50_spill] sm:$0xff] %v19846_v6  ;;  %v19851_v59 = vadd.f32 %v14700_v57, %v19754_v22  ;;  %14957 = vmatprep.mubr.msk.f32.mxu1 %vm280_vm0, %v19635_v16 }
 0x61e   : > { %v7647_v25 = vpop.f32.mrf.mxu0  ;;  %v8156_v34 = vpop.f32.mrf.mxu1 }
 0x61f   : > { %21726 = vst [vmem:[#allocation54_spill] sm:$0xff] %v19851_v59  ;;  %v19856_v61 = vadd.f32 %v8156_v34, %v19767_v38 }
 0x620   : > { %v14623_v23 = vpop.f32.mrf.mxu0  ;;  %v14703_v40 = vpop.f32.mrf.mxu1  ;;  %14958 = vmatmul.mubr.msk.f32.gmra.mxu1 %vm280_vm0, %v19623_v29 }
 0x621   : > { %21727 = vst [vmem:[#allocation124_spill] sm:$0xff] %v19856_v61  ;;  %v19861_v27 = vadd.f32 %v14703_v40, %v19772_v47 }
 0x622   : > { %v7657_v21 = vpop.f32.mrf.mxu0  ;;  %v8166_v54 = vpop.f32.mrf.mxu1 }
 0x623   : > { %21728 = vst [vmem:[#allocation108_spill] sm:$0xff] %v19861_v27  ;;  %v19864_v22 = vadd.f32 %v8166_v54, %v19783_v46 }
 0x624   : > { %v14626_v58 = vpop.f32.mrf.mxu0  ;;  %v14706_v16 = vpop.f32.mrf.mxu1 }
 0x625   : > { %21729 = vst [vmem:[#allocation58_spill] sm:$0xff] %v19864_v22  ;;  %v19867_v49 = vadd.f32 %v14706_v16, %v19788_v39 }
 0x626   : > { %v7667_v38 = vpop.f32.mrf.mxu0  ;;  %v8176_v51 = vpop.f32.mrf.mxu1 }
 0x627   : > { %21730 = vst [vmem:[#allocation62_spill] sm:$0xff] %v19867_v49  ;;  %v19869_v19 = vadd.f32 %v8176_v51, %v7587_v56 }
 0x628   : > { %v14629_v57 = vpop.f32.mrf.mxu0  ;;  %v14709_v34 = vpop.f32.mrf.mxu1 }
 0x629   : > { %21731 = vst [vmem:[#allocation66_spill] sm:$0xff] %v19869_v19  ;;  %v19871_v29 = vadd.f32 %v14709_v34, %v14605_v10 }
 0x62a   : > { %v7677_v47 = vpop.f32.mrf.mxu0  ;;  %v8186_v40 = vpop.f32.mrf.mxu1 }
 0x62b   : > { %21732 = vst [vmem:[#allocation10_spill] sm:$0xff] %v19871_v29  ;;  %v19873_v55 = vadd.f32 %v8186_v40, %v7597_v33 }
 0x62c   : > { %v14632_v32 = vpop.f32.mrf.mxu0  ;;  %v14712_v46 = vpop.f32.mrf.mxu1 }
 0x62d   : > { %21733 = vst [vmem:[#allocation11_spill] sm:$0xff] %v19873_v55  ;;  %v19875_v54 = vadd.f32 %v14712_v46, %v14608_v2 }
 0x62e   : > { %v7687_v8 = vpop.f32.mrf.mxu0  ;;  %v8196_v3 = vpop.f32.mrf.mxu1 }
 0x62f   : > { %21734 = vst [vmem:[#allocation15_spill] sm:$0xff] %v19875_v54  ;;  %v19877_v39 = vadd.f32 %v8196_v3, %v7607_v5 }
 0x630   : > { %v14635_v16 = vpop.f32.mrf.mxu0  ;;  %v14715_v49 = vpop.f32.mrf.mxu1 }
 0x631   : > { %21735 = vst [vmem:[#allocation19_spill] sm:$0xff] %v19877_v39  ;;  %v19879_v56 = vadd.f32 %v14715_v49, %v14611_v13 }
 0x632   : > { %v7697_v51 = vpop.f32.mrf.mxu0  ;;  %v8206_v19 = vpop.f32.mrf.mxu1 }
 0x633   : > { %21736 = vst [vmem:[#allocation23_spill] sm:$0xff] %v19879_v56  ;;  %v19881_v10 = vadd.f32 %v8206_v19, %v7617_v43 }
 0x634   : > { %v14638_v34 = vpop.f32.mrf.mxu0  ;;  %v14718_v29 = vpop.f32.mrf.mxu1 }
 0x635   : > { %21737 = vst [vmem:[#allocation27_spill] sm:$0xff] %v19881_v10  ;;  %v19883_v33 = vadd.f32 %v14718_v29, %v14614_v26 }
 0x636   : > { %v7707_v40 = vpop.f32.mrf.mxu0  ;;  %v8216_v55 = vpop.f32.mrf.mxu1 }
 0x637   : > { %21738 = vst [vmem:[#allocation31_spill] sm:$0xff] %v19883_v33  ;;  %v19885_v2 = vadd.f32 %v8216_v55, %v7627_v9 }
 0x638   : > { %v14641_v46 = vpop.f32.mrf.mxu0  ;;  %v14721_v54 = vpop.f32.mrf.mxu1 }
 0x639   : > { %21739 = vst [vmem:[#allocation35_spill] sm:$0xff] %v19885_v2  ;;  %v19887_v3 = vadd.f32 %v14721_v54, %v14617_v31 }
 0x63a   : > { %v7717_v5 = vpop.f32.mrf.mxu0  ;;  %v8226_v39 = vpop.f32.mrf.mxu1 }
 0x63b   : > { %21740 = vst [vmem:[#allocation39_spill] sm:$0xff] %v19887_v3  ;;  %v19889_v13 = vadd.f32 %v8226_v39, %v7637_v62 }
 0x63c   : > { %v14644_v49 = vpop.f32.mrf.mxu0  ;;  %v14724_v56 = vpop.f32.mrf.mxu1 }
 0x63d   : > { %21741 = vst [vmem:[#allocation43_spill] sm:$0xff] %v19889_v13  ;;  %v19891_v43 = vadd.f32 %v14724_v56, %v14620_v30 }
 0x63e   : > { %v7727_v19 = vpop.f32.mrf.mxu0  ;;  %v8236_v10 = vpop.f32.mrf.mxu1 }
 0x63f   : > { %21742 = vst [vmem:[#allocation122_spill] sm:$0xff] %v19891_v43  ;;  %v19893_v26 = vadd.f32 %v8236_v10, %v7647_v25 }
 0x640   : > { %v14647_v29 = vpop.f32.mrf.mxu0  ;;  %v14727_v33 = vpop.f32.mrf.mxu1 }
 0x641   : > { %21743 = vst [vmem:[#allocation47_spill] sm:$0xff] %v19893_v26  ;;  %v19895_v55 = vadd.f32 %v14727_v33, %v14623_v23 }
 0x642   : > { %v7737_v9 = vpop.f32.mrf.mxu0  ;;  %v8246_v2 = vpop.f32.mrf.mxu1 }
 0x643   : > { %21744 = vst [vmem:[#allocation51_spill] sm:$0xff] %v19895_v55  ;;  %v19897_v31 = vadd.f32 %v8246_v2, %v7657_v21 }
 0x644   : > { %v14762_v54 = vpop.f32.mrf.mxu0  ;;  %v14730_v3 = vpop.f32.mrf.mxu1 }
 0x645   : > { %21745 = vst [vmem:[#allocation103_spill] sm:$0xff] %v19897_v31  ;;  %v19899_v62 = vadd.f32 %v14730_v3, %v14626_v58 }
 0x646   : > { %v8549_v39 = vpop.f32.mrf.mxu0  ;;  %v8256_v13 = vpop.f32.mrf.mxu1 }
 0x647   : > { %21746 = vst [vmem:[#allocation107_spill] sm:$0xff] %v19899_v62  ;;  %v19901_v30 = vadd.f32 %v8256_v13, %v7667_v38 }
 0x648   : > { %v14765_v56 = vpop.f32.mrf.mxu0  ;;  %v14733_v43 = vpop.f32.mrf.mxu1 }
 0x649   : > { %21747 = vst [vmem:[#allocation55_spill] sm:$0xff] %v19901_v30  ;;  %v19903_v25 = vadd.f32 %v14733_v43, %v14629_v57 }
 0x64a   : > { %v8559_v10 = vpop.f32.mrf.mxu0  ;;  %v8266_v26 = vpop.f32.mrf.mxu1 }
 0x64b   : > { %21748 = vst [vmem:[#allocation59_spill] sm:$0xff] %v19903_v25  ;;  %v19905_v23 = vadd.f32 %v8266_v26, %v7677_v47 }
 0x64c   : > { %v14768_v33 = vpop.f32.mrf.mxu0  ;;  %v14736_v55 = vpop.f32.mrf.mxu1 }
 0x64d   : > { %21749 = vst [vmem:[#allocation120_spill] sm:$0xff] %v19905_v23  ;;  %v19907_v21 = vadd.f32 %v14736_v55, %v14632_v32 }
 0x64e   : > { %v8569_v2 = vpop.f32.mrf.mxu0  ;;  %v8276_v31 = vpop.f32.mrf.mxu1 }
 0x64f   : > { %21750 = vst [vmem:[#allocation121_spill] sm:$0xff] %v19907_v21  ;;  %v19909_v58 = vadd.f32 %v8276_v31, %v7687_v8 }
 0x650   : > { %v14771_v3 = vpop.f32.mrf.mxu0  ;;  %v14739_v62 = vpop.f32.mrf.mxu1 }
 0x651   : > { %21751 = vst [vmem:[#allocation63_spill] sm:$0xff] %v19909_v58  ;;  %v19911_v38 = vadd.f32 %v14739_v62, %v14635_v16 }
 0x652   : > { %v8579_v13 = vpop.f32.mrf.mxu0  ;;  %v8286_v30 = vpop.f32.mrf.mxu1 }
 0x653   : > { %21752 = vst [vmem:[#allocation67_spill] sm:$0xff] %v19911_v38  ;;  %v19913_v57 = vadd.f32 %v8286_v30, %v7697_v51 }
 0x654   : > { %v14774_v43 = vpop.f32.mrf.mxu0  ;;  %v14742_v25 = vpop.f32.mrf.mxu1 }
 0x655   : > { %21753 = vst [vmem:[#allocation69_spill] sm:$0xff] %v19913_v57  ;;  %v19915_v47 = vadd.f32 %v14742_v25, %v14638_v34 }
 0x656   : > { %v8589_v26 = vpop.f32.mrf.mxu0  ;;  %v8296_v23 = vpop.f32.mrf.mxu1 }
 0x657   : > { %21754 = vst [vmem:[#allocation12_spill] sm:$0xff] %v19915_v47  ;;  %v19917_v32 = vadd.f32 %v8296_v23, %v7707_v40 }
 0x658   : > { %v19919_v55 = vpop.f32.mrf.mxu0  ;;  %v14745_v8 = vpop.f32.mrf.mxu1 }
 0x659   : > { %21755 = vst [vmem:[#allocation70_spill] sm:$0xff] %v19917_v32  ;;  %v19921_v31 = vadd.f32 %v14745_v8, %v14641_v46 }
 0x65a   : > { %v19923_v58 = vpop.f32.mrf.mxu0  ;;  %v8306_v16 = vpop.f32.mrf.mxu1 }
 0x65b   : > { %21756 = vst [vmem:[#allocation72_spill] sm:$0xff] %v19921_v31  ;;  %v19925_v62 = vadd.f32 %v8306_v16, %v7717_v5 }
 0x65c   : > { %v19927_v51 = vpop.f32.mrf.mxu0  ;;  %v14748_v30 = vpop.f32.mrf.mxu1 }
 0x65d   : > { %21757 = vst [vmem:[#allocation16_spill] sm:$0xff] %v19925_v62  ;;  %v19929_v21 = vadd.f32 %v14748_v30, %v14644_v49 }
 0x65e   : > { %v19931_v34 = vpop.f32.mrf.mxu0  ;;  %v8316_v25 = vpop.f32.mrf.mxu1 }
 0x65f   : > { %21758 = vst [vmem:[#allocation20_spill] sm:$0xff] %v19929_v21  ;;  %v19933_v40 = vadd.f32 %v8316_v25, %v7727_v19 }
 0x660   : > { %v19935_v23 = vpop.f32.mrf.mxu0  ;;  %v14751_v57 = vpop.f32.mrf.mxu1 }
 0x661   : > { %21759 = vst [vmem:[#allocation74_spill] sm:$0xff] %v19933_v40  ;;  %v19937_v46 = vadd.f32 %v14751_v57, %v14647_v29 }
 0x662   : > { %v19939_v8 = vpop.f32.mrf.mxu0  ;;  %v8326_v38 = vpop.f32.mrf.mxu1 }
 0x663   : > { %21760 = vst [vmem:[#allocation76_spill] sm:$0xff] %v19937_v46  ;;  %v19941_v5 = vadd.f32 %v8326_v38, %v7737_v9 }
 0x664   : > { %v14786_v16 = vpop.f32.mrf.mxu0  ;;  %v14866_v32 = vpop.f32.mrf.mxu1 }
 0x665   : > { %21761 = vst [vmem:[#allocation24_spill] sm:$0xff] %v19941_v5  ;;  %v19943_v47 = vadd.f32 %v14866_v32, %v14762_v54  ;;  %v19955_v5 = vpop.permute.xlu1 %9590 }
 0x666   : > { %v8629_v49 = vpop.f32.mrf.mxu0  ;;  %v9138_v30 = vpop.f32.mrf.mxu1  ;;  %21766 = vst [vmem:[#allocation36_spill] sm:$0xff] %v19955_v5  ;;  %12816 = vmatprep.mubr.msk.f32.mxu0 %vm280_vm0, %v19955_v5  ;;  %12850 = vmatprep.mubr.msk.f32.mxu1 %vm280_vm0, %v19955_v5 }
 0x667   : > { %21762 = vst [vmem:[#allocation28_spill] sm:$0xff] %v19943_v47  ;;  %v19945_v62 = vadd.f32 %v9138_v30, %v8549_v39 }
 0x668   : > { %v14789_v19 = vpop.f32.mrf.mxu0  ;;  %v14869_v25 = vpop.f32.mrf.mxu1 }
 0x669   : > { %21763 = vst [vmem:[#allocation78_spill] sm:$0xff] %v19945_v62  ;;  %v19947_v31 = vadd.f32 %v14869_v25, %v14765_v56 }
 0x66a   : > { %v8639_v40 = vpop.f32.mrf.mxu0  ;;  %v9148_v29 = vpop.f32.mrf.mxu1 }
 0x66b   : > { %21764 = vst [vmem:[#allocation79_spill] sm:$0xff] %v19947_v31  ;;  %v19949_v57 = vadd.f32 %v9148_v29, %v8559_v10 }
 0x66c   : > { %v19951_v21 = vpop.f32.mrf.mxu0  ;;  %v14872_v9 = vpop.f32.mrf.mxu1 }
 0x66d   : > { %21765 = vst [vmem:[#allocation32_spill] sm:$0xff] %v19949_v57  ;;  %v19953_v38 = vadd.f32 %v14872_v9, %v14768_v33 }
 0x66e   : > { %v19957_v54 = vpop.f32.mrf.mxu0  ;;  %v9158_v32 = vpop.f32.mrf.mxu1 }
 0x66f   : > { %v19963_v39 = vadd.f32 %v9158_v32, %v8569_v2 }
 0x670   : > { %v19965_v56 = vpop.f32.mrf.mxu0  ;;  %v14875_v10 = vpop.f32.mrf.mxu1 }
 0x671   : > { %v19967_v30 = vadd.f32 %v14875_v10, %v14771_v3 }
 0x672   : > { %v19969_v33 = vpop.f32.mrf.mxu0  ;;  %v9168_v25 = vpop.f32.mrf.mxu1 }
 0x673   : > { %v19971_v29 = vadd.f32 %v9168_v25, %v8579_v13 }
 0x674   : > { %v19973_v9 = vpop.f32.mrf.mxu0  ;;  %v14878_v46 = vpop.f32.mrf.mxu1 }
 0x675   : > { %v19975_v11 = vadd.f32 %v14878_v46, %v14774_v43 }
 0x676   : > { %v19977_v1 = vpop.f32.mrf.mxu0  ;;  %v9178_v52 = vpop.f32.mrf.mxu1 }
 0x677   : > { %v19979_v2 = vadd.f32 %v9178_v52, %v8589_v26 }
 0x678   : > { %v19981_v32 = vpop.f32.mrf.mxu0  ;;  %v19983_v63 = vpop.f32.mrf.mxu1 }
 0x67a   : > { %v19985_v3 = vpop.f32.mrf.mxu0  ;;  %v19987_v10 = vpop.f32.mrf.mxu1 }
 0x67c   : > { %v14804_v13 = vpop.f32.mrf.mxu0  ;;  %v14884_v25 = vpop.f32.mrf.mxu1 }
 0x67e   : > { %v8689_v42 = vpop.f32.mrf.mxu0  ;;  %v19989_v48 = vpop.f32.mrf.mxu1 }
 0x680   : > { %v14807_v43 = vpop.f32.mrf.mxu0  ;;  %v14887_v46 = vpop.f32.mrf.mxu1 }
 0x681   : > { %v9214_v36 = vadd.f32 %v14887_v46, %v19935_v23 }
 0x682   : > { %v8699_v14 = vpop.f32.mrf.mxu0  ;;  %v9208_v60 = vpop.f32.mrf.mxu1 }
 0x684   : > { %v14810_v44 = vpop.f32.mrf.mxu0  ;;  %v14890_v52 = vpop.f32.mrf.mxu1 }
 0x685   : > { %v19991_v26 = vadd.f32 %v14890_v52, %v14786_v16 }
 0x686   : > { %v8709_v50 = vpop.f32.mrf.mxu0  ;;  %v9218_v18 = vpop.f32.mrf.mxu1 }
 0x687   : > { %21767 = vst [vmem:[#allocation81_spill] sm:$0xff] %v19991_v26  ;;  %v19993_v15 = vadd.f32 %v9218_v18, %v8629_v49  ;;  %v9209_v26 = vadd.f32 %v9208_v60, %v19939_v8 }
 0x688   : > { %v14813_v7 = vpop.f32.mrf.mxu0  ;;  %v14893_v12 = vpop.f32.mrf.mxu1 }
 0x689   : > { %21768 = vst [vmem:[#allocation83_spill] sm:$0xff] %v19993_v15  ;;  %v19995_v0 = vadd.f32 %v14893_v12, %v14789_v19  ;;  %v20032_v15 = vpop.permute.xlu0 %9458 }
 0x68a   : > { %v8719_v37 = vpop.f32.mrf.mxu0  ;;  %v9228_v45 = vpop.f32.mrf.mxu1 }
 0x68b   : > { %21769 = vst [vmem:[#allocation40_spill] sm:$0xff] %v19995_v0  ;;  %v19997_v4 = vadd.f32 %v9228_v45, %v8639_v40  ;;  %v9204_v0 = vadd.f32 %v14884_v25, %v19927_v51 }
 0x68c   : > { %v14816_v28 = vpop.f32.mrf.mxu0  ;;  %v19999_v6 = vpop.f32.mrf.mxu1 }
 0x68d   : > { %21770 = vst [vmem:[#allocation44_spill] sm:$0xff] %v19997_v4 }
 0x68e   : > { %v20001_v41 = vpop.f32.mrf.mxu0  ;;  %v20003_v17 = vpop.f32.mrf.mxu1 }
 0x690   : > { %v20005_v16 = vpop.f32.mrf.mxu0  ;;  %v20007_v52 = vpop.f32.mrf.mxu1 }
 0x692   : > { %v20009_v18 = vpop.f32.mrf.mxu0  ;;  %v20011_v49 = vpop.f32.mrf.mxu1 }
 0x694   : > { %v20013_v12 = vpop.f32.mrf.mxu0  ;;  %v20015_v19 = vpop.f32.mrf.mxu1 }
 0x696   : > { %v20017_v45 = vpop.f32.mrf.mxu0  ;;  %v20019_v40 = vpop.f32.mrf.mxu1 }
 0x698   : > { %v20021_v53 = vpop.f32.mrf.mxu0  ;;  %v14905_v61 = vpop.f32.mrf.mxu1 }
 0x699   : > { %21771 = vst [vmem:[#allocation85_spill] sm:$0xff] %v20021_v53  ;;  %v9476_v53 = vadd.f32 %v20032_v15, %v9214_v36  ;;  %v9475_v36 = vadd.f32 %v20032_v15, %v9209_v26 }
 0x69a   : > { %v20023_v35 = vpop.f32.mrf.mxu0  ;;  %v9268_v20 = vpop.f32.mrf.mxu1 }
 0x69b   : > { %21772 = vst [vmem:[#allocation87_spill] sm:$0xff] %v20023_v35  ;;  %v9539_v51 = vmax.f32 %v9475_v36, 0.0 }
 0x69c   : > { %v20025_v5 = vpop.f32.mrf.mxu0  ;;  %v14908_v59 = vpop.f32.mrf.mxu1 }
 0x69d   : > { %21773 = vst [vmem:[#allocation146_spill] sm:$0xff] %v20025_v5  ;;  %v9284_v5 = vadd.f32 %v14908_v59, %v14804_v13 }
 0x69e   : > { %v20028_v22 = vpop.f32.mrf.mxu0  ;;  %v9278_v24 = vpop.f32.mrf.mxu1 }
 0x69f   : > { %21774 = vst [vmem:[#allocation48_spill] sm:$0xff] %v20028_v22  ;;  %v9490_v8 = vadd.f32 %v20032_v15, %v9284_v5  ;;  %v9279_v59 = vadd.f32 %v9278_v24, %v8689_v42  ;;  %v9274_v24 = vadd.f32 %v14905_v61, %v19981_v32 }
 0x6a0   : > { %v20030_v27 = vpop.f32.mrf.mxu0  ;;  %v14911_v62 = vpop.f32.mrf.mxu1 }
 0x6a1   : > { %21775 = vst [vmem:[#allocation52_spill] sm:$0xff] %v20030_v27  ;;  %v9294_v47 = vadd.f32 %v14911_v62, %v14807_v43  ;;  %v9540_v62 = vmax.f32 %v9476_v53, 0.0  ;;  %v9474_v53 = vadd.f32 %v20032_v15, %v9204_v0  ;;  %v9194_v0 = vadd.f32 %v19983_v63, %v19919_v55 }
 0x6a2   : > { %v20036_v35 = vpop.f32.mrf.mxu0  ;;  %v9288_v57 = vpop.f32.mrf.mxu1  ;;  %v9488_v32 = vadd.f32 %v20032_v15, %v9274_v24  ;;  %v9189_v55 = vadd.f32 %v19987_v10, %v19923_v58 }
 0x6a3   : > { %v9492_v4 = vadd.f32 %v20032_v15, %v9294_v47  ;;  %v9289_v23 = vadd.f32 %v9288_v57, %v8699_v14  ;;  %v9472_v63 = vadd.f32 %v20032_v15, %v9194_v0 }
 0x6a4   : > { %v14914_v46 = vpop.f32.mrf.mxu1  ;;  %v20044_v43 = vpop.f32.mrf.mxu0  ;;  %v9471_v10 = vadd.f32 %v20032_v15, %v9189_v55  ;;  %v9467_v55 = vadd.f32 %v20032_v15, %v19971_v29  ;;  %v9466_v29 = vadd.f32 %v20032_v15, %v19953_v38  ;;  %v9465_v38 = vadd.f32 %v20032_v15, %v19963_v39 }
 0x6a5   : > { %v9556_v22 = vmax.f32 %v9492_v4, 0.0  ;;  %v9491_v31 = vadd.f32 %v20032_v15, %v9289_v23  ;;  %v20040_v27 = vadd.f32 %v14914_v46, %v14810_v44  ;;  %v9199_v4 = vadd.f32 %v19989_v48, %v19931_v34 }
 0x6a6   : > { %v9298_v60 = vpop.f32.mrf.mxu1  ;;  %v20057_v5 = vpop.f32.mrf.mxu0  ;;  %v9538_v48 = vmax.f32 %v9474_v53, 0.0  ;;  %v9536_v58 = vmax.f32 %v9472_v63, 0.0 }
 0x6a7   : > { %v9555_v13 = vmax.f32 %v9491_v31, 0.0  ;;  %v20047_v47 = vadd.f32 %v9298_v60, %v8709_v50  ;;  %12784 = vmatprep.subr.msk.mxu0 %vm280_vm0, %v9556_v22  ;;  %v9554_v50 = vmax.f32 %v9490_v8, 0.0  ;;  %v9489_v22 = vadd.f32 %v20032_v15, %v9279_v59 }
 0x6a8   : > { %v14917_v14 = vpop.f32.mrf.mxu1  ;;  %12785 = vmatpush3.xpose.msk.msra.mxu0 %vm280_vm0, %v9540_v62  ;;  %v9473_v34 = vadd.f32 %v20032_v15, %v9199_v4  ;;  %v20070_v25 = vpop.f32.mrf.mxu0 }
 0x6a9   : > { %v20051_v44 = vadd.f32 %v14917_v14, %v14813_v7  ;;  %12786 = vmatprep.subr.msk.mxu0 %vm280_vm0, %v9555_v13  ;;  %v9553_v26 = vmax.f32 %v9489_v22, 0.0 }
 0x6aa   : > { %v9308_v42 = vpop.f32.mrf.mxu1  ;;  %v9537_v62 = vmax.f32 %v9473_v34, 0.0  ;;  %v20085_v36 = vpop.f32.mrf.mxu0 }
 0x6ab   : > { %v20061_v31 = vadd.f32 %v9308_v42, %v8719_v37  ;;  %v9269_v37 = vadd.f32 %v9268_v20, %v19985_v3  ;;  %v9552_v3 = vmax.f32 %v9488_v32, 0.0 }
 0x6ac   : > { %v14920_v7 = vpop.f32.mrf.mxu1  ;;  %12787 = vmatpush3.xpose.msk.msra.mxu0 %vm280_vm0, %v9539_v51  ;;  %v20099_v13 = vpop.f32.mrf.mxu0  ;;  %v9535_v51 = vmax.f32 %v9471_v10, 0.0 }
 0x6ad   : > { %v20064_v57 = vadd.f32 %v14920_v7, %v14816_v28  ;;  %12788 = vmatprep.subr.msk.mxu0 %vm280_vm0, %v9554_v50  ;;  %v9487_v60 = vadd.f32 %v20032_v15, %v9269_v37 }
 0x6ae   : > { %v9318_v61 = vpop.f32.mrf.mxu1  ;;  %v20113_v42 = vpop.f32.mrf.mxu0 }
 0x6af   : > { %v20075_v23 = vadd.f32 %v9318_v61, %v20001_v41  ;;  %v9264_v41 = vadd.f32 %v20015_v19, %v19973_v9  ;;  %v9551_v14 = vmax.f32 %v9487_v60, 0.0  ;;  %v9468_v61 = vadd.f32 %v20032_v15, %v19967_v30 }
 0x6b0   : > { %v14923_v28 = vpop.f32.mrf.mxu1  ;;  %12789 = vmatpush3.xpose.msk.msra.mxu0 %vm280_vm0, %v9538_v48  ;;  %v20126_v7 = vpop.f32.mrf.mxu0 }
 0x6b1   : > { %v20079_v46 = vadd.f32 %v14923_v28, %v20005_v16  ;;  %12790 = vmatprep.subr.msk.mxu0 %vm280_vm0, %v9553_v26  ;;  %v9486_v19 = vadd.f32 %v20032_v15, %v9264_v41  ;;  %v9244_v26 = vadd.f32 %v19999_v6, %v19951_v21  ;;  %v9532_v30 = vmax.f32 %v9468_v61, 0.0 }
 0x6b2   : > { %v9328_v20 = vpop.f32.mrf.mxu1  ;;  %v20139_v32 = vpop.f32.mrf.mxu0  ;;  %v9239_v21 = vadd.f32 %v20003_v17, %v19957_v54 }
 0x6b3   : > { %v20091_v16 = vadd.f32 %v9328_v20, %v20009_v18  ;;  %v9259_v18 = vadd.f32 %v20019_v40, %v19977_v1  ;;  %v9254_v1 = vadd.f32 %v20007_v52, %v19965_v56  ;;  %v9550_v40 = vmax.f32 %v9486_v19, 0.0 }
 0x6b4   : > { %v14926_v8 = vpop.f32.mrf.mxu1  ;;  %12791 = vmatpush3.xpose.msk.msra.mxu0 %vm280_vm0, %v9537_v62  ;;  %v9249_v56 = vadd.f32 %v20011_v49, %v19969_v33  ;;  %v20153_v62 = vpop.f32.mrf.mxu0  ;;  %v9482_v6 = vadd.f32 %v20032_v15, %v9244_v26  ;;  %v9481_v54 = vadd.f32 %v20032_v15, %v9239_v21 }
 0x6b5   : > { %v20095_v59 = vadd.f32 %v14926_v8, %v20013_v12  ;;  %12792 = vmatprep.subr.msk.mxu0 %vm280_vm0, %v9552_v3  ;;  %v9470_v12 = vadd.f32 %v20032_v15, %v19975_v11  ;;  %v9469_v11 = vadd.f32 %v20032_v15, %v19979_v2  ;;  %v9484_v48 = vadd.f32 %v20032_v15, %v9254_v1  ;;  %v21777_v1 = vld [vmem:[#allocation79_spill] sm:$0xff] }
 0x6b6   : > { %v9338_v9 = vpop.f32.mrf.mxu1  ;;  %v9483_v33 = vadd.f32 %v20032_v15, %v9249_v56  ;;  %v9531_v8 = vmax.f32 %v9467_v55, 0.0  ;;  %v9546_v17 = vmax.f32 %v9482_v6, 0.0 }
 0x6b7   : > { %v20105_v53 = vadd.f32 %v9338_v9, %v20017_v45  ;;  %v9485_v45 = vadd.f32 %v20032_v15, %v9259_v18  ;;  %v9534_v22 = vmax.f32 %v9470_v12, 0.0  ;;  %v9533_v2 = vmax.f32 %v9469_v11, 0.0 }
 0x6b8   : > { %v20107_v4 = vpop.f32.mrf.mxu1  ;;  %12793 = vmatpush3.xpose.msk.msra.mxu0 %vm280_vm0, %v9536_v58  ;;  %v9548_v28 = vmax.f32 %v9484_v48, 0.0  ;;  %v9547_v41 = vmax.f32 %v9483_v33, 0.0  ;;  %v20168_v58 = vpop.f32.mrf.mxu0  ;;  %v21778_v48 = vld [vmem:[#allocation44_spill] sm:$0xff] }
 0x6b9   : > { %12794 = vmatprep.subr.msk.mxu0 %vm280_vm0, %v9551_v14  ;;  %v9549_v52 = vmax.f32 %v9485_v45, 0.0  ;;  %v21776_v14 = vld [vmem:[#allocation40_spill] sm:$0xff]  ;;  %v9529_v45 = vmax.f32 %v9465_v38, 0.0  ;;  %v9479_v56 = vadd.f32 %v20032_v15, %v21778_v48 }
 0x6ba   : > { %v20115_v24 = vpop.f32.mrf.mxu1  ;;  %v20180_v19 = vpop.f32.mrf.mxu0  ;;  %v9480_v12 = vadd.f32 %v20032_v15, %v21776_v14 }
 0x6bb   : > { %v9543_v55 = vmax.f32 %v9479_v56, 0.0 }
 0x6bc   : > { %v20120_v50 = vpop.f32.mrf.mxu1  ;;  %12795 = vmatpush3.xpose.msk.msra.mxu0 %vm280_vm0, %v9535_v51  ;;  %v9545_v51 = vmax.f32 %v9481_v54, 0.0  ;;  %v9544_v11 = vmax.f32 %v9480_v12, 0.0  ;;  %v21784_v12 = vld [vmem:[#allocation52_spill] sm:$0xff] }
 0x6bd   : > { %12796 = vmatprep.subr.msk.mxu0 %vm280_vm0, %v9550_v40  ;;  %v9464_v40 = vadd.f32 %v20032_v15, %v21777_v1 }
 0x6be   : > { %v20128_v0 = vpop.f32.mrf.mxu1 }
 0x6bf   : > { %v9528_v61 = vmax.f32 %v9464_v40, 0.0 }
 0x6c0   : > { %v20133_v34 = vpop.f32.mrf.mxu1  ;;  %12797 = vmatpush3.xpose.msk.msra.mxu0 %vm280_vm0, %v9534_v22  ;;  %v20192_v22 = vpop.f32.mrf.mxu0 }
 0x6c1   : > { %12798 = vmatprep.subr.msk.mxu0 %vm280_vm0, %v9549_v52 }
 0x6c2   : > { %v20141_v37 = vpop.f32.mrf.mxu1 }
 0x6c4   : > { %v14938_v49 = vpop.f32.mrf.mxu1  ;;  %12799 = vmatpush3.xpose.msk.msra.mxu0 %vm280_vm0, %v9533_v2  ;;  %v21779_v2 = vld [vmem:[#allocation32_spill] sm:$0xff] }
 0x6c5   : > { %v20148_v63 = vadd.f32 %v14938_v49, %v20044_v43  ;;  %12800 = vmatprep.subr.msk.mxu0 %vm280_vm0, %v9548_v28  ;;  %v9463_v26 = vadd.f32 %v20032_v15, %v21779_v2  ;;  %v14852_v28 = vpop.f32.mrf.mxu0  ;;  %v21780_v49 = vld [vmem:[#allocation81_spill] sm:$0xff] }
 0x6c6   : > { %v9378_v20 = vpop.f32.mrf.mxu1 }
 0x6c7   : > { %v20159_v3 = vadd.f32 %v9378_v20, %v20057_v5  ;;  %v9527_v6 = vmax.f32 %v9463_v26, 0.0  ;;  %v8849_v21 = vpop.f32.mrf.mxu0 }
 0x6c8   : > { %v14941_v43 = vpop.f32.mrf.mxu1  ;;  %12801 = vmatpush3.xpose.msk.msra.mxu0 %vm280_vm0, %v9532_v30  ;;  %v9478_v30 = vadd.f32 %v20032_v15, %v21780_v49 }
 0x6c9   : > { %v20163_v60 = vadd.f32 %v14941_v43, %v20070_v25  ;;  %12802 = vmatprep.subr.msk.mxu0 %vm280_vm0, %v9547_v41  ;;  %v9530_v25 = vmax.f32 %v9466_v29, 0.0  ;;  %v21781_v43 = vld [vmem:[#allocation28_spill] sm:$0xff]  ;;  %v14855_v14 = vpop.f32.mrf.mxu0 }
 0x6ca   : > { %v9388_v10 = vpop.f32.mrf.mxu1  ;;  %v9462_v29 = vadd.f32 %v20032_v15, %v21781_v43 }
 0x6cb   : > { %v20172_v5 = vadd.f32 %v9388_v10, %v20085_v36  ;;  %v21782_v10 = vld [vmem:[#allocation83_spill] sm:$0xff] }
 0x6cc   : > { %v20174_v9 = vpop.f32.mrf.mxu1  ;;  %12803 = vmatpush3.xpose.msk.msra.mxu0 %vm280_vm0, %v9531_v8  ;;  %v9542_v8 = vmax.f32 %v9478_v30, 0.0  ;;  %v9526_v40 = vmax.f32 %v9462_v29, 0.0  ;;  %v9369_v29 = vadd.f32 %v20141_v37, %v20036_v35  ;;  %v21790_v37 = vld [vmem:[#allocation146_spill] sm:$0xff] }
 0x6cd   : > { %12804 = vmatprep.subr.msk.mxu0 %vm280_vm0, %v9546_v17  ;;  %v9477_v17 = vadd.f32 %v20032_v15, %v21782_v10 }
 0x6ce   : > { %v20182_v18 = vpop.f32.mrf.mxu1 }
 0x6cf   : > { %v9541_v56 = vmax.f32 %v9477_v17, 0.0 }
 0x6d0   : > { %v20186_v36 = vpop.f32.mrf.mxu1  ;;  %12805 = vmatpush3.xpose.msk.msra.mxu0 %vm280_vm0, %v9530_v25  ;;  %v21783_v25 = vld [vmem:[#allocation78_spill] sm:$0xff] }
 0x6d1   : > { %12806 = vmatprep.subr.msk.mxu0 %vm280_vm0, %v9545_v51  ;;  %v9461_v38 = vadd.f32 %v20032_v15, %v21783_v25  ;;  %v9374_v51 = vadd.f32 %v20133_v34, %v21784_v12  ;;  %v21787_v34 = vld [vmem:[#allocation58_spill] sm:$0xff] }
 0x6d2   : > { %v20194_v39 = vpop.f32.mrf.mxu1 }
 0x6d3   : > { %v9508_v43 = vadd.f32 %v20032_v15, %v9374_v51 }
 0x6d4   : > { %v20198_v52 = vpop.f32.mrf.mxu1  ;;  %12807 = vmatpush3.xpose.msk.msra.mxu0 %vm280_vm0, %v9529_v45  ;;  %v20227_v45 = vld [vmem:[%s20600_s2 + $0x63] ss:$0 sm:$0xff] }
 0x6d5   : > { %12808 = vmatprep.subr.msk.mxu0 %vm280_vm0, %v9544_v11  ;;  %v21785_v11 = vld [vmem:[#allocation108_spill] sm:$0xff]  ;;  %v8369_v30 = vadd.f32 %v20227_v45, %v21787_v34 }
 0x6d6   : > { %v20204_v33 = vpop.f32.mrf.mxu1  ;;  %v8370_v48 = vadd.f32 %v20227_v45, %v21785_v11  ;;  %v21791_v34 = vld [vmem:[#allocation36_spill] sm:$0xff] }
 0x6d7   : > { %v8433_v35 = vmax.f32 %v8369_v30, 0.0  ;;  %v21792_v30 = vld [vmem:[#allocation53_spill] sm:$0xff] }
 0x6d8   : > { %v20208_v20 = vpop.f32.mrf.mxu1  ;;  %12809 = vmatpush3.xpose.msk.msra.mxu0 %vm280_vm0, %v9528_v61  ;;  %v21786_v61 = vld [vmem:[#allocation61_spill] sm:$0xff]  ;;  %v8434_v10 = vmax.f32 %v8370_v48, 0.0  ;;  %v9507_v48 = vadd.f32 %v20032_v15, %v9369_v29 }
 0x6d9   : > { %12810 = vmatprep.subr.msk.mxu0 %vm280_vm0, %v9543_v55  ;;  %v8354_v2 = vadd.f32 %v20227_v45, %v21786_v61  ;;  %v9525_v55 = vmax.f32 %v9461_v38, 0.0 }
 0x6da   : > { %v20212_v41 = vpop.f32.mrf.mxu1  ;;  %v9571_v29 = vmax.f32 %v9507_v48, 0.0 }
 0x6dc   : > { %v14956_v54 = vpop.f32.mrf.mxu1  ;;  %12811 = vmatpush3.xpose.msk.msra.mxu0 %vm280_vm0, %v9527_v6  ;;  %v8859_v6 = vpop.f32.mrf.mxu0 }
 0x6dd   : > { %12812 = vmatprep.subr.msk.mxu0 %vm280_vm0, %v9542_v8  ;;  %v9444_v17 = vadd.f32 %v14956_v54, %v14852_v28  ;;  %v9364_v28 = vadd.f32 %v20120_v50, %v21790_v37  ;;  %v9572_v54 = vmax.f32 %v9508_v43, 0.0 }
 0x6de   : > { %v9438_v1 = vpop.f32.mrf.mxu1 }
 0x6e0   : > { %v14959_v26 = vpop.f32.mrf.mxu1  ;;  %12813 = vmatpush3.xpose.msk.msra.mxu0 %vm280_vm0, %v9526_v40  ;;  %v8418_v40 = vmax.f32 %v8354_v2, 0.0  ;;  %v9522_v2 = vadd.f32 %v20032_v15, %v9444_v17  ;;  %v21795_v17 = vld [vmem:[#allocation124_spill] sm:$0xff] }
 0x6e1   : > { %v9454_v49 = vadd.f32 %v14959_v26, %v14855_v14  ;;  %12814 = vmatprep.subr.msk.mxu0 %vm280_vm0, %v9541_v56  ;;  %v21788_v14 = vld [vmem:[#allocation65_spill] sm:$0xff]  ;;  %v21789_v56 = vld [vmem:[#allocation54_spill] sm:$0xff]  ;;  %v9439_v26 = vadd.f32 %v9438_v1, %v8849_v21  ;;  %v9506_v21 = vadd.f32 %v20032_v15, %v9364_v28  ;;  %v21793_v1 = vld [vmem:[#allocation48_spill] sm:$0xff] }
 0x6e2   : > { %v9448_v8 = vpop.f32.mrf.mxu1  ;;  %v8353_v11 = vadd.f32 %v20227_v45, %v21788_v14  ;;  %v8368_v38 = vadd.f32 %v20227_v45, %v21789_v56  ;;  %v9359_v43 = vadd.f32 %v20128_v0, %v21793_v1 }
 0x6e3   : > { %v9524_v25 = vadd.f32 %v20032_v15, %v9454_v49  ;;  %v9449_v12 = vadd.f32 %v9448_v8, %v8859_v6  ;;  %v21794_v8 = vld [vmem:[#allocation41_spill] sm:$0xff]  ;;  %v9521_v14 = vadd.f32 %v20032_v15, %v9439_v26 }
 0x6e4   : > { %12815 = vmatpush3.xpose.msk.msra.mxu0 %vm280_vm0, %v9525_v55  ;;  %v8352_v55 = vadd.f32 %v20227_v45, %v21792_v30  ;;  %v8417_v50 = vmax.f32 %v8353_v11, 0.0  ;;  %v8432_v6 = vmax.f32 %v8368_v38, 0.0  ;;  %v21796_v11 = vld [vmem:[#allocation57_spill] sm:$0xff]  ;;  %v21797_v38 = vld [vmem:[#allocation46_spill] sm:$0xff] }
 0x6e5   : > { %v9588_v61 = vmax.f32 %v9524_v25, 0.0  ;;  %v9523_v51 = vadd.f32 %v20032_v15, %v9449_v12  ;;  %12852 = vmatprep.subr.msk.mxu0 %vm280_vm0, %v8434_v10  ;;  %v15349_v10 = vmov 64   ;;  %v8367_v25 = vadd.f32 %v20227_v45, %v21795_v17 }
 0x6e6   : > { %15260 = vset.pattern.permute.xlu0 %v15349_v10  ;;  %v9434_v12 = vadd.f32 %v20208_v20, %v20180_v19  ;;  %v8416_v0 = vmax.f32 %v8352_v55, 0.0  ;;  %v8351_v56 = vadd.f32 %v20227_v45, %v21796_v11  ;;  %v8366_v19 = vadd.f32 %v20227_v45, %v21797_v38  ;;  %v21798_v20 = vld [vmem:[#allocation85_spill] sm:$0xff]  ;;  %v21800_v55 = vld [vmem:[#allocation87_spill] sm:$0xff]  ;;  %v21803_v10 = vld [vmem:[#allocation38_spill] sm:$0xff] }
 0x6e7   : > { %v9587_v49 = vmax.f32 %v9523_v51, 0.0  ;;  %12818 = vmatprep.subr.msk.mxu1 %vm280_vm0, %v9588_v61  ;;  %12817 = vmatmul.mubr.msk.f32.vlgmr.msra.gmra.mxu0 %vm280_vm0, %v21791_v34  ;;  %v9354_v61 = vadd.f32 %v20107_v4, %v21798_v20  ;;  %v9570_v51 = vmax.f32 %v9506_v21, 0.0  ;;  %v8431_v37 = vmax.f32 %v8367_v25, 0.0 }
 0x6e8   : > { %12819 = vmatpush3.xpose.msk.msra.mxu1 %vm280_vm0, %v9572_v54  ;;  %12853 = vmatpush3.xpose.msk.msra.mxu0 %vm280_vm0, %v8418_v40  ;;  %v9586_v40 = vmax.f32 %v9522_v2, 0.0  ;;  %v9520_v28 = vadd.f32 %v20032_v15, %v9434_v12  ;;  %v9429_v54 = vadd.f32 %v20212_v41, %v20192_v22  ;;  %v9585_v48 = vmax.f32 %v9521_v14, 0.0  ;;  %v21799_v2 = vld [vmem:[#allocation45_spill] sm:$0xff]  ;;  %v21801_v41 = vld [vmem:[#allocation50_spill] sm:$0xff] }
 0x6e9   : > { %12820 = vmatprep.subr.msk.mxu1 %vm280_vm0, %v9587_v49  ;;  %12854 = vmatprep.subr.msk.mxu0 %vm280_vm0, %v8433_v35  ;;  %v9505_v35 = vadd.f32 %v20032_v15, %v9359_v43  ;;  %v8350_v26 = vadd.f32 %v20227_v45, %v21799_v2  ;;  %v8415_v49 = vmax.f32 %v8351_v56, 0.0  ;;  %v8430_v4 = vmax.f32 %v8366_v19, 0.0 }
 0x6ea   : > { %12884 = vmatprep.mubr.msk.f32.mxu0 %vm280_vm0, %v21794_v8  ;;  %10265 = vperm.xlu0 %15260, %v21794_v8   ;;  %v9504_v30 = vadd.f32 %v20032_v15, %v9354_v61  ;;  %v9424_v21 = vadd.f32 %v20198_v52, %v20153_v62  ;;  %v9584_v1 = vmax.f32 %v9520_v28, 0.0  ;;  %v9519_v43 = vadd.f32 %v20032_v15, %v9429_v54  ;;  %v21805_v61 = vld [vmem:[#allocation42_spill] sm:$0xff] }
 0x6eb   : > { %v9569_v22 = vmax.f32 %v9505_v35, 0.0  ;;  %v8364_v17 = vadd.f32 %v20227_v45, %v21803_v10  ;;  %v9502_v19 = vadd.f32 %v20032_v15, %v20095_v59  ;;  %v21806_v59 = vld [vmem:[#allocation37_spill] sm:$0xff]  ;;  %v21807_v54 = vld [vmem:[#allocation30_spill] sm:$0xff] }
 0x6ec   : > { %12821 = vmatpush3.xpose.msk.msra.mxu1 %vm280_vm0, %v9571_v29  ;;  %12855 = vmatpush3.xpose.msk.msra.mxu0 %vm280_vm0, %v8417_v50  ;;  %v9349_v50 = vadd.f32 %v20115_v24, %v21800_v55  ;;  %v8414_v29 = vmax.f32 %v8350_v26, 0.0  ;;  %v21802_v24 = vld [vmem:[#allocation49_spill] sm:$0xff]  ;;  %v9568_v25 = vmax.f32 %v9504_v30, 0.0  ;;  %v9518_v12 = vadd.f32 %v20032_v15, %v9424_v21 }
 0x6ed   : > { %12822 = vmatprep.subr.msk.mxu1 %vm280_vm0, %v9586_v40  ;;  %12856 = vmatprep.subr.msk.mxu0 %vm280_vm0, %v8432_v6  ;;  %v8365_v6 = vadd.f32 %v20227_v45, %v21801_v41  ;;  %v8349_v8 = vadd.f32 %v20227_v45, %v21802_v24  ;;  %v9419_v40 = vadd.f32 %v20204_v33, %v20168_v58  ;;  %v9583_v14 = vmax.f32 %v9519_v43, 0.0  ;;  %v21808_v30 = vld [vmem:[#allocation25_spill] sm:$0xff]  ;;  %v21811_v24 = vld [vmem:[#allocation22_spill] sm:$0xff] }
 0x6ee   : > { %v9503_v62 = vadd.f32 %v20032_v15, %v9349_v50  ;;  %v8428_v38 = vmax.f32 %v8364_v17, 0.0  ;;  %v8363_v58 = vadd.f32 %v20227_v45, %v21805_v61  ;;  %v9414_v33 = vadd.f32 %v20186_v36, %v20126_v7 }
 0x6ef   : > { %v8429_v52 = vmax.f32 %v8365_v6, 0.0  ;;  %v8413_v56 = vmax.f32 %v8349_v8, 0.0  ;;  %v9517_v35 = vadd.f32 %v20032_v15, %v9419_v40  ;;  %v8347_v28 = vadd.f32 %v20227_v45, %v21806_v59  ;;  %v21809_v6 = vld [vmem:[#allocation34_spill] sm:$0xff] }
 0x6f0   : > { %12823 = vmatpush3.xpose.msk.msra.mxu1 %vm280_vm0, %v9570_v51  ;;  %12857 = vmatpush3.xpose.msk.msra.mxu0 %vm280_vm0, %v8416_v0  ;;  %v21804_v0 = vld [vmem:[#allocation33_spill] sm:$0xff]  ;;  %v9567_v20 = vmax.f32 %v9503_v62, 0.0  ;;  %v9582_v51 = vmax.f32 %v9518_v12, 0.0  ;;  %v9566_v2 = vmax.f32 %v9502_v19, 0.0  ;;  %v9501_v7 = vadd.f32 %v20032_v15, %v20105_v53 }
 0x6f1   : > { %12824 = vmatprep.subr.msk.mxu1 %vm280_vm0, %v9585_v48  ;;  %12858 = vmatprep.subr.msk.mxu0 %vm280_vm0, %v8431_v37  ;;  %v8348_v11 = vadd.f32 %v20227_v45, %v21804_v0  ;;  %v8362_v48 = vadd.f32 %v20227_v45, %v21807_v54  ;;  %v8427_v36 = vmax.f32 %v8363_v58, 0.0  ;;  %v9516_v26 = vadd.f32 %v20032_v15, %v9414_v33  ;;  %v21814_v19 = vld [vmem:[#allocation21_spill] sm:$0xff] }
 0x6f2   : > { %v8346_v55 = vadd.f32 %v20227_v45, %v21808_v30  ;;  %v8411_v50 = vmax.f32 %v8347_v28, 0.0  ;;  %v9565_v41 = vmax.f32 %v9501_v7, 0.0  ;;  %v8360_v8 = vadd.f32 %v20227_v45, %v21811_v24 }
 0x6f3   : > { %v8412_v37 = vmax.f32 %v8348_v11, 0.0  ;;  %v8426_v53 = vmax.f32 %v8362_v48, 0.0  ;;  %v9580_v21 = vmax.f32 %v9516_v26, 0.0  ;;  %v21813_v11 = vld [vmem:[#allocation26_spill] sm:$0xff]  ;;  %v9497_v33 = vadd.f32 %v20032_v15, %v20075_v23  ;;  %v21818_v48 = vld [vmem:[#allocation5_spill] sm:$0xff] }
 0x6f4   : > { %12825 = vmatpush3.xpose.msk.msra.mxu1 %vm280_vm0, %v9569_v22  ;;  %12859 = vmatpush3.xpose.msk.msra.mxu0 %vm280_vm0, %v8415_v49  ;;  %v9409_v49 = vadd.f32 %v20194_v39, %v20139_v32  ;;  %v9500_v22 = vadd.f32 %v20032_v15, %v20079_v46  ;;  %v8361_v32 = vadd.f32 %v20227_v45, %v21809_v6  ;;  %v8410_v43 = vmax.f32 %v8346_v55, 0.0  ;;  %v21810_v46 = vld [vmem:[#allocation29_spill] sm:$0xff]  ;;  %v21822_v6 = vld [vmem:[#allocation8_spill] sm:$0xff] }
 0x6f5   : > { %12826 = vmatprep.subr.msk.mxu1 %vm280_vm0, %v9584_v1  ;;  %12860 = vmatprep.subr.msk.mxu0 %vm280_vm0, %v8430_v4  ;;  %v9581_v4 = vmax.f32 %v9517_v35, 0.0  ;;  %v9404_v39 = vadd.f32 %v20174_v9, %v20099_v13  ;;  %v9499_v13 = vadd.f32 %v20032_v15, %v20091_v16  ;;  %v9498_v16 = vadd.f32 %v20032_v15, %v20064_v57  ;;  %v21817_v35 = vld [vmem:[#allocation18_spill] sm:$0xff]  ;;  %v21819_v55 = vld [vmem:[#allocation13_spill] sm:$0xff] }
 0x6f6   : > { %v9515_v1 = vadd.f32 %v20032_v15, %v9409_v49  ;;  %v9564_v10 = vmax.f32 %v9500_v22, 0.0  ;;  %v8425_v9 = vmax.f32 %v8361_v32, 0.0  ;;  %v8424_v0 = vmax.f32 %v8360_v8, 0.0 }
 0x6f7   : > { %v9514_v17 = vadd.f32 %v20032_v15, %v9404_v39  ;;  %v8343_v57 = vadd.f32 %v20227_v45, %v21814_v19  ;;  %v9562_v58 = vmax.f32 %v9498_v16, 0.0  ;;  %v9512_v28 = vadd.f32 %v20032_v15, %v20163_v60  ;;  %v21829_v19 = vld [vmem:[#allocation20_spill] sm:$0xff] }
 0x6f8   : > { %12827 = vmatpush3.xpose.msk.msra.mxu1 %vm280_vm0, %v9568_v25  ;;  %12861 = vmatpush3.xpose.msk.msra.mxu0 %vm280_vm0, %v8414_v29  ;;  %v8345_v29 = vadd.f32 %v20227_v45, %v21810_v46  ;;  %v9399_v25 = vadd.f32 %v20182_v18, %v20113_v42  ;;  %v9579_v62 = vmax.f32 %v9515_v1, 0.0  ;;  %v8359_v42 = vadd.f32 %v20227_v45, %v21813_v11 }
 0x6f9   : > { %12828 = vmatprep.subr.msk.mxu1 %vm280_vm0, %v9583_v14  ;;  %12862 = vmatprep.subr.msk.mxu0 %vm280_vm0, %v8429_v52  ;;  %v21812_v52 = vld [vmem:[#allocation17_spill] sm:$0xff]  ;;  %v9563_v14 = vmax.f32 %v9499_v13, 0.0  ;;  %v9578_v18 = vmax.f32 %v9514_v17, 0.0  ;;  %v8407_v23 = vmax.f32 %v8343_v57, 0.0  ;;  %v9496_v7 = vadd.f32 %v20032_v15, %v20051_v44  ;;  %v21824_v17 = vld [vmem:[#allocation123_spill] sm:$0xff] }
 0x6fa   : > { %v8344_v12 = vadd.f32 %v20227_v45, %v21812_v52  ;;  %v8409_v40 = vmax.f32 %v8345_v29, 0.0  ;;  %v8423_v59 = vmax.f32 %v8359_v42, 0.0  ;;  %v9576_v49 = vmax.f32 %v9512_v28, 0.0  ;;  %v21832_v28 = vld [vmem:[#allocation47_spill] sm:$0xff] }
 0x6fb   : > { %v8341_v44 = vadd.f32 %v20227_v45, %v21819_v55  ;;  %v9560_v22 = vmax.f32 %v9496_v7, 0.0  ;;  %v9494_v29 = vadd.f32 %v20032_v15, %v20040_v27  ;;  %v9509_v13 = vadd.f32 %v20032_v15, %v20159_v3  ;;  %v21834_v7 = vld [vmem:[#allocation39_spill] sm:$0xff] }
 0x6fc   : > { %12829 = vmatpush3.xpose.msk.msra.mxu1 %vm280_vm0, %v9567_v20  ;;  %12863 = vmatpush3.xpose.msk.msra.mxu0 %vm280_vm0, %v8413_v56  ;;  %v9513_v56 = vadd.f32 %v20032_v15, %v9399_v25  ;;  %v21815_v20 = vld [vmem:[#allocation14_spill] sm:$0xff]  ;;  %v8339_v27 = vadd.f32 %v20227_v45, %v21824_v17  ;;  %v8400_v57 = vadd.f32 %v20227_v45, %v21829_v19  ;;  %v21836_v55 = vld [vmem:[#allocation43_spill] sm:$0xff] }
 0x6fd   : > { %12830 = vmatprep.subr.msk.mxu1 %vm280_vm0, %v9582_v51  ;;  %12864 = vmatprep.subr.msk.mxu0 %vm280_vm0, %v8428_v38  ;;  %v8408_v38 = vmax.f32 %v8344_v12, 0.0  ;;  %v8358_v61 = vadd.f32 %v20227_v45, %v21815_v20  ;;  %v21816_v51 = vld [vmem:[#allocation7_spill] sm:$0xff]  ;;  %v9558_v25 = vmax.f32 %v9494_v29, 0.0  ;;  %v21825_v12 = vld [vmem:[#allocation76_spill] sm:$0xff] }
 0x6fe   : > { %v9577_v54 = vmax.f32 %v9513_v56, 0.0  ;;  %v8402_v3 = vadd.f32 %v20227_v45, %v21825_v12  ;;  %v8403_v16 = vmax.f32 %v8339_v27, 0.0  ;;  %v21828_v56 = vld [vmem:[#allocation103_spill] sm:$0xff] }
 0x6ff   : > { %v8422_v26 = vmax.f32 %v8358_v61, 0.0  ;;  %v20455_v61 = vld [vmem:[%s20600_s2 + $0x60] sm:$0x3] }
 0x700   : > { %12831 = vmatpush3.xpose.msk.msra.mxu1 %vm280_vm0, %v9566_v2  ;;  %12865 = vmatpush3.xpose.msk.msra.mxu0 %vm280_vm0, %v8412_v37  ;;  %v8107_v37 = vadd.f32 %v21817_v35, %v21816_v51  ;;  %v8342_v2 = vadd.f32 %v20227_v45, %v21818_v48  ;;  %v8466_v42 = vmax.f32 %v8402_v3, 0.0  ;;  %v21831_v35 = vld [vmem:[#allocation74_spill] sm:$0xff]  ;;  %v21833_v48 = vld [vmem:[#allocation72_spill] sm:$0xff] }
 0x701   : > { %12832 = vmatprep.subr.msk.mxu1 %vm280_vm0, %v9581_v4  ;;  %12866 = vmatprep.subr.msk.mxu0 %vm280_vm0, %v8427_v36  ;;  %v9561_v36 = vmax.f32 %v9497_v33, 0.0  ;;  %v9511_v4 = vadd.f32 %v20032_v15, %v20172_v5  ;;  %v21821_v5 = vld [vmem:[#allocation132_spill] sm:$0xff] }
 0x702   : > { %v8357_v60 = vadd.f32 %v20227_v45, %v8107_v37  ;;  %v8406_v30 = vmax.f32 %v8342_v2, 0.0  ;;  %v8097_v32 = vadd.f32 %v21822_v6, %v21821_v5  ;;  %v8399_v37 = vadd.f32 %v20227_v45, %v21831_v35 }
 0x703   : > { %v9575_v1 = vmax.f32 %v9511_v4, 0.0  ;;  %v8398_v2 = vadd.f32 %v20227_v45, %v21833_v48 }
 0x704   : > { %12833 = vmatpush3.xpose.msk.msra.mxu1 %vm280_vm0, %v9565_v41  ;;  %12867 = vmatpush3.xpose.msk.msra.mxu0 %vm280_vm0, %v8411_v50  ;;  %v21820_v50 = vld [vmem:[#allocation9_spill] sm:$0xff]  ;;  %v9495_v41 = vadd.f32 %v20032_v15, %v20061_v31  ;;  %v8421_v39 = vmax.f32 %v8357_v60, 0.0  ;;  %v8405_v31 = vmax.f32 %v8341_v44, 0.0  ;;  %v8381_v44 = vadd.f32 %v20227_v45, %v21836_v55 }
 0x705   : > { %12834 = vmatprep.subr.msk.mxu1 %vm280_vm0, %v9580_v21  ;;  %12868 = vmatprep.subr.msk.mxu0 %vm280_vm0, %v8426_v53  ;;  %v8356_v53 = vadd.f32 %v20227_v45, %v21820_v50  ;;  %v9510_v21 = vadd.f32 %v20032_v15, %v20148_v63  ;;  %v8355_v63 = vadd.f32 %v20227_v45, %v8097_v32  ;;  %v8462_v60 = vmax.f32 %v8398_v2, 0.0  ;;  %v21837_v50 = vld [vmem:[#allocation12_spill] sm:$0xff]  ;;  %v21854_v2 = vld [vmem:[#allocation62_spill] sm:$0xff] }
 0x706   : > { %v9559_v24 = vmax.f32 %v9495_v41, 0.0  ;;  %v21838_v41 = vld [vmem:[#allocation31_spill] sm:$0xff]  ;;  %v8445_v6 = vmax.f32 %v8381_v44, 0.0 }
 0x707   : > { %v8420_v8 = vmax.f32 %v8356_v53, 0.0  ;;  %v8419_v52 = vmax.f32 %v8355_v63, 0.0  ;;  %v8396_v53 = vadd.f32 %v20227_v45, %v21837_v50  ;;  %v8380_v5 = vadd.f32 %v20227_v45, %v21838_v41 }
 0x708   : > { %12835 = vmatpush3.xpose.msk.msra.mxu1 %vm280_vm0, %v9564_v10  ;;  %12869 = vmatpush3.xpose.msk.msra.mxu0 %vm280_vm0, %v8410_v43  ;;  %v21823_v43 = vld [vmem:[#allocation6_spill] sm:$0xff]  ;;  %v9574_v10 = vmax.f32 %v9510_v21, 0.0 }
 0x709   : > { %12836 = vmatprep.subr.msk.mxu1 %vm280_vm0, %v9579_v62  ;;  %12870 = vmatprep.subr.msk.mxu0 %vm280_vm0, %v8425_v9  ;;  %v8340_v46 = vadd.f32 %v20227_v45, %v21823_v43  ;;  %v9493_v62 = vadd.f32 %v20032_v15, %v20047_v47  ;;  %v21827_v15 = vld [vmem:[#allocation24_spill] sm:$0xff]  ;;  %v8460_v32 = vmax.f32 %v8396_v53, 0.0  ;;  %v21840_v43 = vld [vmem:[#allocation35_spill] sm:$0xff] }
 0x70a   : > { %v8401_v47 = vadd.f32 %v20227_v45, %v21827_v15 }
 0x70b   : > { %v8404_v9 = vmax.f32 %v8340_v46, 0.0  ;;  %v9557_v11 = vmax.f32 %v9493_v62, 0.0  ;;  %v8379_v46 = vadd.f32 %v20227_v45, %v21840_v43 }
 0x70c   : > { %12837 = vmatpush3.xpose.msk.msra.mxu1 %vm280_vm0, %v9563_v14  ;;  %12871 = vmatpush3.xpose.msk.msra.mxu0 %vm280_vm0, %v8409_v40  ;;  %v9573_v40 = vmax.f32 %v9509_v13, 0.0  ;;  %v21826_v14 = vld [vmem:[#allocation51_spill] sm:$0xff]  ;;  %v8465_v20 = vmax.f32 %v8401_v47, 0.0 }
 0x70d   : > { %12838 = vmatprep.subr.msk.mxu1 %vm280_vm0, %v9578_v18  ;;  %12872 = vmatprep.subr.msk.mxu0 %vm280_vm0, %v8424_v0  ;;  %v8386_v0 = vadd.f32 %v20227_v45, %v21826_v14  ;;  %v21848_v47 = vld [vmem:[#allocation19_spill] sm:$0xff] }
 0x70f   : > { %v8450_v18 = vmax.f32 %v8386_v0, 0.0 }
 0x710   : > { %12839 = vmatpush3.xpose.msk.msra.mxu1 %vm280_vm0, %v9562_v58  ;;  %12873 = vmatpush3.xpose.msk.msra.mxu0 %vm280_vm0, %v8408_v38  ;;  %v8385_v38 = vadd.f32 %v20227_v45, %v21828_v56  ;;  %v21830_v58 = vld [vmem:[#allocation122_spill] sm:$0xff]  ;;  %v21849_v56 = vld [vmem:[#allocation59_spill] sm:$0xff] }
 0x711   : > { %12840 = vmatprep.subr.msk.mxu1 %vm280_vm0, %v9577_v54  ;;  %12874 = vmatprep.subr.msk.mxu0 %vm280_vm0, %v8423_v59  ;;  %v8384_v33 = vadd.f32 %v20227_v45, %v21830_v58  ;;  %v8383_v54 = vadd.f32 %v20227_v45, %v21832_v28  ;;  %v21853_v28 = vld [vmem:[#allocation107_spill] sm:$0xff] }
 0x712   : > { %v8449_v51 = vmax.f32 %v8385_v38, 0.0  ;;  %v8390_v38 = vadd.f32 %v20227_v45, %v21849_v56 }
 0x713   : > { %v8448_v59 = vmax.f32 %v8384_v33, 0.0 }
 0x714   : > { %12841 = vmatpush3.xpose.msk.msra.mxu1 %vm280_vm0, %v9561_v36  ;;  %12875 = vmatpush3.xpose.msk.msra.mxu0 %vm280_vm0, %v8407_v23  ;;  %v8463_v23 = vmax.f32 %v8399_v37, 0.0  ;;  %v8382_v36 = vadd.f32 %v20227_v45, %v21834_v7  ;;  %v8454_v33 = vmax.f32 %v8390_v38, 0.0  ;;  %v21852_v37 = vld [vmem:[#allocation11_spill] sm:$0xff] }
 0x715   : > { %12842 = vmatprep.subr.msk.mxu1 %vm280_vm0, %v9576_v49  ;;  %12876 = vmatprep.subr.msk.mxu0 %vm280_vm0, %v8422_v26  ;;  %v8447_v26 = vmax.f32 %v8383_v54, 0.0  ;;  %v21835_v49 = vld [vmem:[#allocation16_spill] sm:$0xff]  ;;  %v8388_v54 = vadd.f32 %v20227_v45, %v21853_v28 }
 0x716   : > { %v8397_v4 = vadd.f32 %v20227_v45, %v21835_v49 }
 0x718   : > { %12843 = vmatpush3.xpose.msk.msra.mxu1 %vm280_vm0, %v9560_v22  ;;  %12877 = vmatpush3.xpose.msk.msra.mxu0 %vm280_vm0, %v8406_v30  ;;  %v8446_v30 = vmax.f32 %v8382_v36, 0.0  ;;  %v8461_v22 = vmax.f32 %v8397_v4, 0.0  ;;  %v8452_v36 = vmax.f32 %v8388_v54, 0.0  ;;  %v21856_v4 = vld [vmem:[#allocation66_spill] sm:$0xff] }
 0x719   : > { %12844 = vmatprep.subr.msk.mxu1 %vm280_vm0, %v9575_v1  ;;  %12878 = vmatprep.subr.msk.mxu0 %vm280_vm0, %v8421_v39  ;;  %v21839_v39 = vld [vmem:[#allocation70_spill] sm:$0xff]  ;;  %v8444_v1 = vmax.f32 %v8380_v5, 0.0 }
 0x71a   : > { %v8395_v21 = vadd.f32 %v20227_v45, %v21839_v39 }
 0x71c   : > { %12845 = vmatpush3.xpose.msk.msra.mxu1 %vm280_vm0, %v9559_v24  ;;  %12879 = vmatpush3.xpose.msk.msra.mxu0 %vm280_vm0, %v8405_v31  ;;  %v21841_v31 = vld [vmem:[#allocation67_spill] sm:$0xff]  ;;  %v8459_v24 = vmax.f32 %v8395_v21, 0.0 }
 0x71d   : > { %12846 = vmatprep.subr.msk.mxu1 %vm280_vm0, %v9574_v10  ;;  %12880 = vmatprep.subr.msk.mxu0 %vm280_vm0, %v8420_v8  ;;  %v8394_v29 = vadd.f32 %v20227_v45, %v21841_v31  ;;  %v21842_v8 = vld [vmem:[#allocation23_spill] sm:$0xff]  ;;  %v8443_v10 = vmax.f32 %v8379_v46, 0.0 }
 0x71e   : > { %v8378_v63 = vadd.f32 %v20227_v45, %v21842_v8 }
 0x71f   : > { %v8458_v13 = vmax.f32 %v8394_v29, 0.0 }
 0x720   : > { %12847 = vmatpush3.xpose.msk.msra.mxu1 %vm280_vm0, %v9558_v25  ;;  %12881 = vmatpush3.xpose.msk.msra.mxu0 %vm280_vm0, %v8404_v9  ;;  %v21843_v9 = vld [vmem:[#allocation69_spill] sm:$0xff]  ;;  %v8442_v27 = vmax.f32 %v8378_v63, 0.0  ;;  %v21844_v25 = vld [vmem:[#allocation27_spill] sm:$0xff] }
 0x721   : > { %12848 = vmatprep.subr.msk.mxu1 %vm280_vm0, %v9573_v40  ;;  %12882 = vmatprep.subr.msk.mxu0 %vm280_vm0, %v8419_v52  ;;  %v8393_v17 = vadd.f32 %v20227_v45, %v21843_v9  ;;  %v8377_v62 = vadd.f32 %v20227_v45, %v21844_v25  ;;  %v21845_v52 = vld [vmem:[#allocation121_spill] sm:$0xff]  ;;  %v21846_v40 = vld [vmem:[#allocation15_spill] sm:$0xff] }
 0x722   : > { %v8392_v12 = vadd.f32 %v20227_v45, %v21845_v52 }
 0x723   : > { %v8457_v3 = vmax.f32 %v8393_v17, 0.0  ;;  %v8441_v14 = vmax.f32 %v8377_v62, 0.0 }
 0x724   : > { %12849 = vmatpush3.xpose.msk.msra.mxu1 %vm280_vm0, %v9557_v11  ;;  %12883 = vmatpush3.xpose.msk.msra.mxu0 %vm280_vm0, %v8403_v16  ;;  %v8376_v16 = vadd.f32 %v20227_v45, %v21846_v40  ;;  %v8456_v0 = vmax.f32 %v8392_v12, 0.0  ;;  %v21847_v11 = vld [vmem:[#allocation63_spill] sm:$0xff] }
 0x725   : > { %12886 = vmatprep.subr.msk.mxu1 %vm280_vm0, %v8466_v42  ;;  %v8391_v42 = vadd.f32 %v20227_v45, %v21847_v11 }
 0x726   : > { %v8440_v15 = vmax.f32 %v8376_v16, 0.0 }
 0x727   : > { %12851 = vmatmul.mubr.msk.f32.vlgmr.msra.gmra.mxu1 %vm280_vm0, %v21791_v34  ;;  %12885 = vmatmul.mubr.msk.f32.vlgmr.msra.gmra.mxu0 %vm280_vm0, %v20455_v61  ;;  %v8464_v34 = vmax.f32 %v8400_v57, 0.0  ;;  %v8455_v19 = vmax.f32 %v8391_v42, 0.0  ;;  %v21850_v57 = vld [vmem:[#allocation10_spill] sm:$0xff] }
 0x728   : > { %12887 = vmatpush3.xpose.msk.msra.mxu1 %vm280_vm0, %v8450_v18  ;;  %12918 = vmatprep.mubr.msk.f32.mxu1 %vm280_vm0, %v20455_v61  ;;  %v8375_v18 = vadd.f32 %v20227_v45, %v21848_v47 }
 0x729   : > { %12888 = vmatprep.subr.msk.mxu1 %vm280_vm0, %v8465_v20  ;;  %v8374_v20 = vadd.f32 %v20227_v45, %v21850_v57 }
 0x72a   : > { %v8439_v58 = vmax.f32 %v8375_v18, 0.0 }
 0x72b   : > { %v8438_v35 = vmax.f32 %v8374_v20, 0.0 }
 0x72c   : > { %12889 = vmatpush3.xpose.msk.msra.mxu1 %vm280_vm0, %v8449_v51  ;;  %v21851_v51 = vld [vmem:[#allocation120_spill] sm:$0xff] }
 0x72d   : > { %12890 = vmatprep.subr.msk.mxu1 %vm280_vm0, %v8464_v34  ;;  %v8389_v34 = vadd.f32 %v20227_v45, %v21851_v51 }
 0x72f   : > { %v8453_v48 = vmax.f32 %v8389_v34, 0.0 }
 0x730   : > { %12891 = vmatpush3.xpose.msk.msra.mxu1 %vm280_vm0, %v8448_v59  ;;  %v8373_v59 = vadd.f32 %v20227_v45, %v21852_v37 }
 0x731   : > { %12892 = vmatprep.subr.msk.mxu1 %vm280_vm0, %v8463_v23  ;;  %v8372_v23 = vadd.f32 %v20227_v45, %v21854_v2 }
 0x732   : > { %v8437_v7 = vmax.f32 %v8373_v59, 0.0 }
 0x733   : > { %v8436_v49 = vmax.f32 %v8372_v23, 0.0 }
 0x734   : > { %12893 = vmatpush3.xpose.msk.msra.mxu1 %vm280_vm0, %v8447_v26  ;;  %v21855_v26 = vld [vmem:[#allocation55_spill] sm:$0xff] }
 0x735   : > { %12894 = vmatprep.subr.msk.mxu1 %vm280_vm0, %v8462_v60  ;;  %v8387_v60 = vadd.f32 %v20227_v45, %v21855_v26 }
 0x737   : > { %v8451_v55 = vmax.f32 %v8387_v60, 0.0 }
 0x738   : > { %12895 = vmatpush3.xpose.msk.msra.mxu1 %vm280_vm0, %v8446_v30  ;;  %v8371_v30 = vadd.f32 %v20227_v45, %v21856_v4 }
 0x739   : > { %12896 = vmatprep.subr.msk.mxu1 %vm280_vm0, %v8461_v22 }
 0x73a   : > { %v8435_v44 = vmax.f32 %v8371_v30, 0.0 }
 0x73c   : > { %12897 = vmatpush3.xpose.msk.msra.mxu1 %vm280_vm0, %v8445_v6 }
 0x73d   : > { %12898 = vmatprep.subr.msk.mxu1 %vm280_vm0, %v8460_v32 }
 0x740   : > { %12899 = vmatpush3.xpose.msk.msra.mxu1 %vm280_vm0, %v8444_v1 }
 0x741   : > { %12900 = vmatprep.subr.msk.mxu1 %vm280_vm0, %v8459_v24 }
 0x744   : > { %12901 = vmatpush3.xpose.msk.msra.mxu1 %vm280_vm0, %v8443_v10 }
 0x745   : > { %12902 = vmatprep.subr.msk.mxu1 %vm280_vm0, %v8458_v13 }
 0x748   : > { %12903 = vmatpush3.xpose.msk.msra.mxu1 %vm280_vm0, %v8442_v27 }
 0x749   : > { %12904 = vmatprep.subr.msk.mxu1 %vm280_vm0, %v8457_v3 }
 0x74c   : > { %12905 = vmatpush3.xpose.msk.msra.mxu1 %vm280_vm0, %v8441_v14 }
 0x74d   : > { %12906 = vmatprep.subr.msk.mxu1 %vm280_vm0, %v8456_v0 }
 0x750   : > { %12907 = vmatpush3.xpose.msk.msra.mxu1 %vm280_vm0, %v8440_v15 }
 0x751   : > { %12908 = vmatprep.subr.msk.mxu1 %vm280_vm0, %v8455_v19 }
 0x754   : > { %12909 = vmatpush3.xpose.msk.msra.mxu1 %vm280_vm0, %v8439_v58 }
 0x755   : > { %12910 = vmatprep.subr.msk.mxu1 %vm280_vm0, %v8454_v33 }
 0x758   : > { %12911 = vmatpush3.xpose.msk.msra.mxu1 %vm280_vm0, %v8438_v35 }
 0x759   : > { %12912 = vmatprep.subr.msk.mxu1 %vm280_vm0, %v8453_v48 }
 0x75c   : > { %12913 = vmatpush3.xpose.msk.msra.mxu1 %vm280_vm0, %v8437_v7 }
 0x75d   : > { %12914 = vmatprep.subr.msk.mxu1 %vm280_vm0, %v8452_v36 }
 0x760   : > { %12915 = vmatpush3.xpose.msk.msra.mxu1 %vm280_vm0, %v8436_v49 }
 0x761   : > { %12916 = vmatprep.subr.msk.mxu1 %vm280_vm0, %v8451_v55 }
 0x764   : > { %12917 = vmatpush3.xpose.msk.msra.mxu1 %vm280_vm0, %v8435_v44 }
 0x765   : > { %v10266_v32 = vpop.permute.xlu0 %10265 }
 0x767   : > { %12919 = vmatmul.mubr.msk.f32.vlgmr.msra.gmra.mxu1 %vm280_vm0, %v20455_v61 }
 0x7a7   : > { %v9852_v50 = vpop.f32.mrf.mxu0 }
 0x7a9   : > { %v9854_v53 = vpop.f32.mrf.mxu0 }
 0x7e7   : > { %v10188_v22 = vpop.f32.mrf.mxu0  ;;  %v9923_v62 = vpop.f32.mrf.mxu1 }
 0x7e8   : > { %v10189_v6 = vadd.f32 %v10188_v22, %v9852_v50 }
 0x7e9   : > { %v10190_v41 = vpop.f32.mrf.mxu0  ;;  %v9925_v3 = vpop.f32.mrf.mxu1 }
 0x7ea   : > { %v10191_v5 = vadd.f32 %v10190_v41, %v9854_v53  ;;  %v10268_v45 = vadd.f32 %v10266_v32, %v10189_v6 }
 0x7ec   : > { %v10269_v39 = vadd.f32 %v10266_v32, %v10191_v5  ;;  %v10273_v1 = vsel %vm10272_vm1, %v10268_v45, -inf }
 0x7ed   : > { %v10274_v46 = vrot.slane %v10273_v1, 4 }
 0x7ee   : > { %v10280_v21 = vsel %vm10272_vm1, %v10269_v39, -inf }
 0x7ef   : > { %v10281_v43 = vrot.slane %v10280_v21, 4  ;;  %v10275_v29 = vmax.f32 %v10273_v1, %v10274_v46 }
 0x7f1   : > { %v10282_v31 = vmax.f32 %v10280_v21, %v10281_v43  ;;  %v10276_v61 = vrot.slane %v10275_v29, 2 }
 0x7f3   : > { %v10283_v24 = vrot.slane %v10282_v31, 2  ;;  %v10277_v63 = vmax.f32 %v10275_v29, %v10276_v61 }
 0x7f5   : > { %v10284_v8 = vmax.f32 %v10282_v31, %v10283_v24  ;;  %v10278_v13 = vrot.slane %v10277_v63, 1 }
 0x7f7   : > { %v10285_v10 = vrot.slane %v10284_v8, 1  ;;  %v10279_v17 = vmax.f32 %v10277_v63, %v10278_v13 }
 0x7f9   : > { %v10286_v9 = vmax.f32 %v10284_v8, %v10285_v10  ;;  %v20552_v25 = vsub.f32 %v10268_v45, %v10279_v17 }
 0x7fb   : > { %v20550_v27 = vsub.f32 %v10269_v39, %v10286_v9  ;;  %v10305_v12 = vmul.f32 1.442695, %v20552_v25 }
 0x7fd   : > { %v10307_v52 = vmul.f32 1.442695, %v20550_v27 }
 0x7ff   : > { %15261 = vpow2.f32 %v10307_v52  ;;  %v15350_v52 = vmov 1983009808  }
 0x800   : > { %15263 = vpow2.f32 %v10305_v12  ;;  %v10360_v12 = vunpack.c.l.s4 %v15350_v52 }
 0x80c   : > { %v15262_v33 = vpop.eup %15261 }
 0x80d   : > { %v15264_v35 = vpop.eup %15263  ;;  %v10320_v37 = vsel %vm10272_vm1, %v15262_v33, 0.0 }
 0x80e   : > { %v10313_v54 = vsel %vm10272_vm1, %v15264_v35, 0.0  ;;  %v10321_v23 = vrot.slane %v10320_v37, 4 }
 0x80f   : > { %v10314_v26 = vrot.slane %v10313_v54, 4 }
 0x810   : > { %v10322_v49 = vadd.f32 %v10321_v23, %v10320_v37 }
 0x811   : > { %v10315_v4 = vadd.f32 %v10314_v26, %v10313_v54 }
 0x812   : > { %v10323_v30 = vrot.slane %v10322_v49, 2 }
 0x813   : > { %v10316_v55 = vrot.slane %v10315_v4, 2 }
 0x814   : > { %v10324_v44 = vadd.f32 %v10323_v30, %v10322_v49 }
 0x815   : > { %v10317_v50 = vadd.f32 %v10316_v55, %v10315_v4 }
 0x816   : > { %v10325_v22 = vrot.slane %v10324_v44, 1 }
 0x817   : > { %v10318_v6 = vrot.slane %v10317_v50, 1 }
 0x818   : > { %v10326_v45 = vadd.f32 %v10325_v22, %v10324_v44 }
 0x819   : > { %v10319_v43 = vadd.f32 %v10318_v6, %v10317_v50 }
 0x827   : > { %v10259_v40 = vpop.f32.mrf.mxu1 }
 0x828   : > { %v10260_v16 = vadd.f32 %v10259_v40, %v9923_v62 }
 0x829   : > { %v10261_v14 = vpop.f32.mrf.mxu1 }
 0x82a   : > { %v10270_v0 = vadd.f32 %v10266_v32, %v10260_v16  ;;  %v10262_v11 = vadd.f32 %v10261_v14, %v9925_v3  ;;  %v10362_v3 = vlaneseq }
 0x82c   : > { %v10287_v42 = vsel %vm10272_vm1, %v10270_v0, -inf  ;;  %v10271_v15 = vadd.f32 %v10266_v32, %v10262_v11  ;;  %v10361_v11 = vunpack.c.0.s8 %v10360_v12 }
 0x82d   : > { %v10288_v47 = vrot.slane %v10287_v42, 4 }
 0x82e   : > { %v10294_v18 = vsel %vm10272_vm1, %v10271_v15, -inf }
 0x82f   : > { %v10289_v56 = vmax.f32 %v10287_v42, %v10288_v47  ;;  %v10295_v38 = vrot.slane %v10294_v18, 4  ;;  %v10363_v42 = vshrl.u32 %v10362_v3, 7 }
 0x831   : > { %v10290_v19 = vrot.slane %v10289_v56, 2  ;;  %v10296_v57 = vmax.f32 %v10294_v18, %v10295_v38 }
 0x833   : > { %v10291_v20 = vmax.f32 %v10289_v56, %v10290_v19  ;;  %v10297_v58 = vrot.slane %v10296_v57, 2 }
 0x835   : > { %v10292_v51 = vrot.slane %v10291_v20, 1  ;;  %v10298_v34 = vmax.f32 %v10296_v57, %v10297_v58  ;;  %v10364_v57 = vsub.s32 %v10361_v11, %v10363_v42 }
 0x837   : > { %v10293_v59 = vmax.f32 %v10291_v20, %v10292_v51  ;;  %v10299_v28 = vrot.slane %v10298_v34, 1 }
 0x839   : > { %v10303_v48 = vsub.f32 %v10270_v0, %v10293_v59  ;;  %v10300_v2 = vmax.f32 %v10298_v34, %v10299_v28 }
 0x83b   : > { %v10309_v7 = vmul.f32 1.442695, %v10303_v48  ;;  %v10304_v36 = vsub.f32 %v10271_v15, %v10300_v2 }
 0x83d   : > { %15265 = vpow2.f32 %v10309_v7  ;;  %v10311_v60 = vmul.f32 1.442695, %v10304_v36 }
 0x83f   : > { %15267 = vpow2.f32 %v10311_v60 }
 0x840   : > { %15269 = vlog2.f32 %v10326_v45 }
 0x841   : > { %15271 = vlog2.f32 %v10319_v43 }
 0x84a   : > { %v15266_v53 = vpop.eup %15265 }
 0x84b   : > { %v10327_v41 = vsel %vm10272_vm1, %v15266_v53, 0.0 }
 0x84c   : > { %v15268_v5 = vpop.eup %15267  ;;  %v10328_v32 = vrot.slane %v10327_v41, 4 }
 0x84d   : > { %v10334_v39 = vsel %vm10272_vm1, %v15268_v5, 0.0  ;;  %v15270_v9 = vpop.eup %15269 }
 0x84e   : > { %v10329_v21 = vadd.f32 %v10328_v32, %v10327_v41  ;;  %v10335_v1 = vrot.slane %v10334_v39, 4  ;;  %v15272_v17 = vpop.eup %15271  ;;  %v10344_v62 = vmul.f32 0.6931472, %v15270_v9 }
 0x84f   : > { %v10342_v40 = vmul.f32 0.6931472, %v15272_v17 }
 0x850   : > { %v10330_v46 = vrot.slane %v10329_v21, 2  ;;  %v10336_v31 = vadd.f32 %v10335_v1, %v10334_v39  ;;  %v10350_v14 = vsub.f32 %v20550_v27, %v10344_v62 }
 0x851   : > { %v10349_v47 = vsub.f32 %v20552_v25, %v10342_v40 }
 0x852   : > { %v10331_v29 = vadd.f32 %v10330_v46, %v10329_v21  ;;  %v10337_v24 = vrot.slane %v10336_v31, 2 }
 0x853   : > { %v10357_v19 = vcombine.low %v10349_v47, %v10350_v14 }
 0x854   : > { %v10332_v61 = vrot.slane %v10331_v29, 1  ;;  %v10338_v8 = vadd.f32 %v10337_v24, %v10336_v31 }
 0x855   : > { %v10365_v58 = vrot.slane %v10357_v19, %v10364_v57 }
 0x856   : > { %v10333_v63 = vadd.f32 %v10332_v61, %v10331_v29  ;;  %v10339_v10 = vrot.slane %v10338_v8, 1 }
 0x858   : > { %15273 = vlog2.f32 %v10333_v63  ;;  %v10340_v13 = vadd.f32 %v10339_v10, %v10338_v8 }
 0x85a   : > { %15275 = vlog2.f32 %v10340_v13 }
 0x865   : > { %v15274_v16 = vpop.eup %15273 }
 0x866   : > { %v10346_v0 = vmul.f32 0.6931472, %v15274_v16 }
 0x867   : > { %v15276_v15 = vpop.eup %15275 }
 0x868   : > { %v10348_v18 = vmul.f32 0.6931472, %v15276_v15  ;;  %v10351_v56 = vsub.f32 %v10303_v48, %v10346_v0 }
 0x86a   : > { %v10352_v38 = vsub.f32 %v10304_v36, %v10348_v18 }
 0x86c   : > { %v10358_v20 = vcombine.low %v10351_v56, %v10352_v38 }
 0x86e   : > { %v10372_v33 = vrot.slane %v10358_v20, %v10364_v57 }
 0x870   : > { %v10373_v27 = vcombine.low %v10365_v58, %v10372_v33 }
 0x872   : > { %10375 = vst [vmem:[%s182_s5] sm:$0xff] %v10373_v27 }
 0x873   : > { %15297 = shalt.err (!%p15294_p4)
}
 0x874   : > { %s15298_s19 = scalar_lea.hbm %s10389_s9, 128  ;;  %s15302_s26 = scalar_lea.hbm %s20601_s3, 256 }
 0x875   : > { %p15299_p7 = scmp.ne.s32.totalorder %s10389_s9, %s15298_s19  ;;  %p15303_p10 = scmp.lt.s32.totalorder %s10389_s9, %s20601_s3 }
 0x876   : > { %p15304_p11 = scmp.lt.s32.totalorder %s15302_s26, %s15298_s19 }
 0x877   : > { %p15300_p8 = pnand %p15299_p7, %p15410_p5 }
 0x878   : > { %p15305_p12 = por %p15304_p11, %p15303_p10 }
 0x879   : > { %p15301_p9 = pneg %p15300_p8 }
 0x87b   : > { %p15306_p13 = pnand %p15305_p12, %p15301_p9 }
 0x87d   : > { %15309 = shalt.err (!%p15306_p13)
}
 0x87e   : > { %14992 = dma.vmem_to_hbm [thread:$0]  (%p15410_p5), %s10392_s6, 128, %s10389_s9, %s10377_s10  }
 0x87f PF: > { %p14998_p0 = scmp.ge.s32.totalorder %s15344_s15, 2  ;;  %s10403_s29 = sand.u32 1, %s15332_s12  }
 0x880   : > { %s10404_s4 = scalar_lea.sflag [#allocation3], %s10403_s29 }
 0x881   : > { %p14995_p1 = pnand %p14998_p0, %p15414_p6 }
 0x883   : > { %p14996_p2 = pneg %p14995_p1 }
 0x885   : > { %15327 = dma.done.wait (%p14996_p2), %s10404_s4, 128  }
 0x886   : > { %15329 = vsyncadd (%p14996_p2), %s10404_s4, 4294967168  ;;  %p13_p3 = scmp.ge.s32.totalorder %s15397_s18, 4   ;;  %s21857_s12 = smov %s15336_s13 }
 0x887   : > { %s21858_s13 = smov %s15340_s14  ;;  %s21859_s14 = smov %s15408_s21 }
 0x888   : > { %s21860_s15 = smov %s15397_s18  ;;  %15 = sbr.rel (!%p13_p3) target bundleno = 3 (0x3), region = 73 }
 0x88d   :  { %10409 = vsyncpa [#allocation3], 1 }
 0x88e   :  { %10411 = vsyncpa [#allocation3 + $0x1], 1 }

</bundles_post_ra>
